<compile_context>
chip_gen: v6e
topology: v6e:2x2x1
jax: 0.10.0
libtpu: 0.0.40
codegen_flags: <defaults>
</compile_context>

<pallas_src>
import functools

import jax
import jax.numpy as jnp
from jax import lax
from jax.experimental import pallas as pl
from jax.experimental.pallas import tpu as pltpu


# ----------------------------------------------------------------------------
# Pallas kernels
# ----------------------------------------------------------------------------
def _conv_encoder_kernel(emb_ref, w3_ref, b3_ref, w4_ref, b4_ref, w5_ref,
                         b5_ref, out_ref):
    """ConvSentEncoder for one tile of sentences.

    emb_ref: [n, L, E] bf16; wK_ref: [K*E, Hc] bf16 (im2col layout);
    bK_ref: [1, Hc] f32; out_ref: [n, 3*Hc] bf16
    (conv k=3,4,5 + bias + ReLU + max-over-time, concatenated).
    """
    emb = emb_ref[...]
    n, L, E = emb.shape
    Hc = b3_ref.shape[-1]

    outs = []
    for k, w_ref, b_ref in ((3, w3_ref, b3_ref),
                            (4, w4_ref, b4_ref),
                            (5, w5_ref, b5_ref)):
        T = L - k + 1
        # im2col: one [n*T, k*E] @ [k*E, Hc] bf16 matmul per width.
        # TODO(synk): at production E >= 128, replace im2col concat with k
        # shifted-matmul accumulation to avoid k extra copies of emb in VMEM.
        cols = jnp.concatenate([emb[:, j:j + T, :] for j in range(k)], axis=-1)
        acc = jnp.dot(cols.reshape(n * T, k * E), w_ref[...],
                      preferred_element_type=jnp.float32).reshape(n, T, Hc)
        acc = jnp.maximum(acc + b_ref[0][None, None, :], 0.0)   # bias + ReLU
        outs.append(jnp.max(acc, axis=1))                       # max over time
    out_ref[...] = jnp.concatenate(outs, axis=-1).astype(out_ref.dtype)


def _bi_lstm_kernel(x_ref, wih_ref, whh_ref, b_ref, h0_ref, c0_ref, vmask_ref,
                    out_ref, xw_sc, h_sc, c_sc, outf_sc, outb_sc):
    """Batched bidirectional article LSTM: all documents + both directions.

    x_ref:    [Bs, T, I] bf16  batch-major sentence features (valid + padded)
    wih_ref:  [I, 8H] bf16     [W_ih_fwd^T | W_ih_bwd^T]
    whh_ref:  [H, 8H] bf16     [W_hh_fwd^T | W_hh_bwd^T]
    b_ref:    [1, 8H] f32      [(b_ih+b_hh)_fwd | (b_ih+b_hh)_bwd]
    h0/c0:    [2Bs, H] f32     rows 0:Bs fwd init, Bs:2Bs bwd init
    vmask:    [2Bs, T]  f32    1.0 where step t is a real sentence (bwd rows
                               refer to original time T-1-t)
    out_ref:  [Bs, T, 2H] f32  enc_out, batch-major, fwd | bwd (time order)
    """
    Bs, T, I = x_ref.shape
    H = h0_ref.shape[-1]
    B2 = 2 * Bs

    # Hoisted input projection: one bf16 matmul covers both directions.
    xw = jnp.dot(x_ref[...].reshape(Bs * T, I), wih_ref[...],
                 preferred_element_type=jnp.float32) + b_ref[...]
    xw = xw.reshape(Bs, T, 8 * H)
    # Merged per-step gate inputs: rows [0,Bs) fwd at time t, rows [Bs,2Bs)
    # bwd PRE-REVERSED once (step t holds original time T-1-t) -> no per-step
    # concat/copy on the serial critical path.
    xw_sc[:Bs, :, :] = xw[:, :, :4 * H]
    for t in range(T):
        xw_sc[Bs:, t, :] = xw[:, T - 1 - t, 4 * H:]

    rowmask = lax.broadcasted_iota(jnp.int32, (B2, 1), 0) < Bs   # fwd rows
    h_sc[...] = h0_ref[...]
    c_sc[...] = c0_ref[...]

    # Fully unrolled serial recurrence (static indices -> no per-step scalar
    # loop overhead / dynamic address math; LLO sees the whole chain).
    for t in range(T):
        g_all = jnp.dot(h_sc[...].astype(jnp.bfloat16), whh_ref[...],
                        preferred_element_type=jnp.float32)       # [2Bs, 8H]
        gates = xw_sc[:, t, :] + jnp.where(rowmask, g_all[:, :4 * H],
                                           g_all[:, 4 * H:])
        i_g = jax.nn.sigmoid(gates[:, 0 * H:1 * H])
        f_g = jax.nn.sigmoid(gates[:, 1 * H:2 * H])
        g_g = jnp.tanh(gates[:, 2 * H:3 * H])
        o_g = jax.nn.sigmoid(gates[:, 3 * H:4 * H])
        c_new = f_g * c_sc[...] + i_g * g_g
        h_new = o_g * jnp.tanh(c_new)

        mb = vmask_ref[:, t:t + 1] > 0.5                          # [2Bs, 1]
        c_sc[...] = jnp.where(mb, c_new, c_sc[...])               # carry state
        h_sc[...] = jnp.where(mb, h_new, h_sc[...])               # at padding
        h_out = jnp.where(mb, h_new, 0.0)                         # zeros out
        outf_sc[:, t, :] = h_out[:Bs]
        outb_sc[:, T - 1 - t, :] = h_out[Bs:]

    # Single lane-dense [Bs, T, 2H] store (no wrapper-side concat/transpose).
    out_ref[...] = jnp.concatenate([outf_sc[...], outb_sc[...]], axis=-1)


def _ptr_lstm_kernel(x_ref, wih_ref, whh_ref, b_ref, h0_ref, c0_ref, out_ref,
                     xw_sc, h_sc, c_sc):
    """Unidirectional pointer LSTM, batched over documents, batch-major.

    x_ref: [B, T, I] f32; wih_ref: [I, 4H] bf16; whh_ref: [H, 4H] bf16;
    b_ref: [1, 4H] f32; h0/c0: [B, H] f32; out_ref: [B, T, H] f32.
    """
    B, T, I = x_ref.shape
    H = h0_ref.shape[-1]

    # Hoisted bf16 input projection (one matmul); serial loop only has h@Whh.
    xw = jnp.dot(x_ref[...].reshape(B * T, I).astype(jnp.bfloat16), wih_ref[...],
                 preferred_element_type=jnp.float32) + b_ref[...]
    xw_sc[...] = xw.reshape(B, T, 4 * H)
    h_sc[...] = h0_ref[...]
    c_sc[...] = c0_ref[...]

    for t in range(T):                       # fully unrolled, static indices
        gates = xw_sc[:, t, :] + jnp.dot(h_sc[...].astype(jnp.bfloat16),
                                         whh_ref[...],
                                         preferred_element_type=jnp.float32)
        i_g = jax.nn.sigmoid(gates[:, 0 * H:1 * H])
        f_g = jax.nn.sigmoid(gates[:, 1 * H:2 * H])
        g_g = jnp.tanh(gates[:, 2 * H:3 * H])
        o_g = jax.nn.sigmoid(gates[:, 3 * H:4 * H])
        c_new = f_g * c_sc[...] + i_g * g_g
        h_new = o_g * jnp.tanh(c_new)
        c_sc[...] = c_new
        h_sc[...] = h_new
        out_ref[:, t, :] = h_new             # batch-major query output


def _pointer_attn_kernel(enc_ref, q_ref, mask_ref, hop_wm_ref, hop_wq_ref,
                         hop_v_ref, attn_wm_ref, attn_wq_ref, attn_v_ref,
                         out_ref, *, n_hop):
    """Fused LSTMPointerNet attention for ONE document (grid over batch):
    hop_wm/attn_wm projections computed once, n_hop masked-softmax hops
    unrolled, final unnormalized scores.

    enc_ref: [1, N, D]; q_ref: [1, Q, H]; mask_ref: [1, 1, N]; out: [1, Q, N].
    """
    enc = enc_ref[0].astype(jnp.bfloat16)                          # [N, D]
    hop_feat = jnp.dot(enc, hop_wm_ref[...],
                       preferred_element_type=jnp.float32)         # [N, H]
    attn_feat = jnp.dot(enc, attn_wm_ref[...],
                        preferred_element_type=jnp.float32)
    valid = mask_ref[0] > 0.5                                      # [1, N]
    hv = hop_v_ref[0][None, None, :]                               # hoisted
    av = attn_v_ref[0][None, None, :]                              # broadcasts

    q = q_ref[0]                                                   # [Q, H] f32
    for _ in range(n_hop):                                         # static
        qw = jnp.dot(q.astype(jnp.bfloat16), hop_wq_ref[...],
                     preferred_element_type=jnp.float32)           # [Q, H]
        s = jnp.tanh(hop_feat[None, :, :] + qw[:, None, :])        # [Q, N, H]
        score = jnp.sum(s * hv, axis=-1)                           # [Q, N]
        score = jnp.where(valid, score, -1e18)
        m = jnp.max(score, axis=-1, keepdims=True)
        e = jnp.exp(score - m)
        norm = e * pl.reciprocal(jnp.sum(e, axis=-1, keepdims=True),
                                 approx=True)                      # EUP divide
        q = jnp.dot(norm, hop_feat, preferred_element_type=jnp.float32)

    qw = jnp.dot(q.astype(jnp.bfloat16), attn_wq_ref[...],
                 preferred_element_type=jnp.float32)
    s = jnp.tanh(attn_feat[None, :, :] + qw[:, None, :])
    out_ref[0] = jnp.sum(s * av, axis=-1)


# ----------------------------------------------------------------------------
# Pallas wrappers
# ----------------------------------------------------------------------------
_VMEM_LIMIT = 32 * 1024 * 1024   # explicit scoped-VMEM budget (fits v5e/v6e/v7x)


def conv_sent_encode(emb, p):
    """Gridded over the sentence axis (parallel) with bf16 MXU operands."""
    n, L, E = emb.shape
    hc = p['conv3_b2'].shape[-1]
    tile = 8 if n % 8 == 0 else n               # keep (8,128) rule satisfied
    return pl.pallas_call(
        _conv_encoder_kernel,
        grid=(n // tile,),
        in_specs=[
            pl.BlockSpec((tile, L, E), lambda i: (i, 0, 0)),
            pl.BlockSpec((3 * E, hc), lambda i: (0, 0)),
            pl.BlockSpec((1, hc), lambda i: (0, 0)),
            pl.BlockSpec((4 * E, hc), lambda i: (0, 0)),
            pl.BlockSpec((1, hc), lambda i: (0, 0)),
            pl.BlockSpec((5 * E, hc), lambda i: (0, 0)),
            pl.BlockSpec((1, hc), lambda i: (0, 0)),
        ],
        out_specs=pl.BlockSpec((tile, 3 * hc), lambda i: (i, 0)),
        out_shape=jax.ShapeDtypeStruct((n, 3 * hc), jnp.bfloat16),
        compiler_params=pltpu.CompilerParams(
            dimension_semantics=("parallel",),
            vmem_limit_bytes=_VMEM_LIMIT),
    )(emb, p['conv3_w2'], p['conv3_b2'], p['conv4_w2'], p['conv4_b2'],
      p['conv5_w2'], p['conv5_b2'])


def run_bi_lstm(x, wih, whh, bias, h0, c0, vmask):
    # TODO(synk): at production batch sizes add a grid over document rows
    # (multiples of 8) with dimension_semantics=("parallel",).
    Bs, T, _ = x.shape
    H = h0.shape[-1]
    return pl.pallas_call(
        _bi_lstm_kernel,
        out_shape=jax.ShapeDtypeStruct((Bs, T, 2 * H), jnp.float32),
        scratch_shapes=[pltpu.VMEM((2 * Bs, T, 4 * H), jnp.float32),
                        pltpu.VMEM((2 * Bs, H), jnp.float32),
                        pltpu.VMEM((2 * Bs, H), jnp.float32),
                        pltpu.VMEM((Bs, T, H), jnp.float32),
                        pltpu.VMEM((Bs, T, H), jnp.float32)],
        compiler_params=pltpu.CompilerParams(vmem_limit_bytes=_VMEM_LIMIT),
    )(x, wih, whh, bias, h0, c0, vmask)


def run_lstm(x, wih, whh, bias, h0, c0):
    B, T, _ = x.shape
    H = h0.shape[-1]
    return pl.pallas_call(
        _ptr_lstm_kernel,
        out_shape=jax.ShapeDtypeStruct((B, T, H), jnp.float32),
        scratch_shapes=[pltpu.VMEM((B, T, 4 * H), jnp.float32),
                        pltpu.VMEM((B, H), jnp.float32),
                        pltpu.VMEM((B, H), jnp.float32)],
        compiler_params=pltpu.CompilerParams(vmem_limit_bytes=_VMEM_LIMIT),
    )(x, wih, whh, bias, h0, c0)


def pointer_attention(enc_out, query, mask, p, n_hop):
    B, N, D = enc_out.shape
    Q = query.shape[1]
    H = p['hop_wq'].shape[-1]
    return pl.pallas_call(
        functools.partial(_pointer_attn_kernel, n_hop=n_hop),
        grid=(B,),
        in_specs=[
            pl.BlockSpec((1, N, D), lambda b: (b, 0, 0)),
            pl.BlockSpec((1, Q, H), lambda b: (b, 0, 0)),
            pl.BlockSpec((1, 1, N), lambda b: (b, 0, 0)),
            pl.BlockSpec((D, H), lambda b: (0, 0)),
            pl.BlockSpec((H, H), lambda b: (0, 0)),
            pl.BlockSpec((1, H), lambda b: (0, 0)),
            pl.BlockSpec((D, H), lambda b: (0, 0)),
            pl.BlockSpec((H, H), lambda b: (0, 0)),
            pl.BlockSpec((1, H), lambda b: (0, 0)),
        ],
        out_specs=pl.BlockSpec((1, Q, N), lambda b: (b, 0, 0)),
        out_shape=jax.ShapeDtypeStruct((B, Q, N), jnp.float32),
        compiler_params=pltpu.CompilerParams(
            dimension_semantics=("parallel",),
            vmem_limit_bytes=_VMEM_LIMIT),
    )(enc_out, query, mask, p['hop_wm'], p['hop_wq'], p['hop_v2'],
      p['attn_wm'], p['attn_wq'], p['attn_v2'])


# ----------------------------------------------------------------------------
# Model (glue in plain JAX, hot paths in the kernels above)
# ----------------------------------------------------------------------------
def ptr_extract_summ_forward(params, article_sents, sent_lens, target, n_hop=1):
    """article_sents: [bs, max_n, L] int32 (padded bucket), sent_lens: [bs]
    int32 device array (NOT static -> no recompiles per length combination),
    target: [bs, nt] int32.  Output: [bs, nt+1, max_n] unnormalized scores."""
    # TODO(synk): get_perdoc() separator splitting assumed a no-op.
    bs, max_n, L = article_sents.shape
    H = params['art_init_h'].shape[1]
    D = 2 * H

    # ---- sentence encoder: ONE gridded conv call over all bs*max_n sentences
    toks = article_sents.reshape(bs * max_n, L)
    emb = params['emb_bf16'][toks]                          # gather glue (bf16)
    sent_vec = conv_sent_encode(emb, params)                # [bs*max_n, 3Hc]
    x = sent_vec.reshape(bs, max_n, -1)                     # free reshape

    # ---- batched bidirectional article LSTM (2*bs rows, one kernel)
    lens = sent_lens.astype(jnp.int32)
    pos = jnp.arange(max_n, dtype=jnp.int32)
    valid_f = pos[None, :] < lens[:, None]                  # fwd: step t -> sent t
    valid_b = (max_n - 1 - pos)[None, :] < lens[:, None]    # bwd: step t -> T-1-t
    vmask = jnp.concatenate([valid_f, valid_b], axis=0).astype(jnp.float32)

    h0 = jnp.concatenate([jnp.broadcast_to(params['art_init_h'][0:1], (bs, H)),
                          jnp.broadcast_to(params['art_init_h'][1:2], (bs, H))],
                         axis=0)
    c0 = jnp.concatenate([jnp.broadcast_to(params['art_init_c'][0:1], (bs, H)),
                          jnp.broadcast_to(params['art_init_c'][1:2], (bs, H))],
                         axis=0)
    enc_out = run_bi_lstm(x, params['art_wih_k'], params['art_whh_k'],
                          params['art_bias_k'], h0, c0, vmask)  # [bs, max_n, 2H]

    # ---- ptr_in = gather(enc_out, target)  (tiny XLA glue)
    # TODO(synk): fold this gather into the pointer-LSTM via scalar prefetch.
    nt = target.shape[1]
    idx = jnp.broadcast_to(target[:, :, None], (bs, nt, D)).astype(jnp.int32)
    ptr_in = jnp.take_along_axis(enc_out, idx, axis=1)          # [bs, nt, D]
    init_i = jnp.broadcast_to(params['ptr_init_i'][None, None, :], (bs, 1, D))
    lstm_in = jnp.concatenate([init_i, ptr_in], axis=1)         # [bs, nt+1, D]

    # ---- pointer-network LSTM (batch-major -> query needs no transpose)
    query = run_lstm(lstm_in, params['ptr_wih_k'], params['ptr_whh_k'],
                     params['ptr_bias_k'],
                     jnp.broadcast_to(params['ptr_init_h'][0][None, :], (bs, H)),
                     jnp.broadcast_to(params['ptr_init_c'][0][None, :], (bs, H)))

    # ---- fused hop attention + attention_score (one gridded kernel)
    attn_mask = (pos[None, :] < lens[:, None]).astype(jnp.float32)[:, None, :]
    return pointer_attention(enc_out, query, attn_mask, params, n_hop)


def prepare_params(p):
    """Derive kernel-ready weight layouts + bf16 MXU operands ONCE."""
    q = dict(p)
    E = p['embedding'].shape[1]
    q['emb_bf16'] = p['embedding'].astype(jnp.bfloat16)
    for k in (3, 4, 5):
        w = p[f'conv{k}_w']                                  # [Hc, E, k]
        hc = w.shape[0]
        q[f'conv{k}_w2'] = (jnp.transpose(w, (2, 1, 0))
                            .reshape(k * E, hc).astype(jnp.bfloat16))
        q[f'conv{k}_b2'] = p[f'conv{k}_b'].reshape(1, hc)
    H = p['art_init_h'].shape[1]
    q['art_wih_k'] = jnp.concatenate([p['art_f_w_ih'].T, p['art_b_w_ih'].T],
                                     axis=1).astype(jnp.bfloat16)   # [I, 8H]
    q['art_whh_k'] = jnp.concatenate([p['art_f_w_hh'].T, p['art_b_w_hh'].T],
                                     axis=1).astype(jnp.bfloat16)   # [H, 8H]
    q['art_bias_k'] = jnp.concatenate(
        [p['art_f_b_ih'] + p['art_f_b_hh'],
         p['art_b_b_ih'] + p['art_b_b_hh']]).reshape(1, 8 * H)
    q['ptr_wih_k'] = p['ptr_w_ih'].T.astype(jnp.bfloat16)           # [D, 4H]
    q['ptr_whh_k'] = p['ptr_w_hh'].T.astype(jnp.bfloat16)           # [H, 4H]
    q['ptr_bias_k'] = (p['ptr_b_ih'] + p['ptr_b_hh']).reshape(1, 4 * H)
    q['hop_wm'] = p['hop_wm'].astype(jnp.bfloat16)
    q['hop_wq'] = p['hop_wq'].astype(jnp.bfloat16)
    q['attn_wm'] = p['attn_wm'].astype(jnp.bfloat16)
    q['attn_wq'] = p['attn_wq'].astype(jnp.bfloat16)
    q['hop_v2'] = p['hop_v'].reshape(1, H)
    q['attn_v2'] = p['attn_v'].reshape(1, H)
    return q


def init_params(key, vocab_size, emb_dim, conv_hidden, lstm_hidden):
    keys = jax.random.split(key, 32)
    it = iter(keys)

    def u(shape, scale):
        return jax.random.uniform(next(it), shape, jnp.float32, -scale, scale)

    p = {}
    emb = u((vocab_size, emb_dim), 0.1)
    p['embedding'] = emb.at[0].set(0.0)                      # padding_idx=0
    for k in (3, 4, 5):
        p[f'conv{k}_w'] = u((conv_hidden, emb_dim, k), 0.1)
        p[f'conv{k}_b'] = u((conv_hidden,), 0.1)
    H = lstm_hidden
    d_in = 3 * conv_hidden
    for name in ('art_f', 'art_b'):
        p[f'{name}_w_ih'] = u((4 * H, d_in), 0.1)
        p[f'{name}_w_hh'] = u((4 * H, H), 0.1)
        p[f'{name}_b_ih'] = u((4 * H,), 0.1)
        p[f'{name}_b_hh'] = u((4 * H,), 0.1)
    p['art_init_h'] = u((2, H), 0.01)
    p['art_init_c'] = u((2, H), 0.01)
    D = 2 * H
    p['ptr_init_h'] = u((1, H), 0.01)
    p['ptr_init_c'] = u((1, H), 0.01)
    p['ptr_init_i'] = u((D,), 0.1)
    p['ptr_w_ih'] = u((4 * H, D), 0.1)
    p['ptr_w_hh'] = u((4 * H, H), 0.1)
    p['ptr_b_ih'] = u((4 * H,), 0.1)
    p['ptr_b_hh'] = u((4 * H,), 0.1)
    p['attn_wm'] = u((D, H), 0.1)
    p['attn_wq'] = u((H, H), 0.1)
    p['attn_v'] = u((H,), 0.01)
    p['hop_wm'] = u((D, H), 0.1)
    p['hop_wq'] = u((H, H), 0.1)
    p['hop_v'] = u((H,), 0.01)
    return p


if __name__ == "__main__":
    vocab_size, emb_dim = 50, 32
    conv_hidden, lstm_hidden = 16, 32
    n_hop = 1

    bs, max_sent, seq_len, nt = 2, 8, 10, 3
    sent_nums = (6, 4)

    key = jax.random.PRNGKey(0)
    k_par, k_tok = jax.random.split(key)
    params = prepare_params(
        init_params(k_par, vocab_size, emb_dim, conv_hidden, lstm_hidden))

    # tokens in [1, vocab) so no sentence is a "separator" (sum == 1)
    article_sents = jax.random.randint(
        k_tok, (bs, max_sent, seq_len), 1, vocab_size, dtype=jnp.int32)
    lens = jnp.asarray(sent_nums, jnp.int32)
    # zero out padded sentence slots (padded-bucket serving layout)
    smask = (jnp.arange(max_sent)[None, :] < lens[:, None])[:, :, None]
    article_sents = jnp.where(smask, article_sents, 0)
    target = jnp.array([[0, 2, 5], [1, 3, 0]], dtype=jnp.int32)

    fwd = jax.jit(functools.partial(ptr_extract_summ_forward, n_hop=n_hop))
    out = fwd(params, article_sents, lens, target)
    out = jax.block_until_ready(out)
    # NOTE: with the padded bucket the score axis is max_sent (padded rows are
    # zero enc_out rows); for this toy config max_sent == max(sent_nums).
    assert out.shape == (bs, nt + 1, max_sent)
    print("KERNEL_OK")
</pallas_src>

<mosaic_0001>
module attributes {stable_mosaic.version = 11 : i64} {
  func.func @_conv_encoder_kernel(%arg0: i32, %arg1: memref<8x10x32xbf16, #tpu.memory_space<vmem>>, %arg2: memref<96x16xbf16, #tpu.memory_space<vmem>>, %arg3: memref<1x16xf32, #tpu.memory_space<vmem>>, %arg4: memref<128x16xbf16, #tpu.memory_space<vmem>>, %arg5: memref<1x16xf32, #tpu.memory_space<vmem>>, %arg6: memref<160x16xbf16, #tpu.memory_space<vmem>>, %arg7: memref<1x16xf32, #tpu.memory_space<vmem>>, %arg8: memref<8x48xbf16, #tpu.memory_space<vmem>>) attributes {dimension_semantics = [#tpu.dimension_semantics<parallel>], iteration_bounds = array<i64: 2>, scalar_prefetch = 0 : i64, scratch_operands = 0 : i64, tpu.core_type = #tpu.core_type<tc>, window_params = [{transform_indices = @transform_0, window_bounds = array<i64: 8, 10, 32>}, {pipeline_mode = #tpu.pipeline_mode<synchronous>, transform_indices = @transform_1, window_bounds = array<i64: 96, 16>}, {pipeline_mode = #tpu.pipeline_mode<synchronous>, transform_indices = @transform_2, window_bounds = array<i64: 1, 16>}, {pipeline_mode = #tpu.pipeline_mode<synchronous>, transform_indices = @transform_3, window_bounds = array<i64: 128, 16>}, {pipeline_mode = #tpu.pipeline_mode<synchronous>, transform_indices = @transform_4, window_bounds = array<i64: 1, 16>}, {pipeline_mode = #tpu.pipeline_mode<synchronous>, transform_indices = @transform_5, window_bounds = array<i64: 160, 16>}, {pipeline_mode = #tpu.pipeline_mode<synchronous>, transform_indices = @transform_6, window_bounds = array<i64: 1, 16>}, {transform_indices = @transform_7, window_bounds = array<i64: 8, 48>}]} {
    %c0 = arith.constant 0 : index
    %c0_0 = arith.constant 0 : index
    %c0_1 = arith.constant 0 : index
    %0 = vector.load %arg1[%c0, %c0_0, %c0_1] : memref<8x10x32xbf16, #tpu.memory_space<vmem>>, vector<8x10x32xbf16>
    %1 = vector.extract_strided_slice %0 {offsets = [0, 0, 0], sizes = [8, 8, 32], strides = [1, 1, 1]} : vector<8x10x32xbf16> to vector<8x8x32xbf16>
    %2 = vector.extract_strided_slice %0 {offsets = [0, 1, 0], sizes = [8, 8, 32], strides = [1, 1, 1]} : vector<8x10x32xbf16> to vector<8x8x32xbf16>
    %3 = vector.extract_strided_slice %0 {offsets = [0, 2, 0], sizes = [8, 8, 32], strides = [1, 1, 1]} : vector<8x10x32xbf16> to vector<8x8x32xbf16>
    %4 = tpu.concatenate %1, %2, %3 in 2 : vector<8x8x32xbf16>, vector<8x8x32xbf16>, vector<8x8x32xbf16> -> vector<8x8x96xbf16>
    %5 = vector.shape_cast %4 : vector<8x8x96xbf16> to vector<64x96xbf16>
    %c0_2 = arith.constant 0 : index
    %c0_3 = arith.constant 0 : index
    %6 = vector.load %arg2[%c0_2, %c0_3] : memref<96x16xbf16, #tpu.memory_space<vmem>>, vector<96x16xbf16>
    %cst = arith.constant dense<0.000000e+00> : vector<64x16xf32>
    %7 = tpu.matmul %5, %6, %cst {dimension_numbers = #tpu.dot_dimension_numbers<[1], [0], [0], [1], [0, 0, 1, 1], [], []>} : vector<64x96xbf16>, vector<96x16xbf16>, vector<64x16xf32> -> vector<64x16xf32>
    %8 = vector.shape_cast %7 : vector<64x16xf32> to vector<8x8x16xf32>
    %c0_4 = arith.constant 0 : index
    %c0_5 = arith.constant 0 : index
    %9 = vector.load %arg3[%c0_4, %c0_5] : memref<1x16xf32, #tpu.memory_space<vmem>>, vector<1x16xf32>
    %10 = vector.shape_cast %9 : vector<1x16xf32> to vector<16xf32>
    %11 = vector.shape_cast %10 : vector<16xf32> to vector<1x1x16xf32>
    %12 = vector.broadcast %11 : vector<1x1x16xf32> to vector<8x8x16xf32>
    %13 = arith.addf %8, %12 : vector<8x8x16xf32>
    %cst_6 = arith.constant 0.000000e+00 : f32
    %14 = vector.broadcast %cst_6 : f32 to vector<8x8x16xf32>
    %15 = arith.maximumf %13, %14 : vector<8x8x16xf32>
    %cst_7 = arith.constant dense<0xFF800000> : vector<8x16xf32>
    %16 = vector.multi_reduction <maximumf>, %15, %cst_7 [1] : vector<8x8x16xf32> to vector<8x16xf32>
    %17 = vector.extract_strided_slice %0 {offsets = [0, 0, 0], sizes = [8, 7, 32], strides = [1, 1, 1]} : vector<8x10x32xbf16> to vector<8x7x32xbf16>
    %18 = vector.extract_strided_slice %0 {offsets = [0, 1, 0], sizes = [8, 7, 32], strides = [1, 1, 1]} : vector<8x10x32xbf16> to vector<8x7x32xbf16>
    %19 = vector.extract_strided_slice %0 {offsets = [0, 2, 0], sizes = [8, 7, 32], strides = [1, 1, 1]} : vector<8x10x32xbf16> to vector<8x7x32xbf16>
    %20 = vector.extract_strided_slice %0 {offsets = [0, 3, 0], sizes = [8, 7, 32], strides = [1, 1, 1]} : vector<8x10x32xbf16> to vector<8x7x32xbf16>
    %21 = tpu.concatenate %17, %18, %19, %20 in 2 : vector<8x7x32xbf16>, vector<8x7x32xbf16>, vector<8x7x32xbf16>, vector<8x7x32xbf16> -> vector<8x7x128xbf16>
    %22 = vector.shape_cast %21 : vector<8x7x128xbf16> to vector<56x128xbf16>
    %c0_8 = arith.constant 0 : index
    %c0_9 = arith.constant 0 : index
    %23 = vector.load %arg4[%c0_8, %c0_9] : memref<128x16xbf16, #tpu.memory_space<vmem>>, vector<128x16xbf16>
    %cst_10 = arith.constant dense<0.000000e+00> : vector<56x16xf32>
    %24 = tpu.matmul %22, %23, %cst_10 {dimension_numbers = #tpu.dot_dimension_numbers<[1], [0], [0], [1], [0, 0, 1, 1], [], []>} : vector<56x128xbf16>, vector<128x16xbf16>, vector<56x16xf32> -> vector<56x16xf32>
    %25 = vector.shape_cast %24 : vector<56x16xf32> to vector<8x7x16xf32>
    %c0_11 = arith.constant 0 : index
    %c0_12 = arith.constant 0 : index
    %26 = vector.load %arg5[%c0_11, %c0_12] : memref<1x16xf32, #tpu.memory_space<vmem>>, vector<1x16xf32>
    %27 = vector.shape_cast %26 : vector<1x16xf32> to vector<16xf32>
    %28 = vector.shape_cast %27 : vector<16xf32> to vector<1x1x16xf32>
    %29 = vector.broadcast %28 : vector<1x1x16xf32> to vector<8x7x16xf32>
    %30 = arith.addf %25, %29 : vector<8x7x16xf32>
    %cst_13 = arith.constant 0.000000e+00 : f32
    %31 = vector.broadcast %cst_13 : f32 to vector<8x7x16xf32>
    %32 = arith.maximumf %30, %31 : vector<8x7x16xf32>
    %cst_14 = arith.constant dense<0xFF800000> : vector<8x16xf32>
    %33 = vector.multi_reduction <maximumf>, %32, %cst_14 [1] : vector<8x7x16xf32> to vector<8x16xf32>
    %34 = vector.extract_strided_slice %0 {offsets = [0, 0, 0], sizes = [8, 6, 32], strides = [1, 1, 1]} : vector<8x10x32xbf16> to vector<8x6x32xbf16>
    %35 = vector.extract_strided_slice %0 {offsets = [0, 1, 0], sizes = [8, 6, 32], strides = [1, 1, 1]} : vector<8x10x32xbf16> to vector<8x6x32xbf16>
    %36 = vector.extract_strided_slice %0 {offsets = [0, 2, 0], sizes = [8, 6, 32], strides = [1, 1, 1]} : vector<8x10x32xbf16> to vector<8x6x32xbf16>
    %37 = vector.extract_strided_slice %0 {offsets = [0, 3, 0], sizes = [8, 6, 32], strides = [1, 1, 1]} : vector<8x10x32xbf16> to vector<8x6x32xbf16>
    %38 = vector.extract_strided_slice %0 {offsets = [0, 4, 0], sizes = [8, 6, 32], strides = [1, 1, 1]} : vector<8x10x32xbf16> to vector<8x6x32xbf16>
    %39 = tpu.concatenate %34, %35, %36, %37, %38 in 2 : vector<8x6x32xbf16>, vector<8x6x32xbf16>, vector<8x6x32xbf16>, vector<8x6x32xbf16>, vector<8x6x32xbf16> -> vector<8x6x160xbf16>
    %40 = vector.shape_cast %39 : vector<8x6x160xbf16> to vector<48x160xbf16>
    %c0_15 = arith.constant 0 : index
    %c0_16 = arith.constant 0 : index
    %41 = vector.load %arg6[%c0_15, %c0_16] : memref<160x16xbf16, #tpu.memory_space<vmem>>, vector<160x16xbf16>
    %cst_17 = arith.constant dense<0.000000e+00> : vector<48x16xf32>
    %42 = tpu.matmul %40, %41, %cst_17 {dimension_numbers = #tpu.dot_dimension_numbers<[1], [0], [0], [1], [0, 0, 1, 1], [], []>} : vector<48x160xbf16>, vector<160x16xbf16>, vector<48x16xf32> -> vector<48x16xf32>
    %43 = vector.shape_cast %42 : vector<48x16xf32> to vector<8x6x16xf32>
    %c0_18 = arith.constant 0 : index
    %c0_19 = arith.constant 0 : index
    %44 = vector.load %arg7[%c0_18, %c0_19] : memref<1x16xf32, #tpu.memory_space<vmem>>, vector<1x16xf32>
    %45 = vector.shape_cast %44 : vector<1x16xf32> to vector<16xf32>
    %46 = vector.shape_cast %45 : vector<16xf32> to vector<1x1x16xf32>
    %47 = vector.broadcast %46 : vector<1x1x16xf32> to vector<8x6x16xf32>
    %48 = arith.addf %43, %47 : vector<8x6x16xf32>
    %cst_20 = arith.constant 0.000000e+00 : f32
    %49 = vector.broadcast %cst_20 : f32 to vector<8x6x16xf32>
    %50 = arith.maximumf %48, %49 : vector<8x6x16xf32>
    %cst_21 = arith.constant dense<0xFF800000> : vector<8x16xf32>
    %51 = vector.multi_reduction <maximumf>, %50, %cst_21 [1] : vector<8x6x16xf32> to vector<8x16xf32>
    %52 = tpu.concatenate %16, %33, %51 in 1 : vector<8x16xf32>, vector<8x16xf32>, vector<8x16xf32> -> vector<8x48xf32>
    %53 = arith.truncf %52 : vector<8x48xf32> to vector<8x48xbf16>
    %c0_22 = arith.constant 0 : index
    %c0_23 = arith.constant 0 : index
    %54 = vector.load %arg8[%c0_22, %c0_23] : memref<8x48xbf16, #tpu.memory_space<vmem>>, vector<8x48xbf16>
    tpu.vector_store %arg8[%c0_22, %c0_23], %53 {strides = array<i32>} : memref<8x48xbf16, #tpu.memory_space<vmem>>, vector<8x48xbf16>,
    return
  }
  func.func @transform_0(%arg0: i32) -> (i32, i32, i32) {
    %c0_i32 = arith.constant 0 : i32
    %c0_i32_0 = arith.constant 0 : i32
    %c0_i32_1 = arith.constant 0 : i32
    return %arg0, %c0_i32, %c0_i32_0 : i32, i32, i32
  }
  func.func @transform_1(%arg0: i32) -> (i32, i32) {
    %c0_i32 = arith.constant 0 : i32
    %c0_i32_0 = arith.constant 0 : i32
    %c0_i32_1 = arith.constant 0 : i32
    return %c0_i32, %c0_i32_0 : i32, i32
  }
  func.func @transform_2(%arg0: i32) -> (i32, i32) {
    %c0_i32 = arith.constant 0 : i32
    %c0_i32_0 = arith.constant 0 : i32
    %c0_i32_1 = arith.constant 0 : i32
    return %c0_i32, %c0_i32_0 : i32, i32
  }
  func.func @transform_3(%arg0: i32) -> (i32, i32) {
    %c0_i32 = arith.constant 0 : i32
    %c0_i32_0 = arith.constant 0 : i32
    %c0_i32_1 = arith.constant 0 : i32
    return %c0_i32, %c0_i32_0 : i32, i32
  }
  func.func @transform_4(%arg0: i32) -> (i32, i32) {
    %c0_i32 = arith.constant 0 : i32
    %c0_i32_0 = arith.constant 0 : i32
    %c0_i32_1 = arith.constant 0 : i32
    return %c0_i32, %c0_i32_0 : i32, i32
  }
  func.func @transform_5(%arg0: i32) -> (i32, i32) {
    %c0_i32 = arith.constant 0 : i32
    %c0_i32_0 = arith.constant 0 : i32
    %c0_i32_1 = arith.constant 0 : i32
    return %c0_i32, %c0_i32_0 : i32, i32
  }
  func.func @transform_6(%arg0: i32) -> (i32, i32) {
    %c0_i32 = arith.constant 0 : i32
    %c0_i32_0 = arith.constant 0 : i32
    %c0_i32_1 = arith.constant 0 : i32
    return %c0_i32, %c0_i32_0 : i32, i32
  }
  func.func @transform_7(%arg0: i32) -> (i32, i32) {
    %c0_i32 = arith.constant 0 : i32
    %c0_i32_0 = arith.constant 0 : i32
    return %arg0, %c0_i32 : i32, i32
  }
}

module attributes {stable_mosaic.version = 11 : i64} {
  func.func @_ptr_lstm_kernel(%arg0: memref<2x4x64xf32, #tpu.memory_space<vmem>>, %arg1: memref<64x128xbf16, #tpu.memory_space<vmem>>, %arg2: memref<32x128xbf16, #tpu.memory_space<vmem>>, %arg3: memref<1x128xf32, #tpu.memory_space<vmem>>, %arg4: memref<2x32xf32, #tpu.memory_space<vmem>>, %arg5: memref<2x32xf32, #tpu.memory_space<vmem>>, %arg6: memref<2x4x32xf32, #tpu.memory_space<vmem>>, %arg7: memref<2x4x128xf32, #tpu.memory_space<vmem>>, %arg8: memref<2x32xf32, #tpu.memory_space<vmem>>, %arg9: memref<2x32xf32, #tpu.memory_space<vmem>>) attributes {dimension_semantics = [], scalar_prefetch = 0 : i64, scratch_operands = 3 : i64, tpu.core_type = #tpu.core_type<tc>} {
    %c0 = arith.constant 0 : index
    %c0_0 = arith.constant 0 : index
    %c0_1 = arith.constant 0 : index
    %0 = vector.load %arg0[%c0, %c0_0, %c0_1] : memref<2x4x64xf32, #tpu.memory_space<vmem>>, vector<2x4x64xf32>
    %1 = vector.shape_cast %0 : vector<2x4x64xf32> to vector<8x64xf32>
    %2 = arith.truncf %1 : vector<8x64xf32> to vector<8x64xbf16>
    %c0_2 = arith.constant 0 : index
    %c0_3 = arith.constant 0 : index
    %3 = vector.load %arg1[%c0_2, %c0_3] : memref<64x128xbf16, #tpu.memory_space<vmem>>, vector<64x128xbf16>
    %cst = arith.constant dense<0.000000e+00> : vector<8x128xf32>
    %4 = tpu.matmul %2, %3, %cst {dimension_numbers = #tpu.dot_dimension_numbers<[1], [0], [0], [1], [0, 0, 1, 1], [], []>} : vector<8x64xbf16>, vector<64x128xbf16>, vector<8x128xf32> -> vector<8x128xf32>
    %c0_4 = arith.constant 0 : index
    %c0_5 = arith.constant 0 : index
    %5 = vector.load %arg3[%c0_4, %c0_5] : memref<1x128xf32, #tpu.memory_space<vmem>>, vector<1x128xf32>
    %6 = vector.broadcast %5 : vector<1x128xf32> to vector<8x128xf32>
    %7 = arith.addf %4, %6 : vector<8x128xf32>
    %8 = vector.shape_cast %7 : vector<8x128xf32> to vector<2x4x128xf32>
    %c0_6 = arith.constant 0 : index
    %c0_7 = arith.constant 0 : index
    %c0_8 = arith.constant 0 : index
    %9 = vector.load %arg7[%c0_6, %c0_7, %c0_8] : memref<2x4x128xf32, #tpu.memory_space<vmem>>, vector<2x4x128xf32>
    tpu.vector_store %arg7[%c0_6, %c0_7, %c0_8], %8 {strides = array<i32>} : memref<2x4x128xf32, #tpu.memory_space<vmem>>, vector<2x4x128xf32>,
    %c0_9 = arith.constant 0 : index
    %c0_10 = arith.constant 0 : index
    %10 = vector.load %arg4[%c0_9, %c0_10] : memref<2x32xf32, #tpu.memory_space<vmem>>, vector<2x32xf32>
    %c0_11 = arith.constant 0 : index
    %c0_12 = arith.constant 0 : index
    %11 = vector.load %arg8[%c0_11, %c0_12] : memref<2x32xf32, #tpu.memory_space<vmem>>, vector<2x32xf32>
    tpu.vector_store %arg8[%c0_11, %c0_12], %10 {strides = array<i32>} : memref<2x32xf32, #tpu.memory_space<vmem>>, vector<2x32xf32>,
    %c0_13 = arith.constant 0 : index
    %c0_14 = arith.constant 0 : index
    %12 = vector.load %arg5[%c0_13, %c0_14] : memref<2x32xf32, #tpu.memory_space<vmem>>, vector<2x32xf32>
    %c0_15 = arith.constant 0 : index
    %c0_16 = arith.constant 0 : index
    %13 = vector.load %arg9[%c0_15, %c0_16] : memref<2x32xf32, #tpu.memory_space<vmem>>, vector<2x32xf32>
    tpu.vector_store %arg9[%c0_15, %c0_16], %12 {strides = array<i32>} : memref<2x32xf32, #tpu.memory_space<vmem>>, vector<2x32xf32>,
    %c0_17 = arith.constant 0 : index
    %c0_18 = arith.constant 0 : index
    %c0_19 = arith.constant 0 : index
    %14 = vector.load %arg7[%c0_17, %c0_18, %c0_19] : memref<2x4x128xf32, #tpu.memory_space<vmem>>, vector<2x1x128xf32>
    %15 = vector.shape_cast %14 : vector<2x1x128xf32> to vector<2x128xf32>
    %c0_20 = arith.constant 0 : index
    %c0_21 = arith.constant 0 : index
    %16 = vector.load %arg8[%c0_20, %c0_21] : memref<2x32xf32, #tpu.memory_space<vmem>>, vector<2x32xf32>
    %17 = arith.truncf %16 : vector<2x32xf32> to vector<2x32xbf16>
    %c0_22 = arith.constant 0 : index
    %c0_23 = arith.constant 0 : index
    %18 = vector.load %arg2[%c0_22, %c0_23] : memref<32x128xbf16, #tpu.memory_space<vmem>>, vector<32x128xbf16>
    %cst_24 = arith.constant dense<0.000000e+00> : vector<2x128xf32>
    %19 = tpu.matmul %17, %18, %cst_24 {dimension_numbers = #tpu.dot_dimension_numbers<[1], [0], [0], [1], [0, 0, 1, 1], [], []>} : vector<2x32xbf16>, vector<32x128xbf16>, vector<2x128xf32> -> vector<2x128xf32>
    %20 = arith.addf %15, %19 : vector<2x128xf32>
    %21 = vector.extract_strided_slice %20 {offsets = [0, 0], sizes = [2, 32], strides = [1, 1]} : vector<2x128xf32> to vector<2x32xf32>
    %22 = arith.negf %21 : vector<2x32xf32>
    %23 = math.exp %22 : vector<2x32xf32>
    %cst_25 = arith.constant 1.000000e+00 : f32
    %24 = vector.broadcast %cst_25 : f32 to vector<2x32xf32>
    %25 = arith.addf %24, %23 : vector<2x32xf32>
    %26 = arith.divf %24, %25 : vector<2x32xf32>
    %27 = vector.extract_strided_slice %20 {offsets = [0, 32], sizes = [2, 32], strides = [1, 1]} : vector<2x128xf32> to vector<2x32xf32>
    %28 = arith.negf %27 : vector<2x32xf32>
    %29 = math.exp %28 : vector<2x32xf32>
    %cst_26 = arith.constant 1.000000e+00 : f32
    %30 = vector.broadcast %cst_26 : f32 to vector<2x32xf32>
    %31 = arith.addf %30, %29 : vector<2x32xf32>
    %32 = arith.divf %30, %31 : vector<2x32xf32>
    %33 = vector.extract_strided_slice %20 {offsets = [0, 64], sizes = [2, 32], strides = [1, 1]} : vector<2x128xf32> to vector<2x32xf32>
    %34 = math.tanh %33 : vector<2x32xf32>
    %35 = vector.extract_strided_slice %20 {offsets = [0, 96], sizes = [2, 32], strides = [1, 1]} : vector<2x128xf32> to vector<2x32xf32>
    %36 = arith.negf %35 : vector<2x32xf32>
    %37 = math.exp %36 : vector<2x32xf32>
    %cst_27 = arith.constant 1.000000e+00 : f32
    %38 = vector.broadcast %cst_27 : f32 to vector<2x32xf32>
    %39 = arith.addf %38, %37 : vector<2x32xf32>
    %40 = arith.divf %38, %39 : vector<2x32xf32>
    %c0_28 = arith.constant 0 : index
    %c0_29 = arith.constant 0 : index
    %41 = vector.load %arg9[%c0_28, %c0_29] : memref<2x32xf32, #tpu.memory_space<vmem>>, vector<2x32xf32>
    %42 = arith.mulf %32, %41 : vector<2x32xf32>
    %43 = arith.mulf %26, %34 : vector<2x32xf32>
    %44 = arith.addf %42, %43 : vector<2x32xf32>
    %45 = math.tanh %44 : vector<2x32xf32>
    %46 = arith.mulf %40, %45 : vector<2x32xf32>
    %c0_30 = arith.constant 0 : index
    %c0_31 = arith.constant 0 : index
    %47 = vector.load %arg9[%c0_30, %c0_31] : memref<2x32xf32, #tpu.memory_space<vmem>>, vector<2x32xf32>
    tpu.vector_store %arg9[%c0_30, %c0_31], %44 {strides = array<i32>} : memref<2x32xf32, #tpu.memory_space<vmem>>, vector<2x32xf32>,
    %c0_32 = arith.constant 0 : index
    %c0_33 = arith.constant 0 : index
    %48 = vector.load %arg8[%c0_32, %c0_33] : memref<2x32xf32, #tpu.memory_space<vmem>>, vector<2x32xf32>
    tpu.vector_store %arg8[%c0_32, %c0_33], %46 {strides = array<i32>} : memref<2x32xf32, #tpu.memory_space<vmem>>, vector<2x32xf32>,
    %c0_34 = arith.constant 0 : index
    %c0_35 = arith.constant 0 : index
    %c0_36 = arith.constant 0 : index
    %49 = vector.load %arg6[%c0_34, %c0_35, %c0_36] : memref<2x4x32xf32, #tpu.memory_space<vmem>>, vector<2x1x32xf32>
    %50 = vector.shape_cast %49 : vector<2x1x32xf32> to vector<2x32xf32>
    %51 = vector.shape_cast %46 : vector<2x32xf32> to vector<2x1x32xf32>
    tpu.vector_store %arg6[%c0_34, %c0_35, %c0_36], %51 {strides = array<i32>} : memref<2x4x32xf32, #tpu.memory_space<vmem>>, vector<2x1x32xf32>,
    %c0_37 = arith.constant 0 : index
    %c1 = arith.constant 1 : index
    %c0_38 = arith.constant 0 : index
    %52 = vector.load %arg7[%c0_37, %c1, %c0_38] : memref<2x4x128xf32, #tpu.memory_space<vmem>>, vector<2x1x128xf32>
    %53 = vector.shape_cast %52 : vector<2x1x128xf32> to vector<2x128xf32>
    %c0_39 = arith.constant 0 : index
    %c0_40 = arith.constant 0 : index
    %54 = vector.load %arg8[%c0_39, %c0_40] : memref<2x32xf32, #tpu.memory_space<vmem>>, vector<2x32xf32>
    %55 = arith.truncf %54 : vector<2x32xf32> to vector<2x32xbf16>
    %c0_41 = arith.constant 0 : index
    %c0_42 = arith.constant 0 : index
    %56 = vector.load %arg2[%c0_41, %c0_42] : memref<32x128xbf16, #tpu.memory_space<vmem>>, vector<32x128xbf16>
    %cst_43 = arith.constant dense<0.000000e+00> : vector<2x128xf32>
    %57 = tpu.matmul %55, %56, %cst_43 {dimension_numbers = #tpu.dot_dimension_numbers<[1], [0], [0], [1], [0, 0, 1, 1], [], []>} : vector<2x32xbf16>, vector<32x128xbf16>, vector<2x128xf32> -> vector<2x128xf32>
    %58 = arith.addf %53, %57 : vector<2x128xf32>
    %59 = vector.extract_strided_slice %58 {offsets = [0, 0], sizes = [2, 32], strides = [1, 1]} : vector<2x128xf32> to vector<2x32xf32>
    %60 = arith.negf %59 : vector<2x32xf32>
    %61 = math.exp %60 : vector<2x32xf32>
    %cst_44 = arith.constant 1.000000e+00 : f32
    %62 = vector.broadcast %cst_44 : f32 to vector<2x32xf32>
    %63 = arith.addf %62, %61 : vector<2x32xf32>
    %64 = arith.divf %62, %63 : vector<2x32xf32>
    %65 = vector.extract_strided_slice %58 {offsets = [0, 32], sizes = [2, 32], strides = [1, 1]} : vector<2x128xf32> to vector<2x32xf32>
    %66 = arith.negf %65 : vector<2x32xf32>
    %67 = math.exp %66 : vector<2x32xf32>
    %cst_45 = arith.constant 1.000000e+00 : f32
    %68 = vector.broadcast %cst_45 : f32 to vector<2x32xf32>
    %69 = arith.addf %68, %67 : vector<2x32xf32>
    %70 = arith.divf %68, %69 : vector<2x32xf32>
    %71 = vector.extract_strided_slice %58 {offsets = [0, 64], sizes = [2, 32], strides = [1, 1]} : vector<2x128xf32> to vector<2x32xf32>
    %72 = math.tanh %71 : vector<2x32xf32>
    %73 = vector.extract_strided_slice %58 {offsets = [0, 96], sizes = [2, 32], strides = [1, 1]} : vector<2x128xf32> to vector<2x32xf32>
    %74 = arith.negf %73 : vector<2x32xf32>
    %75 = math.exp %74 : vector<2x32xf32>
    %cst_46 = arith.constant 1.000000e+00 : f32
    %76 = vector.broadcast %cst_46 : f32 to vector<2x32xf32>
    %77 = arith.addf %76, %75 : vector<2x32xf32>
    %78 = arith.divf %76, %77 : vector<2x32xf32>
    %c0_47 = arith.constant 0 : index
    %c0_48 = arith.constant 0 : index
    %79 = vector.load %arg9[%c0_47, %c0_48] : memref<2x32xf32, #tpu.memory_space<vmem>>, vector<2x32xf32>
    %80 = arith.mulf %70, %79 : vector<2x32xf32>
    %81 = arith.mulf %64, %72 : vector<2x32xf32>
    %82 = arith.addf %80, %81 : vector<2x32xf32>
    %83 = math.tanh %82 : vector<2x32xf32>
    %84 = arith.mulf %78, %83 : vector<2x32xf32>
    %c0_49 = arith.constant 0 : index
    %c0_50 = arith.constant 0 : index
    %85 = vector.load %arg9[%c0_49, %c0_50] : memref<2x32xf32, #tpu.memory_space<vmem>>, vector<2x32xf32>
    tpu.vector_store %arg9[%c0_49, %c0_50], %82 {strides = array<i32>} : memref<2x32xf32, #tpu.memory_space<vmem>>, vector<2x32xf32>,
    %c0_51 = arith.constant 0 : index
    %c0_52 = arith.constant 0 : index
    %86 = vector.load %arg8[%c0_51, %c0_52] : memref<2x32xf32, #tpu.memory_space<vmem>>, vector<2x32xf32>
    tpu.vector_store %arg8[%c0_51, %c0_52], %84 {strides = array<i32>} : memref<2x32xf32, #tpu.memory_space<vmem>>, vector<2x32xf32>,
    %c0_53 = arith.constant 0 : index
    %c1_54 = arith.constant 1 : index
    %c0_55 = arith.constant 0 : index
    %87 = vector.load %arg6[%c0_53, %c1_54, %c0_55] : memref<2x4x32xf32, #tpu.memory_space<vmem>>, vector<2x1x32xf32>
    %88 = vector.shape_cast %87 : vector<2x1x32xf32> to vector<2x32xf32>
    %89 = vector.shape_cast %84 : vector<2x32xf32> to vector<2x1x32xf32>
    tpu.vector_store %arg6[%c0_53, %c1_54, %c0_55], %89 {strides = array<i32>} : memref<2x4x32xf32, #tpu.memory_space<vmem>>, vector<2x1x32xf32>,
    %c0_56 = arith.constant 0 : index
    %c2 = arith.constant 2 : index
    %c0_57 = arith.constant 0 : index
    %90 = vector.load %arg7[%c0_56, %c2, %c0_57] : memref<2x4x128xf32, #tpu.memory_space<vmem>>, vector<2x1x128xf32>
    %91 = vector.shape_cast %90 : vector<2x1x128xf32> to vector<2x128xf32>
    %c0_58 = arith.constant 0 : index
    %c0_59 = arith.constant 0 : index
    %92 = vector.load %arg8[%c0_58, %c0_59] : memref<2x32xf32, #tpu.memory_space<vmem>>, vector<2x32xf32>
    %93 = arith.truncf %92 : vector<2x32xf32> to vector<2x32xbf16>
    %c0_60 = arith.constant 0 : index
    %c0_61 = arith.constant 0 : index
    %94 = vector.load %arg2[%c0_60, %c0_61] : memref<32x128xbf16, #tpu.memory_space<vmem>>, vector<32x128xbf16>
    %cst_62 = arith.constant dense<0.000000e+00> : vector<2x128xf32>
    %95 = tpu.matmul %93, %94, %cst_62 {dimension_numbers = #tpu.dot_dimension_numbers<[1], [0], [0], [1], [0, 0, 1, 1], [], []>} : vector<2x32xbf16>, vector<32x128xbf16>, vector<2x128xf32> -> vector<2x128xf32>
    %96 = arith.addf %91, %95 : vector<2x128xf32>
    %97 = vector.extract_strided_slice %96 {offsets = [0, 0], sizes = [2, 32], strides = [1, 1]} : vector<2x128xf32> to vector<2x32xf32>
    %98 = arith.negf %97 : vector<2x32xf32>
    %99 = math.exp %98 : vector<2x32xf32>
    %cst_63 = arith.constant 1.000000e+00 : f32
    %100 = vector.broadcast %cst_63 : f32 to vector<2x32xf32>
    %101 = arith.addf %100, %99 : vector<2x32xf32>
    %102 = arith.divf %100, %101 : vector<2x32xf32>
    %103 = vector.extract_strided_slice %96 {offsets = [0, 32], sizes = [2, 32], strides = [1, 1]} : vector<2x128xf32> to vector<2x32xf32>
    %104 = arith.negf %103 : vector<2x32xf32>
    %105 = math.exp %104 : vector<2x32xf32>
    %cst_64 = arith.constant 1.000000e+00 : f32
    %106 = vector.broadcast %cst_64 : f32 to vector<2x32xf32>
    %107 = arith.addf %106, %105 : vector<2x32xf32>
    %108 = arith.divf %106, %107 : vector<2x32xf32>
    %109 = vector.extract_strided_slice %96 {offsets = [0, 64], sizes = [2, 32], strides = [1, 1]} : vector<2x128xf32> to vector<2x32xf32>
    %110 = math.tanh %109 : vector<2x32xf32>
    %111 = vector.extract_strided_slice %96 {offsets = [0, 96], sizes = [2, 32], strides = [1, 1]} : vector<2x128xf32> to vector<2x32xf32>
    %112 = arith.negf %111 : vector<2x32xf32>
    %113 = math.exp %112 : vector<2x32xf32>
    %cst_65 = arith.constant 1.000000e+00 : f32
    %114 = vector.broadcast %cst_65 : f32 to vector<2x32xf32>
    %115 = arith.addf %114, %113 : vector<2x32xf32>
    %116 = arith.divf %114, %115 : vector<2x32xf32>
    %c0_66 = arith.constant 0 : index
    %c0_67 = arith.constant 0 : index
    %117 = vector.load %arg9[%c0_66, %c0_67] : memref<2x32xf32, #tpu.memory_space<vmem>>, vector<2x32xf32>
    %118 = arith.mulf %108, %117 : vector<2x32xf32>
    %119 = arith.mulf %102, %110 : vector<2x32xf32>
    %120 = arith.addf %118, %119 : vector<2x32xf32>
    %121 = math.tanh %120 : vector<2x32xf32>
    %122 = arith.mulf %116, %121 : vector<2x32xf32>
    %c0_68 = arith.constant 0 : index
    %c0_69 = arith.constant 0 : index
    %123 = vector.load %arg9[%c0_68, %c0_69] : memref<2x32xf32, #tpu.memory_space<vmem>>, vector<2x32xf32>
    tpu.vector_store %arg9[%c0_68, %c0_69], %120 {strides = array<i32>} : memref<2x32xf32, #tpu.memory_space<vmem>>, vector<2x32xf32>,
    %c0_70 = arith.constant 0 : index
    %c0_71 = arith.constant 0 : index
    %124 = vector.load %arg8[%c0_70, %c0_71] : memref<2x32xf32, #tpu.memory_space<vmem>>, vector<2x32xf32>
    tpu.vector_store %arg8[%c0_70, %c0_71], %122 {strides = array<i32>} : memref<2x32xf32, #tpu.memory_space<vmem>>, vector<2x32xf32>,
    %c0_72 = arith.constant 0 : index
    %c2_73 = arith.constant 2 : index
    %c0_74 = arith.constant 0 : index
    %125 = vector.load %arg6[%c0_72, %c2_73, %c0_74] : memref<2x4x32xf32, #tpu.memory_space<vmem>>, vector<2x1x32xf32>
    %126 = vector.shape_cast %125 : vector<2x1x32xf32> to vector<2x32xf32>
    %127 = vector.shape_cast %122 : vector<2x32xf32> to vector<2x1x32xf32>
    tpu.vector_store %arg6[%c0_72, %c2_73, %c0_74], %127 {strides = array<i32>} : memref<2x4x32xf32, #tpu.memory_space<vmem>>, vector<2x1x32xf32>,
    %c0_75 = arith.constant 0 : index
    %c3 = arith.constant 3 : index
    %c0_76 = arith.constant 0 : index
    %128 = vector.load %arg7[%c0_75, %c3, %c0_76] : memref<2x4x128xf32, #tpu.memory_space<vmem>>, vector<2x1x128xf32>
    %129 = vector.shape_cast %128 : vector<2x1x128xf32> to vector<2x128xf32>
    %c0_77 = arith.constant 0 : index
    %c0_78 = arith.constant 0 : index
    %130 = vector.load %arg8[%c0_77, %c0_78] : memref<2x32xf32, #tpu.memory_space<vmem>>, vector<2x32xf32>
    %131 = arith.truncf %130 : vector<2x32xf32> to vector<2x32xbf16>
    %c0_79 = arith.constant 0 : index
    %c0_80 = arith.constant 0 : index
    %132 = vector.load %arg2[%c0_79, %c0_80] : memref<32x128xbf16, #tpu.memory_space<vmem>>, vector<32x128xbf16>
    %cst_81 = arith.constant dense<0.000000e+00> : vector<2x128xf32>
    %133 = tpu.matmul %131, %132, %cst_81 {dimension_numbers = #tpu.dot_dimension_numbers<[1], [0], [0], [1], [0, 0, 1, 1], [], []>} : vector<2x32xbf16>, vector<32x128xbf16>, vector<2x128xf32> -> vector<2x128xf32>
    %134 = arith.addf %129, %133 : vector<2x128xf32>
    %135 = vector.extract_strided_slice %134 {offsets = [0, 0], sizes = [2, 32], strides = [1, 1]} : vector<2x128xf32> to vector<2x32xf32>
    %136 = arith.negf %135 : vector<2x32xf32>
    %137 = math.exp %136 : vector<2x32xf32>
    %cst_82 = arith.constant 1.000000e+00 : f32
    %138 = vector.broadcast %cst_82 : f32 to vector<2x32xf32>
    %139 = arith.addf %138, %137 : vector<2x32xf32>
    %140 = arith.divf %138, %139 : vector<2x32xf32>
    %141 = vector.extract_strided_slice %134 {offsets = [0, 32], sizes = [2, 32], strides = [1, 1]} : vector<2x128xf32> to vector<2x32xf32>
    %142 = arith.negf %141 : vector<2x32xf32>
    %143 = math.exp %142 : vector<2x32xf32>
    %cst_83 = arith.constant 1.000000e+00 : f32
    %144 = vector.broadcast %cst_83 : f32 to vector<2x32xf32>
    %145 = arith.addf %144, %143 : vector<2x32xf32>
    %146 = arith.divf %144, %145 : vector<2x32xf32>
    %147 = vector.extract_strided_slice %134 {offsets = [0, 64], sizes = [2, 32], strides = [1, 1]} : vector<2x128xf32> to vector<2x32xf32>
    %148 = math.tanh %147 : vector<2x32xf32>
    %149 = vector.extract_strided_slice %134 {offsets = [0, 96], sizes = [2, 32], strides = [1, 1]} : vector<2x128xf32> to vector<2x32xf32>
    %150 = arith.negf %149 : vector<2x32xf32>
    %151 = math.exp %150 : vector<2x32xf32>
    %cst_84 = arith.constant 1.000000e+00 : f32
    %152 = vector.broadcast %cst_84 : f32 to vector<2x32xf32>
    %153 = arith.addf %152, %151 : vector<2x32xf32>
    %154 = arith.divf %152, %153 : vector<2x32xf32>
    %c0_85 = arith.constant 0 : index
    %c0_86 = arith.constant 0 : index
    %155 = vector.load %arg9[%c0_85, %c0_86] : memref<2x32xf32, #tpu.memory_space<vmem>>, vector<2x32xf32>
    %156 = arith.mulf %146, %155 : vector<2x32xf32>
    %157 = arith.mulf %140, %148 : vector<2x32xf32>
    %158 = arith.addf %156, %157 : vector<2x32xf32>
    %159 = math.tanh %158 : vector<2x32xf32>
    %160 = arith.mulf %154, %159 : vector<2x32xf32>
    %c0_87 = arith.constant 0 : index
    %c0_88 = arith.constant 0 : index
    %161 = vector.load %arg9[%c0_87, %c0_88] : memref<2x32xf32, #tpu.memory_space<vmem>>, vector<2x32xf32>
    tpu.vector_store %arg9[%c0_87, %c0_88], %158 {strides = array<i32>} : memref<2x32xf32, #tpu.memory_space<vmem>>, vector<2x32xf32>,
    %c0_89 = arith.constant 0 : index
    %c0_90 = arith.constant 0 : index
    %162 = vector.load %arg8[%c0_89, %c0_90] : memref<2x32xf32, #tpu.memory_space<vmem>>, vector<2x32xf32>
    tpu.vector_store %arg8[%c0_89, %c0_90], %160 {strides = array<i32>} : memref<2x32xf32, #tpu.memory_space<vmem>>, vector<2x32xf32>,
    %c0_91 = arith.constant 0 : index
    %c3_92 = arith.constant 3 : index
    %c0_93 = arith.constant 0 : index
    %163 = vector.load %arg6[%c0_91, %c3_92, %c0_93] : memref<2x4x32xf32, #tpu.memory_space<vmem>>, vector<2x1x32xf32>
    %164 = vector.shape_cast %163 : vector<2x1x32xf32> to vector<2x32xf32>
    %165 = vector.shape_cast %160 : vector<2x32xf32> to vector<2x1x32xf32>
    tpu.vector_store %arg6[%c0_91, %c3_92, %c0_93], %165 {strides = array<i32>} : memref<2x4x32xf32, #tpu.memory_space<vmem>>, vector<2x1x32xf32>,
    return
  }
}

module attributes {stable_mosaic.version = 11 : i64} {
  func.func @_bi_lstm_kernel(%arg0: memref<2x8x48xbf16, #tpu.memory_space<vmem>>, %arg1: memref<48x256xbf16, #tpu.memory_space<vmem>>, %arg2: memref<32x256xbf16, #tpu.memory_space<vmem>>, %arg3: memref<1x256xf32, #tpu.memory_space<vmem>>, %arg4: memref<4x32xf32, #tpu.memory_space<vmem>>, %arg5: memref<4x32xf32, #tpu.memory_space<vmem>>, %arg6: memref<4x8xf32, #tpu.memory_space<vmem>>, %arg7: memref<2x8x64xf32, #tpu.memory_space<vmem>>, %arg8: memref<4x8x128xf32, #tpu.memory_space<vmem>>, %arg9: memref<4x32xf32, #tpu.memory_space<vmem>>, %arg10: memref<4x32xf32, #tpu.memory_space<vmem>>, %arg11: memref<2x8x32xf32, #tpu.memory_space<vmem>>, %arg12: memref<2x8x32xf32, #tpu.memory_space<vmem>>) attributes {dimension_semantics = [], scalar_prefetch = 0 : i64, scratch_operands = 5 : i64, tpu.core_type = #tpu.core_type<tc>} {
    %c0 = arith.constant 0 : index
    %c0_0 = arith.constant 0 : index
    %c0_1 = arith.constant 0 : index
    %0 = vector.load %arg0[%c0, %c0_0, %c0_1] : memref<2x8x48xbf16, #tpu.memory_space<vmem>>, vector<2x8x48xbf16>
    %1 = vector.shape_cast %0 : vector<2x8x48xbf16> to vector<16x48xbf16>
    %c0_2 = arith.constant 0 : index
    %c0_3 = arith.constant 0 : index
    %2 = vector.load %arg1[%c0_2, %c0_3] : memref<48x256xbf16, #tpu.memory_space<vmem>>, vector<48x256xbf16>
    %cst = arith.constant dense<0.000000e+00> : vector<16x256xf32>
    %3 = tpu.matmul %1, %2, %cst {dimension_numbers = #tpu.dot_dimension_numbers<[1], [0], [0], [1], [0, 0, 1, 1], [], []>} : vector<16x48xbf16>, vector<48x256xbf16>, vector<16x256xf32> -> vector<16x256xf32>
    %c0_4 = arith.constant 0 : index
    %c0_5 = arith.constant 0 : index
    %4 = vector.load %arg3[%c0_4, %c0_5] : memref<1x256xf32, #tpu.memory_space<vmem>>, vector<1x256xf32>
    %5 = vector.broadcast %4 : vector<1x256xf32> to vector<16x256xf32>
    %6 = arith.addf %3, %5 : vector<16x256xf32>
    %7 = vector.shape_cast %6 : vector<16x256xf32> to vector<2x8x256xf32>
    %8 = vector.extract_strided_slice %7 {offsets = [0, 0, 0], sizes = [2, 8, 128], strides = [1, 1, 1]} : vector<2x8x256xf32> to vector<2x8x128xf32>
    %c0_6 = arith.constant 0 : index
    %c0_7 = arith.constant 0 : index
    %c0_8 = arith.constant 0 : index
    %9 = vector.load %arg8[%c0_6, %c0_7, %c0_8] : memref<4x8x128xf32, #tpu.memory_space<vmem>>, vector<2x8x128xf32>
    tpu.vector_store %arg8[%c0_6, %c0_7, %c0_8], %8 {strides = array<i32>} : memref<4x8x128xf32, #tpu.memory_space<vmem>>, vector<2x8x128xf32>,
    %10 = vector.extract_strided_slice %7 {offsets = [0, 7, 128], sizes = [2, 1, 128], strides = [1, 1, 1]} : vector<2x8x256xf32> to vector<2x1x128xf32>
    %11 = vector.shape_cast %10 : vector<2x1x128xf32> to vector<2x128xf32>
    %c2 = arith.constant 2 : index
    %c0_9 = arith.constant 0 : index
    %c0_10 = arith.constant 0 : index
    %12 = vector.load %arg8[%c2, %c0_9, %c0_10] : memref<4x8x128xf32, #tpu.memory_space<vmem>>, vector<2x1x128xf32>
    %13 = vector.shape_cast %12 : vector<2x1x128xf32> to vector<2x128xf32>
    %14 = vector.shape_cast %11 : vector<2x128xf32> to vector<2x1x128xf32>
    tpu.vector_store %arg8[%c2, %c0_9, %c0_10], %14 {strides = array<i32>} : memref<4x8x128xf32, #tpu.memory_space<vmem>>, vector<2x1x128xf32>,
    %15 = vector.extract_strided_slice %7 {offsets = [0, 6, 128], sizes = [2, 1, 128], strides = [1, 1, 1]} : vector<2x8x256xf32> to vector<2x1x128xf32>
    %16 = vector.shape_cast %15 : vector<2x1x128xf32> to vector<2x128xf32>
    %c2_11 = arith.constant 2 : index
    %c1 = arith.constant 1 : index
    %c0_12 = arith.constant 0 : index
    %17 = vector.load %arg8[%c2_11, %c1, %c0_12] : memref<4x8x128xf32, #tpu.memory_space<vmem>>, vector<2x1x128xf32>
    %18 = vector.shape_cast %17 : vector<2x1x128xf32> to vector<2x128xf32>
    %19 = vector.shape_cast %16 : vector<2x128xf32> to vector<2x1x128xf32>
    tpu.vector_store %arg8[%c2_11, %c1, %c0_12], %19 {strides = array<i32>} : memref<4x8x128xf32, #tpu.memory_space<vmem>>, vector<2x1x128xf32>,
    %20 = vector.extract_strided_slice %7 {offsets = [0, 5, 128], sizes = [2, 1, 128], strides = [1, 1, 1]} : vector<2x8x256xf32> to vector<2x1x128xf32>
    %21 = vector.shape_cast %20 : vector<2x1x128xf32> to vector<2x128xf32>
    %c2_13 = arith.constant 2 : index
    %c2_14 = arith.constant 2 : index
    %c0_15 = arith.constant 0 : index
    %22 = vector.load %arg8[%c2_13, %c2_14, %c0_15] : memref<4x8x128xf32, #tpu.memory_space<vmem>>, vector<2x1x128xf32>
    %23 = vector.shape_cast %22 : vector<2x1x128xf32> to vector<2x128xf32>
    %24 = vector.shape_cast %21 : vector<2x128xf32> to vector<2x1x128xf32>
    tpu.vector_store %arg8[%c2_13, %c2_14, %c0_15], %24 {strides = array<i32>} : memref<4x8x128xf32, #tpu.memory_space<vmem>>, vector<2x1x128xf32>,
    %25 = vector.extract_strided_slice %7 {offsets = [0, 4, 128], sizes = [2, 1, 128], strides = [1, 1, 1]} : vector<2x8x256xf32> to vector<2x1x128xf32>
    %26 = vector.shape_cast %25 : vector<2x1x128xf32> to vector<2x128xf32>
    %c2_16 = arith.constant 2 : index
    %c3 = arith.constant 3 : index
    %c0_17 = arith.constant 0 : index
    %27 = vector.load %arg8[%c2_16, %c3, %c0_17] : memref<4x8x128xf32, #tpu.memory_space<vmem>>, vector<2x1x128xf32>
    %28 = vector.shape_cast %27 : vector<2x1x128xf32> to vector<2x128xf32>
    %29 = vector.shape_cast %26 : vector<2x128xf32> to vector<2x1x128xf32>
    tpu.vector_store %arg8[%c2_16, %c3, %c0_17], %29 {strides = array<i32>} : memref<4x8x128xf32, #tpu.memory_space<vmem>>, vector<2x1x128xf32>,
    %30 = vector.extract_strided_slice %7 {offsets = [0, 3, 128], sizes = [2, 1, 128], strides = [1, 1, 1]} : vector<2x8x256xf32> to vector<2x1x128xf32>
    %31 = vector.shape_cast %30 : vector<2x1x128xf32> to vector<2x128xf32>
    %c2_18 = arith.constant 2 : index
    %c4 = arith.constant 4 : index
    %c0_19 = arith.constant 0 : index
    %32 = vector.load %arg8[%c2_18, %c4, %c0_19] : memref<4x8x128xf32, #tpu.memory_space<vmem>>, vector<2x1x128xf32>
    %33 = vector.shape_cast %32 : vector<2x1x128xf32> to vector<2x128xf32>
    %34 = vector.shape_cast %31 : vector<2x128xf32> to vector<2x1x128xf32>
    tpu.vector_store %arg8[%c2_18, %c4, %c0_19], %34 {strides = array<i32>} : memref<4x8x128xf32, #tpu.memory_space<vmem>>, vector<2x1x128xf32>,
    %35 = vector.extract_strided_slice %7 {offsets = [0, 2, 128], sizes = [2, 1, 128], strides = [1, 1, 1]} : vector<2x8x256xf32> to vector<2x1x128xf32>
    %36 = vector.shape_cast %35 : vector<2x1x128xf32> to vector<2x128xf32>
    %c2_20 = arith.constant 2 : index
    %c5 = arith.constant 5 : index
    %c0_21 = arith.constant 0 : index
    %37 = vector.load %arg8[%c2_20, %c5, %c0_21] : memref<4x8x128xf32, #tpu.memory_space<vmem>>, vector<2x1x128xf32>
    %38 = vector.shape_cast %37 : vector<2x1x128xf32> to vector<2x128xf32>
    %39 = vector.shape_cast %36 : vector<2x128xf32> to vector<2x1x128xf32>
    tpu.vector_store %arg8[%c2_20, %c5, %c0_21], %39 {strides = array<i32>} : memref<4x8x128xf32, #tpu.memory_space<vmem>>, vector<2x1x128xf32>,
    %40 = vector.extract_strided_slice %7 {offsets = [0, 1, 128], sizes = [2, 1, 128], strides = [1, 1, 1]} : vector<2x8x256xf32> to vector<2x1x128xf32>
    %41 = vector.shape_cast %40 : vector<2x1x128xf32> to vector<2x128xf32>
    %c2_22 = arith.constant 2 : index
    %c6 = arith.constant 6 : index
    %c0_23 = arith.constant 0 : index
    %42 = vector.load %arg8[%c2_22, %c6, %c0_23] : memref<4x8x128xf32, #tpu.memory_space<vmem>>, vector<2x1x128xf32>
    %43 = vector.shape_cast %42 : vector<2x1x128xf32> to vector<2x128xf32>
    %44 = vector.shape_cast %41 : vector<2x128xf32> to vector<2x1x128xf32>
    tpu.vector_store %arg8[%c2_22, %c6, %c0_23], %44 {strides = array<i32>} : memref<4x8x128xf32, #tpu.memory_space<vmem>>, vector<2x1x128xf32>,
    %45 = vector.extract_strided_slice %7 {offsets = [0, 0, 128], sizes = [2, 1, 128], strides = [1, 1, 1]} : vector<2x8x256xf32> to vector<2x1x128xf32>
    %46 = vector.shape_cast %45 : vector<2x1x128xf32> to vector<2x128xf32>
    %c2_24 = arith.constant 2 : index
    %c7 = arith.constant 7 : index
    %c0_25 = arith.constant 0 : index
    %47 = vector.load %arg8[%c2_24, %c7, %c0_25] : memref<4x8x128xf32, #tpu.memory_space<vmem>>, vector<2x1x128xf32>
    %48 = vector.shape_cast %47 : vector<2x1x128xf32> to vector<2x128xf32>
    %49 = vector.shape_cast %46 : vector<2x128xf32> to vector<2x1x128xf32>
    tpu.vector_store %arg8[%c2_24, %c7, %c0_25], %49 {strides = array<i32>} : memref<4x8x128xf32, #tpu.memory_space<vmem>>, vector<2x1x128xf32>,
    %50 = tpu.iota {dimensions = array<i32: 0>} : vector<4x1xi32>
    %c2_i32 = arith.constant 2 : i32
    %51 = vector.broadcast %c2_i32 : i32 to vector<4x1xi32>
    %52 = arith.cmpi slt, %50, %51 : vector<4x1xi32>
    %c0_26 = arith.constant 0 : index
    %c0_27 = arith.constant 0 : index
    %53 = vector.load %arg4[%c0_26, %c0_27] : memref<4x32xf32, #tpu.memory_space<vmem>>, vector<4x32xf32>
    %c0_28 = arith.constant 0 : index
    %c0_29 = arith.constant 0 : index
    %54 = vector.load %arg9[%c0_28, %c0_29] : memref<4x32xf32, #tpu.memory_space<vmem>>, vector<4x32xf32>
    tpu.vector_store %arg9[%c0_28, %c0_29], %53 {strides = array<i32>} : memref<4x32xf32, #tpu.memory_space<vmem>>, vector<4x32xf32>,
    %c0_30 = arith.constant 0 : index
    %c0_31 = arith.constant 0 : index
    %55 = vector.load %arg5[%c0_30, %c0_31] : memref<4x32xf32, #tpu.memory_space<vmem>>, vector<4x32xf32>
    %c0_32 = arith.constant 0 : index
    %c0_33 = arith.constant 0 : index
    %56 = vector.load %arg10[%c0_32, %c0_33] : memref<4x32xf32, #tpu.memory_space<vmem>>, vector<4x32xf32>
    tpu.vector_store %arg10[%c0_32, %c0_33], %55 {strides = array<i32>} : memref<4x32xf32, #tpu.memory_space<vmem>>, vector<4x32xf32>,
    %c0_34 = arith.constant 0 : index
    %c0_35 = arith.constant 0 : index
    %57 = vector.load %arg9[%c0_34, %c0_35] : memref<4x32xf32, #tpu.memory_space<vmem>>, vector<4x32xf32>
    %58 = arith.truncf %57 : vector<4x32xf32> to vector<4x32xbf16>
    %c0_36 = arith.constant 0 : index
    %c0_37 = arith.constant 0 : index
    %59 = vector.load %arg2[%c0_36, %c0_37] : memref<32x256xbf16, #tpu.memory_space<vmem>>, vector<32x256xbf16>
    %cst_38 = arith.constant dense<0.000000e+00> : vector<4x256xf32>
    %60 = tpu.matmul %58, %59, %cst_38 {dimension_numbers = #tpu.dot_dimension_numbers<[1], [0], [0], [1], [0, 0, 1, 1], [], []>} : vector<4x32xbf16>, vector<32x256xbf16>, vector<4x256xf32> -> vector<4x256xf32>
    %c0_39 = arith.constant 0 : index
    %c0_40 = arith.constant 0 : index
    %c0_41 = arith.constant 0 : index
    %61 = vector.load %arg8[%c0_39, %c0_40, %c0_41] : memref<4x8x128xf32, #tpu.memory_space<vmem>>, vector<4x1x128xf32>
    %62 = vector.shape_cast %61 : vector<4x1x128xf32> to vector<4x128xf32>
    %63 = vector.extract_strided_slice %60 {offsets = [0, 0], sizes = [4, 128], strides = [1, 1]} : vector<4x256xf32> to vector<4x128xf32>
    %64 = vector.extract_strided_slice %60 {offsets = [0, 128], sizes = [4, 128], strides = [1, 1]} : vector<4x256xf32> to vector<4x128xf32>
    %65 = vector.shape_cast %52 : vector<4x1xi1> to vector<4x1xi1>
    %66 = vector.broadcast %65 : vector<4x1xi1> to vector<4x128xi1>
    %67 = arith.select %66, %63, %64 : vector<4x128xi1>, vector<4x128xf32>
    %68 = arith.addf %62, %67 : vector<4x128xf32>
    %69 = vector.extract_strided_slice %68 {offsets = [0, 0], sizes = [4, 32], strides = [1, 1]} : vector<4x128xf32> to vector<4x32xf32>
    %70 = arith.negf %69 : vector<4x32xf32>
    %71 = math.exp %70 : vector<4x32xf32>
    %cst_42 = arith.constant 1.000000e+00 : f32
    %72 = vector.broadcast %cst_42 : f32 to vector<4x32xf32>
    %73 = arith.addf %72, %71 : vector<4x32xf32>
    %74 = arith.divf %72, %73 : vector<4x32xf32>
    %75 = vector.extract_strided_slice %68 {offsets = [0, 32], sizes = [4, 32], strides = [1, 1]} : vector<4x128xf32> to vector<4x32xf32>
    %76 = arith.negf %75 : vector<4x32xf32>
    %77 = math.exp %76 : vector<4x32xf32>
    %cst_43 = arith.constant 1.000000e+00 : f32
    %78 = vector.broadcast %cst_43 : f32 to vector<4x32xf32>
    %79 = arith.addf %78, %77 : vector<4x32xf32>
    %80 = arith.divf %78, %79 : vector<4x32xf32>
    %81 = vector.extract_strided_slice %68 {offsets = [0, 64], sizes = [4, 32], strides = [1, 1]} : vector<4x128xf32> to vector<4x32xf32>
    %82 = math.tanh %81 : vector<4x32xf32>
    %83 = vector.extract_strided_slice %68 {offsets = [0, 96], sizes = [4, 32], strides = [1, 1]} : vector<4x128xf32> to vector<4x32xf32>
    %84 = arith.negf %83 : vector<4x32xf32>
    %85 = math.exp %84 : vector<4x32xf32>
    %cst_44 = arith.constant 1.000000e+00 : f32
    %86 = vector.broadcast %cst_44 : f32 to vector<4x32xf32>
    %87 = arith.addf %86, %85 : vector<4x32xf32>
    %88 = arith.divf %86, %87 : vector<4x32xf32>
    %c0_45 = arith.constant 0 : index
    %c0_46 = arith.constant 0 : index
    %89 = vector.load %arg10[%c0_45, %c0_46] : memref<4x32xf32, #tpu.memory_space<vmem>>, vector<4x32xf32>
    %90 = arith.mulf %80, %89 : vector<4x32xf32>
    %91 = arith.mulf %74, %82 : vector<4x32xf32>
    %92 = arith.addf %90, %91 : vector<4x32xf32>
    %93 = math.tanh %92 : vector<4x32xf32>
    %94 = arith.mulf %88, %93 : vector<4x32xf32>
    %c0_47 = arith.constant 0 : index
    %c0_48 = arith.constant 0 : index
    %95 = vector.load %arg6[%c0_47, %c0_48] : memref<4x8xf32, #tpu.memory_space<vmem>>, vector<4x1xf32>
    %cst_49 = arith.constant 5.000000e-01 : f32
    %96 = vector.broadcast %cst_49 : f32 to vector<4x1xf32>
    %97 = arith.cmpf ogt, %95, %96 : vector<4x1xf32>
    %c0_50 = arith.constant 0 : index
    %c0_51 = arith.constant 0 : index
    %98 = vector.load %arg10[%c0_50, %c0_51] : memref<4x32xf32, #tpu.memory_space<vmem>>, vector<4x32xf32>
    %99 = vector.shape_cast %97 : vector<4x1xi1> to vector<4x1xi1>
    %100 = vector.broadcast %99 : vector<4x1xi1> to vector<4x32xi1>
    %101 = arith.select %100, %92, %98 : vector<4x32xi1>, vector<4x32xf32>
    %c0_52 = arith.constant 0 : index
    %c0_53 = arith.constant 0 : index
    %102 = vector.load %arg10[%c0_52, %c0_53] : memref<4x32xf32, #tpu.memory_space<vmem>>, vector<4x32xf32>
    tpu.vector_store %arg10[%c0_52, %c0_53], %101 {strides = array<i32>} : memref<4x32xf32, #tpu.memory_space<vmem>>, vector<4x32xf32>,
    %c0_54 = arith.constant 0 : index
    %c0_55 = arith.constant 0 : index
    %103 = vector.load %arg9[%c0_54, %c0_55] : memref<4x32xf32, #tpu.memory_space<vmem>>, vector<4x32xf32>
    %104 = vector.shape_cast %97 : vector<4x1xi1> to vector<4x1xi1>
    %105 = vector.broadcast %104 : vector<4x1xi1> to vector<4x32xi1>
    %106 = arith.select %105, %94, %103 : vector<4x32xi1>, vector<4x32xf32>
    %c0_56 = arith.constant 0 : index
    %c0_57 = arith.constant 0 : index
    %107 = vector.load %arg9[%c0_56, %c0_57] : memref<4x32xf32, #tpu.memory_space<vmem>>, vector<4x32xf32>
    tpu.vector_store %arg9[%c0_56, %c0_57], %106 {strides = array<i32>} : memref<4x32xf32, #tpu.memory_space<vmem>>, vector<4x32xf32>,
    %cst_58 = arith.constant 0.000000e+00 : f32
    %108 = vector.shape_cast %97 : vector<4x1xi1> to vector<4x1xi1>
    %109 = vector.broadcast %108 : vector<4x1xi1> to vector<4x32xi1>
    %110 = vector.broadcast %cst_58 : f32 to vector<4x32xf32>
    %111 = arith.select %109, %94, %110 : vector<4x32xi1>, vector<4x32xf32>
    %112 = vector.extract_strided_slice %111 {offsets = [0, 0], sizes = [2, 32], strides = [1, 1]} : vector<4x32xf32> to vector<2x32xf32>
    %c0_59 = arith.constant 0 : index
    %c0_60 = arith.constant 0 : index
    %c0_61 = arith.constant 0 : index
    %113 = vector.load %arg11[%c0_59, %c0_60, %c0_61] : memref<2x8x32xf32, #tpu.memory_space<vmem>>, vector<2x1x32xf32>
    %114 = vector.shape_cast %113 : vector<2x1x32xf32> to vector<2x32xf32>
    %115 = vector.shape_cast %112 : vector<2x32xf32> to vector<2x1x32xf32>
    tpu.vector_store %arg11[%c0_59, %c0_60, %c0_61], %115 {strides = array<i32>} : memref<2x8x32xf32, #tpu.memory_space<vmem>>, vector<2x1x32xf32>,
    %116 = vector.extract_strided_slice %111 {offsets = [2, 0], sizes = [2, 32], strides = [1, 1]} : vector<4x32xf32> to vector<2x32xf32>
    %c0_62 = arith.constant 0 : index
    %c7_63 = arith.constant 7 : index
    %c0_64 = arith.constant 0 : index
    %117 = vector.load %arg12[%c0_62, %c7_63, %c0_64] : memref<2x8x32xf32, #tpu.memory_space<vmem>>, vector<2x1x32xf32>
    %118 = vector.shape_cast %117 : vector<2x1x32xf32> to vector<2x32xf32>
    %119 = vector.shape_cast %116 : vector<2x32xf32> to vector<2x1x32xf32>
    tpu.vector_store %arg12[%c0_62, %c7_63, %c0_64], %119 {strides = array<i32>} : memref<2x8x32xf32, #tpu.memory_space<vmem>>, vector<2x1x32xf32>,
    %c0_65 = arith.constant 0 : index
    %c0_66 = arith.constant 0 : index
    %120 = vector.load %arg9[%c0_65, %c0_66] : memref<4x32xf32, #tpu.memory_space<vmem>>, vector<4x32xf32>
    %121 = arith.truncf %120 : vector<4x32xf32> to vector<4x32xbf16>
    %c0_67 = arith.constant 0 : index
    %c0_68 = arith.constant 0 : index
    %122 = vector.load %arg2[%c0_67, %c0_68] : memref<32x256xbf16, #tpu.memory_space<vmem>>, vector<32x256xbf16>
    %cst_69 = arith.constant dense<0.000000e+00> : vector<4x256xf32>
    %123 = tpu.matmul %121, %122, %cst_69 {dimension_numbers = #tpu.dot_dimension_numbers<[1], [0], [0], [1], [0, 0, 1, 1], [], []>} : vector<4x32xbf16>, vector<32x256xbf16>, vector<4x256xf32> -> vector<4x256xf32>
    %c0_70 = arith.constant 0 : index
    %c1_71 = arith.constant 1 : index
    %c0_72 = arith.constant 0 : index
    %124 = vector.load %arg8[%c0_70, %c1_71, %c0_72] : memref<4x8x128xf32, #tpu.memory_space<vmem>>, vector<4x1x128xf32>
    %125 = vector.shape_cast %124 : vector<4x1x128xf32> to vector<4x128xf32>
    %126 = vector.extract_strided_slice %123 {offsets = [0, 0], sizes = [4, 128], strides = [1, 1]} : vector<4x256xf32> to vector<4x128xf32>
    %127 = vector.extract_strided_slice %123 {offsets = [0, 128], sizes = [4, 128], strides = [1, 1]} : vector<4x256xf32> to vector<4x128xf32>
    %128 = vector.shape_cast %52 : vector<4x1xi1> to vector<4x1xi1>
    %129 = vector.broadcast %128 : vector<4x1xi1> to vector<4x128xi1>
    %130 = arith.select %129, %126, %127 : vector<4x128xi1>, vector<4x128xf32>
    %131 = arith.addf %125, %130 : vector<4x128xf32>
    %132 = vector.extract_strided_slice %131 {offsets = [0, 0], sizes = [4, 32], strides = [1, 1]} : vector<4x128xf32> to vector<4x32xf32>
    %133 = arith.negf %132 : vector<4x32xf32>
    %134 = math.exp %133 : vector<4x32xf32>
    %cst_73 = arith.constant 1.000000e+00 : f32
    %135 = vector.broadcast %cst_73 : f32 to vector<4x32xf32>
    %136 = arith.addf %135, %134 : vector<4x32xf32>
    %137 = arith.divf %135, %136 : vector<4x32xf32>
    %138 = vector.extract_strided_slice %131 {offsets = [0, 32], sizes = [4, 32], strides = [1, 1]} : vector<4x128xf32> to vector<4x32xf32>
    %139 = arith.negf %138 : vector<4x32xf32>
    %140 = math.exp %139 : vector<4x32xf32>
    %cst_74 = arith.constant 1.000000e+00 : f32
    %141 = vector.broadcast %cst_74 : f32 to vector<4x32xf32>
    %142 = arith.addf %141, %140 : vector<4x32xf32>
    %143 = arith.divf %141, %142 : vector<4x32xf32>
    %144 = vector.extract_strided_slice %131 {offsets = [0, 64], sizes = [4, 32], strides = [1, 1]} : vector<4x128xf32> to vector<4x32xf32>
    %145 = math.tanh %144 : vector<4x32xf32>
    %146 = vector.extract_strided_slice %131 {offsets = [0, 96], sizes = [4, 32], strides = [1, 1]} : vector<4x128xf32> to vector<4x32xf32>
    %147 = arith.negf %146 : vector<4x32xf32>
    %148 = math.exp %147 : vector<4x32xf32>
    %cst_75 = arith.constant 1.000000e+00 : f32
    %149 = vector.broadcast %cst_75 : f32 to vector<4x32xf32>
    %150 = arith.addf %149, %148 : vector<4x32xf32>
    %151 = arith.divf %149, %150 : vector<4x32xf32>
    %c0_76 = arith.constant 0 : index
    %c0_77 = arith.constant 0 : index
    %152 = vector.load %arg10[%c0_76, %c0_77] : memref<4x32xf32, #tpu.memory_space<vmem>>, vector<4x32xf32>
    %153 = arith.mulf %143, %152 : vector<4x32xf32>
    %154 = arith.mulf %137, %145 : vector<4x32xf32>
    %155 = arith.addf %153, %154 : vector<4x32xf32>
    %156 = math.tanh %155 : vector<4x32xf32>
    %157 = arith.mulf %151, %156 : vector<4x32xf32>
    %c0_78 = arith.constant 0 : index
    %c1_79 = arith.constant 1 : index
    %158 = vector.load %arg6[%c0_78, %c1_79] : memref<4x8xf32, #tpu.memory_space<vmem>>, vector<4x1xf32>
    %cst_80 = arith.constant 5.000000e-01 : f32
    %159 = vector.broadcast %cst_80 : f32 to vector<4x1xf32>
    %160 = arith.cmpf ogt, %158, %159 : vector<4x1xf32>
    %c0_81 = arith.constant 0 : index
    %c0_82 = arith.constant 0 : index
    %161 = vector.load %arg10[%c0_81, %c0_82] : memref<4x32xf32, #tpu.memory_space<vmem>>, vector<4x32xf32>
    %162 = vector.shape_cast %160 : vector<4x1xi1> to vector<4x1xi1>
    %163 = vector.broadcast %162 : vector<4x1xi1> to vector<4x32xi1>
    %164 = arith.select %163, %155, %161 : vector<4x32xi1>, vector<4x32xf32>
    %c0_83 = arith.constant 0 : index
    %c0_84 = arith.constant 0 : index
    %165 = vector.load %arg10[%c0_83, %c0_84] : memref<4x32xf32, #tpu.memory_space<vmem>>, vector<4x32xf32>
    tpu.vector_store %arg10[%c0_83, %c0_84], %164 {strides = array<i32>} : memref<4x32xf32, #tpu.memory_space<vmem>>, vector<4x32xf32>,
    %c0_85 = arith.constant 0 : index
    %c0_86 = arith.constant 0 : index
    %166 = vector.load %arg9[%c0_85, %c0_86] : memref<4x32xf32, #tpu.memory_space<vmem>>, vector<4x32xf32>
    %167 = vector.shape_cast %160 : vector<4x1xi1> to vector<4x1xi1>
    %168 = vector.broadcast %167 : vector<4x1xi1> to vector<4x32xi1>
    %169 = arith.select %168, %157, %166 : vector<4x32xi1>, vector<4x32xf32>
    %c0_87 = arith.constant 0 : index
    %c0_88 = arith.constant 0 : index
    %170 = vector.load %arg9[%c0_87, %c0_88] : memref<4x32xf32, #tpu.memory_space<vmem>>, vector<4x32xf32>
    tpu.vector_store %arg9[%c0_87, %c0_88], %169 {strides = array<i32>} : memref<4x32xf32, #tpu.memory_space<vmem>>, vector<4x32xf32>,
    %cst_89 = arith.constant 0.000000e+00 : f32
    %171 = vector.shape_cast %160 : vector<4x1xi1> to vector<4x1xi1>
    %172 = vector.broadcast %171 : vector<4x1xi1> to vector<4x32xi1>
    %173 = vector.broadcast %cst_89 : f32 to vector<4x32xf32>
    %174 = arith.select %172, %157, %173 : vector<4x32xi1>, vector<4x32xf32>
    %175 = vector.extract_strided_slice %174 {offsets = [0, 0], sizes = [2, 32], strides = [1, 1]} : vector<4x32xf32> to vector<2x32xf32>
    %c0_90 = arith.constant 0 : index
    %c1_91 = arith.constant 1 : index
    %c0_92 = arith.constant 0 : index
    %176 = vector.load %arg11[%c0_90, %c1_91, %c0_92] : memref<2x8x32xf32, #tpu.memory_space<vmem>>, vector<2x1x32xf32>
    %177 = vector.shape_cast %176 : vector<2x1x32xf32> to vector<2x32xf32>
    %178 = vector.shape_cast %175 : vector<2x32xf32> to vector<2x1x32xf32>
    tpu.vector_store %arg11[%c0_90, %c1_91, %c0_92], %178 {strides = array<i32>} : memref<2x8x32xf32, #tpu.memory_space<vmem>>, vector<2x1x32xf32>,
    %179 = vector.extract_strided_slice %174 {offsets = [2, 0], sizes = [2, 32], strides = [1, 1]} : vector<4x32xf32> to vector<2x32xf32>
    %c0_93 = arith.constant 0 : index
    %c6_94 = arith.constant 6 : index
    %c0_95 = arith.constant 0 : index
    %180 = vector.load %arg12[%c0_93, %c6_94, %c0_95] : memref<2x8x32xf32, #tpu.memory_space<vmem>>, vector<2x1x32xf32>
    %181 = vector.shape_cast %180 : vector<2x1x32xf32> to vector<2x32xf32>
    %182 = vector.shape_cast %179 : vector<2x32xf32> to vector<2x1x32xf32>
    tpu.vector_store %arg12[%c0_93, %c6_94, %c0_95], %182 {strides = array<i32>} : memref<2x8x32xf32, #tpu.memory_space<vmem>>, vector<2x1x32xf32>,
    %c0_96 = arith.constant 0 : index
    %c0_97 = arith.constant 0 : index
    %183 = vector.load %arg9[%c0_96, %c0_97] : memref<4x32xf32, #tpu.memory_space<vmem>>, vector<4x32xf32>
    %184 = arith.truncf %183 : vector<4x32xf32> to vector<4x32xbf16>
    %c0_98 = arith.constant 0 : index
    %c0_99 = arith.constant 0 : index
    %185 = vector.load %arg2[%c0_98, %c0_99] : memref<32x256xbf16, #tpu.memory_space<vmem>>, vector<32x256xbf16>
    %cst_100 = arith.constant dense<0.000000e+00> : vector<4x256xf32>
    %186 = tpu.matmul %184, %185, %cst_100 {dimension_numbers = #tpu.dot_dimension_numbers<[1], [0], [0], [1], [0, 0, 1, 1], [], []>} : vector<4x32xbf16>, vector<32x256xbf16>, vector<4x256xf32> -> vector<4x256xf32>
    %c0_101 = arith.constant 0 : index
    %c2_102 = arith.constant 2 : index
    %c0_103 = arith.constant 0 : index
    %187 = vector.load %arg8[%c0_101, %c2_102, %c0_103] : memref<4x8x128xf32, #tpu.memory_space<vmem>>, vector<4x1x128xf32>
    %188 = vector.shape_cast %187 : vector<4x1x128xf32> to vector<4x128xf32>
    %189 = vector.extract_strided_slice %186 {offsets = [0, 0], sizes = [4, 128], strides = [1, 1]} : vector<4x256xf32> to vector<4x128xf32>
    %190 = vector.extract_strided_slice %186 {offsets = [0, 128], sizes = [4, 128], strides = [1, 1]} : vector<4x256xf32> to vector<4x128xf32>
    %191 = vector.shape_cast %52 : vector<4x1xi1> to vector<4x1xi1>
    %192 = vector.broadcast %191 : vector<4x1xi1> to vector<4x128xi1>
    %193 = arith.select %192, %189, %190 : vector<4x128xi1>, vector<4x128xf32>
    %194 = arith.addf %188, %193 : vector<4x128xf32>
    %195 = vector.extract_strided_slice %194 {offsets = [0, 0], sizes = [4, 32], strides = [1, 1]} : vector<4x128xf32> to vector<4x32xf32>
    %196 = arith.negf %195 : vector<4x32xf32>
    %197 = math.exp %196 : vector<4x32xf32>
    %cst_104 = arith.constant 1.000000e+00 : f32
    %198 = vector.broadcast %cst_104 : f32 to vector<4x32xf32>
    %199 = arith.addf %198, %197 : vector<4x32xf32>
    %200 = arith.divf %198, %199 : vector<4x32xf32>
    %201 = vector.extract_strided_slice %194 {offsets = [0, 32], sizes = [4, 32], strides = [1, 1]} : vector<4x128xf32> to vector<4x32xf32>
    %202 = arith.negf %201 : vector<4x32xf32>
    %203 = math.exp %202 : vector<4x32xf32>
    %cst_105 = arith.constant 1.000000e+00 : f32
    %204 = vector.broadcast %cst_105 : f32 to vector<4x32xf32>
    %205 = arith.addf %204, %203 : vector<4x32xf32>
    %206 = arith.divf %204, %205 : vector<4x32xf32>
    %207 = vector.extract_strided_slice %194 {offsets = [0, 64], sizes = [4, 32], strides = [1, 1]} : vector<4x128xf32> to vector<4x32xf32>
    %208 = math.tanh %207 : vector<4x32xf32>
    %209 = vector.extract_strided_slice %194 {offsets = [0, 96], sizes = [4, 32], strides = [1, 1]} : vector<4x128xf32> to vector<4x32xf32>
    %210 = arith.negf %209 : vector<4x32xf32>
    %211 = math.exp %210 : vector<4x32xf32>
    %cst_106 = arith.constant 1.000000e+00 : f32
    %212 = vector.broadcast %cst_106 : f32 to vector<4x32xf32>
    %213 = arith.addf %212, %211 : vector<4x32xf32>
    %214 = arith.divf %212, %213 : vector<4x32xf32>
    %c0_107 = arith.constant 0 : index
    %c0_108 = arith.constant 0 : index
    %215 = vector.load %arg10[%c0_107, %c0_108] : memref<4x32xf32, #tpu.memory_space<vmem>>, vector<4x32xf32>
    %216 = arith.mulf %206, %215 : vector<4x32xf32>
    %217 = arith.mulf %200, %208 : vector<4x32xf32>
    %218 = arith.addf %216, %217 : vector<4x32xf32>
    %219 = math.tanh %218 : vector<4x32xf32>
    %220 = arith.mulf %214, %219 : vector<4x32xf32>
    %c0_109 = arith.constant 0 : index
    %c2_110 = arith.constant 2 : index
    %221 = vector.load %arg6[%c0_109, %c2_110] : memref<4x8xf32, #tpu.memory_space<vmem>>, vector<4x1xf32>
    %cst_111 = arith.constant 5.000000e-01 : f32
    %222 = vector.broadcast %cst_111 : f32 to vector<4x1xf32>
    %223 = arith.cmpf ogt, %221, %222 : vector<4x1xf32>
    %c0_112 = arith.constant 0 : index
    %c0_113 = arith.constant 0 : index
    %224 = vector.load %arg10[%c0_112, %c0_113] : memref<4x32xf32, #tpu.memory_space<vmem>>, vector<4x32xf32>
    %225 = vector.shape_cast %223 : vector<4x1xi1> to vector<4x1xi1>
    %226 = vector.broadcast %225 : vector<4x1xi1> to vector<4x32xi1>
    %227 = arith.select %226, %218, %224 : vector<4x32xi1>, vector<4x32xf32>
    %c0_114 = arith.constant 0 : index
    %c0_115 = arith.constant 0 : index
    %228 = vector.load %arg10[%c0_114, %c0_115] : memref<4x32xf32, #tpu.memory_space<vmem>>, vector<4x32xf32>
    tpu.vector_store %arg10[%c0_114, %c0_115], %227 {strides = array<i32>} : memref<4x32xf32, #tpu.memory_space<vmem>>, vector<4x32xf32>,
    %c0_116 = arith.constant 0 : index
    %c0_117 = arith.constant 0 : index
    %229 = vector.load %arg9[%c0_116, %c0_117] : memref<4x32xf32, #tpu.memory_space<vmem>>, vector<4x32xf32>
    %230 = vector.shape_cast %223 : vector<4x1xi1> to vector<4x1xi1>
    %231 = vector.broadcast %230 : vector<4x1xi1> to vector<4x32xi1>
    %232 = arith.select %231, %220, %229 : vector<4x32xi1>, vector<4x32xf32>
    %c0_118 = arith.constant 0 : index
    %c0_119 = arith.constant 0 : index
    %233 = vector.load %arg9[%c0_118, %c0_119] : memref<4x32xf32, #tpu.memory_space<vmem>>, vector<4x32xf32>
    tpu.vector_store %arg9[%c0_118, %c0_119], %232 {strides = array<i32>} : memref<4x32xf32, #tpu.memory_space<vmem>>, vector<4x32xf32>,
    %cst_120 = arith.constant 0.000000e+00 : f32
    %234 = vector.shape_cast %223 : vector<4x1xi1> to vector<4x1xi1>
    %235 = vector.broadcast %234 : vector<4x1xi1> to vector<4x32xi1>
    %236 = vector.broadcast %cst_120 : f32 to vector<4x32xf32>
    %237 = arith.select %235, %220, %236 : vector<4x32xi1>, vector<4x32xf32>
    %238 = vector.extract_strided_slice %237 {offsets = [0, 0], sizes = [2, 32], strides = [1, 1]} : vector<4x32xf32> to vector<2x32xf32>
    %c0_121 = arith.constant 0 : index
    %c2_122 = arith.constant 2 : index
    %c0_123 = arith.constant 0 : index
    %239 = vector.load %arg11[%c0_121, %c2_122, %c0_123] : memref<2x8x32xf32, #tpu.memory_space<vmem>>, vector<2x1x32xf32>
    %240 = vector.shape_cast %239 : vector<2x1x32xf32> to vector<2x32xf32>
    %241 = vector.shape_cast %238 : vector<2x32xf32> to vector<2x1x32xf32>
    tpu.vector_store %arg11[%c0_121, %c2_122, %c0_123], %241 {strides = array<i32>} : memref<2x8x32xf32, #tpu.memory_space<vmem>>, vector<2x1x32xf32>,
    %242 = vector.extract_strided_slice %237 {offsets = [2, 0], sizes = [2, 32], strides = [1, 1]} : vector<4x32xf32> to vector<2x32xf32>
    %c0_124 = arith.constant 0 : index
    %c5_125 = arith.constant 5 : index
    %c0_126 = arith.constant 0 : index
    %243 = vector.load %arg12[%c0_124, %c5_125, %c0_126] : memref<2x8x32xf32, #tpu.memory_space<vmem>>, vector<2x1x32xf32>
    %244 = vector.shape_cast %243 : vector<2x1x32xf32> to vector<2x32xf32>
    %245 = vector.shape_cast %242 : vector<2x32xf32> to vector<2x1x32xf32>
    tpu.vector_store %arg12[%c0_124, %c5_125, %c0_126], %245 {strides = array<i32>} : memref<2x8x32xf32, #tpu.memory_space<vmem>>, vector<2x1x32xf32>,
    %c0_127 = arith.constant 0 : index
    %c0_128 = arith.constant 0 : index
    %246 = vector.load %arg9[%c0_127, %c0_128] : memref<4x32xf32, #tpu.memory_space<vmem>>, vector<4x32xf32>
    %247 = arith.truncf %246 : vector<4x32xf32> to vector<4x32xbf16>
    %c0_129 = arith.constant 0 : index
    %c0_130 = arith.constant 0 : index
    %248 = vector.load %arg2[%c0_129, %c0_130] : memref<32x256xbf16, #tpu.memory_space<vmem>>, vector<32x256xbf16>
    %cst_131 = arith.constant dense<0.000000e+00> : vector<4x256xf32>
    %249 = tpu.matmul %247, %248, %cst_131 {dimension_numbers = #tpu.dot_dimension_numbers<[1], [0], [0], [1], [0, 0, 1, 1], [], []>} : vector<4x32xbf16>, vector<32x256xbf16>, vector<4x256xf32> -> vector<4x256xf32>
    %c0_132 = arith.constant 0 : index
    %c3_133 = arith.constant 3 : index
    %c0_134 = arith.constant 0 : index
    %250 = vector.load %arg8[%c0_132, %c3_133, %c0_134] : memref<4x8x128xf32, #tpu.memory_space<vmem>>, vector<4x1x128xf32>
    %251 = vector.shape_cast %250 : vector<4x1x128xf32> to vector<4x128xf32>
    %252 = vector.extract_strided_slice %249 {offsets = [0, 0], sizes = [4, 128], strides = [1, 1]} : vector<4x256xf32> to vector<4x128xf32>
    %253 = vector.extract_strided_slice %249 {offsets = [0, 128], sizes = [4, 128], strides = [1, 1]} : vector<4x256xf32> to vector<4x128xf32>
    %254 = vector.shape_cast %52 : vector<4x1xi1> to vector<4x1xi1>
    %255 = vector.broadcast %254 : vector<4x1xi1> to vector<4x128xi1>
    %256 = arith.select %255, %252, %253 : vector<4x128xi1>, vector<4x128xf32>
    %257 = arith.addf %251, %256 : vector<4x128xf32>
    %258 = vector.extract_strided_slice %257 {offsets = [0, 0], sizes = [4, 32], strides = [1, 1]} : vector<4x128xf32> to vector<4x32xf32>
    %259 = arith.negf %258 : vector<4x32xf32>
    %260 = math.exp %259 : vector<4x32xf32>
    %cst_135 = arith.constant 1.000000e+00 : f32
    %261 = vector.broadcast %cst_135 : f32 to vector<4x32xf32>
    %262 = arith.addf %261, %260 : vector<4x32xf32>
    %263 = arith.divf %261, %262 : vector<4x32xf32>
    %264 = vector.extract_strided_slice %257 {offsets = [0, 32], sizes = [4, 32], strides = [1, 1]} : vector<4x128xf32> to vector<4x32xf32>
    %265 = arith.negf %264 : vector<4x32xf32>
    %266 = math.exp %265 : vector<4x32xf32>
    %cst_136 = arith.constant 1.000000e+00 : f32
    %267 = vector.broadcast %cst_136 : f32 to vector<4x32xf32>
    %268 = arith.addf %267, %266 : vector<4x32xf32>
    %269 = arith.divf %267, %268 : vector<4x32xf32>
    %270 = vector.extract_strided_slice %257 {offsets = [0, 64], sizes = [4, 32], strides = [1, 1]} : vector<4x128xf32> to vector<4x32xf32>
    %271 = math.tanh %270 : vector<4x32xf32>
    %272 = vector.extract_strided_slice %257 {offsets = [0, 96], sizes = [4, 32], strides = [1, 1]} : vector<4x128xf32> to vector<4x32xf32>
    %273 = arith.negf %272 : vector<4x32xf32>
    %274 = math.exp %273 : vector<4x32xf32>
    %cst_137 = arith.constant 1.000000e+00 : f32
    %275 = vector.broadcast %cst_137 : f32 to vector<4x32xf32>
    %276 = arith.addf %275, %274 : vector<4x32xf32>
    %277 = arith.divf %275, %276 : vector<4x32xf32>
    %c0_138 = arith.constant 0 : index
    %c0_139 = arith.constant 0 : index
    %278 = vector.load %arg10[%c0_138, %c0_139] : memref<4x32xf32, #tpu.memory_space<vmem>>, vector<4x32xf32>
    %279 = arith.mulf %269, %278 : vector<4x32xf32>
    %280 = arith.mulf %263, %271 : vector<4x32xf32>
    %281 = arith.addf %279, %280 : vector<4x32xf32>
    %282 = math.tanh %281 : vector<4x32xf32>
    %283 = arith.mulf %277, %282 : vector<4x32xf32>
    %c0_140 = arith.constant 0 : index
    %c3_141 = arith.constant 3 : index
    %284 = vector.load %arg6[%c0_140, %c3_141] : memref<4x8xf32, #tpu.memory_space<vmem>>, vector<4x1xf32>
    %cst_142 = arith.constant 5.000000e-01 : f32
    %285 = vector.broadcast %cst_142 : f32 to vector<4x1xf32>
    %286 = arith.cmpf ogt, %284, %285 : vector<4x1xf32>
    %c0_143 = arith.constant 0 : index
    %c0_144 = arith.constant 0 : index
    %287 = vector.load %arg10[%c0_143, %c0_144] : memref<4x32xf32, #tpu.memory_space<vmem>>, vector<4x32xf32>
    %288 = vector.shape_cast %286 : vector<4x1xi1> to vector<4x1xi1>
    %289 = vector.broadcast %288 : vector<4x1xi1> to vector<4x32xi1>
    %290 = arith.select %289, %281, %287 : vector<4x32xi1>, vector<4x32xf32>
    %c0_145 = arith.constant 0 : index
    %c0_146 = arith.constant 0 : index
    %291 = vector.load %arg10[%c0_145, %c0_146] : memref<4x32xf32, #tpu.memory_space<vmem>>, vector<4x32xf32>
    tpu.vector_store %arg10[%c0_145, %c0_146], %290 {strides = array<i32>} : memref<4x32xf32, #tpu.memory_space<vmem>>, vector<4x32xf32>,
    %c0_147 = arith.constant 0 : index
    %c0_148 = arith.constant 0 : index
    %292 = vector.load %arg9[%c0_147, %c0_148] : memref<4x32xf32, #tpu.memory_space<vmem>>, vector<4x32xf32>
    %293 = vector.shape_cast %286 : vector<4x1xi1> to vector<4x1xi1>
    %294 = vector.broadcast %293 : vector<4x1xi1> to vector<4x32xi1>
    %295 = arith.select %294, %283, %292 : vector<4x32xi1>, vector<4x32xf32>
    %c0_149 = arith.constant 0 : index
    %c0_150 = arith.constant 0 : index
    %296 = vector.load %arg9[%c0_149, %c0_150] : memref<4x32xf32, #tpu.memory_space<vmem>>, vector<4x32xf32>
    tpu.vector_store %arg9[%c0_149, %c0_150], %295 {strides = array<i32>} : memref<4x32xf32, #tpu.memory_space<vmem>>, vector<4x32xf32>,
    %cst_151 = arith.constant 0.000000e+00 : f32
    %297 = vector.shape_cast %286 : vector<4x1xi1> to vector<4x1xi1>
    %298 = vector.broadcast %297 : vector<4x1xi1> to vector<4x32xi1>
    %299 = vector.broadcast %cst_151 : f32 to vector<4x32xf32>
    %300 = arith.select %298, %283, %299 : vector<4x32xi1>, vector<4x32xf32>
    %301 = vector.extract_strided_slice %300 {offsets = [0, 0], sizes = [2, 32], strides = [1, 1]} : vector<4x32xf32> to vector<2x32xf32>
    %c0_152 = arith.constant 0 : index
    %c3_153 = arith.constant 3 : index
    %c0_154 = arith.constant 0 : index
    %302 = vector.load %arg11[%c0_152, %c3_153, %c0_154] : memref<2x8x32xf32, #tpu.memory_space<vmem>>, vector<2x1x32xf32>
    %303 = vector.shape_cast %302 : vector<2x1x32xf32> to vector<2x32xf32>
    %304 = vector.shape_cast %301 : vector<2x32xf32> to vector<2x1x32xf32>
    tpu.vector_store %arg11[%c0_152, %c3_153, %c0_154], %304 {strides = array<i32>} : memref<2x8x32xf32, #tpu.memory_space<vmem>>, vector<2x1x32xf32>,
    %305 = vector.extract_strided_slice %300 {offsets = [2, 0], sizes = [2, 32], strides = [1, 1]} : vector<4x32xf32> to vector<2x32xf32>
    %c0_155 = arith.constant 0 : index
    %c4_156 = arith.constant 4 : index
    %c0_157 = arith.constant 0 : index
    %306 = vector.load %arg12[%c0_155, %c4_156, %c0_157] : memref<2x8x32xf32, #tpu.memory_space<vmem>>, vector<2x1x32xf32>
    %307 = vector.shape_cast %306 : vector<2x1x32xf32> to vector<2x32xf32>
    %308 = vector.shape_cast %305 : vector<2x32xf32> to vector<2x1x32xf32>
    tpu.vector_store %arg12[%c0_155, %c4_156, %c0_157], %308 {strides = array<i32>} : memref<2x8x32xf32, #tpu.memory_space<vmem>>, vector<2x1x32xf32>,
    %c0_158 = arith.constant 0 : index
    %c0_159 = arith.constant 0 : index
    %309 = vector.load %arg9[%c0_158, %c0_159] : memref<4x32xf32, #tpu.memory_space<vmem>>, vector<4x32xf32>
    %310 = arith.truncf %309 : vector<4x32xf32> to vector<4x32xbf16>
    %c0_160 = arith.constant 0 : index
    %c0_161 = arith.constant 0 : index
    %311 = vector.load %arg2[%c0_160, %c0_161] : memref<32x256xbf16, #tpu.memory_space<vmem>>, vector<32x256xbf16>
    %cst_162 = arith.constant dense<0.000000e+00> : vector<4x256xf32>
    %312 = tpu.matmul %310, %311, %cst_162 {dimension_numbers = #tpu.dot_dimension_numbers<[1], [0], [0], [1], [0, 0, 1, 1], [], []>} : vector<4x32xbf16>, vector<32x256xbf16>, vector<4x256xf32> -> vector<4x256xf32>
    %c0_163 = arith.constant 0 : index
    %c4_164 = arith.constant 4 : index
    %c0_165 = arith.constant 0 : index
    %313 = vector.load %arg8[%c0_163, %c4_164, %c0_165] : memref<4x8x128xf32, #tpu.memory_space<vmem>>, vector<4x1x128xf32>
    %314 = vector.shape_cast %313 : vector<4x1x128xf32> to vector<4x128xf32>
    %315 = vector.extract_strided_slice %312 {offsets = [0, 0], sizes = [4, 128], strides = [1, 1]} : vector<4x256xf32> to vector<4x128xf32>
    %316 = vector.extract_strided_slice %312 {offsets = [0, 128], sizes = [4, 128], strides = [1, 1]} : vector<4x256xf32> to vector<4x128xf32>
    %317 = vector.shape_cast %52 : vector<4x1xi1> to vector<4x1xi1>
    %318 = vector.broadcast %317 : vector<4x1xi1> to vector<4x128xi1>
    %319 = arith.select %318, %315, %316 : vector<4x128xi1>, vector<4x128xf32>
    %320 = arith.addf %314, %319 : vector<4x128xf32>
    %321 = vector.extract_strided_slice %320 {offsets = [0, 0], sizes = [4, 32], strides = [1, 1]} : vector<4x128xf32> to vector<4x32xf32>
    %322 = arith.negf %321 : vector<4x32xf32>
    %323 = math.exp %322 : vector<4x32xf32>
    %cst_166 = arith.constant 1.000000e+00 : f32
    %324 = vector.broadcast %cst_166 : f32 to vector<4x32xf32>
    %325 = arith.addf %324, %323 : vector<4x32xf32>
    %326 = arith.divf %324, %325 : vector<4x32xf32>
    %327 = vector.extract_strided_slice %320 {offsets = [0, 32], sizes = [4, 32], strides = [1, 1]} : vector<4x128xf32> to vector<4x32xf32>
    %328 = arith.negf %327 : vector<4x32xf32>
    %329 = math.exp %328 : vector<4x32xf32>
    %cst_167 = arith.constant 1.000000e+00 : f32
    %330 = vector.broadcast %cst_167 : f32 to vector<4x32xf32>
    %331 = arith.addf %330, %329 : vector<4x32xf32>
    %332 = arith.divf %330, %331 : vector<4x32xf32>
    %333 = vector.extract_strided_slice %320 {offsets = [0, 64], sizes = [4, 32], strides = [1, 1]} : vector<4x128xf32> to vector<4x32xf32>
    %334 = math.tanh %333 : vector<4x32xf32>
    %335 = vector.extract_strided_slice %320 {offsets = [0, 96], sizes = [4, 32], strides = [1, 1]} : vector<4x128xf32> to vector<4x32xf32>
    %336 = arith.negf %335 : vector<4x32xf32>
    %337 = math.exp %336 : vector<4x32xf32>
    %cst_168 = arith.constant 1.000000e+00 : f32
    %338 = vector.broadcast %cst_168 : f32 to vector<4x32xf32>
    %339 = arith.addf %338, %337 : vector<4x32xf32>
    %340 = arith.divf %338, %339 : vector<4x32xf32>
    %c0_169 = arith.constant 0 : index
    %c0_170 = arith.constant 0 : index
    %341 = vector.load %arg10[%c0_169, %c0_170] : memref<4x32xf32, #tpu.memory_space<vmem>>, vector<4x32xf32>
    %342 = arith.mulf %332, %341 : vector<4x32xf32>
    %343 = arith.mulf %326, %334 : vector<4x32xf32>
    %344 = arith.addf %342, %343 : vector<4x32xf32>
    %345 = math.tanh %344 : vector<4x32xf32>
    %346 = arith.mulf %340, %345 : vector<4x32xf32>
    %c0_171 = arith.constant 0 : index
    %c4_172 = arith.constant 4 : index
    %347 = vector.load %arg6[%c0_171, %c4_172] : memref<4x8xf32, #tpu.memory_space<vmem>>, vector<4x1xf32>
    %cst_173 = arith.constant 5.000000e-01 : f32
    %348 = vector.broadcast %cst_173 : f32 to vector<4x1xf32>
    %349 = arith.cmpf ogt, %347, %348 : vector<4x1xf32>
    %c0_174 = arith.constant 0 : index
    %c0_175 = arith.constant 0 : index
    %350 = vector.load %arg10[%c0_174, %c0_175] : memref<4x32xf32, #tpu.memory_space<vmem>>, vector<4x32xf32>
    %351 = vector.shape_cast %349 : vector<4x1xi1> to vector<4x1xi1>
    %352 = vector.broadcast %351 : vector<4x1xi1> to vector<4x32xi1>
    %353 = arith.select %352, %344, %350 : vector<4x32xi1>, vector<4x32xf32>
    %c0_176 = arith.constant 0 : index
    %c0_177 = arith.constant 0 : index
    %354 = vector.load %arg10[%c0_176, %c0_177] : memref<4x32xf32, #tpu.memory_space<vmem>>, vector<4x32xf32>
    tpu.vector_store %arg10[%c0_176, %c0_177], %353 {strides = array<i32>} : memref<4x32xf32, #tpu.memory_space<vmem>>, vector<4x32xf32>,
    %c0_178 = arith.constant 0 : index
    %c0_179 = arith.constant 0 : index
    %355 = vector.load %arg9[%c0_178, %c0_179] : memref<4x32xf32, #tpu.memory_space<vmem>>, vector<4x32xf32>
    %356 = vector.shape_cast %349 : vector<4x1xi1> to vector<4x1xi1>
    %357 = vector.broadcast %356 : vector<4x1xi1> to vector<4x32xi1>
    %358 = arith.select %357, %346, %355 : vector<4x32xi1>, vector<4x32xf32>
    %c0_180 = arith.constant 0 : index
    %c0_181 = arith.constant 0 : index
    %359 = vector.load %arg9[%c0_180, %c0_181] : memref<4x32xf32, #tpu.memory_space<vmem>>, vector<4x32xf32>
    tpu.vector_store %arg9[%c0_180, %c0_181], %358 {strides = array<i32>} : memref<4x32xf32, #tpu.memory_space<vmem>>, vector<4x32xf32>,
    %cst_182 = arith.constant 0.000000e+00 : f32
    %360 = vector.shape_cast %349 : vector<4x1xi1> to vector<4x1xi1>
    %361 = vector.broadcast %360 : vector<4x1xi1> to vector<4x32xi1>
    %362 = vector.broadcast %cst_182 : f32 to vector<4x32xf32>
    %363 = arith.select %361, %346, %362 : vector<4x32xi1>, vector<4x32xf32>
    %364 = vector.extract_strided_slice %363 {offsets = [0, 0], sizes = [2, 32], strides = [1, 1]} : vector<4x32xf32> to vector<2x32xf32>
    %c0_183 = arith.constant 0 : index
    %c4_184 = arith.constant 4 : index
    %c0_185 = arith.constant 0 : index
    %365 = vector.load %arg11[%c0_183, %c4_184, %c0_185] : memref<2x8x32xf32, #tpu.memory_space<vmem>>, vector<2x1x32xf32>
    %366 = vector.shape_cast %365 : vector<2x1x32xf32> to vector<2x32xf32>
    %367 = vector.shape_cast %364 : vector<2x32xf32> to vector<2x1x32xf32>
    tpu.vector_store %arg11[%c0_183, %c4_184, %c0_185], %367 {strides = array<i32>} : memref<2x8x32xf32, #tpu.memory_space<vmem>>, vector<2x1x32xf32>,
    %368 = vector.extract_strided_slice %363 {offsets = [2, 0], sizes = [2, 32], strides = [1, 1]} : vector<4x32xf32> to vector<2x32xf32>
    %c0_186 = arith.constant 0 : index
    %c3_187 = arith.constant 3 : index
    %c0_188 = arith.constant 0 : index
    %369 = vector.load %arg12[%c0_186, %c3_187, %c0_188] : memref<2x8x32xf32, #tpu.memory_space<vmem>>, vector<2x1x32xf32>
    %370 = vector.shape_cast %369 : vector<2x1x32xf32> to vector<2x32xf32>
    %371 = vector.shape_cast %368 : vector<2x32xf32> to vector<2x1x32xf32>
    tpu.vector_store %arg12[%c0_186, %c3_187, %c0_188], %371 {strides = array<i32>} : memref<2x8x32xf32, #tpu.memory_space<vmem>>, vector<2x1x32xf32>,
    %c0_189 = arith.constant 0 : index
    %c0_190 = arith.constant 0 : index
    %372 = vector.load %arg9[%c0_189, %c0_190] : memref<4x32xf32, #tpu.memory_space<vmem>>, vector<4x32xf32>
    %373 = arith.truncf %372 : vector<4x32xf32> to vector<4x32xbf16>
    %c0_191 = arith.constant 0 : index
    %c0_192 = arith.constant 0 : index
    %374 = vector.load %arg2[%c0_191, %c0_192] : memref<32x256xbf16, #tpu.memory_space<vmem>>, vector<32x256xbf16>
    %cst_193 = arith.constant dense<0.000000e+00> : vector<4x256xf32>
    %375 = tpu.matmul %373, %374, %cst_193 {dimension_numbers = #tpu.dot_dimension_numbers<[1], [0], [0], [1], [0, 0, 1, 1], [], []>} : vector<4x32xbf16>, vector<32x256xbf16>, vector<4x256xf32> -> vector<4x256xf32>
    %c0_194 = arith.constant 0 : index
    %c5_195 = arith.constant 5 : index
    %c0_196 = arith.constant 0 : index
    %376 = vector.load %arg8[%c0_194, %c5_195, %c0_196] : memref<4x8x128xf32, #tpu.memory_space<vmem>>, vector<4x1x128xf32>
    %377 = vector.shape_cast %376 : vector<4x1x128xf32> to vector<4x128xf32>
    %378 = vector.extract_strided_slice %375 {offsets = [0, 0], sizes = [4, 128], strides = [1, 1]} : vector<4x256xf32> to vector<4x128xf32>
    %379 = vector.extract_strided_slice %375 {offsets = [0, 128], sizes = [4, 128], strides = [1, 1]} : vector<4x256xf32> to vector<4x128xf32>
    %380 = vector.shape_cast %52 : vector<4x1xi1> to vector<4x1xi1>
    %381 = vector.broadcast %380 : vector<4x1xi1> to vector<4x128xi1>
    %382 = arith.select %381, %378, %379 : vector<4x128xi1>, vector<4x128xf32>
    %383 = arith.addf %377, %382 : vector<4x128xf32>
    %384 = vector.extract_strided_slice %383 {offsets = [0, 0], sizes = [4, 32], strides = [1, 1]} : vector<4x128xf32> to vector<4x32xf32>
    %385 = arith.negf %384 : vector<4x32xf32>
    %386 = math.exp %385 : vector<4x32xf32>
    %cst_197 = arith.constant 1.000000e+00 : f32
    %387 = vector.broadcast %cst_197 : f32 to vector<4x32xf32>
    %388 = arith.addf %387, %386 : vector<4x32xf32>
    %389 = arith.divf %387, %388 : vector<4x32xf32>
    %390 = vector.extract_strided_slice %383 {offsets = [0, 32], sizes = [4, 32], strides = [1, 1]} : vector<4x128xf32> to vector<4x32xf32>
    %391 = arith.negf %390 : vector<4x32xf32>
    %392 = math.exp %391 : vector<4x32xf32>
    %cst_198 = arith.constant 1.000000e+00 : f32
    %393 = vector.broadcast %cst_198 : f32 to vector<4x32xf32>
    %394 = arith.addf %393, %392 : vector<4x32xf32>
    %395 = arith.divf %393, %394 : vector<4x32xf32>
    %396 = vector.extract_strided_slice %383 {offsets = [0, 64], sizes = [4, 32], strides = [1, 1]} : vector<4x128xf32> to vector<4x32xf32>
    %397 = math.tanh %396 : vector<4x32xf32>
    %398 = vector.extract_strided_slice %383 {offsets = [0, 96], sizes = [4, 32], strides = [1, 1]} : vector<4x128xf32> to vector<4x32xf32>
    %399 = arith.negf %398 : vector<4x32xf32>
    %400 = math.exp %399 : vector<4x32xf32>
    %cst_199 = arith.constant 1.000000e+00 : f32
    %401 = vector.broadcast %cst_199 : f32 to vector<4x32xf32>
    %402 = arith.addf %401, %400 : vector<4x32xf32>
    %403 = arith.divf %401, %402 : vector<4x32xf32>
    %c0_200 = arith.constant 0 : index
    %c0_201 = arith.constant 0 : index
    %404 = vector.load %arg10[%c0_200, %c0_201] : memref<4x32xf32, #tpu.memory_space<vmem>>, vector<4x32xf32>
    %405 = arith.mulf %395, %404 : vector<4x32xf32>
    %406 = arith.mulf %389, %397 : vector<4x32xf32>
    %407 = arith.addf %405, %406 : vector<4x32xf32>
    %408 = math.tanh %407 : vector<4x32xf32>
    %409 = arith.mulf %403, %408 : vector<4x32xf32>
    %c0_202 = arith.constant 0 : index
    %c5_203 = arith.constant 5 : index
    %410 = vector.load %arg6[%c0_202, %c5_203] : memref<4x8xf32, #tpu.memory_space<vmem>>, vector<4x1xf32>
    %cst_204 = arith.constant 5.000000e-01 : f32
    %411 = vector.broadcast %cst_204 : f32 to vector<4x1xf32>
    %412 = arith.cmpf ogt, %410, %411 : vector<4x1xf32>
    %c0_205 = arith.constant 0 : index
    %c0_206 = arith.constant 0 : index
    %413 = vector.load %arg10[%c0_205, %c0_206] : memref<4x32xf32, #tpu.memory_space<vmem>>, vector<4x32xf32>
    %414 = vector.shape_cast %412 : vector<4x1xi1> to vector<4x1xi1>
    %415 = vector.broadcast %414 : vector<4x1xi1> to vector<4x32xi1>
    %416 = arith.select %415, %407, %413 : vector<4x32xi1>, vector<4x32xf32>
    %c0_207 = arith.constant 0 : index
    %c0_208 = arith.constant 0 : index
    %417 = vector.load %arg10[%c0_207, %c0_208] : memref<4x32xf32, #tpu.memory_space<vmem>>, vector<4x32xf32>
    tpu.vector_store %arg10[%c0_207, %c0_208], %416 {strides = array<i32>} : memref<4x32xf32, #tpu.memory_space<vmem>>, vector<4x32xf32>,
    %c0_209 = arith.constant 0 : index
    %c0_210 = arith.constant 0 : index
    %418 = vector.load %arg9[%c0_209, %c0_210] : memref<4x32xf32, #tpu.memory_space<vmem>>, vector<4x32xf32>
    %419 = vector.shape_cast %412 : vector<4x1xi1> to vector<4x1xi1>
    %420 = vector.broadcast %419 : vector<4x1xi1> to vector<4x32xi1>
    %421 = arith.select %420, %409, %418 : vector<4x32xi1>, vector<4x32xf32>
    %c0_211 = arith.constant 0 : index
    %c0_212 = arith.constant 0 : index
    %422 = vector.load %arg9[%c0_211, %c0_212] : memref<4x32xf32, #tpu.memory_space<vmem>>, vector<4x32xf32>
    tpu.vector_store %arg9[%c0_211, %c0_212], %421 {strides = array<i32>} : memref<4x32xf32, #tpu.memory_space<vmem>>, vector<4x32xf32>,
    %cst_213 = arith.constant 0.000000e+00 : f32
    %423 = vector.shape_cast %412 : vector<4x1xi1> to vector<4x1xi1>
    %424 = vector.broadcast %423 : vector<4x1xi1> to vector<4x32xi1>
    %425 = vector.broadcast %cst_213 : f32 to vector<4x32xf32>
    %426 = arith.select %424, %409, %425 : vector<4x32xi1>, vector<4x32xf32>
    %427 = vector.extract_strided_slice %426 {offsets = [0, 0], sizes = [2, 32], strides = [1, 1]} : vector<4x32xf32> to vector<2x32xf32>
    %c0_214 = arith.constant 0 : index
    %c5_215 = arith.constant 5 : index
    %c0_216 = arith.constant 0 : index
    %428 = vector.load %arg11[%c0_214, %c5_215, %c0_216] : memref<2x8x32xf32, #tpu.memory_space<vmem>>, vector<2x1x32xf32>
    %429 = vector.shape_cast %428 : vector<2x1x32xf32> to vector<2x32xf32>
    %430 = vector.shape_cast %427 : vector<2x32xf32> to vector<2x1x32xf32>
    tpu.vector_store %arg11[%c0_214, %c5_215, %c0_216], %430 {strides = array<i32>} : memref<2x8x32xf32, #tpu.memory_space<vmem>>, vector<2x1x32xf32>,
    %431 = vector.extract_strided_slice %426 {offsets = [2, 0], sizes = [2, 32], strides = [1, 1]} : vector<4x32xf32> to vector<2x32xf32>
    %c0_217 = arith.constant 0 : index
    %c2_218 = arith.constant 2 : index
    %c0_219 = arith.constant 0 : index
    %432 = vector.load %arg12[%c0_217, %c2_218, %c0_219] : memref<2x8x32xf32, #tpu.memory_space<vmem>>, vector<2x1x32xf32>
    %433 = vector.shape_cast %432 : vector<2x1x32xf32> to vector<2x32xf32>
    %434 = vector.shape_cast %431 : vector<2x32xf32> to vector<2x1x32xf32>
    tpu.vector_store %arg12[%c0_217, %c2_218, %c0_219], %434 {strides = array<i32>} : memref<2x8x32xf32, #tpu.memory_space<vmem>>, vector<2x1x32xf32>,
    %c0_220 = arith.constant 0 : index
    %c0_221 = arith.constant 0 : index
    %435 = vector.load %arg9[%c0_220, %c0_221] : memref<4x32xf32, #tpu.memory_space<vmem>>, vector<4x32xf32>
    %436 = arith.truncf %435 : vector<4x32xf32> to vector<4x32xbf16>
    %c0_222 = arith.constant 0 : index
    %c0_223 = arith.constant 0 : index
    %437 = vector.load %arg2[%c0_222, %c0_223] : memref<32x256xbf16, #tpu.memory_space<vmem>>, vector<32x256xbf16>
    %cst_224 = arith.constant dense<0.000000e+00> : vector<4x256xf32>
    %438 = tpu.matmul %436, %437, %cst_224 {dimension_numbers = #tpu.dot_dimension_numbers<[1], [0], [0], [1], [0, 0, 1, 1], [], []>} : vector<4x32xbf16>, vector<32x256xbf16>, vector<4x256xf32> -> vector<4x256xf32>
    %c0_225 = arith.constant 0 : index
    %c6_226 = arith.constant 6 : index
    %c0_227 = arith.constant 0 : index
    %439 = vector.load %arg8[%c0_225, %c6_226, %c0_227] : memref<4x8x128xf32, #tpu.memory_space<vmem>>, vector<4x1x128xf32>
    %440 = vector.shape_cast %439 : vector<4x1x128xf32> to vector<4x128xf32>
    %441 = vector.extract_strided_slice %438 {offsets = [0, 0], sizes = [4, 128], strides = [1, 1]} : vector<4x256xf32> to vector<4x128xf32>
    %442 = vector.extract_strided_slice %438 {offsets = [0, 128], sizes = [4, 128], strides = [1, 1]} : vector<4x256xf32> to vector<4x128xf32>
    %443 = vector.shape_cast %52 : vector<4x1xi1> to vector<4x1xi1>
    %444 = vector.broadcast %443 : vector<4x1xi1> to vector<4x128xi1>
    %445 = arith.select %444, %441, %442 : vector<4x128xi1>, vector<4x128xf32>
    %446 = arith.addf %440, %445 : vector<4x128xf32>
    %447 = vector.extract_strided_slice %446 {offsets = [0, 0], sizes = [4, 32], strides = [1, 1]} : vector<4x128xf32> to vector<4x32xf32>
    %448 = arith.negf %447 : vector<4x32xf32>
    %449 = math.exp %448 : vector<4x32xf32>
    %cst_228 = arith.constant 1.000000e+00 : f32
    %450 = vector.broadcast %cst_228 : f32 to vector<4x32xf32>
    %451 = arith.addf %450, %449 : vector<4x32xf32>
    %452 = arith.divf %450, %451 : vector<4x32xf32>
    %453 = vector.extract_strided_slice %446 {offsets = [0, 32], sizes = [4, 32], strides = [1, 1]} : vector<4x128xf32> to vector<4x32xf32>
    %454 = arith.negf %453 : vector<4x32xf32>
    %455 = math.exp %454 : vector<4x32xf32>
    %cst_229 = arith.constant 1.000000e+00 : f32
    %456 = vector.broadcast %cst_229 : f32 to vector<4x32xf32>
    %457 = arith.addf %456, %455 : vector<4x32xf32>
    %458 = arith.divf %456, %457 : vector<4x32xf32>
    %459 = vector.extract_strided_slice %446 {offsets = [0, 64], sizes = [4, 32], strides = [1, 1]} : vector<4x128xf32> to vector<4x32xf32>
    %460 = math.tanh %459 : vector<4x32xf32>
    %461 = vector.extract_strided_slice %446 {offsets = [0, 96], sizes = [4, 32], strides = [1, 1]} : vector<4x128xf32> to vector<4x32xf32>
    %462 = arith.negf %461 : vector<4x32xf32>
    %463 = math.exp %462 : vector<4x32xf32>
    %cst_230 = arith.constant 1.000000e+00 : f32
    %464 = vector.broadcast %cst_230 : f32 to vector<4x32xf32>
    %465 = arith.addf %464, %463 : vector<4x32xf32>
    %466 = arith.divf %464, %465 : vector<4x32xf32>
    %c0_231 = arith.constant 0 : index
    %c0_232 = arith.constant 0 : index
    %467 = vector.load %arg10[%c0_231, %c0_232] : memref<4x32xf32, #tpu.memory_space<vmem>>, vector<4x32xf32>
    %468 = arith.mulf %458, %467 : vector<4x32xf32>
    %469 = arith.mulf %452, %460 : vector<4x32xf32>
    %470 = arith.addf %468, %469 : vector<4x32xf32>
    %471 = math.tanh %470 : vector<4x32xf32>
    %472 = arith.mulf %466, %471 : vector<4x32xf32>
    %c0_233 = arith.constant 0 : index
    %c6_234 = arith.constant 6 : index
    %473 = vector.load %arg6[%c0_233, %c6_234] : memref<4x8xf32, #tpu.memory_space<vmem>>, vector<4x1xf32>
    %cst_235 = arith.constant 5.000000e-01 : f32
    %474 = vector.broadcast %cst_235 : f32 to vector<4x1xf32>
    %475 = arith.cmpf ogt, %473, %474 : vector<4x1xf32>
    %c0_236 = arith.constant 0 : index
    %c0_237 = arith.constant 0 : index
    %476 = vector.load %arg10[%c0_236, %c0_237] : memref<4x32xf32, #tpu.memory_space<vmem>>, vector<4x32xf32>
    %477 = vector.shape_cast %475 : vector<4x1xi1> to vector<4x1xi1>
    %478 = vector.broadcast %477 : vector<4x1xi1> to vector<4x32xi1>
    %479 = arith.select %478, %470, %476 : vector<4x32xi1>, vector<4x32xf32>
    %c0_238 = arith.constant 0 : index
    %c0_239 = arith.constant 0 : index
    %480 = vector.load %arg10[%c0_238, %c0_239] : memref<4x32xf32, #tpu.memory_space<vmem>>, vector<4x32xf32>
    tpu.vector_store %arg10[%c0_238, %c0_239], %479 {strides = array<i32>} : memref<4x32xf32, #tpu.memory_space<vmem>>, vector<4x32xf32>,
    %c0_240 = arith.constant 0 : index
    %c0_241 = arith.constant 0 : index
    %481 = vector.load %arg9[%c0_240, %c0_241] : memref<4x32xf32, #tpu.memory_space<vmem>>, vector<4x32xf32>
    %482 = vector.shape_cast %475 : vector<4x1xi1> to vector<4x1xi1>
    %483 = vector.broadcast %482 : vector<4x1xi1> to vector<4x32xi1>
    %484 = arith.select %483, %472, %481 : vector<4x32xi1>, vector<4x32xf32>
    %c0_242 = arith.constant 0 : index
    %c0_243 = arith.constant 0 : index
    %485 = vector.load %arg9[%c0_242, %c0_243] : memref<4x32xf32, #tpu.memory_space<vmem>>, vector<4x32xf32>
    tpu.vector_store %arg9[%c0_242, %c0_243], %484 {strides = array<i32>} : memref<4x32xf32, #tpu.memory_space<vmem>>, vector<4x32xf32>,
    %cst_244 = arith.constant 0.000000e+00 : f32
    %486 = vector.shape_cast %475 : vector<4x1xi1> to vector<4x1xi1>
    %487 = vector.broadcast %486 : vector<4x1xi1> to vector<4x32xi1>
    %488 = vector.broadcast %cst_244 : f32 to vector<4x32xf32>
    %489 = arith.select %487, %472, %488 : vector<4x32xi1>, vector<4x32xf32>
    %490 = vector.extract_strided_slice %489 {offsets = [0, 0], sizes = [2, 32], strides = [1, 1]} : vector<4x32xf32> to vector<2x32xf32>
    %c0_245 = arith.constant 0 : index
    %c6_246 = arith.constant 6 : index
    %c0_247 = arith.constant 0 : index
    %491 = vector.load %arg11[%c0_245, %c6_246, %c0_247] : memref<2x8x32xf32, #tpu.memory_space<vmem>>, vector<2x1x32xf32>
    %492 = vector.shape_cast %491 : vector<2x1x32xf32> to vector<2x32xf32>
    %493 = vector.shape_cast %490 : vector<2x32xf32> to vector<2x1x32xf32>
    tpu.vector_store %arg11[%c0_245, %c6_246, %c0_247], %493 {strides = array<i32>} : memref<2x8x32xf32, #tpu.memory_space<vmem>>, vector<2x1x32xf32>,
    %494 = vector.extract_strided_slice %489 {offsets = [2, 0], sizes = [2, 32], strides = [1, 1]} : vector<4x32xf32> to vector<2x32xf32>
    %c0_248 = arith.constant 0 : index
    %c1_249 = arith.constant 1 : index
    %c0_250 = arith.constant 0 : index
    %495 = vector.load %arg12[%c0_248, %c1_249, %c0_250] : memref<2x8x32xf32, #tpu.memory_space<vmem>>, vector<2x1x32xf32>
    %496 = vector.shape_cast %495 : vector<2x1x32xf32> to vector<2x32xf32>
    %497 = vector.shape_cast %494 : vector<2x32xf32> to vector<2x1x32xf32>
    tpu.vector_store %arg12[%c0_248, %c1_249, %c0_250], %497 {strides = array<i32>} : memref<2x8x32xf32, #tpu.memory_space<vmem>>, vector<2x1x32xf32>,
    %c0_251 = arith.constant 0 : index
    %c0_252 = arith.constant 0 : index
    %498 = vector.load %arg9[%c0_251, %c0_252] : memref<4x32xf32, #tpu.memory_space<vmem>>, vector<4x32xf32>
    %499 = arith.truncf %498 : vector<4x32xf32> to vector<4x32xbf16>
    %c0_253 = arith.constant 0 : index
    %c0_254 = arith.constant 0 : index
    %500 = vector.load %arg2[%c0_253, %c0_254] : memref<32x256xbf16, #tpu.memory_space<vmem>>, vector<32x256xbf16>
    %cst_255 = arith.constant dense<0.000000e+00> : vector<4x256xf32>
    %501 = tpu.matmul %499, %500, %cst_255 {dimension_numbers = #tpu.dot_dimension_numbers<[1], [0], [0], [1], [0, 0, 1, 1], [], []>} : vector<4x32xbf16>, vector<32x256xbf16>, vector<4x256xf32> -> vector<4x256xf32>
    %c0_256 = arith.constant 0 : index
    %c7_257 = arith.constant 7 : index
    %c0_258 = arith.constant 0 : index
    %502 = vector.load %arg8[%c0_256, %c7_257, %c0_258] : memref<4x8x128xf32, #tpu.memory_space<vmem>>, vector<4x1x128xf32>
    %503 = vector.shape_cast %502 : vector<4x1x128xf32> to vector<4x128xf32>
    %504 = vector.extract_strided_slice %501 {offsets = [0, 0], sizes = [4, 128], strides = [1, 1]} : vector<4x256xf32> to vector<4x128xf32>
    %505 = vector.extract_strided_slice %501 {offsets = [0, 128], sizes = [4, 128], strides = [1, 1]} : vector<4x256xf32> to vector<4x128xf32>
    %506 = vector.shape_cast %52 : vector<4x1xi1> to vector<4x1xi1>
    %507 = vector.broadcast %506 : vector<4x1xi1> to vector<4x128xi1>
    %508 = arith.select %507, %504, %505 : vector<4x128xi1>, vector<4x128xf32>
    %509 = arith.addf %503, %508 : vector<4x128xf32>
    %510 = vector.extract_strided_slice %509 {offsets = [0, 0], sizes = [4, 32], strides = [1, 1]} : vector<4x128xf32> to vector<4x32xf32>
    %511 = arith.negf %510 : vector<4x32xf32>
    %512 = math.exp %511 : vector<4x32xf32>
    %cst_259 = arith.constant 1.000000e+00 : f32
    %513 = vector.broadcast %cst_259 : f32 to vector<4x32xf32>
    %514 = arith.addf %513, %512 : vector<4x32xf32>
    %515 = arith.divf %513, %514 : vector<4x32xf32>
    %516 = vector.extract_strided_slice %509 {offsets = [0, 32], sizes = [4, 32], strides = [1, 1]} : vector<4x128xf32> to vector<4x32xf32>
    %517 = arith.negf %516 : vector<4x32xf32>
    %518 = math.exp %517 : vector<4x32xf32>
    %cst_260 = arith.constant 1.000000e+00 : f32
    %519 = vector.broadcast %cst_260 : f32 to vector<4x32xf32>
    %520 = arith.addf %519, %518 : vector<4x32xf32>
    %521 = arith.divf %519, %520 : vector<4x32xf32>
    %522 = vector.extract_strided_slice %509 {offsets = [0, 64], sizes = [4, 32], strides = [1, 1]} : vector<4x128xf32> to vector<4x32xf32>
    %523 = math.tanh %522 : vector<4x32xf32>
    %524 = vector.extract_strided_slice %509 {offsets = [0, 96], sizes = [4, 32], strides = [1, 1]} : vector<4x128xf32> to vector<4x32xf32>
    %525 = arith.negf %524 : vector<4x32xf32>
    %526 = math.exp %525 : vector<4x32xf32>
    %cst_261 = arith.constant 1.000000e+00 : f32
    %527 = vector.broadcast %cst_261 : f32 to vector<4x32xf32>
    %528 = arith.addf %527, %526 : vector<4x32xf32>
    %529 = arith.divf %527, %528 : vector<4x32xf32>
    %c0_262 = arith.constant 0 : index
    %c0_263 = arith.constant 0 : index
    %530 = vector.load %arg10[%c0_262, %c0_263] : memref<4x32xf32, #tpu.memory_space<vmem>>, vector<4x32xf32>
    %531 = arith.mulf %521, %530 : vector<4x32xf32>
    %532 = arith.mulf %515, %523 : vector<4x32xf32>
    %533 = arith.addf %531, %532 : vector<4x32xf32>
    %534 = math.tanh %533 : vector<4x32xf32>
    %535 = arith.mulf %529, %534 : vector<4x32xf32>
    %c0_264 = arith.constant 0 : index
    %c7_265 = arith.constant 7 : index
    %536 = vector.load %arg6[%c0_264, %c7_265] : memref<4x8xf32, #tpu.memory_space<vmem>>, vector<4x1xf32>
    %cst_266 = arith.constant 5.000000e-01 : f32
    %537 = vector.broadcast %cst_266 : f32 to vector<4x1xf32>
    %538 = arith.cmpf ogt, %536, %537 : vector<4x1xf32>
    %c0_267 = arith.constant 0 : index
    %c0_268 = arith.constant 0 : index
    %539 = vector.load %arg10[%c0_267, %c0_268] : memref<4x32xf32, #tpu.memory_space<vmem>>, vector<4x32xf32>
    %540 = vector.shape_cast %538 : vector<4x1xi1> to vector<4x1xi1>
    %541 = vector.broadcast %540 : vector<4x1xi1> to vector<4x32xi1>
    %542 = arith.select %541, %533, %539 : vector<4x32xi1>, vector<4x32xf32>
    %c0_269 = arith.constant 0 : index
    %c0_270 = arith.constant 0 : index
    %543 = vector.load %arg10[%c0_269, %c0_270] : memref<4x32xf32, #tpu.memory_space<vmem>>, vector<4x32xf32>
    tpu.vector_store %arg10[%c0_269, %c0_270], %542 {strides = array<i32>} : memref<4x32xf32, #tpu.memory_space<vmem>>, vector<4x32xf32>,
    %c0_271 = arith.constant 0 : index
    %c0_272 = arith.constant 0 : index
    %544 = vector.load %arg9[%c0_271, %c0_272] : memref<4x32xf32, #tpu.memory_space<vmem>>, vector<4x32xf32>
    %545 = vector.shape_cast %538 : vector<4x1xi1> to vector<4x1xi1>
    %546 = vector.broadcast %545 : vector<4x1xi1> to vector<4x32xi1>
    %547 = arith.select %546, %535, %544 : vector<4x32xi1>, vector<4x32xf32>
    %c0_273 = arith.constant 0 : index
    %c0_274 = arith.constant 0 : index
    %548 = vector.load %arg9[%c0_273, %c0_274] : memref<4x32xf32, #tpu.memory_space<vmem>>, vector<4x32xf32>
    tpu.vector_store %arg9[%c0_273, %c0_274], %547 {strides = array<i32>} : memref<4x32xf32, #tpu.memory_space<vmem>>, vector<4x32xf32>,
    %cst_275 = arith.constant 0.000000e+00 : f32
    %549 = vector.shape_cast %538 : vector<4x1xi1> to vector<4x1xi1>
    %550 = vector.broadcast %549 : vector<4x1xi1> to vector<4x32xi1>
    %551 = vector.broadcast %cst_275 : f32 to vector<4x32xf32>
    %552 = arith.select %550, %535, %551 : vector<4x32xi1>, vector<4x32xf32>
    %553 = vector.extract_strided_slice %552 {offsets = [0, 0], sizes = [2, 32], strides = [1, 1]} : vector<4x32xf32> to vector<2x32xf32>
    %c0_276 = arith.constant 0 : index
    %c7_277 = arith.constant 7 : index
    %c0_278 = arith.constant 0 : index
    %554 = vector.load %arg11[%c0_276, %c7_277, %c0_278] : memref<2x8x32xf32, #tpu.memory_space<vmem>>, vector<2x1x32xf32>
    %555 = vector.shape_cast %554 : vector<2x1x32xf32> to vector<2x32xf32>
    %556 = vector.shape_cast %553 : vector<2x32xf32> to vector<2x1x32xf32>
    tpu.vector_store %arg11[%c0_276, %c7_277, %c0_278], %556 {strides = array<i32>} : memref<2x8x32xf32, #tpu.memory_space<vmem>>, vector<2x1x32xf32>,
    %557 = vector.extract_strided_slice %552 {offsets = [2, 0], sizes = [2, 32], strides = [1, 1]} : vector<4x32xf32> to vector<2x32xf32>
    %c0_279 = arith.constant 0 : index
    %c0_280 = arith.constant 0 : index
    %c0_281 = arith.constant 0 : index
    %558 = vector.load %arg12[%c0_279, %c0_280, %c0_281] : memref<2x8x32xf32, #tpu.memory_space<vmem>>, vector<2x1x32xf32>
    %559 = vector.shape_cast %558 : vector<2x1x32xf32> to vector<2x32xf32>
    %560 = vector.shape_cast %557 : vector<2x32xf32> to vector<2x1x32xf32>
    tpu.vector_store %arg12[%c0_279, %c0_280, %c0_281], %560 {strides = array<i32>} : memref<2x8x32xf32, #tpu.memory_space<vmem>>, vector<2x1x32xf32>,
    %c0_282 = arith.constant 0 : index
    %c0_283 = arith.constant 0 : index
    %c0_284 = arith.constant 0 : index
    %561 = vector.load %arg11[%c0_282, %c0_283, %c0_284] : memref<2x8x32xf32, #tpu.memory_space<vmem>>, vector<2x8x32xf32>
    %c0_285 = arith.constant 0 : index
    %c0_286 = arith.constant 0 : index
    %c0_287 = arith.constant 0 : index
    %562 = vector.load %arg12[%c0_285, %c0_286, %c0_287] : memref<2x8x32xf32, #tpu.memory_space<vmem>>, vector<2x8x32xf32>
    %563 = tpu.concatenate %561, %562 in 2 : vector<2x8x32xf32>, vector<2x8x32xf32> -> vector<2x8x64xf32>
    %c0_288 = arith.constant 0 : index
    %c0_289 = arith.constant 0 : index
    %c0_290 = arith.constant 0 : index
    %564 = vector.load %arg7[%c0_288, %c0_289, %c0_290] : memref<2x8x64xf32, #tpu.memory_space<vmem>>, vector<2x8x64xf32>
    tpu.vector_store %arg7[%c0_288, %c0_289, %c0_290], %563 {strides = array<i32>} : memref<2x8x64xf32, #tpu.memory_space<vmem>>, vector<2x8x64xf32>,
    return
  }
}

module attributes {stable_mosaic.version = 11 : i64} {
  func.func @_pointer_attn_kernel(%arg0: i32, %arg1: memref<1x8x64xf32, #tpu.memory_space<vmem>>, %arg2: memref<1x4x32xf32, #tpu.memory_space<vmem>>, %arg3: memref<1x1x8xf32, #tpu.memory_space<vmem>>, %arg4: memref<64x32xbf16, #tpu.memory_space<vmem>>, %arg5: memref<32x32xbf16, #tpu.memory_space<vmem>>, %arg6: memref<1x32xf32, #tpu.memory_space<vmem>>, %arg7: memref<64x32xbf16, #tpu.memory_space<vmem>>, %arg8: memref<32x32xbf16, #tpu.memory_space<vmem>>, %arg9: memref<1x32xf32, #tpu.memory_space<vmem>>, %arg10: memref<1x4x8xf32, #tpu.memory_space<vmem>>) attributes {dimension_semantics = [#tpu.dimension_semantics<parallel>], iteration_bounds = array<i64: 2>, scalar_prefetch = 0 : i64, scratch_operands = 0 : i64, tpu.core_type = #tpu.core_type<tc>, window_params = [{transform_indices = @transform_0, window_bounds = array<i64: 1, 8, 64>}, {transform_indices = @transform_1, window_bounds = array<i64: 1, 4, 32>}, {transform_indices = @transform_2, window_bounds = array<i64: 1, 1, 8>}, {pipeline_mode = #tpu.pipeline_mode<synchronous>, transform_indices = @transform_3, window_bounds = array<i64: 64, 32>}, {pipeline_mode = #tpu.pipeline_mode<synchronous>, transform_indices = @transform_4, window_bounds = array<i64: 32, 32>}, {pipeline_mode = #tpu.pipeline_mode<synchronous>, transform_indices = @transform_5, window_bounds = array<i64: 1, 32>}, {pipeline_mode = #tpu.pipeline_mode<synchronous>, transform_indices = @transform_6, window_bounds = array<i64: 64, 32>}, {pipeline_mode = #tpu.pipeline_mode<synchronous>, transform_indices = @transform_7, window_bounds = array<i64: 32, 32>}, {pipeline_mode = #tpu.pipeline_mode<synchronous>, transform_indices = @transform_8, window_bounds = array<i64: 1, 32>}, {transform_indices = @transform_9, window_bounds = array<i64: 1, 4, 8>}]} {
    %c0 = arith.constant 0 : index
    %c0_0 = arith.constant 0 : index
    %c0_1 = arith.constant 0 : index
    %0 = vector.load %arg1[%c0, %c0_0, %c0_1] : memref<1x8x64xf32, #tpu.memory_space<vmem>>, vector<1x8x64xf32>
    %1 = vector.shape_cast %0 : vector<1x8x64xf32> to vector<8x64xf32>
    %2 = arith.truncf %1 : vector<8x64xf32> to vector<8x64xbf16>
    %c0_2 = arith.constant 0 : index
    %c0_3 = arith.constant 0 : index
    %3 = vector.load %arg4[%c0_2, %c0_3] : memref<64x32xbf16, #tpu.memory_space<vmem>>, vector<64x32xbf16>
    %cst = arith.constant dense<0.000000e+00> : vector<8x32xf32>
    %4 = tpu.matmul %2, %3, %cst {dimension_numbers = #tpu.dot_dimension_numbers<[1], [0], [0], [1], [0, 0, 1, 1], [], []>} : vector<8x64xbf16>, vector<64x32xbf16>, vector<8x32xf32> -> vector<8x32xf32>
    %c0_4 = arith.constant 0 : index
    %c0_5 = arith.constant 0 : index
    %5 = vector.load %arg7[%c0_4, %c0_5] : memref<64x32xbf16, #tpu.memory_space<vmem>>, vector<64x32xbf16>
    %cst_6 = arith.constant dense<0.000000e+00> : vector<8x32xf32>
    %6 = tpu.matmul %2, %5, %cst_6 {dimension_numbers = #tpu.dot_dimension_numbers<[1], [0], [0], [1], [0, 0, 1, 1], [], []>} : vector<8x64xbf16>, vector<64x32xbf16>, vector<8x32xf32> -> vector<8x32xf32>
    %c0_7 = arith.constant 0 : index
    %c0_8 = arith.constant 0 : index
    %c0_9 = arith.constant 0 : index
    %7 = vector.load %arg3[%c0_7, %c0_8, %c0_9] : memref<1x1x8xf32, #tpu.memory_space<vmem>>, vector<1x1x8xf32>
    %8 = vector.shape_cast %7 : vector<1x1x8xf32> to vector<1x8xf32>
    %cst_10 = arith.constant 5.000000e-01 : f32
    %9 = vector.broadcast %cst_10 : f32 to vector<1x8xf32>
    %10 = arith.cmpf ogt, %8, %9 : vector<1x8xf32>
    %c0_11 = arith.constant 0 : index
    %c0_12 = arith.constant 0 : index
    %11 = vector.load %arg6[%c0_11, %c0_12] : memref<1x32xf32, #tpu.memory_space<vmem>>, vector<1x32xf32>
    %12 = vector.shape_cast %11 : vector<1x32xf32> to vector<32xf32>
    %13 = vector.shape_cast %12 : vector<32xf32> to vector<1x1x32xf32>
    %c0_13 = arith.constant 0 : index
    %c0_14 = arith.constant 0 : index
    %14 = vector.load %arg9[%c0_13, %c0_14] : memref<1x32xf32, #tpu.memory_space<vmem>>, vector<1x32xf32>
    %15 = vector.shape_cast %14 : vector<1x32xf32> to vector<32xf32>
    %16 = vector.shape_cast %15 : vector<32xf32> to vector<1x1x32xf32>
    %c0_15 = arith.constant 0 : index
    %c0_16 = arith.constant 0 : index
    %c0_17 = arith.constant 0 : index
    %17 = vector.load %arg2[%c0_15, %c0_16, %c0_17] : memref<1x4x32xf32, #tpu.memory_space<vmem>>, vector<1x4x32xf32>
    %18 = vector.shape_cast %17 : vector<1x4x32xf32> to vector<4x32xf32>
    %19 = arith.truncf %18 : vector<4x32xf32> to vector<4x32xbf16>
    %c0_18 = arith.constant 0 : index
    %c0_19 = arith.constant 0 : index
    %20 = vector.load %arg5[%c0_18, %c0_19] : memref<32x32xbf16, #tpu.memory_space<vmem>>, vector<32x32xbf16>
    %cst_20 = arith.constant dense<0.000000e+00> : vector<4x32xf32>
    %21 = tpu.matmul %19, %20, %cst_20 {dimension_numbers = #tpu.dot_dimension_numbers<[1], [0], [0], [1], [0, 0, 1, 1], [], []>} : vector<4x32xbf16>, vector<32x32xbf16>, vector<4x32xf32> -> vector<4x32xf32>
    %22 = vector.shape_cast %4 : vector<8x32xf32> to vector<1x8x32xf32>
    %23 = vector.shape_cast %21 : vector<4x32xf32> to vector<4x1x32xf32>
    %24 = vector.broadcast %22 : vector<1x8x32xf32> to vector<4x8x32xf32>
    %25 = vector.broadcast %23 : vector<4x1x32xf32> to vector<4x8x32xf32>
    %26 = arith.addf %24, %25 : vector<4x8x32xf32>
    %27 = math.tanh %26 : vector<4x8x32xf32>
    %28 = vector.broadcast %13 : vector<1x1x32xf32> to vector<4x8x32xf32>
    %29 = arith.mulf %27, %28 : vector<4x8x32xf32>
    %cst_21 = arith.constant dense<0.000000e+00> : vector<4x8xf32>
    %30 = vector.multi_reduction <add>, %29, %cst_21 [2] : vector<4x8x32xf32> to vector<4x8xf32>
    %cst_22 = arith.constant -9.99999984E+17 : f32
    %31 = vector.shape_cast %10 : vector<1x8xi1> to vector<1x8xi1>
    %32 = vector.broadcast %31 : vector<1x8xi1> to vector<4x8xi1>
    %33 = vector.broadcast %cst_22 : f32 to vector<4x8xf32>
    %34 = arith.select %32, %30, %33 : vector<4x8xi1>, vector<4x8xf32>
    %cst_23 = arith.constant dense<0xFF800000> : vector<4xf32>
    %35 = vector.multi_reduction <maximumf>, %34, %cst_23 [1] : vector<4x8xf32> to vector<4xf32>
    %36 = vector.shape_cast %35 : vector<4xf32> to vector<4x1xf32>
    %37 = vector.broadcast %36 : vector<4x1xf32> to vector<4x8xf32>
    %38 = arith.subf %34, %37 : vector<4x8xf32>
    %39 = math.exp %38 : vector<4x8xf32>
    %cst_24 = arith.constant dense<0.000000e+00> : vector<4xf32>
    %40 = vector.multi_reduction <add>, %39, %cst_24 [1] : vector<4x8xf32> to vector<4xf32>
    %41 = vector.shape_cast %40 : vector<4xf32> to vector<4x1xf32>
    %42 = tpu.reciprocal %41 {approx = true} : vector<4x1xf32> -> vector<4x1xf32>
    %43 = vector.broadcast %42 : vector<4x1xf32> to vector<4x8xf32>
    %44 = arith.mulf %39, %43 : vector<4x8xf32>
    %cst_25 = arith.constant dense<0.000000e+00> : vector<4x32xf32>
    %45 = tpu.matmul %44, %4, %cst_25 {dimension_numbers = #tpu.dot_dimension_numbers<[1], [0], [0], [1], [0, 0, 1, 1], [], []>} : vector<4x8xf32>, vector<8x32xf32>, vector<4x32xf32> -> vector<4x32xf32>
    %46 = arith.truncf %45 : vector<4x32xf32> to vector<4x32xbf16>
    %c0_26 = arith.constant 0 : index
    %c0_27 = arith.constant 0 : index
    %47 = vector.load %arg8[%c0_26, %c0_27] : memref<32x32xbf16, #tpu.memory_space<vmem>>, vector<32x32xbf16>
    %cst_28 = arith.constant dense<0.000000e+00> : vector<4x32xf32>
    %48 = tpu.matmul %46, %47, %cst_28 {dimension_numbers = #tpu.dot_dimension_numbers<[1], [0], [0], [1], [0, 0, 1, 1], [], []>} : vector<4x32xbf16>, vector<32x32xbf16>, vector<4x32xf32> -> vector<4x32xf32>
    %49 = vector.shape_cast %6 : vector<8x32xf32> to vector<1x8x32xf32>
    %50 = vector.shape_cast %48 : vector<4x32xf32> to vector<4x1x32xf32>
    %51 = vector.broadcast %49 : vector<1x8x32xf32> to vector<4x8x32xf32>
    %52 = vector.broadcast %50 : vector<4x1x32xf32> to vector<4x8x32xf32>
    %53 = arith.addf %51, %52 : vector<4x8x32xf32>
    %54 = math.tanh %53 : vector<4x8x32xf32>
    %55 = vector.broadcast %16 : vector<1x1x32xf32> to vector<4x8x32xf32>
    %56 = arith.mulf %54, %55 : vector<4x8x32xf32>
    %cst_29 = arith.constant dense<0.000000e+00> : vector<4x8xf32>
    %57 = vector.multi_reduction <add>, %56, %cst_29 [2] : vector<4x8x32xf32> to vector<4x8xf32>
    %c0_30 = arith.constant 0 : index
    %c0_31 = arith.constant 0 : index
    %c0_32 = arith.constant 0 : index
    %58 = vector.load %arg10[%c0_30, %c0_31, %c0_32] : memref<1x4x8xf32, #tpu.memory_space<vmem>>, vector<1x4x8xf32>
    %59 = vector.shape_cast %58 : vector<1x4x8xf32> to vector<4x8xf32>
    %60 = vector.shape_cast %57 : vector<4x8xf32> to vector<1x4x8xf32>
    tpu.vector_store %arg10[%c0_30, %c0_31, %c0_32], %60 {strides = array<i32>} : memref<1x4x8xf32, #tpu.memory_space<vmem>>, vector<1x4x8xf32>,
    return
  }
  func.func @transform_0(%arg0: i32) -> (i32, i32, i32) {
    %c0_i32 = arith.constant 0 : i32
    %c0_i32_0 = arith.constant 0 : i32
    %c0_i32_1 = arith.constant 0 : i32
    return %arg0, %c0_i32, %c0_i32_0 : i32, i32, i32
  }
  func.func @transform_1(%arg0: i32) -> (i32, i32, i32) {
    %c0_i32 = arith.constant 0 : i32
    %c0_i32_0 = arith.constant 0 : i32
    %c0_i32_1 = arith.constant 0 : i32
    return %arg0, %c0_i32, %c0_i32_0 : i32, i32, i32
  }
  func.func @transform_2(%arg0: i32) -> (i32, i32, i32) {
    %c0_i32 = arith.constant 0 : i32
    %c0_i32_0 = arith.constant 0 : i32
    %c0_i32_1 = arith.constant 0 : i32
    return %arg0, %c0_i32, %c0_i32_0 : i32, i32, i32
  }
  func.func @transform_3(%arg0: i32) -> (i32, i32) {
    %c0_i32 = arith.constant 0 : i32
    %c0_i32_0 = arith.constant 0 : i32
    %c0_i32_1 = arith.constant 0 : i32
    return %c0_i32, %c0_i32_0 : i32, i32
  }
  func.func @transform_4(%arg0: i32) -> (i32, i32) {
    %c0_i32 = arith.constant 0 : i32
    %c0_i32_0 = arith.constant 0 : i32
    %c0_i32_1 = arith.constant 0 : i32
    return %c0_i32, %c0_i32_0 : i32, i32
  }
  func.func @transform_5(%arg0: i32) -> (i32, i32) {
    %c0_i32 = arith.constant 0 : i32
    %c0_i32_0 = arith.constant 0 : i32
    %c0_i32_1 = arith.constant 0 : i32
    return %c0_i32, %c0_i32_0 : i32, i32
  }
  func.func @transform_6(%arg0: i32) -> (i32, i32) {
    %c0_i32 = arith.constant 0 : i32
    %c0_i32_0 = arith.constant 0 : i32
    %c0_i32_1 = arith.constant 0 : i32
    return %c0_i32, %c0_i32_0 : i32, i32
  }
  func.func @transform_7(%arg0: i32) -> (i32, i32) {
    %c0_i32 = arith.constant 0 : i32
    %c0_i32_0 = arith.constant 0 : i32
    %c0_i32_1 = arith.constant 0 : i32
    return %c0_i32, %c0_i32_0 : i32, i32
  }
  func.func @transform_8(%arg0: i32) -> (i32, i32) {
    %c0_i32 = arith.constant 0 : i32
    %c0_i32_0 = arith.constant 0 : i32
    %c0_i32_1 = arith.constant 0 : i32
    return %c0_i32, %c0_i32_0 : i32, i32
  }
  func.func @transform_9(%arg0: i32) -> (i32, i32, i32) {
    %c0_i32 = arith.constant 0 : i32
    %c0_i32_0 = arith.constant 0 : i32
    %c0_i32_1 = arith.constant 0 : i32
    return %arg0, %c0_i32, %c0_i32_0 : i32, i32, i32
  }
}

</mosaic_0001>

<bundles_post_ra>
// kernel: ptr_extract_summ_forward.6
= control target key start
LH: loop header
LB: loop body
LE: loop exit
PB: predicated region body
PF: predicated region fallthrough
CT: control target
= control target key end

     0   :  { %v900_v0 = vmov 0.0   ;;  %vm901_vm0 = vmmov 0   ;;  %vm120_vm1 = vcmask 254976   ;;  %vm70_vm2 = vcmask 523264   ;;  %s1136_s1 = inlined_call_operand.vmem [shape: bf16[64,128], index: 1, kind: input, shape index: {}]   ;;  %s1137_s2 = inlined_call_operand.vmem [shape: bf16[32,128], index: 2, kind: input, shape index: {}]   ;;  %s1138_s0 = inlined_call_operand.vmem [shape: f32[2,4,64], index: 0, kind: input, shape index: {}]   ;;  %s1139_s4 = inlined_call_operand.vmem [shape: f32[2,32], index: 4, kind: input, shape index: {}]   ;;  %s1140_s5 = inlined_call_operand.vmem [shape: f32[2,32], index: 5, kind: input, shape index: {}]   ;;  %s1141_s3 = inlined_call_operand.vmem [shape: f32[1,128], index: 3, kind: input, shape index: {}]   ;;  %s1142_s6 = inlined_call_operand.vmem [shape: f32[2,4,32], index: 6, kind: output, shape index: {}]  }
   0x1   :  { %774 = vmatprep.subr.bf16.mxu0 %v900_v0  ;;  %v823_v1 = vld [vmem:[%s1136_s1 + $0x18] sm:$0xff]   ;;  %786 = vmatprep.subr.bf16.mxu1 %v900_v0  ;;  %v824_v2 = vld [vmem:[%s1136_s1 + $0x10] sm:$0xff]   ;;  %v827_v3 = vld [vmem:[%s1137_s2 + $0x8] sm:$0xff]   ;;  %vm144_vm3 = vcmask 261120   ;;  %vm254_vm4 = vcmask 1041409   ;;  %vm274_vm5 = vcmask 253952  }
   0x2   :  { %782 = vmatprep.mubr.msk.bf16.mxu0 %vm901_vm0, %v900_v0  ;;  %790 = vmatprep.mubr.msk.bf16.mxu1 %vm901_vm0, %v900_v0  ;;  %v825_v4 = vld [vmem:[%s1136_s1 + $0x8] sm:$0xff]   ;;  %v829_v5 = vld [vmem:[%s1137_s2] sm:$0xff]  }
   0x3   :  { %775 = vmatpush3.bf16.msra.mxu0 %v823_v1  ;;  %787 = vmatpush3.bf16.msra.mxu1 %v827_v3  ;;  %v828_v6 = vld [vmem:[%s1138_s0] sm:$0xff]   ;;  %s902_s0 = smov 32   ;;  %v830_v57 = vld [vmem:[%s1137_s2 + $0x8] sm:$0xff]  }
   0x4   :  { %776 = vmatprep.subr.bf16.mxu0 %v900_v0  ;;  %788 = vmatprep.subr.bf16.mxu1 %v900_v0  ;;  %v119_v7 = vld [vmem:[%s1139_s4] sm:$0x3]  ;;  %v30_v10 = vpack.c.bf16 %v828_v6, %v828_v6 }
   0x5   :  { %v122_v8 = vld [vmem:[%s1140_s5] sm:$0x3]  ;;  %121 = vst.msk [vmem:[#allocation3] sm:$0x3] %vm120_vm1, %v119_v7  ;;  %s904_s5 = smov 96  }
   0x6   :  { %v826_v9 = vld [vmem:[%s1136_s1] sm:$0xff]   ;;  %123 = vst.msk [vmem:[#allocation4] sm:$0x3] %vm120_vm1, %v122_v8 }
   0x7   :  { %777 = vmatpush3.bf16.msra.mxu0 %v824_v2  ;;  %789 = vmatpush3.bf16.msra.mxu1 %v829_v5  ;;  %v731_v15 = vld [vmem:[%s1141_s3] ss:$0 sm:$0xff]  ;;  %s903_s3 = smov 64  }
   0x8   :  { %778 = vmatprep.subr.bf16.mxu0 %v900_v0  ;;  %794 = vmatprep.subr.bf16.mxu1 %v900_v0  ;;  %v831_v58 = vld [vmem:[%s1137_s2] sm:$0xff]  }
   0xb   :  { %779 = vmatpush3.bf16.msra.mxu0 %v825_v4 }
   0xc   :  { %780 = vmatprep.subr.bf16.mxu0 %v900_v0  ;;  %v126_v11 = vld [vmem:[#allocation3] sm:$0x3] }
   0xd   :  { %v208_v12 = vld [vmem:[#allocation4] sm:$0x3]  ;;  %v127_v13 = vpack.c.bf16 %v126_v11, %v126_v11 }
   0xe   :  { %v210_v14 = vrot.slane %v208_v12, 1 }
   0xf   :  { %781 = vmatpush3.bf16.msra.mxu0 %v826_v9  ;;  %791 = vmatmul.mubr.msk.bf16.vlgmr.msra.gmra.mxu1 %vm144_vm3, %v127_v13 }
  0x10   :  { %802 = vmatprep.subr.bf16.mxu0 %v900_v0  ;;  %213 = vrot.lane.b32.xlu1 %v210_v14, %s902_s0 }
  0x11   :  { %798 = vmatprep.mubr.msk.bf16.mxu1 %vm901_vm0, %v900_v0  ;;  %795 = vmatpush3.bf16.msra.mxu1 %v830_v57 }
  0x12   :  { %783 = vmatmul.mubr.msk.bf16.vlgmr.msra.gmra.mxu0 %vm70_vm2, %v30_v10  ;;  %796 = vmatprep.subr.bf16.mxu1 %v900_v0 }
  0x13   :  { %806 = vmatprep.mubr.msk.bf16.mxu0 %vm901_vm0, %v900_v0 }
  0x14   :  { %211 = vrot.lane.b32.xlu1 %v208_v12, %s902_s0 }
  0x15   :  { %797 = vmatpush3.bf16.msra.mxu1 %v831_v58 }
  0x16   :  { %810 = vmatprep.subr.bf16.mxu1 %v900_v0 }
  0x82   :  { %v214_v45 = vpop.permute.xlu1 %213 }
  0x86   :  { %v212_v47 = vpop.permute.xlu1 %211 }
  0xcf   :  { %v182_v18 = vpop.f32.mrf.mxu1 }
  0xd0   :  { %v189_v26 = vrot.slane %v182_v18, 1 }
  0xd1   :  { %v792_v21 = vpop.f32.mrf.mxu1 }
  0xd2   :  { %v108_v16 = vpop.f32.mrf.mxu0 }
  0xd3   :  { %v109_v17 = vadd.f32 %v731_v15, %v108_v16  ;;  %v185_v23 = vpop.f32.mrf.mxu1 }
  0xd4   :  { %v784_v19 = vpop.f32.mrf.mxu0 }
  0xd5   :  { %v115_v20 = vcombine.high %v109_v17, %v109_v17  ;;  %117 = vst [vmem:[#allocation2] sm:$0xf] %v109_v17  ;;  %v793_v25 = vpop.f32.mrf.mxu1 }
  0xd6   :  { %v111_v22 = vpop.f32.mrf.mxu0 }
  0xd7   :  { %118 = vst [vmem:[#allocation2 + $0x4] sm:$0xf] %v115_v20 }
  0xd8   :  { %v785_v24 = vpop.f32.mrf.mxu0 }
  0xdc   :  { %v124_v28 = vld [vmem:[#allocation2] sm:$0x1]  ;;  %v277_v6 = vld [vmem:[#allocation2 + $0x1] sm:$0x1] }
  0xdd   :  { %v192_v30 = vadd.f32 %v182_v18, %v124_v28 }
  0xde   :  { %v125_v27 = vld [vmem:[#allocation2 + $0x4] sm:$0x1]  ;;  %v278_v10 = vld [vmem:[#allocation2 + $0x5] sm:$0x1] }
  0xdf   :  { %v193_v29 = vadd.f32 %v189_v26, %v125_v27  ;;  %v740_v34 = vmul.f32 -1.442695, %v192_v30 }
  0xe1   :  { %836 = vtanh.f32 %v193_v29  ;;  %v741_v33 = vmul.f32 -1.442695, %v193_v29 }
  0xe2   :  { %838 = vtanh.f32 %v192_v30 }
  0xe3   :  { %840 = vpow2.f32 %v741_v33 }
  0xe4   :  { %842 = vpow2.f32 %v740_v34 }
  0xee   :  { %v837_v31 = vpop.eup %836 }
  0xef   :  { %223 = vrot.lane.b32.xlu0 %v837_v31, %s903_s3  ;;  %v839_v32 = vpop.eup %838 }
  0xf0   :  { %v841_v35 = vpop.eup %840 }
  0xf1   :  { %v201_v36 = vadd.f32 1.0, %v841_v35  ;;  %v843_v37 = vpop.eup %842 }
  0xf2   :  { %v200_v38 = vadd.f32 1.0, %v843_v37 }
  0xf3   :  { %221 = vrot.lane.b32.xlu0 %v839_v32, %s903_s3  ;;  %844 = vrcp.f32 %v201_v36 }
  0xf4   :  { %846 = vrcp.f32 %v200_v38 }
 0x100   :  { %v845_v39 = vpop.eup %844 }
 0x101   :  { %v847_v42 = vpop.eup %846  ;;  %v218_v46 = vmul.f32 %v845_v39, %v214_v45 }
 0x102   :  { %v217_v50 = vmul.f32 %v847_v42, %v212_v47 }
 0x161   :  { %v224_v40 = vpop.permute.xlu0 %223 }
 0x162   :  { %v228_v41 = vmul.f32 %v845_v39, %v224_v40 }
 0x164   :  { %233 = vrot.lane.b32.xlu0 %v228_v41, %s902_s0 }
 0x165   :  { %v222_v43 = vpop.permute.xlu0 %221 }
 0x166   :  { %v227_v44 = vmul.f32 %v847_v42, %v222_v43  ;;  %v832_v43 = vld [vmem:[%s1137_s2 + $0x8] sm:$0xff]  }
 0x167   :  { %803 = vmatpush3.bf16.msra.mxu0 %v832_v43 }
 0x168   :  { %231 = vrot.lane.b32.xlu1 %v227_v44, %s902_s0  ;;  %v833_v44 = vld [vmem:[%s1137_s2] sm:$0xff]   ;;  %804 = vmatprep.subr.bf16.mxu0 %v900_v0 }
 0x16b   :  { %805 = vmatpush3.bf16.msra.mxu0 %v833_v44 }
 0x1d6   :  { %v234_v48 = vpop.permute.xlu0 %233 }
 0x1d7   :  { %v238_v49 = vadd.f32 %v234_v48, %v218_v46 }
 0x1d9   :  { %848 = vtanh.f32 %v238_v49  ;;  %v253_v55 = vrot.slane %v238_v49, 7 }
 0x1da   :  { %v232_v51 = vpop.permute.xlu1 %231 }
 0x1db   :  { %v237_v52 = vadd.f32 %v232_v51, %v217_v50 }
 0x1dd   :  { %850 = vtanh.f32 %v237_v52  ;;  %v255_v56 = vsel %vm254_vm4, %v253_v55, %v237_v52  ;;  %v427_v55 = vld [vmem:[#allocation2 + $0x2] sm:$0x1] }
 0x1e6   :  { %v849_v53 = vpop.eup %848 }
 0x1e7   :  { %245 = vrot.lane.b32.xlu0 %v849_v53, %s903_s3 }
 0x1ea   :  { %v851_v54 = vpop.eup %850 }
 0x1eb   :  { %243 = vrot.lane.b32.xlu1 %v851_v54, %s903_s3 }
 0x1ef   :  { %256 = vrot.lane.b32.xlu1 %v255_v56, %s904_s5 }
 0x259   :  { %v246_v59 = vpop.permute.xlu0 %245 }
 0x25a   :  { %v1006_v60 = vmul.f32 %v845_v39, %v246_v59  ;;  %v428_v59 = vld [vmem:[#allocation2 + $0x6] sm:$0x1] }
 0x25c   :  { %v262_v62 = vrot.slane %v1006_v60, 7 }
 0x25d   :  { %v244_v61 = vpop.permute.xlu1 %243 }
 0x25e   :  { %v1010_v63 = vmul.f32 %v847_v42, %v244_v61 }
 0x260   :  { %v263_v1 = vsel %vm254_vm4, %v262_v62, %v1010_v63 }
 0x261   :  { %v257_v2 = vpop.permute.xlu1 %256  ;;  %264 = vrot.lane.b32.xlu0 %v263_v1, %s902_s0 }
 0x262   :  { %259 = vst.msk [vmem:[#allocation4] sm:$0x3] %vm120_vm1, %v257_v2 }
 0x269   :  { %v360_v17 = vld [vmem:[#allocation4] sm:$0x3] }
 0x26a   :  { %v362_v18 = vrot.slane %v360_v17, 1 }
 0x2d3   :  { %v265_v3 = vpop.permute.xlu0 %264 }
 0x2d4   :  { %267 = vst.msk [vmem:[#allocation3] sm:$0x3] %vm120_vm1, %v265_v3 }
 0x2db   :  { %v279_v4 = vld [vmem:[#allocation3] sm:$0x3] }
 0x2dc   :  { %v280_v5 = vpack.c.bf16 %v279_v4, %v279_v4 }
 0x2de   :  { %799 = vmatmul.mubr.msk.bf16.vlgmr.msra.gmra.mxu1 %vm144_vm3, %v280_v5 }
 0x2df   :  { %814 = vmatprep.mubr.msk.bf16.mxu1 %vm901_vm0, %v900_v0 }
 0x39e   :  { %v334_v7 = vpop.f32.mrf.mxu1 }
 0x39f   :  { %v341_v8 = vrot.slane %v334_v7, 1  ;;  %v344_v9 = vadd.f32 %v334_v7, %v277_v6 }
 0x3a0   :  { %v800_v11 = vpop.f32.mrf.mxu1 }
 0x3a1   :  { %v345_v12 = vadd.f32 %v341_v8, %v278_v10  ;;  %852 = vtanh.f32 %v344_v9  ;;  %v745_v19 = vmul.f32 -1.442695, %v344_v9 }
 0x3a2   :  { %v337_v13 = vpop.f32.mrf.mxu1 }
 0x3a3   :  { %854 = vtanh.f32 %v345_v12  ;;  %v746_v20 = vmul.f32 -1.442695, %v345_v12 }
 0x3a4   :  { %v801_v14 = vpop.f32.mrf.mxu1  ;;  %856 = vpow2.f32 %v745_v19 }
 0x3a5   :  { %858 = vpow2.f32 %v746_v20 }
 0x3ae   :  { %v853_v15 = vpop.eup %852 }
 0x3af   :  { %373 = vrot.lane.b32.xlu1 %v853_v15, %s903_s3 }
 0x3b0   :  { %v855_v16 = vpop.eup %854 }
 0x3b1   :  { %375 = vrot.lane.b32.xlu0 %v855_v16, %s903_s3  ;;  %v857_v21 = vpop.eup %856 }
 0x3b2   :  { %v859_v22 = vpop.eup %858  ;;  %v352_v23 = vadd.f32 1.0, %v857_v21 }
 0x3b3   :  { %363 = vrot.lane.b32.xlu1 %v360_v17, %s902_s0  ;;  %v353_v24 = vadd.f32 1.0, %v859_v22 }
 0x3b4   :  { %860 = vrcp.f32 %v352_v23 }
 0x3b5   :  { %365 = vrot.lane.b32.xlu0 %v362_v18, %s902_s0  ;;  %862 = vrcp.f32 %v353_v24 }
 0x3c1   :  { %v861_v25 = vpop.eup %860 }
 0x3c2   :  { %v863_v28 = vpop.eup %862 }
 0x421   :  { %v374_v26 = vpop.permute.xlu1 %373 }
 0x422   :  { %v379_v27 = vmul.f32 %v861_v25, %v374_v26 }
 0x423   :  { %v376_v29 = vpop.permute.xlu0 %375 }
 0x424   :  { %383 = vrot.lane.b32.xlu1 %v379_v27, %s902_s0  ;;  %v380_v30 = vmul.f32 %v863_v28, %v376_v29 }
 0x425   :  { %v364_v31 = vpop.permute.xlu1 %363 }
 0x426   :  { %385 = vrot.lane.b32.xlu0 %v380_v30, %s902_s0  ;;  %v369_v32 = vmul.f32 %v861_v25, %v364_v31  ;;  %v834_v31 = vld [vmem:[%s1137_s2 + $0x8] sm:$0xff]  }
 0x427   :  { %v366_v33 = vpop.permute.xlu0 %365  ;;  %811 = vmatpush3.bf16.msra.mxu1 %v834_v31 }
 0x428   :  { %v370_v36 = vmul.f32 %v863_v28, %v366_v33  ;;  %812 = vmatprep.subr.bf16.mxu1 %v900_v0 }
 0x496   :  { %v384_v34 = vpop.permute.xlu1 %383 }
 0x497   :  { %v389_v35 = vadd.f32 %v384_v34, %v369_v32  ;;  %v835_v32 = vld [vmem:[%s1137_s2] sm:$0xff]  }
 0x498   :  { %v386_v37 = vpop.permute.xlu0 %385  ;;  %813 = vmatpush3.bf16.msra.mxu1 %v835_v32 }
 0x499   :  { %864 = vtanh.f32 %v389_v35  ;;  %v390_v38 = vadd.f32 %v386_v37, %v370_v36 }
 0x49b   :  { %866 = vtanh.f32 %v390_v38  ;;  %v405_v40 = vrot.slane %v390_v38, 7 }
 0x49d   :  { %v406_v42 = vsel %vm254_vm4, %v405_v40, %v389_v35 }
 0x4a6   :  { %v865_v39 = vpop.eup %864 }
 0x4a7   :  { %395 = vrot.lane.b32.xlu1 %v865_v39, %s903_s3 }
 0x4a8   :  { %v867_v41 = vpop.eup %866 }
 0x4a9   :  { %397 = vrot.lane.b32.xlu0 %v867_v41, %s903_s3 }
 0x4ab   :  { %407 = vrot.lane.b32.xlu1 %v406_v42, %s904_s5  ;;  %v577_v42 = vld [vmem:[#allocation2 + $0x3] sm:$0x1] }
 0x519   :  { %v396_v45 = vpop.permute.xlu1 %395 }
 0x51a   :  { %v1040_v49 = vmul.f32 %v861_v25, %v396_v45 }
 0x51b   :  { %v398_v46 = vpop.permute.xlu0 %397 }
 0x51c   :  { %v1037_v47 = vmul.f32 %v863_v28, %v398_v46  ;;  %v578_v46 = vld [vmem:[#allocation2 + $0x7] sm:$0x1] }
 0x51d   :  { %v408_v48 = vpop.permute.xlu1 %407 }
 0x51e   :  { %410 = vst.msk [vmem:[#allocation4] sm:$0x3] %vm120_vm1, %v408_v48  ;;  %v413_v50 = vrot.slane %v1037_v47, 7 }
 0x520   :  { %v414_v51 = vsel %vm254_vm4, %v413_v50, %v1040_v49 }
 0x521   :  { %415 = vrot.lane.b32.xlu0 %v414_v51, %s902_s0 }
 0x525   :  { %v510_v5 = vld [vmem:[#allocation4] sm:$0x3] }
 0x526   :  { %v512_v6 = vrot.slane %v510_v5, 1 }
 0x593   :  { %v416_v52 = vpop.permute.xlu0 %415 }
 0x594   :  { %418 = vst.msk [vmem:[#allocation3] sm:$0x3] %vm120_vm1, %v416_v52 }
 0x59b   :  { %v429_v53 = vld [vmem:[#allocation3] sm:$0x3] }
 0x59c   :  { %v430_v54 = vpack.c.bf16 %v429_v53, %v429_v53 }
 0x59e   :  { %807 = vmatmul.mubr.msk.bf16.vlgmr.msra.gmra.mxu0 %vm144_vm3, %v430_v54 }
 0x65e   :  { %v484_v56 = vpop.f32.mrf.mxu0 }
 0x65f   :  { %v491_v57 = vrot.slane %v484_v56, 1  ;;  %v494_v58 = vadd.f32 %v484_v56, %v427_v55 }
 0x660   :  { %v808_v61 = vpop.f32.mrf.mxu0 }
 0x661   :  { %v495_v62 = vadd.f32 %v491_v57, %v428_v59  ;;  %868 = vtanh.f32 %v494_v58  ;;  %v750_v7 = vmul.f32 -1.442695, %v494_v58 }
 0x662   :  { %v487_v1 = vpop.f32.mrf.mxu0 }
 0x663   :  { %870 = vtanh.f32 %v495_v62  ;;  %v751_v8 = vmul.f32 -1.442695, %v495_v62 }
 0x664   :  { %v809_v2 = vpop.f32.mrf.mxu0  ;;  %872 = vpow2.f32 %v750_v7 }
 0x665   :  { %874 = vpow2.f32 %v751_v8 }
 0x66e   :  { %v869_v3 = vpop.eup %868 }
 0x66f   :  { %523 = vrot.lane.b32.xlu1 %v869_v3, %s903_s3 }
 0x670   :  { %v871_v4 = vpop.eup %870 }
 0x671   :  { %525 = vrot.lane.b32.xlu0 %v871_v4, %s903_s3  ;;  %v873_v9 = vpop.eup %872 }
 0x672   :  { %v875_v10 = vpop.eup %874  ;;  %v502_v11 = vadd.f32 1.0, %v873_v9 }
 0x673   :  { %513 = vrot.lane.b32.xlu1 %v510_v5, %s902_s0  ;;  %v503_v12 = vadd.f32 1.0, %v875_v10 }
 0x674   :  { %876 = vrcp.f32 %v502_v11 }
 0x675   :  { %515 = vrot.lane.b32.xlu0 %v512_v6, %s902_s0  ;;  %878 = vrcp.f32 %v503_v12 }
 0x681   :  { %v877_v13 = vpop.eup %876 }
 0x682   :  { %v879_v16 = vpop.eup %878 }
 0x6e1   :  { %v524_v14 = vpop.permute.xlu1 %523 }
 0x6e2   :  { %v529_v15 = vmul.f32 %v877_v13, %v524_v14 }
 0x6e3   :  { %v526_v17 = vpop.permute.xlu0 %525 }
 0x6e4   :  { %533 = vrot.lane.b32.xlu1 %v529_v15, %s902_s0  ;;  %v530_v18 = vmul.f32 %v879_v16, %v526_v17 }
 0x6e5   :  { %v514_v19 = vpop.permute.xlu1 %513 }
 0x6e6   :  { %535 = vrot.lane.b32.xlu0 %v530_v18, %s902_s0  ;;  %v519_v20 = vmul.f32 %v877_v13, %v514_v19 }
 0x6e7   :  { %v516_v21 = vpop.permute.xlu0 %515 }
 0x6e8   :  { %v520_v24 = vmul.f32 %v879_v16, %v516_v21 }
 0x756   :  { %v534_v22 = vpop.permute.xlu1 %533 }
 0x757   :  { %v539_v23 = vadd.f32 %v534_v22, %v519_v20 }
 0x758   :  { %v536_v25 = vpop.permute.xlu0 %535 }
 0x759   :  { %880 = vtanh.f32 %v539_v23  ;;  %v540_v26 = vadd.f32 %v536_v25, %v520_v24 }
 0x75b   :  { %882 = vtanh.f32 %v540_v26  ;;  %v555_v28 = vrot.slane %v540_v26, 7 }
 0x75d   :  { %v556_v30 = vsel %vm254_vm4, %v555_v28, %v539_v23 }
 0x766   :  { %v881_v27 = vpop.eup %880 }
 0x767   :  { %545 = vrot.lane.b32.xlu1 %v881_v27, %s903_s3 }
 0x768   :  { %v883_v29 = vpop.eup %882 }
 0x769   :  { %547 = vrot.lane.b32.xlu0 %v883_v29, %s903_s3 }
 0x76b   :  { %557 = vrot.lane.b32.xlu1 %v556_v30, %s904_s5 }
 0x7d9   :  { %v546_v33 = vpop.permute.xlu1 %545 }
 0x7da   :  { %v1068_v37 = vmul.f32 %v877_v13, %v546_v33 }
 0x7db   :  { %v548_v34 = vpop.permute.xlu0 %547 }
 0x7dc   :  { %v1065_v35 = vmul.f32 %v879_v16, %v548_v34 }
 0x7dd   :  { %v558_v36 = vpop.permute.xlu1 %557 }
 0x7de   :  { %560 = vst.msk [vmem:[#allocation4] sm:$0x3] %vm120_vm1, %v558_v36  ;;  %v563_v38 = vrot.slane %v1065_v35, 7 }
 0x7e0   :  { %v564_v39 = vsel %vm254_vm4, %v563_v38, %v1068_v37 }
 0x7e1   :  { %565 = vrot.lane.b32.xlu0 %v564_v39, %s902_s0 }
 0x7e5   :  { %v660_v55 = vld [vmem:[#allocation4] sm:$0x3] }
 0x7e6   :  { %v662_v56 = vrot.slane %v660_v55, 1 }
 0x853   :  { %v566_v40 = vpop.permute.xlu0 %565 }
 0x854   :  { %568 = vst.msk [vmem:[#allocation3] sm:$0x3] %vm120_vm1, %v566_v40 }
 0x85b   :  { %v579_v0 = vld [vmem:[#allocation3] sm:$0x3] }
 0x85c   :  { %v580_v41 = vpack.c.bf16 %v579_v0, %v579_v0 }
 0x85e   :  { %815 = vmatmul.mubr.msk.bf16.vlgmr.msra.gmra.mxu1 %vm144_vm3, %v580_v41 }
 0x91e   :  { %v634_v43 = vpop.f32.mrf.mxu1 }
 0x91f   :  { %v641_v44 = vrot.slane %v634_v43, 1  ;;  %v644_v45 = vadd.f32 %v634_v43, %v577_v42 }
 0x920   :  { %v816_v48 = vpop.f32.mrf.mxu1 }
 0x921   :  { %v645_v50 = vadd.f32 %v641_v44, %v578_v46  ;;  %884 = vtanh.f32 %v644_v45  ;;  %v755_v57 = vmul.f32 -1.442695, %v644_v45 }
 0x922   :  { %v637_v51 = vpop.f32.mrf.mxu1 }
 0x923   :  { %886 = vtanh.f32 %v645_v50  ;;  %v756_v58 = vmul.f32 -1.442695, %v645_v50 }
 0x924   :  { %v817_v52 = vpop.f32.mrf.mxu1  ;;  %888 = vpow2.f32 %v755_v57 }
 0x925   :  { %890 = vpow2.f32 %v756_v58 }
 0x92e   :  { %v885_v53 = vpop.eup %884 }
 0x92f   :  { %673 = vrot.lane.b32.xlu1 %v885_v53, %s903_s3 }
 0x930   :  { %v887_v54 = vpop.eup %886 }
 0x931   :  { %675 = vrot.lane.b32.xlu0 %v887_v54, %s903_s3  ;;  %v889_v59 = vpop.eup %888 }
 0x932   :  { %v891_v61 = vpop.eup %890  ;;  %v652_v62 = vadd.f32 1.0, %v889_v59 }
 0x933   :  { %663 = vrot.lane.b32.xlu1 %v660_v55, %s902_s0  ;;  %v653_v1 = vadd.f32 1.0, %v891_v61 }
 0x934   :  { %892 = vrcp.f32 %v652_v62 }
 0x935   :  { %665 = vrot.lane.b32.xlu0 %v662_v56, %s902_s0  ;;  %894 = vrcp.f32 %v653_v1 }
 0x941   :  { %v893_v2 = vpop.eup %892 }
 0x942   :  { %v895_v5 = vpop.eup %894 }
 0x9a1   :  { %v674_v3 = vpop.permute.xlu1 %673 }
 0x9a2   :  { %v679_v4 = vmul.f32 %v893_v2, %v674_v3 }
 0x9a3   :  { %v676_v6 = vpop.permute.xlu0 %675 }
 0x9a4   :  { %683 = vrot.lane.b32.xlu1 %v679_v4, %s902_s0  ;;  %v680_v7 = vmul.f32 %v895_v5, %v676_v6 }
 0x9a5   :  { %v664_v8 = vpop.permute.xlu1 %663 }
 0x9a6   :  { %685 = vrot.lane.b32.xlu0 %v680_v7, %s902_s0  ;;  %v669_v9 = vmul.f32 %v893_v2, %v664_v8 }
 0x9a7   :  { %v666_v10 = vpop.permute.xlu0 %665 }
 0x9a8   :  { %v670_v13 = vmul.f32 %v895_v5, %v666_v10 }
 0xa16   :  { %v684_v11 = vpop.permute.xlu1 %683 }
 0xa17   :  { %v689_v12 = vadd.f32 %v684_v11, %v669_v9 }
 0xa18   :  { %v686_v14 = vpop.permute.xlu0 %685 }
 0xa19   :  { %896 = vtanh.f32 %v689_v12  ;;  %v690_v15 = vadd.f32 %v686_v14, %v670_v13 }
 0xa1b   :  { %898 = vtanh.f32 %v690_v15  ;;  %v705_v18 = vrot.slane %v690_v15, 7 }
 0xa1d   :  { %v706_v19 = vsel %vm254_vm4, %v705_v18, %v689_v12 }
 0xa26   :  { %v897_v16 = vpop.eup %896 }
 0xa27   :  { %695 = vrot.lane.b32.xlu1 %v897_v16, %s903_s3 }
 0xa28   :  { %v899_v17 = vpop.eup %898 }
 0xa29   :  { %697 = vrot.lane.b32.xlu0 %v899_v17, %s903_s3 }
 0xa2b   :  { %270 = vrot.lane.b32.xlu1 %v1006_v60, %s902_s0 }
 0xa2d   :  { %268 = vrot.lane.b32.xlu0 %v1010_v63, %s902_s0 }
 0xa2f   :  { %421 = vrot.lane.b32.xlu1 %v1037_v47, %s902_s0 }
 0xa31   :  { %419 = vrot.lane.b32.xlu0 %v1040_v49, %s902_s0 }
 0xa33   :  { %571 = vrot.lane.b32.xlu1 %v1065_v35, %s902_s0 }
 0xa35   :  { %569 = vrot.lane.b32.xlu0 %v1068_v37, %s902_s0 }
 0xa39   :  { %707 = vrot.lane.b32.xlu0 %v706_v19, %s904_s5 }
 0xa99   :  { %v696_v60 = vpop.permute.xlu1 %695 }
 0xa9a   :  { %v701_v20 = vmul.f32 %v893_v2, %v696_v60 }
 0xa9b   :  { %v698_v63 = vpop.permute.xlu0 %697 }
 0xa9c   :  { %719 = vrot.lane.b32.xlu0 %v701_v20, %s902_s0  ;;  %v702_v47 = vmul.f32 %v895_v5, %v698_v63 }
 0xa9d   :  { %v271_v21 = vpop.permute.xlu1 %270 }
 0xa9e   :  { %276 = vst.msk [vmem:[%s1142_s6 + $0x4] sm:$0x1] %vm274_vm5, %v271_v21  ;;  %v713_v49 = vrot.slane %v702_v47, 7 }
 0xa9f   :  { %v269_v22 = vpop.permute.xlu0 %268 }
 0xaa0   :  { %275 = vst.msk [vmem:[%s1142_s6] sm:$0x1] %vm274_vm5, %v269_v22  ;;  %v714_v24 = vsel %vm254_vm4, %v713_v49, %v701_v20 }
 0xaa1   :  { %v422_v23 = vpop.permute.xlu1 %421  ;;  %715 = vrot.lane.b32.xlu1 %v714_v24, %s902_s0 }
 0xaa2   :  { %426 = vst.msk [vmem:[%s1142_s6 + $0x5] sm:$0x1] %vm274_vm5, %v422_v23 }
 0xaa3   :  { %v420_v25 = vpop.permute.xlu0 %419 }
 0xaa4   :  { %425 = vst.msk [vmem:[%s1142_s6 + $0x1] sm:$0x1] %vm274_vm5, %v420_v25 }
 0xaa5   :  { %v572_v26 = vpop.permute.xlu1 %571  ;;  %721 = vrot.lane.b32.xlu1 %v702_v47, %s902_s0 }
 0xaa6   :  { %576 = vst.msk [vmem:[%s1142_s6 + $0x6] sm:$0x1] %vm274_vm5, %v572_v26 }
 0xaa7   :  { %v570_v27 = vpop.permute.xlu0 %569 }
 0xaa8   :  { %575 = vst.msk [vmem:[%s1142_s6 + $0x2] sm:$0x1] %vm274_vm5, %v570_v27 }
 0xaab   :  { %v708_v28 = vpop.permute.xlu0 %707 }
 0xaac   :  { %710 = vst.msk [vmem:[#allocation4] sm:$0x3] %vm120_vm1, %v708_v28 }
 0xb0e   :  { %v720_v29 = vpop.permute.xlu0 %719 }
 0xb0f   :  { %725 = vst.msk [vmem:[%s1142_s6 + $0x3] sm:$0x1] %vm274_vm5, %v720_v29 }
 0xb13   :  { %v716_v30 = vpop.permute.xlu1 %715 }
 0xb14   :  { %718 = vst.msk [vmem:[#allocation3] sm:$0x3] %vm120_vm1, %v716_v30 }
 0xb17   :  { %v722_v31 = vpop.permute.xlu1 %721 }
 0xb18   :  { %726 = vst.msk [vmem:[%s1142_s6 + $0x7] sm:$0x1] %vm274_vm5, %v722_v31 }

// kernel: ptr_extract_summ_forward.4
= control target key start
LH: loop header
LB: loop body
LE: loop exit
PB: predicated region body
PF: predicated region fallthrough
CT: control target
= control target key end

     0   :  { %s3934_s24 = smov 0   ;;  %s5006_s0 = inlined_call_operand.vmem [shape: bf16[16,10,32], index: 0, kind: input, shape index: {}]   ;;  %s5007_s1 = inlined_call_operand.vmem [shape: bf16[96,16], index: 1, kind: input, shape index: {}]   ;;  %s5008_s2 = inlined_call_operand.vmem [shape: f32[1,16], index: 2, kind: input, shape index: {}]   ;;  %s5009_s3 = inlined_call_operand.vmem [shape: bf16[128,16], index: 3, kind: input, shape index: {}]   ;;  %s5010_s4 = inlined_call_operand.vmem [shape: f32[1,16], index: 4, kind: input, shape index: {}]   ;;  %s5011_s5 = inlined_call_operand.vmem [shape: bf16[160,16], index: 5, kind: input, shape index: {}]   ;;  %s5012_s6 = inlined_call_operand.vmem [shape: f32[1,16], index: 6, kind: input, shape index: {}]   ;;  %s5013_s7 = inlined_call_operand.vmem [shape: bf16[16,48], index: 7, kind: output, shape index: {}]  }
   0x1 LB: > { %s3940_s25 = sadd.s32 4294967295, %s3885_s24   ;;  %p3680_p0 = scmp.ge.s32.totalorder %s3885_s24, 1  ;;  %s3885_s24 = sphi %s3934_s24, %s17_s24  }
   0x2   : > { %p239_p1 = scmp.lt.s32.totalorder %s3885_s24, 3 }
   0x4   : > { %p240_p2 = pnand %p3680_p0, %p239_p1 }
   0x5   : > { %s3681_s26 = sshll.u32 (!%p240_p2), %s3940_s25, 3  ;;  %s3887_s16 = smov (!%p240_p2), 64  }
   0x6   : > { %243 = sbr.rel (%p240_p2) target bundleno = 664 (0x298), region = 48  ;;  %p272_p3 = scmp.lt.s32.totalorder (!%p240_p2), %s3681_s26, 15 }
   0x7   : > { %s3888_s21 = smov (!%p240_p2), 32   ;;  %s3889_s22 = smov (!%p240_p2), 96  }
   0x8   : > { %p278_p4 = scmp.lt.s32.totalorder (!%p240_p2), %s3940_s25, 1 }
   0xb   : > { %v3855_v0 = vld [vmem:[%s5007_s1 + $0x28] sm:$0xff]   ;;  %v3856_v1 = vld [vmem:[%s5007_s1 + $0x20] sm:$0xff]   ;;  %s5015_s26 = smov (!%p272_p3, %s3681_s26), 15  ;;  %v3857_v2 = vld [vmem:[%s5007_s1 + $0x18] sm:$0xff]   ;;  %vm435_vm0 = vcmask 261120   ;;  %vm460_vm1 = vcmask 523264  }
   0xc   : > { %3780 = vmatprep.subr.bf16.mxu1 %v3855_v0  ;;  %s3757_s8 = sshll.u32 %s5015_s26, 3  ;;  %v3858_v14 = vld [vmem:[%s5007_s1 + $0x10] sm:$0xff]   ;;  %v3859_v29 = vld [vmem:[%s5007_s1 + $0x8] sm:$0xff]   ;;  %v3860_v41 = vld [vmem:[%s5007_s1] sm:$0xff]   ;;  %vm545_vm2 = vcmask 785408   ;;  %vm646_vm3 = vcmask 130048  }
   0xd   : > { %3781 = vmatpush3.bf16.msra.mxu1 %v3855_v0  ;;  %s3957_s13 = scalar_lea.vmem %s5006_s0, %s3757_s8  ;;  %vm3567_vm4 = vcmask 1041409   ;;  %vm3569_vm5 = vcmask 1042434   ;;  %vm3571_vm6 = vcmask 1043459   ;;  %vm3502_vm7 = vcmask 128000   ;;  %s5017_s25 = smov (!%p278_p4, %s3940_s25), 1 }
   0xe   : > { %3782 = vmatprep.subr.bf16.mxu1 %v3856_v1  ;;  %v3960_v3 = vld [vmem:[%s3957_s13 + $0x8] sm:$0xf]  ;;  %v286_v4 = vld [vmem:[%s3957_s13 + $0xc] sm:$0x1]  ;;  %v3964_v5 = vld [vmem:[%s3957_s13] sm:$0xf] }
   0xf   : > { %v3967_v6 = vcombine.low %v3960_v3, %v286_v4  ;;  %v284_v7 = vld [vmem:[%s3957_s13 + $0x4] sm:$0x1]  ;;  %v3971_v8 = vld [vmem:[%s3957_s13 + $0x18] sm:$0xf]  ;;  %v290_v9 = vld [vmem:[%s3957_s13 + $0x1c] sm:$0x1]  ;;  %v3995_v19 = vcombine.low %v3960_v3, %v3960_v3  ;;  %v3999_v20 = vcombine.low %v3964_v5, %v3964_v5 }
  0x10   : > { %v3975_v10 = vcombine.low %v3964_v5, %v284_v7  ;;  %v3978_v11 = vcombine.low %v3971_v8, %v290_v9  ;;  %v3981_v12 = vld [vmem:[%s3957_s13 + $0x10] sm:$0xf]  ;;  %v288_v13 = vld [vmem:[%s3957_s13 + $0x14] sm:$0x1]  ;;  %v4021_v33 = vcombine.low %v3971_v8, %v3971_v8  ;;  %v4047_v56 = vld [vmem:[%s3957_s13 + $0x20] sm:$0xf] }
  0x11   : > { %3783 = vmatpush3.bf16.msra.mxu1 %v3856_v1  ;;  %v412_v15 = vrot.slane %v3967_v6, 1  ;;  %v3989_v16 = vcombine.low %v3981_v12, %v288_v13  ;;  %v349_v24 = vshll.u32 %v3967_v6, 16  ;;  %v347_v32 = vshrl.u32 %v3967_v6, 16  ;;  %v292_v59 = vld [vmem:[%s3957_s13 + $0x24] sm:$0x1] }
  0x12   : > { %3784 = vmatprep.subr.bf16.mxu1 %v3857_v2  ;;  %v411_v17 = vrot.slane %v3975_v10, 1  ;;  %v342_v18 = vshll.u32 %v3975_v10, 16  ;;  %v414_v21 = vrot.slane %v3978_v11, 1  ;;  %v340_v26 = vshrl.u32 %v3975_v10, 16  ;;  %v4052_v61 = vld [vmem:[%s3957_s13 + $0x28] sm:$0xf] }
  0x13   : > { %421 = vrot.lane.b32.xlu1 %v412_v15, %s3887_s16  ;;  %v354_v22 = vshrl.u32 %v3989_v16, 16  ;;  %v356_v23 = vshll.u32 %v3989_v16, 16  ;;  %v413_v25 = vrot.slane %v3989_v16, 1  ;;  %v363_v28 = vshll.u32 %v3978_v11, 16 }
  0x14   : > { %419 = vrot.lane.b32.xlu0 %v411_v17, %s3887_s16  ;;  %v344_v27 = vrot.slane %v342_v18, 1  ;;  %v361_v31 = vshrl.u32 %v3978_v11, 16  ;;  %v351_v36 = vrot.slane %v349_v24, 1  ;;  %v721_v37 = vshll.u32 %v3995_v19, 16 }
  0x15   : > { %3785 = vmatpush3.bf16.msra.mxu1 %v3857_v2  ;;  %v358_v30 = vrot.slane %v356_v23, 1  ;;  %v365_v35 = vrot.slane %v363_v28, 1  ;;  %v714_v39 = vshll.u32 %v3999_v20, 16  ;;  %v4031_v40 = vcombine.low %v3981_v12, %v3981_v12 }
  0x16   : > { %3786 = vmatprep.subr.bf16.mxu1 %v3858_v14  ;;  %v345_v38 = vor.u32 %v344_v27, %v340_v26  ;;  %v719_v42 = vshrl.u32 %v3995_v19, 16  ;;  %v723_v44 = vrot.slane %v721_v37, 1  ;;  %v712_v45 = vshrl.u32 %v3999_v20, 16  ;;  %v3861_v27 = vld [vmem:[%s5011_s5 + $0x38] sm:$0xff]   ;;  %v3862_v37 = vld [vmem:[%s5011_s5 + $0x30] sm:$0xff]  }
  0x17   : > { %425 = vrot.lane.b32.xlu1 %v414_v21, %s3887_s16  ;;  %v359_v34 = vor.u32 %v358_v30, %v354_v22  ;;  %v366_v43 = vor.u32 %v365_v35, %v361_v31  ;;  %v735_v46 = vshll.u32 %v4021_v33, 16  ;;  %v352_v47 = vor.u32 %v351_v36, %v347_v32 }
  0x18   : > { %423 = vrot.lane.b32.xlu0 %v413_v25, %s3887_s16  ;;  %v716_v48 = vrot.slane %v714_v39, 1  ;;  %v728_v49 = vshll.u32 %v4031_v40, 16  ;;  %v724_v50 = vor.u32 %v723_v44, %v719_v42  ;;  %v733_v51 = vshrl.u32 %v4021_v33, 16  ;;  %v3863_v44 = vld [vmem:[%s5011_s5 + $0x28] sm:$0xff]  }
  0x19   : > { %3787 = vmatpush3.bf16.msra.mxu1 %v3858_v14  ;;  %v737_v52 = vrot.slane %v735_v46, 1  ;;  %v726_v54 = vshrl.u32 %v4031_v40, 16  ;;  %v786_v57 = vrot.slane %v347_v32, 1  ;;  %v787_v58 = vrot.slane %v349_v24, 2 }
  0x1a   : > { %3788 = vmatprep.subr.bf16.mxu1 %v3859_v29  ;;  %v717_v53 = vor.u32 %v716_v48, %v712_v45  ;;  %v730_v55 = vrot.slane %v728_v49, 1  ;;  %v783_v63 = vrot.slane %v340_v26, 1  ;;  %v784_v0 = vrot.slane %v342_v18, 2  ;;  %v4108_v45 = vld [vmem:[%s5009_s3 + $0x38] sm:$0xff]  }
  0x1b   : > { %399 = vrot.lane.b32.xlu1 %v359_v34, %s3888_s21  ;;  %v738_v60 = vor.u32 %v737_v52, %v733_v51  ;;  %v4059_v1 = vcombine.low %v4047_v56, %v4047_v56  ;;  %v788_v2 = vor.u32 %v787_v58, %v786_v57  ;;  %v792_v4 = vrot.slane %v361_v31, 1  ;;  %v296_v51 = vld [vmem:[%s3957_s13 + $0x34] sm:$0x1]  ;;  %v3864_v52 = vld [vmem:[%s5011_s5 + $0x20] sm:$0xff]  }
  0x1c   : > { %395 = vrot.lane.b32.xlu0 %v345_v38, %s3888_s21  ;;  %v731_v62 = vor.u32 %v730_v55, %v726_v54  ;;  %v793_v7 = vrot.slane %v363_v28, 2  ;;  %v4063_v9 = vcombine.low %v4047_v56, %v292_v59  ;;  %v4067_v13 = vcombine.low %v4052_v61, %v4052_v61  ;;  %v294_v38 = vld [vmem:[%s3957_s13 + $0x2c] sm:$0x1] }
  0x1d   : > { %3789 = vmatpush3.bf16.msra.mxu1 %v3859_v29  ;;  %v785_v14 = vor.u32 %v784_v0, %v783_v63  ;;  %v789_v15 = vrot.slane %v354_v22, 1  ;;  %v790_v17 = vrot.slane %v356_v23, 2  ;;  %v742_v18 = vshll.u32 %v4059_v1, 16  ;;  %v298_v63 = vld [vmem:[%s3957_s13 + $0x3c] sm:$0x1] }
  0x1e   : > { %3790 = vmatprep.subr.bf16.mxu1 %v3860_v41  ;;  %v794_v21 = vor.u32 %v793_v7, %v792_v4  ;;  %v740_v24 = vshrl.u32 %v4059_v1, 16  ;;  %v749_v25 = vshll.u32 %v4067_v13, 16  ;;  %v368_v26 = vshrl.u32 %v4063_v9, 16 }
  0x1f   : > { %401 = vrot.lane.b32.xlu1 %v366_v43, %s3888_s21  ;;  %v791_v22 = vor.u32 %v790_v17, %v789_v15  ;;  %v744_v23 = vrot.slane %v742_v18, 1  ;;  %v370_v28 = vshll.u32 %v4063_v9, 16  ;;  %v415_v29 = vrot.slane %v4063_v9, 1  ;;  %v4100_v43 = vld [vmem:[%s3957_s13 + $0x30] sm:$0xf] }
  0x20   : > { %397 = vrot.lane.b32.xlu0 %v352_v47, %s3888_s21  ;;  %v747_v30 = vshrl.u32 %v4067_v13, 16  ;;  %v751_v31 = vrot.slane %v749_v25, 1  ;;  %v3890_v32 = vmov 0   ;;  %v795_v35 = vrot.slane %v368_v26, 1  ;;  %v3867_v18 = vld [vmem:[%s5011_s5 + $0x10] sm:$0xff]  }
  0x21   : > { %3791 = vmatpush3.bf16.msra.mxu1 %v3860_v41  ;;  %3080 = vmatprep.subr.bf16.mxu0 %v3890_v32  ;;  %v745_v34 = vor.u32 %v744_v23, %v740_v24  ;;  %v796_v36 = vrot.slane %v370_v28, 2  ;;  %v4097_v42 = vcombine.low %v4052_v61, %v294_v38  ;;  %v2534_v46 = vrot.slane %v3999_v20, 1  ;;  %v4127_v20 = vld [vmem:[%s3957_s13 + $0x38] sm:$0xf] }
  0x22   : > { %3081 = vmatpush1.bf16.msra.mxu0 %v3861_v27  ;;  %v752_v39 = vor.u32 %v751_v31, %v747_v30  ;;  %3800 = vmatprep.subr.bf16.mxu1 %v4108_v45  ;;  %v4116_v47 = vcombine.low %v4100_v43, %v4100_v43  ;;  %v372_v54 = vrot.slane %v370_v28, 1  ;;  %v4134_v57 = vcombine.low %v4100_v43, %v296_v51  ;;  %v3869_v28 = vld [vmem:[%s5011_s5 + $0x8] sm:$0xff]  }
  0x23   : > { %769 = vrot.lane.b32.xlu1 %v724_v50, %s3888_s21  ;;  %3082 = vmatprep.subr.bf16.mxu0 %v3890_v32  ;;  %v797_v41 = vor.u32 %v796_v36, %v795_v35  ;;  %v416_v48 = vrot.slane %v4097_v42, 1  ;;  %v375_v49 = vshrl.u32 %v4097_v42, 16  ;;  %v377_v50 = vshll.u32 %v4097_v42, 16  ;;  %v3871_v35 = vld [vmem:[%s5011_s5] sm:$0xff]  }
  0x24   : > { %767 = vrot.lane.b32.xlu0 %v717_v53, %s3888_s21  ;;  %v2536_v53 = vrot.slane %v4031_v40, 1  ;;  %v756_v55 = vshll.u32 %v4116_v47, 16  ;;  %v2535_v58 = vrot.slane %v3995_v19, 1  ;;  %v3865_v40 = vld [vmem:[%s5011_s5 + $0x18] sm:$0xff]   ;;  %v373_v0 = vor.u32 %v372_v54, %v368_v26 }
  0x25   : > { %v798_v59 = vrot.slane %v375_v49, 1  ;;  %v384_v4 = vshll.u32 %v4134_v57, 16  ;;  %v4153_v17 = vcombine.low %v4127_v20, %v298_v63  ;;  %v382_v24 = vshrl.u32 %v4134_v57, 16 }
  0x26   : > { %3083 = vmatpush1.bf16.msra.mxu0 %v3862_v37  ;;  %v758_v19 = vrot.slane %v756_v55, 1  ;;  %v417_v36 = vrot.slane %v4134_v57, 1  ;;  %v2537_v51 = vrot.slane %v4021_v33, 1  ;;  %v2538_v54 = vrot.slane %v4059_v1, 1 }
  0x27   : > { %773 = vrot.lane.b32.xlu1 %v738_v60, %s3888_s21  ;;  %3084 = vmatprep.subr.bf16.mxu0 %v3890_v32  ;;  %v799_v60 = vrot.slane %v377_v50, 2  ;;  %v386_v25 = vrot.slane %v384_v4, 1  ;;  %v391_v23 = vshll.u32 %v4153_v17, 16  ;;  %v389_v31 = vshrl.u32 %v4153_v17, 16 }
  0x28   : > { %771 = vrot.lane.b32.xlu0 %v731_v62, %s3888_s21  ;;  %v4140_v62 = vcombine.low %v4127_v20, %v4127_v20  ;;  %v801_v37 = vrot.slane %v382_v24, 1  ;;  %v802_v38 = vrot.slane %v384_v4, 2  ;;  %v2540_v33 = vrot.slane %v4116_v47, 1 }
  0x29   : > { %v800_v7 = vor.u32 %v799_v60, %v798_v59  ;;  %vm2477_vm8 = vcmask 129024   ;;  %vm3573_vm9 = vcmask 1044484   ;;  %vm3575_vm10 = vcmask 1045509  }
  0x2a   : > { %3085 = vmatpush1.bf16.msra.mxu0 %v3863_v44  ;;  %v763_v15 = vshll.u32 %v4140_v62, 16  ;;  %v761_v27 = vshrl.u32 %v4140_v62, 16  ;;  %v803_v44 = vor.u32 %v802_v38, %v801_v37  ;;  %vm3577_vm11 = vcmask 1046534  }
  0x2b   : > { %809 = vrot.lane.b32.xlu1 %v788_v2, %s3889_s22  ;;  %3086 = vmatprep.subr.bf16.mxu0 %v3890_v32  ;;  %v754_v2 = vshrl.u32 %v4116_v47, 16  ;;  %vm3579_vm12 = vcmask 1047559   ;;  %vm3621_vm13 = vcmask 388096  }
  0x2c   : > { %807 = vrot.lane.b32.xlu0 %v785_v14, %s3889_s22  ;;  %v379_v14 = vrot.slane %v377_v50, 1  ;;  %v3875_v50 = vld [vmem:[%s5011_s5 + $0x40] sm:$0xff]  }
  0x2e   : > { %3087 = vmatpush1.bf16.msra.mxu0 %v3864_v52  ;;  %v380_v26 = vor.u32 %v379_v14, %v375_v49  ;;  %v805_v49 = vrot.slane %v391_v23, 2 }
  0x2f   : > { %813 = vrot.lane.b32.xlu1 %v794_v21, %s3889_s22  ;;  %3088 = vmatprep.subr.bf16.mxu0 %v3890_v32  ;;  %v759_v21 = vor.u32 %v758_v19, %v754_v2  ;;  %v3891_v2 = vmov 1966171168  }
  0x30   : > { %811 = vrot.lane.b32.xlu0 %v791_v22, %s3889_s22  ;;  %v765_v22 = vrot.slane %v763_v15, 1  ;;  %v872_v19 = vunpack.c.l.s4 %v3891_v2  ;;  %v874_v15 = vlaneseq }
  0x32   : > { %3089 = vmatpush1.bf16.msra.mxu0 %v3865_v40  ;;  %v766_v30 = vor.u32 %v765_v22, %v761_v27  ;;  %v3868_v22 = vld [vmem:[%s5009_s3 + $0x30] sm:$0xff]  }
  0x33   : > { %427 = vrot.lane.b32.xlu1 %v415_v29, %s3887_s16  ;;  %3090 = vmatprep.subr.bf16.mxu0 %v3890_v32  ;;  %v387_v29 = vor.u32 %v386_v25, %v382_v24 }
  0x34   : > { %775 = vrot.lane.b32.xlu0 %v745_v34, %s3888_s21  ;;  %v393_v34 = vrot.slane %v391_v23, 1  ;;  %v873_v23 = vunpack.c.0.s8 %v872_v19  ;;  %v2560_v19 = vrot.slane %v3989_v16, 2 }
  0x36   : > { %3091 = vmatpush1.bf16.msra.mxu0 %v3867_v18 }
  0x37   : > { %777 = vrot.lane.b32.xlu1 %v752_v39, %s3888_s21  ;;  %3092 = vmatprep.subr.bf16.mxu0 %v3890_v32  ;;  %v394_v39 = vor.u32 %v393_v34, %v389_v31  ;;  %v3870_v34 = vld [vmem:[%s5009_s3 + $0x28] sm:$0xff]  }
  0x38   : > { %815 = vrot.lane.b32.xlu0 %v797_v41, %s3889_s22  ;;  %v3873_v41 = vld [vmem:[%s5011_s5 + $0x48] sm:$0xff]  }
  0x3a   : > { %3093 = vmatpush1.bf16.msra.mxu0 %v3869_v28  ;;  %v4221_v28 = vshrl.u32 %v874_v15, 7 }
  0x3b   : > { %2542 = vrot.lane.b32.xlu1 %v2534_v46, %s3887_s16  ;;  %3094 = vmatprep.subr.bf16.mxu0 %v3890_v32  ;;  %v418_v46 = vrot.slane %v4153_v17, 1 }
  0x3c   : > { %429 = vrot.lane.b32.xlu0 %v416_v48, %s3887_s16  ;;  %v804_v48 = vrot.slane %v389_v31, 1 }
  0x3e   : > { %3095 = vmatpush1.bf16.msra.mxu0 %v3871_v35  ;;  %v806_v52 = vor.u32 %v805_v49, %v804_v48 }
  0x3f   : > { %2546 = vrot.lane.b32.xlu1 %v2536_v53, %s3887_s16  ;;  %3108 = vmatprep.subr.bf16.mxu0 %v3890_v32  ;;  %v2539_v53 = vrot.slane %v4067_v13, 1 }
  0x40   : > { %2544 = vrot.lane.b32.xlu0 %v2535_v58, %s3887_s16 }
  0x42   : > { %3109 = vmatpush2.bf16.msra.mxu0 %v3873_v41  ;;  %v3872_v41 = vld [vmem:[%s5009_s3 + $0x20] sm:$0xff]  }
  0x43   : > { %403 = vrot.lane.b32.xlu1 %v373_v0, %s3888_s21  ;;  %3110 = vmatprep.subr.bf16.mxu0 %v3890_v32  ;;  %v2541_v32 = vrot.slane %v4140_v62, 1 }
  0x44   : > { %817 = vrot.lane.b32.xlu0 %v800_v7, %s3889_s22 }
  0x46   : > { %3111 = vmatpush2.bf16.msra.mxu0 %v3875_v50 }
  0x47   : > { %779 = vrot.lane.b32.xlu1 %v759_v21, %s3888_s21 }
  0x48   : > { %405 = vrot.lane.b32.xlu0 %v380_v26, %s3888_s21 }
  0x4b   : > { %407 = vrot.lane.b32.xlu1 %v387_v29, %s3888_s21 }
  0x4c   : > { %781 = vrot.lane.b32.xlu0 %v766_v30, %s3888_s21 }
  0x4f   : > { %431 = vrot.lane.b32.xlu1 %v417_v36, %s3887_s16  ;;  %v4237_v36 = vsub.s32 %v873_v23, %v4221_v28 }
  0x50   : > { %409 = vrot.lane.b32.xlu0 %v394_v39, %s3888_s21 }
  0x53   : > { %819 = vrot.lane.b32.xlu1 %v803_v44, %s3889_s22 }
  0x54   : > { %433 = vrot.lane.b32.xlu0 %v418_v46, %s3887_s16 }
  0x57   : > { %2548 = vrot.lane.b32.xlu1 %v2537_v51, %s3887_s16 }
  0x58   : > { %821 = vrot.lane.b32.xlu0 %v806_v52, %s3889_s22  ;;  %s3684_s22 = sshll.u32 %s5017_s25, 2 }
  0x59   : > { %s281_s8 = scalar_lea.vmem %s5013_s7, %s3684_s22 }
  0x5b   : > { %2552 = vrot.lane.b32.xlu1 %v2539_v53, %s3887_s16 }
  0x5c   : > { %2550 = vrot.lane.b32.xlu0 %v2538_v54, %s3887_s16 }
  0x5f   : > { %2556 = vrot.lane.b32.xlu1 %v2541_v32, %s3887_s16 }
  0x60   : > { %2554 = vrot.lane.b32.xlu0 %v2540_v33, %s3887_s16  ;;  %s3893_s16 = smov 16  }
  0x85   : > { %v422_v55 = vpop.permute.xlu1 %421 }
  0x86   : > { %v420_v58 = vpop.permute.xlu0 %419 }
  0x89   : > { %v426_v59 = vpop.permute.xlu1 %425 }
  0x8a   : > { %v4202_v13 = vpop.permute.xlu0 %423 }
  0x8d   : > { %v400_v60 = vpop.permute.xlu1 %399 }
  0x8e   : > { %v396_v1 = vpop.permute.xlu0 %395  ;;  %v444_v62 = vsel %vm435_vm0, %v3981_v12, %v400_v60 }
  0x8f   : > { %v438_v40 = vsel %vm435_vm0, %v3964_v5, %v396_v1  ;;  %v466_v4 = vsel %vm460_vm1, %v444_v62, %v4202_v13 }
  0x90   : > { %v462_v21 = vsel %vm460_vm1, %v438_v40, %v420_v58 }
  0x91   : > { %v402_v47 = vpop.permute.xlu1 %401 }
  0x92   : > { %v447_v63 = vsel %vm435_vm0, %v3971_v8, %v402_v47  ;;  %v398_v0 = vpop.permute.xlu0 %397 }
  0x93   : > { %v468_v7 = vsel %vm460_vm1, %v447_v63, %v426_v59  ;;  %v441_v14 = vsel %vm435_vm0, %v3960_v3, %v398_v0  ;;  %v2558_v63 = vrot.slane %v3975_v10, 2 }
  0x94   : > { %v3694_v18 = vcombine.low %v466_v4, %v468_v7  ;;  %v464_v24 = vsel %vm460_vm1, %v441_v14, %v422_v55  ;;  %v2559_v4 = vrot.slane %v3967_v6, 2  ;;  %v2561_v7 = vrot.slane %v3978_v11, 2 }
  0x95   : > { %v770_v25 = vpop.permute.xlu1 %769  ;;  %v3693_v26 = vcombine.low %v462_v21, %v464_v24 }
  0x96   : > { %v768_v27 = vpop.permute.xlu0 %767  ;;  %v4227_v30 = vsel %vm435_vm0, %v3960_v3, %v770_v25 }
  0x97   : > { %3792 = vmatprep.mubr.msk.bf16.mxu1 %vm545_vm2, %v3693_v26  ;;  %v4234_v35 = vsel %vm435_vm0, %v3964_v5, %v768_v27  ;;  %v2563_v26 = vrot.slane %v4097_v42, 2 }
  0x98   : > { %3793 = vmatmul.mubr.msk.bf16.vlgmr.msra.gmra.mxu1 %vm545_vm2, %v3694_v18  ;;  %v839_v5 = vsel %vm460_vm1, %v4234_v35, %v420_v58 }
  0x99   : > { %v774_v29 = vpop.permute.xlu1 %773  ;;  %3801 = vmatpush3.bf16.msra.mxu1 %v4108_v45  ;;  %v840_v45 = vsel %vm460_vm1, %v4227_v30, %v422_v55 }
  0x9a   : > { %v772_v31 = vpop.permute.xlu0 %771  ;;  %3802 = vmatprep.subr.bf16.mxu1 %v3868_v22  ;;  %v4245_v3 = vsel %vm435_vm0, %v3971_v8, %v774_v29 }
  0x9b   : > { %v4262_v48 = vsel %vm435_vm0, %v3981_v12, %v772_v31  ;;  %v842_v51 = vsel %vm460_vm1, %v4245_v3, %v426_v59  ;;  %v3874_v12 = vld [vmem:[%s5009_s3 + $0x18] sm:$0xff]  }
  0x9c   : > { %v841_v60 = vsel %vm460_vm1, %v4262_v48, %v4202_v13  ;;  %v3876_v13 = vld [vmem:[%s5009_s3 + $0x10] sm:$0xff]  }
  0x9d   : > { %v4241_v37 = vpop.permute.xlu1 %809  ;;  %3803 = vmatpush3.bf16.msra.mxu1 %v3868_v22 }
  0x9e   : > { %v850_v38 = vsel %vm545_vm2, %v840_v45, %v4241_v37  ;;  %v4251_v39 = vpop.permute.xlu0 %807  ;;  %3804 = vmatprep.subr.bf16.mxu1 %v3870_v34 }
  0x9f   : > { %v901_v44 = vrot.slane %v850_v38, %v4237_v36  ;;  %v848_v46 = vsel %vm545_vm2, %v839_v5, %v4251_v39 }
  0xa0   : > { %v877_v8 = vrot.slane %v848_v46, %v4237_v36 }
  0xa1   : > { %v902_v49 = vcombine.high %v901_v44, %v901_v44  ;;  %v4265_v50 = vrot.slane %v901_v44, %v4237_v36  ;;  %v4269_v52 = vpop.permute.xlu1 %813  ;;  %3805 = vmatpush3.bf16.msra.mxu1 %v3870_v34  ;;  %v3877_v44 = vld [vmem:[%s5009_s3 + $0x8] sm:$0xff]  }
  0xa2   : > { %v878_v53 = vcombine.high %v877_v8, %v877_v8  ;;  %v854_v54 = vsel %vm545_vm2, %v842_v51, %v4269_v52  ;;  %v4273_v32 = vpop.permute.xlu0 %811  ;;  %3806 = vmatprep.subr.bf16.mxu1 %v3872_v41  ;;  %v885_v24 = vrot.slane %v877_v8, %v4237_v36 }
  0xa3   : > { %v916_v33 = vrot.slane %v902_v49, %v4237_v36  ;;  %v917_v55 = vcombine.high %v4265_v50, %v4265_v50  ;;  %v949_v58 = vrot.slane %v854_v54, %v4237_v36  ;;  %v852_v40 = vsel %vm545_vm2, %v841_v60, %v4273_v32 }
  0xa4   : > { %v892_v59 = vrot.slane %v878_v53, %v4237_v36  ;;  %v1071_v10 = vunpack.i.h.s16 %v4265_v50  ;;  %v925_v25 = vrot.slane %v852_v40, %v4237_v36  ;;  %v893_v60 = vcombine.high %v885_v24, %v885_v24 }
  0xa5   : > { %v950_v1 = vcombine.high %v949_v58, %v949_v58  ;;  %v957_v62 = vrot.slane %v949_v58, %v4237_v36  ;;  %v4289_v47 = vpop.permute.xlu1 %427  ;;  %3807 = vmatpush3.bf16.msra.mxu1 %v3872_v41  ;;  %v918_v18 = vcombine.high %v916_v33, %v916_v33  ;;  %v1075_v21 = vunpack.i.h.s16 %v917_v55 }
  0xa6   : > { %v894_v0 = vcombine.high %v892_v59, %v892_v59  ;;  %v776_v2 = vpop.permute.xlu0 %775  ;;  %3808 = vmatprep.subr.bf16.mxu1 %v3874_v12  ;;  %v1073_v27 = vunpack.i.h.s16 %v916_v33  ;;  %v1163_v34 = vcombine.low %v885_v24, %v892_v59  ;;  %v926_v45 = vcombine.high %v925_v25, %v925_v25 }
  0xa7   : > { %v964_v14 = vrot.slane %v950_v1, %v4237_v36  ;;  %v965_v15 = vcombine.high %v957_v62, %v957_v62  ;;  %v933_v38 = vrot.slane %v925_v25, %v4237_v36  ;;  %v4306_v5 = vsel %vm435_vm0, %v4047_v56, %v776_v2 }
  0xa8   : > { %v3716_v46 = vpack.i.b16 %v4265_v50, %v894_v0  ;;  %v1085_v8 = vunpack.i.h.s16 %v957_v62  ;;  %v3719_v49 = vpack.i.b16 %v918_v18, %v1075_v21  ;;  %v843_v51 = vsel %vm460_vm1, %v4306_v5, %v4289_v47 }
  0xa9   : > { %v966_v22 = vcombine.high %v964_v14, %v964_v14  ;;  %v1087_v23 = vunpack.i.h.s16 %v964_v14  ;;  %v1089_v29 = vunpack.i.h.s16 %v965_v15  ;;  %v778_v31 = vpop.permute.xlu1 %777  ;;  %3809 = vmatpush3.bf16.msra.mxu1 %v3874_v12  ;;  %v940_v12 = vrot.slane %v926_v45, %v4237_v36 }
  0xaa   : > { %v4308_v41 = vpop.permute.xlu0 %815  ;;  %3810 = vmatprep.subr.bf16.mxu1 %v3876_v13  ;;  %v3718_v59 = vpack.i.b16 %v917_v55, %v1073_v27  ;;  %v2562_v50 = vrot.slane %v4063_v9, 2  ;;  %v3717_v0 = vpack.i.b16 %v916_v33, %v1071_v10  ;;  %v941_v2 = vcombine.high %v933_v38, %v933_v38  ;;  %v3878_v55 = vld [vmem:[%s5009_s3] sm:$0xff]  }
  0xab   : > { %v3722_v53 = vpack.i.b16 %v965_v15, %v1087_v23  ;;  %v3723_v54 = vpack.i.b16 %v966_v22, %v1089_v29  ;;  %v856_v58 = vsel %vm545_vm2, %v843_v51, %v4308_v41  ;;  %v942_v18 = vcombine.high %v940_v12, %v940_v12 }
  0xac   : > { %v973_v1 = vrot.slane %v856_v58, %v4237_v36  ;;  %v1164_v24 = vcombine.low %v893_v60, %v3716_v46  ;;  %v1173_v25 = vrot.slane %v1163_v34, %v4237_v36  ;;  %v3721_v33 = vpack.i.b16 %v964_v14, %v1085_v8 }
  0xad   : > { %v2543_v40 = vpop.permute.xlu1 %2542  ;;  %3811 = vmatpush3.bf16.msra.mxu1 %v3876_v13  ;;  %v1214_v10 = vcombine.low %v3722_v53, %v3723_v54  ;;  %v1166_v22 = vcombine.low %v3719_v49, %v933_v38  ;;  %v3720_v29 = vpack.i.b16 %v957_v62, %v942_v18  ;;  %v1165_v46 = vcombine.low %v3717_v0, %v3718_v59 }
  0xae   : > { %v2567_v15 = vsel %vm460_vm1, %v4234_v35, %v2543_v40  ;;  %v4324_v21 = vpop.permute.xlu0 %429  ;;  %3812 = vmatprep.subr.bf16.mxu1 %v3877_v44  ;;  %v974_v27 = vcombine.high %v973_v1, %v973_v1  ;;  %v4333_v35 = vrot.slane %v973_v1, %v4237_v36  ;;  %v1212_v58 = vcombine.low %v940_v12, %v941_v2 }
  0xaf   : > { %v2582_v13 = vsel %vm545_vm2, %v2567_v15, %v4251_v39  ;;  %v4340_v34 = vsel %vm435_vm0, %v4052_v61, %v778_v31  ;;  %v1180_v8 = vrot.slane %v1164_v24, %v4237_v36  ;;  %v1194_v31 = vrot.slane %v1166_v22, %v4237_v36 }
  0xb0   : > { %v2598_v23 = vcombine.low %v2582_v13, %v2558_v63  ;;  %v4336_v45 = vrot.slane %v974_v27, %v4237_v36  ;;  %v1236_v49 = vrot.slane %v1214_v10, %v4237_v36  ;;  %v1213_v54 = vcombine.low %v3720_v29, %v3721_v33 }
  0xb1   : > { %v2547_v51 = vpop.permute.xlu1 %2546  ;;  %3813 = vmatpush3.bf16.msra.mxu1 %v3877_v44  ;;  %v1187_v60 = vrot.slane %v1165_v46, %v4237_v36  ;;  %v844_v40 = vsel %vm460_vm1, %v4340_v34, %v4324_v21  ;;  %v4374_v18 = vcombine.low %v1173_v25, %v1180_v8 }
  0xb2   : > { %v2605_v39 = vrot.slane %v2598_v23, %v4237_v36  ;;  %v2571_v63 = vsel %vm460_vm1, %v4262_v48, %v2547_v51  ;;  %v2545_v62 = vpop.permute.xlu0 %2544  ;;  %3814 = vmatprep.subr.bf16.mxu1 %v3878_v55  ;;  %v1215_v14 = vcombine.low %v4333_v35, %v4336_v45  ;;  %v990_v0 = vcombine.high %v4336_v45, %v4336_v45 }
  0xb3   : > { %v2584_v38 = vsel %vm545_vm2, %v2571_v63, %v4273_v32  ;;  %v2569_v44 = vsel %vm460_vm1, %v4227_v30, %v2545_v62  ;;  %v1222_v30 = vrot.slane %v1212_v58, %v4237_v36  ;;  %v1229_v13 = vrot.slane %v1213_v54, %v4237_v36 }
  0xb4   : > { %v2606_v53 = vcombine.high %v2605_v39, %v2605_v39  ;;  %v2646_v48 = vcombine.low %v2584_v38, %v2560_v19  ;;  %v2613_v12 = vrot.slane %v2605_v39, %v4237_v36  ;;  %v2583_v59 = vsel %vm545_vm2, %v2569_v44, %v4241_v37 }
  0xb5   : > { %v404_v32 = vpop.permute.xlu1 %403  ;;  %3815 = vmatpush3.bf16.msra.mxu1 %v3878_v55  ;;  %v1243_v1 = vrot.slane %v1215_v14, %v4237_v36  ;;  %v2622_v37 = vcombine.low %v2583_v59, %v2559_v4  ;;  %v1196_v4 = vcombine.low %v1187_v60, %v1194_v31  ;;  %v1203_v60 = vrot.slane %v4374_v18, %v4237_v36 }
  0xb6   : > { %v2653_v16 = vrot.slane %v2646_v48, %v4237_v36  ;;  %v4366_v19 = vpop.permute.xlu0 %817  ;;  %v2620_v15 = vrot.slane %v2606_v53, %v4237_v36  ;;  %v450_v24 = vsel %vm435_vm0, %v4047_v56, %v404_v32  ;;  %v2621_v33 = vcombine.high %v2613_v12, %v2613_v12 }
  0xb7   : > { %v858_v2 = vsel %vm545_vm2, %v844_v40, %v4366_v19  ;;  %v2629_v10 = vrot.slane %v2622_v37, %v4237_v36  ;;  %v1245_v22 = vcombine.low %v1236_v49, %v1243_v1  ;;  %v470_v46 = vsel %vm460_vm1, %v450_v24, %v4289_v47 }
  0xb8   : > { %v2654_v55 = vcombine.high %v2653_v16, %v2653_v16  ;;  %v997_v27 = vrot.slane %v858_v2, %v4237_v36  ;;  %v4383_v23 = vrot.slane %v2653_v16, %v4237_v36  ;;  %v2810_v14 = vcombine.low %v2613_v12, %v2620_v15 }
  0xb9   : > { %v780_v6 = vpop.permute.xlu1 %779  ;;  %v2630_v51 = vcombine.high %v2629_v10, %v2629_v10  ;;  %v2637_v56 = vrot.slane %v2629_v10, %v4237_v36  ;;  %v989_v32 = vcombine.high %v4333_v35, %v4333_v35  ;;  %v4401_v12 = vrot.slane %v1245_v22, %v4237_v36 }
  0xba   : > { %v998_v25 = vcombine.high %v997_v27, %v997_v27  ;;  %v1005_v29 = vrot.slane %v997_v27, %v4237_v36  ;;  %v406_v45 = vpop.permute.xlu0 %405  ;;  %v2668_v39 = vrot.slane %v2654_v55, %v4237_v36  ;;  %v1210_v16 = vrot.slane %v1196_v4, %v4237_v36 }
  0xbb   : > { %v453_v58 = vsel %vm435_vm0, %v4052_v61, %v406_v45  ;;  %v2644_v38 = vrot.slane %v2630_v51, %v4237_v36  ;;  %v2645_v44 = vcombine.high %v2637_v56, %v2637_v56  ;;  %v2811_v49 = vcombine.low %v2621_v33, %v2637_v56 }
  0xbc   : > { %v1012_v63 = vrot.slane %v998_v25, %v4237_v36  ;;  %v1099_v62 = vunpack.i.h.s16 %v1005_v29  ;;  %v472_v8 = vsel %vm460_vm1, %v453_v58, %v4324_v21  ;;  %v1013_v53 = vcombine.high %v1005_v29, %v1005_v29 }
  0xbd   : > { %v408_v31 = vpop.permute.xlu1 %407  ;;  %v3724_v47 = vpack.i.b16 %v1005_v29, %v990_v0  ;;  %v3695_v54 = vcombine.low %v470_v46, %v472_v8  ;;  %v4396_v61 = vcombine.low %v1222_v30, %v1229_v13  ;;  %v2812_v21 = vcombine.low %v2644_v38, %v2645_v44 }
  0xbe   : > { %v1101_v48 = vunpack.i.h.s16 %v1012_v63  ;;  %v782_v59 = vpop.permute.xlu0 %781  ;;  %v2813_v40 = vcombine.low %v4383_v23, %v2668_v39  ;;  %v3725_v0 = vpack.i.b16 %v1012_v63, %v1099_v62  ;;  %v4410_v30 = vsel %vm435_vm0, %v4100_v43, %v780_v6 }
  0xbf   : > { %3796 = vmatprep.mubr.msk.bf16.mxu1 %vm545_vm2, %v3695_v54  ;;  %v2820_v37 = vrot.slane %v2810_v14, %v4237_v36  ;;  %v2827_v2 = vrot.slane %v2811_v49, %v4237_v36  ;;  %v1261_v15 = vcombine.low %v989_v32, %v3724_v47  ;;  %v456_v18 = vsel %vm435_vm0, %v4100_v43, %v408_v31 }
  0xc0   : > { %v3726_v1 = vpack.i.b16 %v1013_v53, %v1101_v48  ;;  %v2834_v24 = vrot.slane %v2812_v21, %v4237_v36  ;;  %v2841_v27 = vrot.slane %v2813_v40, %v4237_v36  ;;  %v4420_v13 = vsel %vm435_vm0, %v4127_v20, %v782_v59 }
  0xc1   : > { %v432_v35 = vpop.permute.xlu1 %431  ;;  %v1014_v33 = vcombine.high %v1012_v63, %v1012_v63  ;;  %v2843_v10 = vcombine.high %v2820_v37, %v2827_v2  ;;  %v2842_v6 = vcombine.low %v2820_v37, %v2827_v2  ;;  %v1103_v4 = vunpack.i.h.s16 %v1013_v53 }
  0xc2   : > { %v410_v55 = vpop.permute.xlu0 %409  ;;  %v2845_v22 = vcombine.high %v2834_v24, %v2841_v27  ;;  %v2844_v25 = vcombine.low %v2834_v24, %v2841_v27  ;;  %v1262_v29 = vcombine.low %v3725_v0, %v3726_v1  ;;  %v845_v45 = vsel %vm460_vm1, %v4410_v30, %v432_v35 }
  0xc3   : > { %v459_v43 = vsel %vm435_vm0, %v4127_v20, %v410_v55  ;;  %v2859_v56 = vrot.slane %v2843_v10, %v4237_v36  ;;  %v2852_v46 = vrot.slane %v2842_v6, %v4237_v36  ;;  %v474_v38 = vsel %vm460_vm1, %v456_v18, %v432_v35 }
  0xc4   : > { %v2873_v63 = vrot.slane %v2845_v22, %v4237_v36  ;;  %v2866_v62 = vrot.slane %v2844_v25, %v4237_v36  ;;  %v1278_v14 = vrot.slane %v1262_v29, %v4237_v36  ;;  %v1271_v8 = vrot.slane %v1261_v15, %v4237_v36 }
  0xc5   : > { %v4426_v51 = vpop.permute.xlu1 %819  ;;  %v3727_v31 = vpack.i.b16 %v1014_v33, %v1103_v4  ;;  %v1211_v32 = vcombine.low %v1203_v60, %v1210_v16  ;;  %v2565_v35 = vrot.slane %v4153_v17, 2  ;;  %v1252_v37 = vrot.slane %v4396_v61, %v4237_v36 }
  0xc6   : > { %v860_v58 = vsel %vm545_vm2, %v845_v45, %v4426_v51  ;;  %v434_v39 = vpop.permute.xlu0 %433  ;;  %v2875_v53 = vcombine.low %v2859_v56, %v2873_v63  ;;  %v2874_v48 = vcombine.low %v2852_v46, %v2866_v62  ;;  %v4440_v1 = vcombine.low %v1271_v8, %v1278_v14 }
  0xc7   : > { %v1021_v20 = vrot.slane %v860_v58, %v4237_v36  ;;  %v476_v44 = vsel %vm460_vm1, %v459_v43, %v434_v39  ;;  %v846_v21 = vsel %vm460_vm1, %v4420_v13, %v434_v39  ;;  %v2669_v18 = vcombine.high %v4383_v23, %v4383_v23 }
  0xc8   : > { %v3696_v49 = vcombine.low %v474_v38, %v476_v44  ;;  %3751 = vmatprep.mubr.msk.bf16.mxu0 %vm435_vm0, %v2875_v53  ;;  %v2564_v17 = vrot.slane %v4134_v57, 2  ;;  %v1260_v33 = vcombine.low %v1252_v37, %v4401_v12 }
  0xc9   : > { %v1022_v47 = vcombine.high %v1021_v20, %v1021_v20  ;;  %v1029_v54 = vrot.slane %v1021_v20, %v4237_v36  ;;  %v2549_v59 = vpop.permute.xlu1 %2548  ;;  %3113 = vmatmul.mubr.bf16.vlgmr.msra.gmra.mxu0 %v2874_v48 }
  0xca   : > { %v2573_v40 = vsel %vm460_vm1, %v4245_v3, %v2549_v59  ;;  %3797 = vmatmul.mubr.msk.bf16.gmra.mxu1 %vm545_vm2, %v3696_v49  ;;  %v822_v0 = vpop.permute.xlu0 %821 }
  0xcb   : > { %v1036_v60 = vrot.slane %v1022_v47, %v4237_v36  ;;  %v1037_v16 = vcombine.high %v1029_v54, %v1029_v54  ;;  %v1263_v2 = vcombine.low %v3727_v31, %v1029_v54  ;;  %v2585_v15 = vsel %vm545_vm2, %v2573_v40, %v4269_v52  ;;  %3816 = vmatprep.mubr.bf16.mxu1 %v1211_v32 }
  0xcc   : > { %v2670_v3 = vcombine.low %v2585_v15, %v2561_v7  ;;  %v862_v55 = vsel %vm545_vm2, %v846_v21, %v822_v0  ;;  %v1301_v52 = vrot.slane %v4440_v1, %v4237_v36 }
  0xcd   : > { %v1038_v61 = vcombine.high %v1036_v60, %v1036_v60  ;;  %v1045_v24 = vrot.slane %v862_v55, %v4237_v36  ;;  %v2553_v27 = vpop.permute.xlu1 %2552  ;;  %v1264_v10 = vcombine.low %v1036_v60, %v1037_v16  ;;  %v1285_v23 = vrot.slane %v1263_v2, %v4237_v36 }
  0xce   : > { %v2677_v11 = vrot.slane %v2670_v3, %v4237_v36  ;;  %v2577_v7 = vsel %vm460_vm1, %v4340_v34, %v2553_v27  ;;  %v2551_v6 = vpop.permute.xlu0 %2550 }
  0xcf   : > { %v1046_v4 = vcombine.high %v1045_v24, %v1045_v24  ;;  %v1053_v57 = vrot.slane %v1045_v24, %v4237_v36  ;;  %v2587_v22 = vsel %vm545_vm2, %v2577_v7, %v4366_v19  ;;  %v2575_v12 = vsel %vm460_vm1, %v4306_v5, %v2551_v6 }
  0xd0   : > { %v2678_v25 = vcombine.high %v2677_v11, %v2677_v11  ;;  %v2685_v29 = vrot.slane %v2677_v11, %v4237_v36  ;;  %v2718_v45 = vcombine.low %v2587_v22, %v2563_v26  ;;  %v2586_v43 = vsel %vm545_vm2, %v2575_v12, %v4308_v41 }
  0xd1   : > { %v1060_v34 = vrot.slane %v1046_v4, %v4237_v36  ;;  %v1061_v56 = vcombine.high %v1053_v57, %v1053_v57  ;;  %v1113_v46 = vunpack.i.h.s16 %v1053_v57  ;;  %v3728_v58 = vpack.i.b16 %v1053_v57, %v1038_v61  ;;  %v2557_v62 = vpop.permute.xlu1 %2556 }
  0xd2   : > { %v2692_v39 = vrot.slane %v2678_v25, %v4237_v36  ;;  %v2693_v19 = vcombine.high %v2685_v29, %v2685_v29  ;;  %v2876_v63 = vcombine.low %v2669_v18, %v2685_v29  ;;  %v2725_v5 = vrot.slane %v2718_v45, %v4237_v36  ;;  %3817 = vmatmul.mubr.bf16.vlgmr.msra.gmra.mxu1 %v1260_v33  ;;  %v2555_v14 = vpop.permute.xlu0 %2554 }
  0xd3   : > { %v1062_v38 = vcombine.high %v1060_v34, %v1060_v34  ;;  %v1115_v42 = vunpack.i.h.s16 %v1060_v34  ;;  %v1117_v26 = vunpack.i.h.s16 %v1061_v56  ;;  %v3729_v20 = vpack.i.b16 %v1060_v34, %v1113_v46 }
  0xd4   : > { %v2877_v44 = vcombine.low %v2692_v39, %v2693_v19  ;;  %v2886_v41 = vrot.slane %v2876_v63, %v4237_v36  ;;  %v2726_v8 = vcombine.high %v2725_v5, %v2725_v5  ;;  %v2733_v31 = vrot.slane %v2725_v5, %v4237_v36 }
  0xd5   : > { %v3730_v49 = vpack.i.b16 %v1061_v56, %v1115_v42  ;;  %v2694_v53 = vcombine.low %v2586_v43, %v2562_v50  ;;  %v2581_v48 = vsel %vm460_vm1, %v4420_v13, %v2557_v62  ;;  %v2579_v47 = vsel %vm460_vm1, %v4410_v30, %v2555_v14 }
  0xd6   : > { %v2740_v54 = vrot.slane %v2726_v8, %v4237_v36  ;;  %v2741_v59 = vcombine.high %v2733_v31, %v2733_v31  ;;  %v2589_v32 = vsel %vm545_vm2, %v2581_v48, %v822_v0  ;;  %v2588_v21 = vsel %vm545_vm2, %v2579_v47, %v4426_v51 }
  0xd7   : > { %v2701_v40 = vrot.slane %v2694_v53, %v4237_v36  ;;  %v2766_v37 = vcombine.low %v2589_v32, %v2565_v35  ;;  %v2742_v60 = vcombine.low %v2588_v21, %v2564_v17  ;;  %v1292_v9 = vrot.slane %v1264_v10, %v4237_v36  ;;  %v4530_v21 = vld [vmem:[%s5008_s2] ss:$0 sm:$0xff] }
  0xd8   : > { %v2942_v50 = vcombine.low %v2740_v54, %v2741_v59  ;;  %v3731_v16 = vpack.i.b16 %v1062_v38, %v1117_v26  ;;  %v1310_v13 = vcombine.low %v3728_v58, %v3729_v20  ;;  %v2893_v2 = vrot.slane %v2877_v44, %v4237_v36 }
  0xd9   : > { %v2702_v30 = vcombine.high %v2701_v40, %v2701_v40  ;;  %v2709_v15 = vrot.slane %v2701_v40, %v4237_v36  ;;  %v2773_v18 = vrot.slane %v2766_v37, %v4237_v36  ;;  %v2749_v0 = vrot.slane %v2742_v60, %v4237_v36 }
  0xda   : > { %v1294_v3 = vcombine.low %v1285_v23, %v1292_v9  ;;  %v1311_v51 = vcombine.low %v3730_v49, %v3731_v16  ;;  %v1318_v55 = vrot.slane %v1310_v13, %v4237_v36  ;;  %v2909_v35 = vcombine.high %v2886_v41, %v2893_v2 }
  0xdb   : > { %v2716_v17 = vrot.slane %v2702_v30, %v4237_v36  ;;  %v2717_v61 = vcombine.high %v2709_v15, %v2709_v15  ;;  %v2774_v24 = vcombine.high %v2773_v18, %v2773_v18  ;;  %v2781_v27 = vrot.slane %v2773_v18, %v4237_v36 }
  0xdc   : > { %v2750_v33 = vcombine.high %v2749_v0, %v2749_v0  ;;  %v2757_v10 = vrot.slane %v2749_v0, %v4237_v36  ;;  %v1308_v11 = vrot.slane %v1294_v3, %v4237_v36  ;;  %v1325_v7 = vrot.slane %v1311_v51, %v4237_v36 }
  0xdd   : > { %v2878_v6 = vcombine.low %v2709_v15, %v2716_v17  ;;  %v2879_v4 = vcombine.low %v2717_v61, %v2733_v31  ;;  %v2788_v23 = vrot.slane %v2774_v24, %v4237_v36  ;;  %v2789_v57 = vcombine.high %v2781_v27, %v2781_v27 }
  0xde   : > { %v2764_v22 = vrot.slane %v2750_v33, %v4237_v36  ;;  %v2765_v12 = vcombine.high %v2757_v10, %v2757_v10  ;;  %v1309_v25 = vcombine.low %v1301_v52, %v1308_v11  ;;  %v1326_v29 = vcombine.low %v1318_v55, %v1325_v7 }
  0xdf   : > { %v2900_v45 = vrot.slane %v2878_v6, %v4237_v36  ;;  %v2945_v43 = vcombine.low %v2788_v23, %v2789_v57  ;;  %v2907_v34 = vrot.slane %v2879_v4, %v4237_v36  ;;  %v2908_v39 = vcombine.low %v2886_v41, %v2893_v2 }
  0xe0   : > { %v2943_v56 = vcombine.low %v2757_v10, %v2764_v22  ;;  %v2944_v46 = vcombine.low %v2765_v12, %v2781_v27  ;;  %3820 = vmatprep.mubr.bf16.mxu1 %v1309_v25  ;;  %v1333_v58 = vrot.slane %v1326_v29, %v4237_v36  ;;  %v2952_v1 = vrot.slane %v2942_v50, %v4237_v36 }
  0xe1   : > { %v2911_v19 = vcombine.high %v2900_v45, %v2907_v34  ;;  %v2910_v63 = vcombine.low %v2900_v45, %v2907_v34  ;;  %v2973_v5 = vrot.slane %v2945_v43, %v4237_v36  ;;  %v2925_v14 = vrot.slane %v2909_v35, %v4237_v36 }
  0xe2   : > { %v2959_v62 = vrot.slane %v2943_v56, %v4237_v36  ;;  %3821 = vmatmul.mubr.bf16.gmra.mxu1 %v1333_v58  ;;  %v2966_v52 = vrot.slane %v2944_v46, %v4237_v36  ;;  %v2918_v42 = vrot.slane %v2908_v39, %v4237_v36 }
  0xe3   : > { %v2939_v38 = vrot.slane %v2911_v19, %v4237_v36  ;;  %v2932_v26 = vrot.slane %v2910_v63, %v4237_v36 }
  0xe4   : > { %v2975_v20 = vcombine.high %v2952_v1, %v2959_v62  ;;  %v2977_v44 = vcombine.high %v2966_v52, %v2973_v5  ;;  %v2974_v41 = vcombine.low %v2952_v1, %v2959_v62  ;;  %v2976_v8 = vcombine.low %v2966_v52, %v2973_v5 }
  0xe5   : > { %v2941_v31 = vcombine.low %v2925_v14, %v2939_v38  ;;  %v2940_v49 = vcombine.low %v2918_v42, %v2932_v26  ;;  %v3892_v1 = vmov 1983009808   ;;  %v3740_v14 = vld [vmem:[%s5010_s4] ss:$0 sm:$0xff] }
  0xe6   : > { %v2991_v53 = vrot.slane %v2975_v20, %v4237_v36  ;;  %v3005_v48 = vrot.slane %v2977_v44, %v4237_v36  ;;  %v2984_v47 = vrot.slane %v2974_v41, %v4237_v36  ;;  %v2998_v54 = vrot.slane %v2976_v8, %v4237_v36  ;;  %v3754_v44 = vld [vmem:[%s5012_s6] ss:$0 sm:$0xff] }
  0xe7   : > { %3752 = vmatprep.mubr.msk.bf16.mxu0 %vm435_vm0, %v2941_v31  ;;  %v3145_v52 = vunpack.c.l.s4 %v3892_v1  ;;  %v1862_v42 = vcombine.high %v3740_v14, %v3740_v14  ;;  %v1869_v26 = vrot.slane %v3740_v14, %v4237_v36  ;;  %v3275_v31 = vcombine.high %v3754_v44, %v3754_v44 }
  0xe8   : > { %3121 = vmatmul.mubr.bf16.gmra.mxu0 %v2940_v49  ;;  %v3007_v59 = vcombine.low %v2991_v53, %v3005_v48  ;;  %v3006_v32 = vcombine.low %v2984_v47, %v2998_v54 }
  0xe9   : > { %v3146_v38 = vunpack.c.0.s8 %v3145_v52  ;;  %v1876_v41 = vrot.slane %v1862_v42, %v4237_v36  ;;  %v1877_v8 = vcombine.high %v1869_v26, %v1869_v26  ;;  %v4560_v53 = vrot.slane %v1869_v26, %v4237_v36 }
  0xea   : > { %3753 = vmatprep.mubr.msk.bf16.mxu0 %vm435_vm0, %v3007_v59 }
  0xeb   : > { %v4550_v20 = vsub.s32 %v3146_v38, %v4221_v28  ;;  %v4563_v48 = vrot.slane %v1876_v41, %v4237_v36  ;;  %v4566_v28 = vrot.slane %v1877_v8, %v4237_v36 }
  0xed   : > { %v4557_v49 = vrot.slane %v3754_v44, %v4550_v20 }
  0xf0   : > { %3129 = vmatmul.mubr.bf16.gmra.mxu0 %v3006_v32  ;;  %v1878_v32 = vcombine.high %v1876_v41, %v1876_v41 }
 0x158   : > { %v3794_v40 = vpop.f32.mrf.mxu1 }
 0x159   : > { %v632_v37 = vadd.f32 %v3794_v40, %v4530_v21 }
 0x15a   : > { %v592_v60 = vpop.f32.mrf.mxu1 }
 0x15b   : > { %v640_v9 = vmax.f32 %v632_v37, 0.0  ;;  %v630_v50 = vadd.f32 %v4530_v21, %v592_v60  ;;  %v4571_v60 = vrot.slane %v3275_v31, %v4550_v20 }
 0x15c   : > { %v3795_v16 = vpop.f32.mrf.mxu1 }
 0x15d   : > { %v661_v13 = vsel %vm646_vm3, %v640_v9, -inf  ;;  %v638_v2 = vmax.f32 %v630_v50, 0.0  ;;  %v633_v30 = vadd.f32 %v3795_v16, %v4530_v21  ;;  %v4575_v9 = vcombine.high %v4557_v49, %v4557_v49 }
 0x15e   : > { %v662_v15 = vrot.slane %v661_v13, 4  ;;  %v595_v18 = vpop.f32.mrf.mxu1 }
 0x15f   : > { %v647_v0 = vsel %vm646_vm3, %v638_v2, -inf  ;;  %v641_v3 = vmax.f32 %v633_v30, 0.0  ;;  %v631_v51 = vadd.f32 %v4530_v21, %v595_v18  ;;  %v4580_v30 = vcombine.high %v4560_v53, %v4560_v53 }
 0x160   : > { %v663_v55 = vmax.f32 %v661_v13, %v662_v15  ;;  %v648_v35 = vrot.slane %v647_v0, 4  ;;  %v4584_v15 = vcombine.high %v4563_v48, %v4563_v48 }
 0x161   : > { %v668_v17 = vsel %vm646_vm3, %v641_v3, -inf  ;;  %v639_v61 = vmax.f32 %v631_v51, 0.0 }
 0x162   : > { %v649_v24 = vmax.f32 %v647_v0, %v648_v35  ;;  %v669_v27 = vrot.slane %v668_v17, 4  ;;  %v664_v33 = vrot.slane %v663_v55, 2 }
 0x163   : > { %v654_v10 = vsel %vm646_vm3, %v639_v61, -inf }
 0x164   : > { %v650_v11 = vrot.slane %v649_v24, 2  ;;  %v670_v7 = vmax.f32 %v668_v17, %v669_v27  ;;  %v655_v6 = vrot.slane %v654_v10, 4  ;;  %v665_v22 = vmax.f32 %v663_v55, %v664_v33 }
 0x165   : > { %v4590_v55 = vcombine.high %v4566_v28, %v4566_v28  ;;  %v4595_v27 = vrot.slane %v1878_v32, %v4237_v36 }
 0x166   : > { %v651_v4 = vmax.f32 %v649_v24, %v650_v11  ;;  %v671_v23 = vrot.slane %v670_v7, 2  ;;  %v656_v57 = vmax.f32 %v654_v10, %v655_v6  ;;  %v666_v43 = vrot.slane %v665_v22, 1 }
 0x168   : > { %v672_v12 = vmax.f32 %v670_v7, %v671_v23  ;;  %v657_v25 = vrot.slane %v656_v57, 2  ;;  %v652_v29 = vrot.slane %v651_v4, 1  ;;  %v667_v39 = vmax.f32 %v665_v22, %v666_v43 }
 0x16a   : > { %v658_v45 = vmax.f32 %v656_v57, %v657_v25  ;;  %v673_v34 = vrot.slane %v672_v12, 1  ;;  %v653_v46 = vmax.f32 %v651_v4, %v652_v29 }
 0x16c   : > { %v659_v56 = vrot.slane %v658_v45, 1  ;;  %v674_v19 = vmax.f32 %v672_v12, %v673_v34 }
 0x16e   : > { %v660_v58 = vmax.f32 %v658_v45, %v659_v56 }
 0x170   : > { %v3568_v63 = vsel %vm3567_vm4, %v660_v58, %v653_v46 }
 0x171   : > { %v3570_v5 = vsel %vm3569_vm5, %v667_v39, %v3568_v63 }
 0x172   : > { %v4543_v62 = vsel %vm3571_vm6, %v674_v19, %v3570_v5 }
 0x189   : > { %v3114_v54 = vpop.f32.mrf.mxu0 }
 0x18a   : > { %v3798_v47 = vpop.f32.mrf.mxu1  ;;  %v3143_v40 = vcombine.high %v3114_v54, %v3114_v54  ;;  %v3150_v37 = vrot.slane %v3114_v54, %v4550_v20 }
 0x18b   : > { %v636_v59 = vadd.f32 %v3798_v47, %v4530_v21  ;;  %v3116_v13 = vpop.f32.mrf.mxu0 }
 0x18c   : > { %v608_v50 = vpop.f32.mrf.mxu1  ;;  %v3157_v18 = vrot.slane %v3143_v40, %v4550_v20  ;;  %v3158_v0 = vcombine.high %v3150_v37, %v3150_v37  ;;  %v3294_v3 = vadd.f32 %v4557_v49, %v3150_v37 }
 0x18d   : > { %v644_v16 = vmax.f32 %v636_v59, 0.0  ;;  %v634_v2 = vadd.f32 %v4530_v21, %v608_v50  ;;  %v3117_v61 = vpop.f32.mrf.mxu0 }
 0x18e   : > { %v3799_v51 = vpop.f32.mrf.mxu1  ;;  %v3159_v33 = vcombine.high %v3157_v18, %v3157_v18  ;;  %v3295_v10 = vadd.f32 %v4575_v9, %v3158_v0  ;;  %v3296_v11 = vadd.f32 %v4571_v60, %v3157_v18  ;;  %v3318_v7 = vmax.f32 %v3294_v3, 0.0 }
 0x18f   : > { %v689_v35 = vsel %vm646_vm3, %v644_v16, -inf  ;;  %v642_v17 = vmax.f32 %v634_v2, 0.0  ;;  %v637_v24 = vadd.f32 %v3799_v51, %v4530_v21  ;;  %v3160_v57 = vcombine.high %v3117_v61, %v3117_v61  ;;  %v3119_v12 = vpop.f32.mrf.mxu0 }
 0x190   : > { %v611_v6 = vpop.f32.mrf.mxu1  ;;  %v690_v4 = vrot.slane %v689_v35, 4  ;;  %v3167_v22 = vrot.slane %v3117_v61, %v4550_v20  ;;  %v3297_v25 = vadd.f32 %v4557_v49, %v3159_v33  ;;  %v3319_v29 = vmax.f32 %v3295_v10, 0.0 }
 0x191   : > { %v675_v23 = vsel %vm646_vm3, %v642_v17, -inf  ;;  %v3320_v45 = vmax.f32 %v3296_v11, 0.0  ;;  %v3174_v56 = vrot.slane %v3160_v57, %v4550_v20  ;;  %v645_v8 = vmax.f32 %v637_v24, 0.0 }
 0x192   : > { %v676_v43 = vrot.slane %v675_v23, 4  ;;  %v691_v34 = vmax.f32 %v689_v35, %v690_v4  ;;  %v3175_v46 = vcombine.high %v3167_v22, %v3167_v22  ;;  %v3298_v58 = vadd.f32 %v4575_v9, %v3167_v22  ;;  %v3818_v1 = vpop.f32.mrf.mxu1 }
 0x193   : > { %v3366_v39 = vcombine.low %v3318_v7, %v3319_v29  ;;  %v3380_v19 = vrot.slane %v3320_v45, %v4550_v20  ;;  %v3321_v5 = vmax.f32 %v3297_v25, 0.0  ;;  %v3176_v14 = vcombine.high %v3174_v56, %v3174_v56 }
 0x194   : > { %v677_v63 = vmax.f32 %v675_v23, %v676_v43  ;;  %v692_v52 = vrot.slane %v691_v34, 2  ;;  %v3299_v38 = vadd.f32 %v4571_v60, %v3175_v46  ;;  %v3300_v42 = vadd.f32 %v4557_v49, %v3174_v56  ;;  %v4610_v16 = vpop.f32.mrf.mxu1 }
 0x195   : > { %v3373_v26 = vrot.slane %v3366_v39, %v4550_v20  ;;  %v3322_v41 = vmax.f32 %v3298_v58, 0.0  ;;  %v3301_v47 = vadd.f32 %v4575_v9, %v3176_v14  ;;  %v696_v50 = vsel %vm646_vm3, %v645_v8, -inf }
 0x196   : > { %v678_v44 = vrot.slane %v677_v63, 2  ;;  %v693_v31 = vmax.f32 %v691_v34, %v692_v52  ;;  %v3323_v54 = vmax.f32 %v3299_v38, 0.0  ;;  %v3324_v59 = vmax.f32 %v3300_v42, 0.0  ;;  %v4622_v57 = vpop.f32.mrf.mxu1 }
 0x197   : > { %v3381_v32 = vcombine.low %v3373_v26, %v3380_v19  ;;  %v3382_v37 = vcombine.low %v3321_v5, %v3322_v41  ;;  %v3325_v2 = vmax.f32 %v3301_v47, 0.0  ;;  %v697_v0 = vrot.slane %v696_v50, 4 }
 0x198   : > { %v679_v40 = vmax.f32 %v677_v63, %v678_v44  ;;  %v694_v13 = vrot.slane %v693_v31, 1  ;;  %v3396_v18 = vrot.slane %v3323_v54, %v4550_v20  ;;  %v635_v17 = vadd.f32 %v4530_v21, %v611_v6 }
 0x199   : > { %v3503_v3 = vsel %vm3502_vm7, %v3381_v32, -inf  ;;  %v3389_v35 = vrot.slane %v3382_v37, %v4550_v20  ;;  %v4618_v33 = vcombine.low %v3324_v59, %v3325_v2  ;;  %v698_v10 = vmax.f32 %v696_v50, %v697_v0 }
 0x19a   : > { %v680_v51 = vrot.slane %v679_v40, 1  ;;  %v3504_v61 = vrot.slane %v3503_v3, 4  ;;  %v4616_v24 = vmax.f32 %v693_v31, %v694_v13  ;;  %v643_v4 = vmax.f32 %v635_v17, 0.0 }
 0x19b   : > { %v3397_v7 = vcombine.low %v3389_v35, %v3396_v18  ;;  %v1555_v23 = vcombine.high %v3818_v1, %v3818_v1  ;;  %v699_v12 = vrot.slane %v698_v10, 2  ;;  %v1562_v25 = vrot.slane %v3818_v1, %v4237_v36  ;;  %v4636_v1 = vpop.f32.mrf.mxu1 }
 0x19c   : > { %v4620_v11 = vmax.f32 %v679_v40, %v680_v51  ;;  %v3505_v22 = vmax.f32 %v3503_v3, %v3504_v61  ;;  %v1457_v21 = vcombine.high %v4610_v16, %v4610_v16  ;;  %v682_v29 = vsel %vm646_vm3, %v643_v4, -inf }
 0x19d   : > { %v3510_v6 = vsel %vm3502_vm7, %v3397_v7, -inf  ;;  %v1569_v45 = vrot.slane %v1555_v23, %v4237_v36  ;;  %v4632_v43 = vrot.slane %v4610_v16, %v4237_v36  ;;  %v700_v46 = vmax.f32 %v698_v10, %v699_v12 }
 0x19e   : > { %v3506_v34 = vrot.slane %v3505_v22, 2  ;;  %v3511_v56 = vrot.slane %v3510_v6, 4  ;;  %v683_v58 = vrot.slane %v682_v29, 4  ;;  %v1570_v39 = vcombine.high %v1562_v25, %v1562_v25 }
 0x19f   : > { %v1571_v19 = vcombine.high %v1569_v45, %v1569_v45  ;;  %v1578_v63 = vrot.slane %v1562_v25, %v4237_v36  ;;  %v1585_v5 = vrot.slane %v1569_v45, %v4237_v36  ;;  %v701_v38 = vrot.slane %v700_v46, 1 }
 0x1a0   : > { %v3507_v52 = vmax.f32 %v3505_v22, %v3506_v34  ;;  %v3512_v14 = vmax.f32 %v3510_v6, %v3511_v56  ;;  %v684_v42 = vmax.f32 %v682_v29, %v683_v58  ;;  %v1592_v26 = vrot.slane %v1570_v39, %v4237_v36 }
 0x1a1   : > { %v4640_v44 = vrot.slane %v1571_v19, %v4237_v36  ;;  %v1600_v41 = vcombine.high %v1578_v63, %v1578_v63  ;;  %v1601_v8 = vcombine.high %v1585_v5, %v1585_v5  ;;  %v4644_v59 = vmax.f32 %v700_v46, %v701_v38 }
 0x1a2   : > { %v4642_v31 = vpop.f32.mrf.mxu1  ;;  %v3508_v47 = vrot.slane %v3507_v52, 1  ;;  %v3513_v54 = vrot.slane %v3512_v14, 2  ;;  %v685_v32 = vrot.slane %v684_v42, 2  ;;  %v1602_v40 = vcombine.high %v1592_v26, %v1592_v26 }
 0x1a3   : > { %v1603_v37 = vcombine.high %v4640_v44, %v4640_v44  ;;  %v1933_v50 = vadd.f32 %v4580_v30, %v1578_v63  ;;  %v1934_v16 = vadd.f32 %v4590_v55, %v1592_v26  ;;  %v1935_v3 = vadd.f32 %v4563_v48, %v1600_v41 }
 0x1a4   : > { %v4650_v13 = vpop.f32.mrf.mxu1  ;;  %v4652_v2 = vmax.f32 %v3507_v52, %v3508_v47  ;;  %v3514_v18 = vmax.f32 %v3512_v14, %v3513_v54  ;;  %v686_v0 = vmax.f32 %v684_v42, %v685_v32  ;;  %v1936_v51 = vadd.f32 %v4595_v27, %v1602_v40 }
 0x1a5   : > { %v1937_v35 = vadd.f32 %v4584_v15, %v1585_v5  ;;  %v1938_v17 = vadd.f32 %v4560_v53, %v4640_v44  ;;  %v1939_v61 = vadd.f32 %v4566_v28, %v1601_v8  ;;  %v1989_v23 = vmax.f32 %v1933_v50, 0.0 }
 0x1a6   : > { %v3823_v10 = vpop.f32.mrf.mxu1  ;;  %v3515_v7 = vrot.slane %v3514_v18, 1  ;;  %v687_v4 = vrot.slane %v686_v0, 1  ;;  %v1990_v22 = vmax.f32 %v1934_v16, 0.0  ;;  %v1991_v12 = vmax.f32 %v1935_v3, 0.0 }
 0x1a7   : > { %v1992_v25 = vmax.f32 %v1936_v51, 0.0  ;;  %v1993_v6 = vmax.f32 %v1937_v35, 0.0  ;;  %v1994_v29 = vmax.f32 %v1938_v17, 0.0  ;;  %v1995_v46 = vmax.f32 %v1939_v61, 0.0 }
 0x1a8   : > { %v4660_v45 = vpop.f32.mrf.mxu0  ;;  %v4662_v34 = vmax.f32 %v3514_v18, %v3515_v7  ;;  %v4664_v56 = vmax.f32 %v686_v0, %v687_v4  ;;  %v4666_v58 = vcombine.low %v1989_v23, %v1990_v22  ;;  %v1471_v63 = vrot.slane %v1457_v21, %v4237_v36 }
 0x1a9   : > { %v2183_v39 = vcombine.low %v1991_v12, %v1992_v25  ;;  %v2211_v19 = vrot.slane %v1993_v6, %v4237_v36  ;;  %v1472_v5 = vcombine.high %v4632_v43, %v4632_v43  ;;  %v4674_v38 = vcombine.low %v1994_v29, %v1995_v46 }
 0x1aa   : > { %v3124_v52 = vpop.f32.mrf.mxu0  ;;  %v2197_v14 = vrot.slane %v4666_v58, %v4237_v36  ;;  %v1480_v42 = vrot.slane %v4632_v43, %v4237_v36  ;;  %v1604_v26 = vcombine.high %v4622_v57, %v4622_v57  ;;  %v1473_v8 = vcombine.high %v1471_v63, %v1471_v63 }
 0x1ab   : > { %v2204_v41 = vrot.slane %v2183_v39, %v4237_v36  ;;  %v1487_v21 = vrot.slane %v1471_v63, %v4237_v36  ;;  %v1494_v47 = vrot.slane %v1472_v5, %v4237_v36  ;;  %v1611_v50 = vrot.slane %v4622_v57, %v4237_v36 }
 0x1ac   : > { %v4683_v54 = vpop.f32.mrf.mxu0  ;;  %v1502_v32 = vcombine.high %v1480_v42, %v1480_v42  ;;  %v1917_v40 = vadd.f32 %v4560_v53, %v1480_v42  ;;  %v1618_v43 = vrot.slane %v1604_v26, %v4237_v36  ;;  %v4692_v18 = vrot.slane %v1473_v8, %v4237_v36 }
 0x1ad   : > { %v4689_v16 = vcombine.low %v2204_v41, %v2211_v19  ;;  %v1503_v0 = vcombine.high %v1487_v21, %v1487_v21  ;;  %v1504_v3 = vcombine.high %v1494_v47, %v1494_v47  ;;  %v1918_v35 = vadd.f32 %v4566_v28, %v1494_v47 }
 0x1ae   : > { %v3127_v51 = vpop.f32.mrf.mxu0  ;;  %v1919_v17 = vadd.f32 %v4580_v30, %v1502_v32  ;;  %v1921_v61 = vadd.f32 %v4563_v48, %v1487_v21  ;;  %v1973_v10 = vmax.f32 %v1917_v40, 0.0  ;;  %v1505_v7 = vcombine.high %v4692_v18, %v4692_v18 }
 0x1af   : > { %v2227_v57 = vrot.slane %v4689_v16, %v4237_v36  ;;  %v1920_v4 = vadd.f32 %v4590_v55, %v1504_v3  ;;  %v1922_v23 = vadd.f32 %v4595_v27, %v4692_v18  ;;  %v1923_v12 = vadd.f32 %v4584_v15, %v1503_v0 }
 0x1b0   : > { %v4704_v22 = vpop.f32.mrf.mxu0  ;;  %v1974_v25 = vmax.f32 %v1918_v35, 0.0  ;;  %v1975_v6 = vmax.f32 %v1919_v17, 0.0  ;;  %v1977_v29 = vmax.f32 %v1921_v61, 0.0  ;;  %v1619_v19 = vcombine.high %v1611_v50, %v1611_v50 }
 0x1b1   : > { %v1976_v46 = vmax.f32 %v1920_v4, 0.0  ;;  %v1978_v39 = vmax.f32 %v1922_v23, 0.0  ;;  %v1620_v63 = vcombine.high %v1618_v43, %v1618_v43  ;;  %v1979_v52 = vmax.f32 %v1923_v12, 0.0 }
 0x1b2   : > { %v3132_v5 = vpop.f32.mrf.mxu0  ;;  %v2085_v42 = vcombine.low %v1973_v10, %v1974_v25  ;;  %v1627_v26 = vrot.slane %v1611_v50, %v4237_v36  ;;  %v1634_v41 = vrot.slane %v1618_v43, %v4237_v36  ;;  %v1641_v47 = vrot.slane %v1619_v19, %v4237_v36 }
 0x1b3   : > { %v2086_v8 = vcombine.low %v1975_v6, %v1976_v46  ;;  %v2087_v21 = vcombine.low %v1977_v29, %v1978_v39  ;;  %v1648_v32 = vrot.slane %v1620_v63, %v4237_v36  ;;  %v2115_v3 = vrot.slane %v1979_v52, %v4237_v36 }
 0x1b4   : > { %v4711_v40 = vpop.f32.mrf.mxu0  ;;  %v2094_v0 = vrot.slane %v2085_v42, %v4237_v36  ;;  %v1649_v51 = vcombine.high %v1627_v26, %v1627_v26  ;;  %v1650_v35 = vcombine.high %v1634_v41, %v1634_v41  ;;  %v1651_v61 = vcombine.high %v1641_v47, %v1641_v47 }
 0x1b5   : > { %v2101_v17 = vrot.slane %v2086_v8, %v4237_v36  ;;  %v2108_v50 = vrot.slane %v2087_v21, %v4237_v36  ;;  %v1652_v43 = vcombine.high %v1648_v32, %v1648_v32  ;;  %v1940_v4 = vadd.f32 %v4580_v30, %v1603_v37 }
 0x1b6   : > { %v3135_v10 = vpop.f32.mrf.mxu0  ;;  %v1941_v23 = vadd.f32 %v4590_v55, %v1627_v26  ;;  %v1942_v12 = vadd.f32 %v4563_v48, %v1641_v47  ;;  %v1943_v25 = vadd.f32 %v4595_v27, %v1649_v51  ;;  %v1944_v46 = vadd.f32 %v4584_v15, %v1651_v61 }
 0x1b7   : > { %v2116_v6 = vcombine.low %v2094_v0, %v2101_v17  ;;  %v2117_v29 = vcombine.low %v2108_v50, %v2115_v3  ;;  %v1945_v39 = vadd.f32 %v4560_v53, %v1634_v41  ;;  %v1946_v19 = vadd.f32 %v4566_v28, %v1648_v32 }
 0x1b8   : > { %v1947_v63 = vadd.f32 %v4580_v30, %v1650_v35  ;;  %v1948_v44 = vadd.f32 %v4590_v55, %v1652_v43  ;;  %v1996_v5 = vmax.f32 %v1940_v4, 0.0  ;;  %v1997_v42 = vmax.f32 %v1941_v23, 0.0 }
 0x1b9   : > { %v2124_v37 = vrot.slane %v2116_v6, %v4237_v36  ;;  %v2131_v52 = vrot.slane %v2117_v29, %v4237_v36  ;;  %v1998_v26 = vmax.f32 %v1942_v12, 0.0  ;;  %v1999_v8 = vmax.f32 %v1943_v25, 0.0 }
 0x1ba   : > { %v2000_v21 = vmax.f32 %v1944_v46, 0.0  ;;  %v2001_v47 = vmax.f32 %v1945_v39, 0.0  ;;  %v2002_v0 = vmax.f32 %v1946_v19, 0.0  ;;  %v2003_v51 = vmax.f32 %v1947_v63, 0.0 }
 0x1bb   : > { %v2132_v3 = vcombine.low %v2124_v37, %v2131_v52  ;;  %v2004_v41 = vmax.f32 %v1948_v44, 0.0  ;;  %v2230_v17 = vcombine.low %v1996_v5, %v1997_v42  ;;  %v2231_v32 = vcombine.low %v1998_v26, %v1999_v8 }
 0x1bc   : > { %v2238_v35 = vrot.slane %v4674_v38, %v4237_v36  ;;  %v2259_v50 = vrot.slane %v2000_v21, %v4237_v36  ;;  %v2277_v61 = vcombine.low %v2001_v47, %v2002_v0  ;;  %v1506_v23 = vcombine.high %v4636_v1, %v4636_v1 }
 0x1bd   : > { %v2478_v43 = vsel %vm2477_vm8, %v2132_v3, -inf  ;;  %v2245_v10 = vrot.slane %v2230_v17, %v4237_v36  ;;  %v2278_v4 = vcombine.low %v2003_v51, %v2004_v41  ;;  %v2252_v25 = vrot.slane %v2231_v32, %v4237_v36 }
 0x1be   : > { %v2479_v12 = vrot.slane %v2478_v43, 4  ;;  %v2286_v6 = vrot.slane %v2277_v61, %v4237_v36  ;;  %v1513_v29 = vrot.slane %v4636_v1, %v4237_v36  ;;  %v1520_v39 = vrot.slane %v1506_v23, %v4237_v36 }
 0x1bf   : > { %v2260_v38 = vcombine.low %v2238_v35, %v2245_v10  ;;  %v2293_v46 = vrot.slane %v2278_v4, %v4237_v36  ;;  %v1924_v19 = vadd.f32 %v4560_v53, %v1505_v7  ;;  %v2261_v44 = vcombine.low %v2252_v25, %v2259_v50 }
 0x1c0   : > { %v2480_v63 = vmax.f32 %v2478_v43, %v2479_v12  ;;  %v1521_v5 = vcombine.high %v1513_v29, %v1513_v29  ;;  %v1529_v37 = vrot.slane %v1513_v29, %v4237_v36  ;;  %v1522_v1 = vcombine.high %v1520_v39, %v1520_v39 }
 0x1c1   : > { %v2268_v52 = vrot.slane %v2260_v38, %v4237_v36  ;;  %v4750_v42 = vcombine.low %v2286_v6, %v2293_v46  ;;  %v1536_v26 = vrot.slane %v1520_v39, %v4237_v36  ;;  %v2275_v21 = vrot.slane %v2261_v44, %v4237_v36 }
 0x1c2   : > { %v2481_v8 = vrot.slane %v2480_v63, 2  ;;  %v1543_v47 = vrot.slane %v1521_v5, %v4237_v36  ;;  %v1551_v18 = vcombine.high %v1529_v37, %v1529_v37  ;;  %v1550_v0 = vrot.slane %v1522_v1, %v4237_v36 }
 0x1c3   : > { %v2316_v7 = vrot.slane %v4750_v42, %v4237_v36  ;;  %v1552_v3 = vcombine.high %v1536_v26, %v1536_v26  ;;  %v1925_v51 = vadd.f32 %v4566_v28, %v1529_v37  ;;  %v2276_v17 = vcombine.low %v2268_v52, %v2275_v21 }
 0x1c4   : > { %v4759_v41 = vmax.f32 %v2480_v63, %v2481_v8  ;;  %v1553_v32 = vcombine.high %v1543_v47, %v1543_v47  ;;  %v1926_v35 = vadd.f32 %v4580_v30, %v1543_v47  ;;  %v1554_v50 = vcombine.high %v1550_v0, %v1550_v0 }
 0x1c5   : > { %v1927_v61 = vadd.f32 %v4590_v55, %v1551_v18  ;;  %v1929_v43 = vadd.f32 %v4595_v27, %v1536_v26  ;;  %v1930_v10 = vadd.f32 %v4584_v15, %v1550_v0  ;;  %v4766_v4 = vsel %vm2477_vm8, %v2276_v17, -inf }
 0x1c6   : > { %v1928_v23 = vadd.f32 %v4563_v48, %v1553_v32  ;;  %v1931_v12 = vadd.f32 %v4560_v53, %v1552_v3  ;;  %v1980_v25 = vmax.f32 %v1924_v19, 0.0  ;;  %v2500_v6 = vrot.slane %v4766_v4, 4 }
 0x1c7   : > { %v1932_v29 = vadd.f32 %v4566_v28, %v1554_v50  ;;  %v1981_v38 = vmax.f32 %v1925_v51, 0.0  ;;  %v1982_v46 = vmax.f32 %v1926_v35, 0.0  ;;  %v1983_v39 = vmax.f32 %v1927_v61, 0.0 }
 0x1c8   : > { %v1984_v63 = vmax.f32 %v1928_v23, 0.0  ;;  %v1985_v44 = vmax.f32 %v1929_v43, 0.0  ;;  %v1986_v5 = vmax.f32 %v1930_v10, 0.0  ;;  %v1987_v37 = vmax.f32 %v1931_v12, 0.0 }
 0x1c9   : > { %v1988_v52 = vmax.f32 %v1932_v29, 0.0  ;;  %v2133_v1 = vcombine.low %v1980_v25, %v1981_v38  ;;  %v1751_v26 = vcombine.high %v4642_v31, %v4642_v31  ;;  %v2134_v8 = vcombine.low %v1982_v46, %v1983_v39 }
 0x1ca   : > { %v2135_v21 = vcombine.low %v1984_v63, %v1985_v44  ;;  %v2163_v19 = vrot.slane %v1986_v5, %v4237_v36  ;;  %v1758_v47 = vrot.slane %v4642_v31, %v4237_v36  ;;  %v1653_v51 = vcombine.high %v4650_v13, %v4650_v13 }
 0x1cb   : > { %v2142_v18 = vrot.slane %v2133_v1, %v4237_v36  ;;  %v2181_v0 = vcombine.low %v1987_v37, %v1988_v52  ;;  %v1765_v3 = vrot.slane %v1751_v26, %v4237_v36  ;;  %v2149_v17 = vrot.slane %v2134_v8, %v4237_v36 }
 0x1cc   : > { %v2156_v32 = vrot.slane %v2135_v21, %v4237_v36  ;;  %v1766_v35 = vcombine.high %v1758_v47, %v1758_v47  ;;  %v1774_v50 = vrot.slane %v1758_v47, %v4237_v36  ;;  %v1660_v10 = vrot.slane %v4650_v13, %v4237_v36 }
 0x1cd   : > { %v2190_v61 = vrot.slane %v2181_v0, %v4237_v36  ;;  %v1767_v43 = vcombine.high %v1765_v3, %v1765_v3  ;;  %v1781_v31 = vrot.slane %v1765_v3, %v4237_v36  ;;  %v2164_v23 = vcombine.low %v2142_v18, %v2149_v17 }
 0x1ce   : > { %v2165_v12 = vcombine.low %v2156_v32, %v2163_v19  ;;  %v1788_v25 = vrot.slane %v1766_v35, %v4237_v36  ;;  %v1796_v29 = vcombine.high %v1774_v50, %v1774_v50  ;;  %v1965_v63 = vadd.f32 %v4584_v15, %v1774_v50 }
 0x1cf   : > { %v2212_v38 = vcombine.low %v2190_v61, %v2197_v14  ;;  %v1795_v46 = vrot.slane %v1767_v43, %v4237_v36  ;;  %v1797_v39 = vcombine.high %v1781_v31, %v1781_v31  ;;  %v2172_v44 = vrot.slane %v2164_v23, %v4237_v36 }
 0x1d0   : > { %v2179_v5 = vrot.slane %v2165_v12, %v4237_v36  ;;  %v1798_v37 = vcombine.high %v1788_v25, %v1788_v25  ;;  %v1966_v13 = vadd.f32 %v4560_v53, %v1788_v25  ;;  %v1967_v26 = vadd.f32 %v4566_v28, %v1796_v29 }
 0x1d1   : > { %v2220_v52 = vrot.slane %v2212_v38, %v4237_v36  ;;  %v1799_v1 = vcombine.high %v1795_v46, %v1795_v46  ;;  %v1969_v58 = vadd.f32 %v4590_v55, %v1781_v31  ;;  %v1970_v21 = vadd.f32 %v4563_v48, %v1795_v46 }
 0x1d2   : > { %v2180_v14 = vcombine.low %v2172_v44, %v2179_v5  ;;  %v1968_v8 = vadd.f32 %v4580_v30, %v1798_v37  ;;  %v1971_v19 = vadd.f32 %v4595_v27, %v1797_v39  ;;  %v2021_v0 = vmax.f32 %v1965_v63, 0.0 }
 0x1d3   : > { %v2228_v47 = vcombine.low %v2220_v52, %v2227_v57  ;;  %v1972_v18 = vadd.f32 %v4584_v15, %v1799_v1  ;;  %v2022_v3 = vmax.f32 %v1966_v13, 0.0  ;;  %v2023_v32 = vmax.f32 %v1967_v26, 0.0 }
 0x1d4   : > { %v2485_v17 = vsel %vm2477_vm8, %v2180_v14, -inf  ;;  %v2024_v35 = vmax.f32 %v1968_v8, 0.0  ;;  %v2025_v50 = vmax.f32 %v1969_v58, 0.0  ;;  %v2026_v31 = vmax.f32 %v1970_v21, 0.0 }
 0x1d5   : > { %v2486_v61 = vrot.slane %v2485_v17, 4  ;;  %v4809_v43 = vsel %vm2477_vm8, %v2228_v47, -inf  ;;  %v2027_v23 = vmax.f32 %v1971_v19, 0.0  ;;  %v2028_v25 = vmax.f32 %v1972_v18, 0.0 }
 0x1d6   : > { %v2493_v12 = vrot.slane %v4809_v43, 4  ;;  %v4813_v16 = vrot.slane %v2021_v0, %v4237_v36  ;;  %v2421_v57 = vcombine.low %v2022_v3, %v2023_v32  ;;  %v2422_v38 = vcombine.low %v2024_v35, %v2025_v50  ;;  %v1439_v32 = vpop.f32.mrf.mxu1 }
 0x1d7   : > { %v2487_v29 = vmax.f32 %v2485_v17, %v2486_v61  ;;  %v2423_v46 = vcombine.low %v2026_v31, %v2027_v23  ;;  %v1667_v39 = vrot.slane %v1653_v51, %v4237_v36  ;;  %v2451_v44 = vrot.slane %v2028_v25, %v4237_v36 }
 0x1d8   : > { %v2430_v63 = vrot.slane %v2421_v57, %v4237_v36  ;;  %v1668_v5 = vcombine.high %v1660_v10, %v1660_v10  ;;  %v1676_v37 = vrot.slane %v1660_v10, %v4237_v36  ;;  %v2437_v52 = vrot.slane %v2422_v38, %v4237_v36 }
 0x1d9   : > { %v2488_v13 = vrot.slane %v2487_v29, 2  ;;  %v2444_v1 = vrot.slane %v2423_v46, %v4237_v36  ;;  %v1669_v26 = vcombine.high %v1667_v39, %v1667_v39  ;;  %v1683_v58 = vrot.slane %v1667_v39, %v4237_v36 }
 0x1da   : > { %v1690_v14 = vrot.slane %v1668_v5, %v4237_v36  ;;  %v1698_v8 = vcombine.high %v1676_v37, %v1676_v37  ;;  %v1949_v51 = vadd.f32 %v4563_v48, %v1676_v37  ;;  %v4826_v19 = vcombine.low %v2430_v63, %v2437_v52 }
 0x1db   : > { %v4824_v21 = vmax.f32 %v2487_v29, %v2488_v13  ;;  %v4828_v47 = vcombine.low %v2444_v1, %v2451_v44  ;;  %v1697_v10 = vrot.slane %v1669_v26, %v4237_v36  ;;  %v1699_v18 = vcombine.high %v1683_v58, %v1683_v58 }
 0x1dc   : > { %v1700_v0 = vcombine.high %v1690_v14, %v1690_v14  ;;  %v1950_v3 = vadd.f32 %v4595_v27, %v1690_v14  ;;  %v1951_v17 = vadd.f32 %v4584_v15, %v1698_v8  ;;  %v1953_v50 = vadd.f32 %v4566_v28, %v1683_v58 }
 0x1dd   : > { %v1701_v35 = vcombine.high %v1697_v10, %v1697_v10  ;;  %v1954_v61 = vadd.f32 %v4580_v30, %v1697_v10  ;;  %v2005_v31 = vmax.f32 %v1949_v51, 0.0  ;;  %v1955_v25 = vadd.f32 %v4590_v55, %v1699_v18 }
 0x1de   : > { %v1952_v23 = vadd.f32 %v4560_v53, %v1700_v0  ;;  %v2006_v57 = vmax.f32 %v1950_v3, 0.0  ;;  %v2007_v29 = vmax.f32 %v1951_v17, 0.0  ;;  %v2009_v38 = vmax.f32 %v1953_v50, 0.0 }
 0x1df   : > { %v2010_v46 = vmax.f32 %v1954_v61, 0.0  ;;  %v1702_v39 = vcombine.high %v1439_v32, %v1439_v32  ;;  %v1709_v63 = vrot.slane %v1439_v32, %v4237_v36  ;;  %v2011_v5 = vmax.f32 %v1955_v25, 0.0 }
 0x1e0   : > { %v2008_v44 = vmax.f32 %v1952_v23, 0.0  ;;  %v2279_v37 = vcombine.low %v2005_v31, %v2006_v57  ;;  %v2307_v13 = vrot.slane %v2007_v29, %v4237_v36  ;;  %v1956_v58 = vadd.f32 %v4563_v48, %v1701_v35 }
 0x1e1   : > { %v1716_v52 = vrot.slane %v1702_v39, %v4237_v36  ;;  %v1717_v1 = vcombine.high %v1709_v63, %v1709_v63  ;;  %v1725_v26 = vrot.slane %v1709_v63, %v4237_v36  ;;  %v2326_v51 = vcombine.low %v2010_v46, %v2011_v5 }
 0x1e2   : > { %v2300_v14 = vrot.slane %v2279_v37, %v4237_v36  ;;  %v2325_v8 = vcombine.low %v2008_v44, %v2009_v38  ;;  %v3177_v10 = vcombine.high %v4660_v45, %v4660_v45  ;;  %v3184_v42 = vrot.slane %v4660_v45, %v4550_v20 }
 0x1e3   : > { %v1718_v18 = vcombine.high %v1716_v52, %v1716_v52  ;;  %v1732_v0 = vrot.slane %v1716_v52, %v4237_v36  ;;  %v1739_v3 = vrot.slane %v1717_v1, %v4237_v36  ;;  %v1747_v17 = vcombine.high %v1725_v26, %v1725_v26 }
 0x1e4   : > { %v2309_v32 = vcombine.low %v2300_v14, %v2307_v13  ;;  %v2334_v50 = vrot.slane %v2325_v8, %v4237_v36  ;;  %v2341_v61 = vrot.slane %v2326_v51, %v4237_v36  ;;  %v1957_v35 = vadd.f32 %v4595_v27, %v1725_v26 }
 0x1e5   : > { %v1746_v31 = vrot.slane %v1718_v18, %v4237_v36  ;;  %v1748_v23 = vcombine.high %v1732_v0, %v1732_v0  ;;  %v1749_v25 = vcombine.high %v1739_v3, %v1739_v3  ;;  %v1958_v57 = vadd.f32 %v4584_v15, %v1739_v3 }
 0x1e6   : > { %v2323_v29 = vrot.slane %v2309_v32, %v4237_v36  ;;  %v2356_v38 = vcombine.low %v2334_v50, %v2341_v61  ;;  %v1959_v46 = vadd.f32 %v4560_v53, %v1747_v17  ;;  %v1961_v39 = vadd.f32 %v4580_v30, %v1732_v0 }
 0x1e7   : > { %v1750_v63 = vcombine.high %v1746_v31, %v1746_v31  ;;  %v1960_v44 = vadd.f32 %v4566_v28, %v1749_v25  ;;  %v1962_v5 = vadd.f32 %v4590_v55, %v1746_v31  ;;  %v1963_v37 = vadd.f32 %v4563_v48, %v1748_v23 }
 0x1e8   : > { %v4861_v13 = vcombine.low %v2316_v7, %v2323_v29  ;;  %v2364_v15 = vrot.slane %v2356_v38, %v4237_v36  ;;  %v2012_v52 = vmax.f32 %v1956_v58, 0.0  ;;  %v2013_v1 = vmax.f32 %v1957_v35, 0.0 }
 0x1e9   : > { %v1964_v53 = vadd.f32 %v4595_v27, %v1750_v63  ;;  %v2014_v26 = vmax.f32 %v1958_v57, 0.0  ;;  %v2015_v30 = vmax.f32 %v1959_v46, 0.0  ;;  %v2016_v14 = vmax.f32 %v1960_v44, 0.0 }
 0x1ea   : > { %v2017_v8 = vmax.f32 %v1961_v39, 0.0  ;;  %v2018_v28 = vmax.f32 %v1962_v5, 0.0  ;;  %v2019_v51 = vmax.f32 %v1963_v37, 0.0  ;;  %v2327_v55 = vcombine.low %v2012_v52, %v2013_v1 }
 0x1eb   : > { %v2020_v18 = vmax.f32 %v1964_v53, 0.0  ;;  %v2355_v48 = vrot.slane %v2014_v26, %v4237_v36  ;;  %v2373_v0 = vcombine.low %v2015_v30, %v2016_v14  ;;  %v3191_v3 = vrot.slane %v3177_v10, %v4550_v20 }
 0x1ec   : > { %v2348_v7 = vrot.slane %v2327_v55, %v4237_v36  ;;  %v2374_v58 = vcombine.low %v2017_v8, %v2018_v28  ;;  %v3405_v27 = vrot.slane %v4618_v33, %v4550_v20  ;;  %v3192_v50 = vcombine.high %v3184_v42, %v3184_v42 }
 0x1ed   : > { %v2375_v17 = vcombine.low %v2019_v51, %v2020_v18  ;;  %v2382_v32 = vrot.slane %v2373_v0, %v4237_v36  ;;  %v3302_v61 = vadd.f32 %v4571_v60, %v3184_v42  ;;  %v3193_v23 = vcombine.high %v3191_v3, %v3191_v3 }
 0x1ee   : > { %v2357_v35 = vcombine.low %v2348_v7, %v2355_v48  ;;  %v2389_v31 = vrot.slane %v2374_v58, %v4237_v36  ;;  %v3304_v45 = vadd.f32 %v4575_v9, %v3191_v3  ;;  %v3303_v57 = vadd.f32 %v4557_v49, %v3192_v50 }
 0x1ef   : > { %v2396_v25 = vrot.slane %v2375_v17, %v4237_v36  ;;  %v3326_v10 = vmax.f32 %v3302_v61, 0.0  ;;  %v3194_v33 = vcombine.high %v4683_v54, %v4683_v54  ;;  %v3305_v46 = vadd.f32 %v4571_v60, %v3193_v23 }
 0x1f0   : > { %v2371_v29 = vrot.slane %v2357_v35, %v4237_v36  ;;  %v4881_v38 = vcombine.low %v2382_v32, %v2389_v31  ;;  %v3328_v39 = vmax.f32 %v3304_v45, 0.0  ;;  %v3327_v44 = vmax.f32 %v3303_v57, 0.0 }
 0x1f1   : > { %v4885_v63 = vcombine.low %v2396_v25, %v4813_v16  ;;  %v3412_v5 = vrot.slane %v3326_v10, %v4550_v20  ;;  %v3201_v37 = vrot.slane %v4683_v54, %v4550_v20  ;;  %v3329_v53 = vmax.f32 %v3305_v46, 0.0 }
 0x1f2   : > { %v4890_v52 = vcombine.low %v2364_v15, %v2371_v29  ;;  %v2412_v1 = vrot.slane %v4881_v38, %v4237_v36  ;;  %v3208_v26 = vrot.slane %v3194_v33, %v4550_v20  ;;  %v3414_v16 = vcombine.low %v3327_v44, %v3328_v39 }
 0x1f3   : > { %v2419_v30 = vrot.slane %v4885_v63, %v4237_v36  ;;  %v3413_v14 = vcombine.low %v3405_v27, %v3412_v5  ;;  %v3209_v8 = vcombine.high %v3201_v37, %v3201_v37  ;;  %v3428_v28 = vrot.slane %v3329_v53, %v4550_v20 }
 0x1f4   : > { %v3210_v51 = vcombine.high %v3208_v26, %v3208_v26  ;;  %v3306_v55 = vadd.f32 %v4557_v49, %v3201_v37  ;;  %v3308_v54 = vadd.f32 %v4571_v60, %v3208_v26  ;;  %v3421_v15 = vrot.slane %v3414_v16, %v4550_v20 }
 0x1f5   : > { %v3517_v18 = vsel %vm3502_vm7, %v3413_v14, -inf  ;;  %v3307_v48 = vadd.f32 %v4575_v9, %v3209_v8  ;;  %v3211_v0 = vcombine.high %v4704_v22, %v4704_v22  ;;  %v3218_v32 = vrot.slane %v4704_v22, %v4550_v20 }
 0x1f6   : > { %v3518_v42 = vrot.slane %v3517_v18, 4  ;;  %v3309_v7 = vadd.f32 %v4557_v49, %v3210_v51  ;;  %v3330_v58 = vmax.f32 %v3306_v55, 0.0  ;;  %v3332_v3 = vmax.f32 %v3308_v54, 0.0 }
 0x1f7   : > { %v3429_v27 = vcombine.low %v3421_v15, %v3428_v28  ;;  %v3331_v17 = vmax.f32 %v3307_v48, 0.0  ;;  %v3225_v50 = vrot.slane %v3211_v0, %v4550_v20  ;;  %v3228_v23 = vcombine.high %v4711_v40, %v4711_v40 }
 0x1f8   : > { %v3519_v61 = vmax.f32 %v3517_v18, %v3518_v42  ;;  %v3444_v35 = vrot.slane %v3332_v3, %v4550_v20  ;;  %v3333_v31 = vmax.f32 %v3309_v7, 0.0  ;;  %v3226_v57 = vcombine.high %v3218_v32, %v3218_v32 }
 0x1f9   : > { %v3524_v45 = vsel %vm3502_vm7, %v3429_v27, -inf  ;;  %v3430_v25 = vcombine.low %v3330_v58, %v3331_v17  ;;  %v3227_v10 = vcombine.high %v3225_v50, %v3225_v50  ;;  %v3310_v46 = vadd.f32 %v4575_v9, %v3218_v32 }
 0x1fa   : > { %v3520_v33 = vrot.slane %v3519_v61, 2  ;;  %v3525_v29 = vrot.slane %v3524_v45, 4  ;;  %v3312_v22 = vadd.f32 %v4557_v49, %v3225_v50  ;;  %v3311_v44 = vadd.f32 %v4571_v60, %v3226_v57 }
 0x1fb   : > { %v3437_v39 = vrot.slane %v3430_v25, %v4550_v20  ;;  %v3313_v5 = vadd.f32 %v4575_v9, %v3227_v10  ;;  %v3235_v37 = vrot.slane %v4711_v40, %v4550_v20  ;;  %v3334_v14 = vmax.f32 %v3310_v46, 0.0 }
 0x1fc   : > { %v3521_v53 = vmax.f32 %v3519_v61, %v3520_v33  ;;  %v4920_v26 = vmax.f32 %v3524_v45, %v3525_v29  ;;  %v3336_v16 = vmax.f32 %v3312_v22, 0.0  ;;  %v3335_v28 = vmax.f32 %v3311_v44, 0.0 }
 0x1fd   : > { %v3445_v8 = vcombine.low %v3437_v39, %v3444_v35  ;;  %v3337_v51 = vmax.f32 %v3313_v5, 0.0  ;;  %v3242_v55 = vrot.slane %v3228_v23, %v4550_v20  ;;  %v3446_v18 = vcombine.low %v3333_v31, %v3334_v14 }
 0x1fe   : > { %v3522_v54 = vrot.slane %v3521_v53, 1  ;;  %v3527_v15 = vrot.slane %v4920_v26, 2  ;;  %v3243_v48 = vcombine.high %v3235_v37, %v3235_v37  ;;  %v3460_v42 = vrot.slane %v3335_v28, %v4550_v20 }
 0x1ff   : > { %v3531_v0 = vsel %vm3502_vm7, %v3445_v8, -inf  ;;  %v3462_v40 = vcombine.low %v3336_v16, %v3337_v51  ;;  %v3244_v7 = vcombine.high %v3242_v55, %v3242_v55  ;;  %v3453_v27 = vrot.slane %v3446_v18, %v4550_v20 }
 0x200   : > { %v4926_v58 = vmax.f32 %v3521_v53, %v3522_v54  ;;  %v3532_v3 = vrot.slane %v3531_v0, 4  ;;  %v3314_v17 = vadd.f32 %v4571_v60, %v3235_v37  ;;  %v3315_v32 = vadd.f32 %v4557_v49, %v3243_v48 }
 0x201   : > { %v3316_v50 = vadd.f32 %v4575_v9, %v3242_v55  ;;  %v3317_v61 = vadd.f32 %v4571_v60, %v3244_v7  ;;  %v3469_v35 = vrot.slane %v3462_v40, %v4550_v20  ;;  %v3461_v23 = vcombine.low %v3453_v27, %v3460_v42 }
 0x202   : > { %v3533_v31 = vmax.f32 %v3531_v0, %v3532_v3  ;;  %v3338_v45 = vmax.f32 %v3314_v17, 0.0  ;;  %v2420_v25 = vcombine.low %v2412_v1, %v2419_v30  ;;  %v3339_v57 = vmax.f32 %v3315_v32, 0.0 }
 0x203   : > { %v3340_v10 = vmax.f32 %v3316_v50, 0.0  ;;  %v3341_v33 = vmax.f32 %v3317_v61, 0.0  ;;  %v2460_v49 = vrot.slane %v4826_v19, %v4237_v36  ;;  %v3538_v60 = vsel %vm3502_vm7, %v3461_v23, -inf }
 0x204   : > { %v3534_v9 = vrot.slane %v3533_v31, 2  ;;  %v3476_v29 = vrot.slane %v3338_v45, %v4550_v20  ;;  %v2467_v46 = vrot.slane %v4828_v47, %v4237_v36  ;;  %v3539_v22 = vrot.slane %v3538_v60, 4 }
 0x205   : > { %v3478_v63 = vcombine.low %v3339_v57, %v3340_v10  ;;  %v3492_v39 = vrot.slane %v3341_v33, %v4550_v20  ;;  %v2483_v38 = vrot.slane %v4759_v41, 1  ;;  %v2490_v44 = vrot.slane %v4824_v21, 1 }
 0x206   : > { %v3477_v1 = vcombine.low %v3469_v35, %v3476_v29  ;;  %v2468_v30 = vcombine.low %v2460_v49, %v2467_v46  ;;  %v2494_v19 = vmax.f32 %v4809_v43, %v2493_v12  ;;  %v3540_v5 = vmax.f32 %v3538_v60, %v3539_v22 }
 0x207   : > { %v3485_v37 = vrot.slane %v3478_v63, %v4550_v20  ;;  %v2484_v53 = vmax.f32 %v4759_v41, %v2483_v38  ;;  %v2501_v36 = vmax.f32 %v4766_v4, %v2500_v6  ;;  %v2491_v14 = vmax.f32 %v4824_v21, %v2490_v44 }
 0x208   : > { %v3545_v47 = vsel %vm3502_vm7, %v3477_v1, -inf  ;;  %v2495_v16 = vrot.slane %v2494_v19, 2  ;;  %v2506_v8 = vsel %vm2477_vm8, %v4861_v13, -inf  ;;  %v2513_v20 = vsel %vm2477_vm8, %v4890_v52, -inf }
 0x209   : > { %v3493_v28 = vcombine.low %v3485_v37, %v3492_v39  ;;  %v3546_v51 = vrot.slane %v3545_v47, 4  ;;  %v2502_v43 = vrot.slane %v2501_v36, 2  ;;  %v2507_v12 = vrot.slane %v2506_v8, 4 }
 0x20a   : > { %v2496_v55 = vmax.f32 %v2494_v19, %v2495_v16  ;;  %v2520_v41 = vsel %vm2477_vm8, %v2420_v25, -inf  ;;  %v2527_v4 = vsel %vm2477_vm8, %v2468_v30, -inf  ;;  %v2514_v21 = vrot.slane %v2513_v20, 4 }
 0x20b   : > { %v3547_v6 = vmax.f32 %v3545_v47, %v3546_v51  ;;  %v2503_v54 = vmax.f32 %v2501_v36, %v2502_v43  ;;  %v2508_v18 = vmax.f32 %v2506_v8, %v2507_v12  ;;  %v2521_v0 = vrot.slane %v2520_v41, 4 }
 0x20c   : > { %v2497_v48 = vrot.slane %v2496_v55, 1  ;;  %v2528_v42 = vrot.slane %v2527_v4, 4  ;;  %v3590_v13 = vsel %vm3567_vm4, %v2491_v14, %v2484_v53  ;;  %v2515_v3 = vmax.f32 %v2513_v20, %v2514_v21 }
 0x20d   : > { %v2504_v40 = vrot.slane %v2503_v54, 1  ;;  %v2509_v7 = vrot.slane %v2508_v18, 2  ;;  %v3528_v52 = vmax.f32 %v4920_v26, %v3527_v15  ;;  %v2522_v17 = vmax.f32 %v2520_v41, %v2521_v0 }
 0x20e   : > { %v2498_v27 = vmax.f32 %v2496_v55, %v2497_v48  ;;  %v2529_v32 = vmax.f32 %v2527_v4, %v2528_v42  ;;  %v3535_v50 = vmax.f32 %v3533_v31, %v3534_v9  ;;  %v2516_v23 = vrot.slane %v2515_v3, 2 }
 0x20f   : > { %v2505_v61 = vmax.f32 %v2503_v54, %v2504_v40  ;;  %v2510_v35 = vmax.f32 %v2508_v18, %v2509_v7  ;;  %v3529_v45 = vrot.slane %v3528_v52, 1  ;;  %v2523_v25 = vrot.slane %v2522_v17, 2 }
 0x210   : > { %v2530_v57 = vrot.slane %v2529_v32, 2  ;;  %v3591_v10 = vsel %vm3569_vm5, %v2498_v27, %v3590_v13  ;;  %v3536_v33 = vrot.slane %v3535_v50, 1  ;;  %v2517_v60 = vmax.f32 %v2515_v3, %v2516_v23 }
 0x211   : > { %v2511_v49 = vrot.slane %v2510_v35, 1  ;;  %v3592_v26 = vsel %vm3571_vm6, %v2505_v61, %v3591_v10  ;;  %v3530_v15 = vmax.f32 %v3528_v52, %v3529_v45  ;;  %v2524_v29 = vmax.f32 %v2522_v17, %v2523_v25 }
 0x212   : > { %v2531_v46 = vmax.f32 %v2529_v32, %v2530_v57  ;;  %v3537_v22 = vmax.f32 %v3535_v50, %v3536_v33  ;;  %v3541_v31 = vrot.slane %v3540_v5, 2  ;;  %v2518_v63 = vrot.slane %v2517_v60, 1 }
 0x213   : > { %v2512_v9 = vmax.f32 %v2510_v35, %v2511_v49  ;;  %v3548_v39 = vrot.slane %v3547_v6, 2  ;;  %v3552_v38 = vsel %vm3502_vm7, %v3493_v28, -inf  ;;  %v2525_v1 = vrot.slane %v2524_v29, 1 }
 0x214   : > { %v2532_v30 = vrot.slane %v2531_v46, 1  ;;  %v3542_v44 = vmax.f32 %v3540_v5, %v3541_v31  ;;  %v3553_v19 = vrot.slane %v3552_v38, 4  ;;  %v2519_v37 = vmax.f32 %v2517_v60, %v2518_v63 }
 0x215   : > { %v3593_v53 = vsel %vm3573_vm9, %v2512_v9, %v3592_v26  ;;  %v3549_v36 = vmax.f32 %v3547_v6, %v3548_v39  ;;  %v3608_v47 = vsel %vm3567_vm4, %v4662_v34, %v4652_v2  ;;  %v2526_v14 = vmax.f32 %v2524_v29, %v2525_v1 }
 0x216   : > { %v2533_v16 = vmax.f32 %v2531_v46, %v2532_v30  ;;  %v3543_v8 = vrot.slane %v3542_v44, 1  ;;  %v3554_v51 = vmax.f32 %v3552_v38, %v3553_v19  ;;  %v3594_v43 = vsel %vm3575_vm10, %v2519_v37, %v3593_v53 }
 0x217   : > { %v3550_v12 = vrot.slane %v3549_v36, 1  ;;  %v3609_v28 = vsel %vm3569_vm5, %v4926_v58, %v3608_v47  ;;  %v3574_v5 = vsel %vm3573_vm9, %v4620_v11, %v4543_v62  ;;  %v3595_v55 = vsel %vm3577_vm11, %v2526_v14, %v3594_v43 }
 0x218   : > { %v3544_v20 = vmax.f32 %v3542_v44, %v3543_v8  ;;  %v3555_v41 = vrot.slane %v3554_v51, 2  ;;  %v3610_v2 = vsel %vm3571_vm6, %v3530_v15, %v3609_v28  ;;  %v3596_v34 = vsel %vm3579_vm12, %v2533_v16, %v3595_v55 }
 0x219   : > { %v3551_v4 = vmax.f32 %v3549_v36, %v3550_v12  ;;  %v3611_v6 = vsel %vm3573_vm9, %v3537_v22, %v3610_v2  ;;  %v3576_v58 = vsel %vm3575_vm10, %v4664_v56, %v3574_v5  ;;  %3597 = vrot.lane.b32.xlu0 %v3596_v34, %s3893_s16 }
 0x21a   : > { %v3556_v54 = vmax.f32 %v3554_v51, %v3555_v41  ;;  %v3578_v62 = vsel %vm3577_vm11, %v4616_v24, %v3576_v58  ;;  %v3612_v21 = vsel %vm3575_vm10, %v3544_v20, %v3611_v6 }
 0x21b   : > { %v3580_v11 = vsel %vm3579_vm12, %v4644_v59, %v3578_v62  ;;  %v3613_v48 = vsel %vm3577_vm11, %v3551_v4, %v3612_v21 }
 0x21c   : > { %v3557_v18 = vrot.slane %v3556_v54, 1 }
 0x21e   : > { %v3558_v0 = vmax.f32 %v3556_v54, %v3557_v18 }
 0x220   : > { %v3614_v42 = vsel %vm3579_vm12, %v3558_v0, %v3613_v48 }
 0x221   : > { %3615 = vrot.lane.b32.xlu1 %v3614_v42, %s3888_s21 }
 0x28b   : > { %v3598_v56 = vpop.permute.xlu0 %3597 }
 0x28c   : > { %v3618_v13 = vsel %vm646_vm3, %v3580_v11, %v3598_v56 }
 0x293   : > { %v3616_v24 = vpop.permute.xlu1 %3615 }
 0x294   : > { %v3619_v59 = vsel %vm435_vm0, %v3618_v13, %v3616_v24 }
 0x295   : > { %v3620_v40 = vpack.c.bf16 %v3619_v59, %v3619_v59 }
 0x297   : > { %3622 = vst.msk [vmem:[%s281_s8] sm:$0xf] %vm3621_vm13, %v3620_v40 }
 0x298 PF: > { %s17_s24 = sadd.s32 1, %s3885_s24  }
 0x299   : > { %p14_p5 = scmp.ge.s32.totalorder %s17_s24, 4  }
 0x29b   :  { %16 = sbr.rel (!%p14_p5) target bundleno = 1 (0x1), region = 78 }

// kernel: ptr_extract_summ_forward.7
= control target key start
LH: loop header
LB: loop body
LE: loop exit
PB: predicated region body
PF: predicated region fallthrough
CT: control target
= control target key end

     0   :  { %14 = vsyncpa [#allocation3], 0  ;;  %s1535_s0 = inlined_call_operand.vmem [shape: f32[2,8,64], index: 0, kind: input, shape index: {}]   ;;  %s1536_s1 = inlined_call_operand.vmem [shape: f32[2,4,32], index: 1, kind: input, shape index: {}]   ;;  %s1537_s2 = inlined_call_operand.vmem [shape: f32[2,1,8], index: 2, kind: input, shape index: {}]   ;;  %s1538_s3 = inlined_call_operand.vmem [shape: bf16[64,32], index: 3, kind: input, shape index: {}]   ;;  %s1539_s4 = inlined_call_operand.vmem [shape: bf16[32,32], index: 4, kind: input, shape index: {}]   ;;  %s1540_s5 = inlined_call_operand.vmem [shape: f32[1,32], index: 5, kind: input, shape index: {}]   ;;  %s1541_s6 = inlined_call_operand.vmem [shape: bf16[64,32], index: 6, kind: input, shape index: {}]   ;;  %s1542_s7 = inlined_call_operand.vmem [shape: bf16[32,32], index: 7, kind: input, shape index: {}]   ;;  %s1543_s8 = inlined_call_operand.vmem [shape: f32[1,32], index: 8, kind: input, shape index: {}]   ;;  %s1544_s9 = inlined_call_operand.hbm [shape: f32[2,4,8], index: 9, kind: output, shape index: {}]  }
   0x1   :  { %16 = vsyncpa [#allocation3 + $0x1], 0  ;;  %s1312_s30 = smov 0   ;;  %s1314_s10 = smov 0  }
   0x2   :  { %s1316_s11 = smov 0   ;;  %s1318_s12 = smov 0  }
   0x3 LB: > { %s1333_s13 = sadd.s32 4294967295, %s1255_s12   ;;  %s1027_s14 = sadd.s32 4294967294, %s1255_s12   ;;  %s1255_s12 = sphi %s1318_s12, %s1550_s12   ;;  %s1251_s11 = sphi %s1316_s11, %s1549_s11   ;;  %s1247_s10 = sphi %s1314_s10, %s1548_s10   ;;  %s1243_s30 = sphi %s1312_s30, %s1547_s30  }
   0x4   : > { %s1337_s15 = sadd.s32 1, %s1255_s12   ;;  %s233_s16 = sadd.s32 1, %s1251_s11 }
   0x5   : > { %s230_s17 = ssub.s32 %s1255_s12, %s1337_s15  ;;  %p243_p0 = scmp.ne.s32.totalorder %s1251_s11, %s1247_s10 }
   0x6   : > { %p231_p1 = scmp.eq.s32.totalorder %s230_s17, 0  ;;  %p244_p2 = scmp.eq.s32.totalorder %s1333_s13, 1 }
   0x7   : > { %p249_p3 = scmp.ne.s32.totalorder %s1247_s10, %s1243_s30  ;;  %p250_p4 = scmp.eq.s32.totalorder %s1027_s14, 1 }
   0x8   : > { %s1348_s18 = scalar_select %p231_p1, %s1251_s11, %s233_s16  }
   0x9   : > { %p1350_p5 = por %p244_p2, %p243_p0  ;;  %p1354_p6 = por %p250_p4, %p249_p3 }
   0xa   : > { %p1030_p7 = scmp.ge.s32.totalorder %s1255_s12, 1  ;;  %p306_p8 = scmp.lt.s32.totalorder %s1255_s12, 3 }
   0xc   : > { %p307_p9 = pnand %p1030_p7, %p306_p8 }
   0xd   : > { %p348_p10 = scmp.lt.s32.totalorder (!%p307_p9), %s1333_s13, 1  ;;  %s345_s26 = sand.u32 (!%p307_p9), 1, %s1247_s10  }
   0xe   : > { %310 = sbr.rel (%p307_p9) target bundleno = 1296 (0x510), region = 56  ;;  %s1031_s28 = sshll.u32 (!%p307_p9), %s345_s26, 2 }
   0xf   : > { %s347_s14 = scalar_lea.vmem (!%p307_p9), [#allocation2], %s1031_s28  ;;  %s934_s22 = scalar_lea.sflag (!%p307_p9), [#allocation3], %s345_s26 }
  0x10   : > { %s947_s16 = sshll.u32 (!%p307_p9), %s347_s14, 4  ;;  %s948_s16 = int_to_ptr.vmem [resolvable:$true] %s947_s16 }
  0x13   : > { %v1163_v0 = vld [vmem:[%s1541_s6 + $0x18] sm:$0xff]   ;;  %v1257_v1 = vmov 0.0   ;;  %v1164_v2 = vld [vmem:[%s1541_s6 + $0x10] sm:$0xff]   ;;  %vm1258_vm0 = vmmov 0   ;;  %s1378_s27 = scalar_select %p348_p10, %s1333_s13, 1  ;;  %v1165_v5 = vld [vmem:[%s1541_s6 + $0x8] sm:$0xff]   ;;  %v580_v15 = vlaneseq }
  0x14   : > { %1087 = vmatprep.subr.bf16.mxu1 %v1257_v1  ;;  %1075 = vmatprep.subr.bf16.mxu0 %v1257_v1  ;;  %v1166_v3 = vld [vmem:[%s1538_s3 + $0x18] sm:$0xff]   ;;  %v1168_v4 = vld [vmem:[%s1538_s3 + $0x10] sm:$0xff]   ;;  %v1170_v6 = vld [vmem:[%s1538_s3 + $0x8] sm:$0xff]   ;;  %vm394_vm1 = vcmask 523264   ;;  %vm532_vm2 = vcmask 261120   ;;  %vm679_vm4 = vcmask 1041409  }
  0x15   : > { %1088 = vmatpush3.bf16.msra.mxu1 %v1163_v0  ;;  %1095 = vmatprep.mubr.msk.bf16.mxu1 %vm1258_vm0, %v1257_v1  ;;  %s1032_s17 = sshll.u32 %s1378_s27, 3  ;;  %v1167_v7 = vld [vmem:[%s1541_s6] sm:$0xff]   ;;  %s1033_s29 = sshll.u32 %s1378_s27, 2  ;;  %v1169_v11 = vld [vmem:[%s1539_s4 + $0x8] sm:$0xff]   ;;  %v581_v16 = vshrl.u32 %v580_v15, 7  ;;  %v662_v17 = vand.u32 127, %v580_v15 }
  0x16   : > { %1089 = vmatprep.subr.bf16.mxu1 %v1257_v1  ;;  %1083 = vmatprep.mubr.msk.bf16.mxu0 %vm1258_vm0, %v1257_v1  ;;  %s351_s23 = scalar_lea.vmem %s1535_s0, %s1032_s17  ;;  %v1172_v10 = vld [vmem:[%s1538_s3] sm:$0xff]   ;;  %s355_s24 = scalar_lea.vmem %s1536_s1, %s1033_s29  ;;  %v1259_v19 = vmov 1966171168   ;;  %vm681_vm5 = vcmask 1042434   ;;  %vm683_vm6 = vcmask 1043459   ;;  %vm687_vm8 = vcmask 60416  }
  0x17   : > { %1076 = vmatpush3.bf16.msra.mxu0 %v1166_v3  ;;  %v360_v8 = vld [vmem:[%s351_s23] sm:$0xff]  ;;  %v1425_v18 = vsub.s32 %v662_v17, %v581_v16  ;;  %v578_v20 = vunpack.c.l.s4 %v1259_v19  ;;  %v1432_v32 = vsub.s32 0, %v581_v16  ;;  %s358_s17 = scalar_lea.vmem %s1537_s2, %s1378_s27  ;;  %vm699_vm9 = vcmask 64512   ;;  %s1054_s29 = sshll.u32 %s1333_s13, 6 }
  0x18   : > { %1077 = vmatprep.subr.bf16.mxu0 %v1257_v1  ;;  %v361_v9 = vpack.c.bf16 %v360_v8, %v360_v8  ;;  %v1171_v12 = vld [vmem:[%s1539_s4] sm:$0xff]   ;;  %s1498_s21 = scalar_lea.hbm %s1544_s9, %s1054_s29  ;;  %s1195_s23 = scalar_lea.vmem %s948_s16, 64 }
  0x19   : > { %1090 = vmatpush3.bf16.msra.mxu1 %v1164_v2  ;;  %v514_v13 = vld [vmem:[%s355_s24] sm:$0xf]  ;;  %v579_v22 = vunpack.c.0.s8 %v578_v20  ;;  %v1260_v2 = vmov 0   ;;  %p1196_p11 = scmp.ne.s32.totalorder %s948_s16, %s1195_s23  ;;  %s1261_s13 = smov [#allocation2]  }
  0x1a   : > { %1091 = vmatprep.subr.bf16.mxu1 %v1257_v1  ;;  %v515_v14 = vpack.c.bf16 %v514_v13, %v514_v13  ;;  %v1047_v50 = vld [vmem:[%s1540_s5] ss:$0 sm:$0xff]  ;;  %s1199_s24 = sshll.u32 %s1261_s13, 4  ;;  %s1200_s24 = int_to_ptr.vmem [resolvable:$false] %s1199_s24 }
  0x1b   : > { %1078 = vmatpush3.bf16.msra.mxu0 %v1168_v4  ;;  %v1429_v26 = vsub.s32 %v579_v22, %v581_v16  ;;  %v510_v63 = vld [vmem:[%s358_s17] sm:$0x1]  ;;  %p1197_p12 = pnand %p1196_p11, %p1350_p5  ;;  %s1201_s25 = scalar_lea.vmem %s1200_s24, 128 }
  0x1c   : > { %1079 = vmatprep.subr.bf16.mxu0 %v1257_v1  ;;  %vm511_vm3 = vcmp.gt.f32.partialorder %v510_v63, 0.5  ;;  %p1202_p0 = scmp.lt.s32.totalorder %s948_s16, %s1200_s24  ;;  %p1203_p1 = scmp.lt.s32.totalorder %s1201_s25, %s1195_s23 }
  0x1d   : > { %1092 = vmatpush3.bf16.msra.mxu1 %v1165_v5  ;;  %v651_v3 = vsel %vm511_vm3, 1, %v1260_v2  ;;  %p1198_p13 = pneg %p1197_p12 }
  0x1e   : > { %1093 = vmatprep.subr.bf16.mxu1 %v1257_v1  ;;  %p1204_p2 = por %p1203_p1, %p1202_p0 }
  0x1f   : > { %1080 = vmatpush3.bf16.msra.mxu0 %v1170_v6  ;;  %v655_v6 = vrot.slane %v651_v3, %v1432_v32 }
  0x20   : > { %1081 = vmatprep.subr.bf16.mxu0 %v1257_v1  ;;  %p1205_p3 = pnand %p1204_p2, %p1198_p13 }
  0x21   : > { %1094 = vmatpush3.bf16.msra.mxu1 %v1167_v7  ;;  %vm656_vm7 = vcmp.eq.s32.totalorder %v655_v6, 1 }
  0x22   : > { %1099 = vmatprep.subr.bf16.mxu1 %v1257_v1 }
  0x23   : > { %1082 = vmatpush3.bf16.msra.mxu0 %v1172_v10 }
  0x24   : > { %1096 = vmatmul.mubr.msk.bf16.vlgmr.msra.gmra.mxu1 %vm394_vm1, %v361_v9  ;;  %1112 = vmatprep.subr.bf16.mxu0 %v1257_v1 }
  0x25   : > { %1100 = vmatpush3.bf16.msra.mxu1 %v1169_v11  ;;  %1103 = vmatprep.mubr.msk.bf16.mxu1 %vm1258_vm0, %v1257_v1 }
  0x26   : > { %1101 = vmatprep.subr.bf16.mxu1 %v1257_v1  ;;  %1084 = vmatmul.mubr.msk.bf16.vlgmr.msra.gmra.mxu0 %vm394_vm1, %v361_v9 }
  0x27   : > { %1116 = vmatprep.mubr.msk.bf16.mxu0 %vm1258_vm0, %v1257_v1 }
  0x29   : > { %1102 = vmatpush3.bf16.msra.mxu1 %v1171_v12 }
  0x2a   : > { %1107 = vmatprep.subr.mxu1 %v1257_v1 }
  0x2c   : > { %1104 = vmatmul.mubr.msk.bf16.vlgmr.msra.gmra.mxu1 %vm532_vm2, %v515_v14 }
  0x2d   : > { %1109 = vmatprep.mubr.msk.f32.mxu1 %vm1258_vm0, %v1257_v1 }
  0xe4   : > { %v1427_v21 = vpop.f32.mrf.mxu1 }
  0xe6   : > { %v1097_v23 = vpop.f32.mrf.mxu1  ;;  %v432_v24 = vpop.f32.mrf.mxu0 }
  0xe7   : > { %1108 = vmatpush3.msra.mxu1 %v432_v24 }
  0xe8   : > { %v507_v25 = vpop.f32.mrf.mxu1  ;;  %v1085_v27 = vpop.f32.mrf.mxu0 }
  0xea   : > { %v1098_v28 = vpop.f32.mrf.mxu1  ;;  %v435_v29 = vpop.f32.mrf.mxu0 }
  0xeb   : > { %v1174_v29 = vld [vmem:[%s1542_s7] sm:$0xff]  }
  0xec   : > { %v570_v30 = vpop.f32.mrf.mxu1  ;;  %v1086_v33 = vpop.f32.mrf.mxu0 }
  0xed   : > { %v583_v31 = vrot.slane %v570_v30, %v1429_v26 }
  0xee   : > { %v1105_v34 = vpop.f32.mrf.mxu1 }
  0xef   : > { %v584_v35 = vcombine.high %v583_v31, %v583_v31  ;;  %v591_v36 = vrot.slane %v583_v31, %v1429_v26 }
  0xf0   : > { %v573_v37 = vpop.f32.mrf.mxu1 }
  0xf1   : > { %v598_v38 = vrot.slane %v584_v35, %v1429_v26  ;;  %v599_v39 = vcombine.high %v591_v36, %v591_v36  ;;  %v604_v40 = vrot.slane %v591_v36, %v1432_v32 }
  0xf2   : > { %v1106_v41 = vpop.f32.mrf.mxu1 }
  0xf3   : > { %v600_v42 = vcombine.high %v598_v38, %v598_v38  ;;  %v608_v43 = vrot.slane %v598_v38, %v1432_v32  ;;  %v612_v44 = vrot.slane %v599_v39, %v1432_v32  ;;  %v621_v45 = vadd.f32 %v604_v40, %v432_v24 }
  0xf5   : > { %v616_v46 = vrot.slane %v600_v42, %v1432_v32  ;;  %v622_v47 = vadd.f32 %v608_v43, %v432_v24  ;;  %v623_v48 = vadd.f32 %v612_v44, %v432_v24  ;;  %1175 = vtanh.f32 %v621_v45 }
  0xf7   : > { %v624_v49 = vadd.f32 %v616_v46, %v432_v24  ;;  %1177 = vtanh.f32 %v622_v47  ;;  %v1173_v24 = vld [vmem:[%s1542_s7 + $0x8] sm:$0xff]  }
  0xf8   : > { %1179 = vtanh.f32 %v623_v48  ;;  %1113 = vmatpush3.bf16.msra.mxu0 %v1173_v24 }
  0xf9   : > { %1181 = vtanh.f32 %v624_v49  ;;  %1114 = vmatprep.subr.bf16.mxu0 %v1257_v1 }
  0xfc   : > { %1115 = vmatpush3.bf16.msra.mxu0 %v1174_v29 }
 0x102   : > { %v1176_v51 = vpop.eup %1175 }
 0x103   : > { %v635_v52 = vmul.f32 %v1176_v51, %v1047_v50 }
 0x104   : > { %v1178_v53 = vpop.eup %1177 }
 0x105   : > { %v1180_v54 = vpop.eup %1179  ;;  %v639_v55 = vsel %vm532_vm2, %v635_v52, 0.0  ;;  %v636_v56 = vmul.f32 %v1178_v53, %v1047_v50 }
 0x106   : > { %v1182_v57 = vpop.eup %1181  ;;  %640 = vadd.xlane.f32.xlu0 %v639_v55  ;;  %v637_v58 = vmul.f32 %v1180_v54, %v1047_v50 }
 0x107   : > { %v638_v60 = vmul.f32 %v1182_v57, %v1047_v50  ;;  %v642_v61 = vsel %vm532_vm2, %v636_v56, 0.0  ;;  %v1052_v50 = vld [vmem:[%s1543_s8] ss:$0 sm:$0xff] }
 0x108   : > { %v645_v59 = vsel %vm532_vm2, %v637_v58, 0.0 }
 0x109   : > { %646 = vadd.xlane.f32.xlu1 %v645_v59  ;;  %v648_v62 = vsel %vm532_vm2, %v638_v60, 0.0 }
 0x10a   : > { %643 = vadd.xlane.f32.xlu0 %v642_v61 }
 0x10d   : > { %649 = vadd.xlane.f32.xlu1 %v648_v62 }
 0x18f   : > { %v641_v0 = vpop.xlane.xlu0 %640 }
 0x190   : > { %v666_v7 = vrot.slane %v641_v0, %v1425_v18 }
 0x192   : > { %v647_v4 = vpop.xlane.xlu1 %646 }
 0x193   : > { %v644_v5 = vpop.xlane.xlu0 %643  ;;  %v674_v9 = vrot.slane %v647_v4, %v1425_v18 }
 0x194   : > { %v670_v8 = vrot.slane %v644_v5, %v1425_v18 }
 0x196   : > { %v680_v10 = vsel %vm679_vm4, %v670_v8, %v666_v7  ;;  %v650_v11 = vpop.xlane.xlu1 %649 }
 0x197   : > { %v678_v12 = vrot.slane %v650_v11, %v1425_v18  ;;  %v682_v13 = vsel %vm681_vm5, %v674_v9, %v680_v10 }
 0x199   : > { %v684_v14 = vsel %vm683_vm6, %v678_v12, %v682_v13 }
 0x19a   : > { %v686_v15 = vsel %vm656_vm7, %v684_v14, -1e+18 }
 0x19b   : > { %v688_v16 = vsel %vm687_vm8, %v686_v15, -inf }
 0x19c   : > { %689 = vmax.xlane.f32.xlu0 %v688_v16 }
 0x225   : > { %v690_v17 = vpop.xlane.xlu0 %689 }
 0x226   : > { %v691_v19 = vsub.f32 %v686_v15, %v690_v17 }
 0x228   : > { %v692_v20 = vmul.f32 1.442695, %v691_v19 }
 0x22a   : > { %1183 = vpow2.f32 %v692_v20 }
 0x237   : > { %v1184_v22 = vpop.eup %1183 }
 0x238   : > { %v694_v23 = vsel %vm687_vm8, %v1184_v22, 0.0 }
 0x239   : > { %695 = vadd.xlane.f32.xlu1 %v694_v23 }
 0x2c2   : > { %v696_v25 = vpop.xlane.xlu1 %695 }
 0x2c3   : > { %1185 = vrcp.f32 %v696_v25 }
 0x2d0   : > { %v1186_v27 = vpop.eup %1185 }
 0x2d1   : > { %v698_v28 = vmul.f32 %v1186_v27, %v1184_v22 }
 0x2d3   : > { %1110 = vmatmul.mubr.msk.f32.vlgmr.msra.gmra.mxu1 %vm699_vm9, %v698_v28 }
 0x393   : > { %v769_v30 = vpop.f32.mrf.mxu1 }
 0x394   : > { %v773_v31 = vpack.c.bf16 %v769_v30, %v769_v30 }
 0x395   : > { %v1111_v33 = vpop.f32.mrf.mxu1 }
 0x396   : > { %1117 = vmatmul.mubr.msk.bf16.vlgmr.msra.gmra.mxu0 %vm532_vm2, %v773_v31 }
 0x456   : > { %v827_v34 = vpop.f32.mrf.mxu0 }
 0x457   : > { %v840_v35 = vrot.slane %v827_v34, %v1429_v26 }
 0x458   : > { %v1118_v1 = vpop.f32.mrf.mxu0 }
 0x459   : > { %v841_v36 = vcombine.high %v840_v35, %v840_v35  ;;  %v848_v37 = vrot.slane %v840_v35, %v1429_v26 }
 0x45a   : > { %v830_v38 = vpop.f32.mrf.mxu0 }
 0x45b   : > { %v855_v39 = vrot.slane %v841_v36, %v1429_v26  ;;  %v856_v40 = vcombine.high %v848_v37, %v848_v37  ;;  %v861_v41 = vrot.slane %v848_v37, %v1432_v32 }
 0x45c   : > { %v1119_v42 = vpop.f32.mrf.mxu0 }
 0x45d   : > { %v857_v43 = vcombine.high %v855_v39, %v855_v39  ;;  %v865_v44 = vrot.slane %v855_v39, %v1432_v32  ;;  %v869_v45 = vrot.slane %v856_v40, %v1432_v32  ;;  %v878_v46 = vadd.f32 %v861_v41, %v1427_v21 }
 0x45f   : > { %v873_v47 = vrot.slane %v857_v43, %v1432_v32  ;;  %v879_v48 = vadd.f32 %v865_v44, %v1427_v21  ;;  %v880_v49 = vadd.f32 %v869_v45, %v1427_v21  ;;  %1187 = vtanh.f32 %v878_v46 }
 0x461   : > { %v881_v26 = vadd.f32 %v873_v47, %v1427_v21  ;;  %1189 = vtanh.f32 %v879_v48 }
 0x462   : > { %1191 = vtanh.f32 %v880_v49 }
 0x463   : > { %1193 = vtanh.f32 %v881_v26 }
 0x46c   : > { %v1188_v51 = vpop.eup %1187 }
 0x46d   : > { %v892_v52 = vmul.f32 %v1188_v51, %v1052_v50 }
 0x46e   : > { %v1190_v53 = vpop.eup %1189 }
 0x46f   : > { %v1192_v54 = vpop.eup %1191  ;;  %v896_v32 = vsel %vm532_vm2, %v892_v52, 0.0  ;;  %v893_v55 = vmul.f32 %v1190_v53, %v1052_v50 }
 0x470   : > { %v1194_v56 = vpop.eup %1193  ;;  %897 = vadd.xlane.f32.xlu0 %v896_v32  ;;  %v894_v57 = vmul.f32 %v1192_v54, %v1052_v50 }
 0x471   : > { %v899_v21 = vsel %vm532_vm2, %v893_v55, 0.0  ;;  %v895_v58 = vmul.f32 %v1194_v56, %v1052_v50 }
 0x472   : > { %900 = vadd.xlane.f32.xlu1 %v899_v21  ;;  %v902_v59 = vsel %vm532_vm2, %v894_v57, 0.0 }
 0x473   : > { %v905_v60 = vsel %vm532_vm2, %v895_v58, 0.0 }
 0x474   : > { %903 = vadd.xlane.f32.xlu0 %v902_v59 }
 0x476   : > { %906 = vadd.xlane.f32.xlu1 %v905_v60 }
 0x4f9   : > { %v898_v61 = vpop.xlane.xlu0 %897 }
 0x4fa   : > { %v915_v63 = vrot.slane %v898_v61, %v1425_v18 }
 0x4fb   : > { %v901_v62 = vpop.xlane.xlu1 %900 }
 0x4fc   : > { %v919_v0 = vrot.slane %v901_v62, %v1425_v18 }
 0x4fd   : > { %v904_v2 = vpop.xlane.xlu0 %903 }
 0x4fe   : > { %v928_v3 = vsel %vm679_vm4, %v919_v0, %v915_v63  ;;  %v923_v4 = vrot.slane %v904_v2, %v1425_v18 }
 0x4ff   : > { %v907_v5 = vpop.xlane.xlu1 %906 }
 0x500   : > { %v929_v6 = vsel %vm681_vm5, %v923_v4, %v928_v3  ;;  %v927_v7 = vrot.slane %v907_v5, %v1425_v18 }
 0x502   : > { %v930_v8 = vsel %vm683_vm6, %v927_v7, %v929_v6 }
 0x503   : > { %932 = vst.msk [vmem:[%s347_s14] sm:$0xf] %vm687_vm8, %v930_v8 }
 0x504   : > { %1208 = shalt.err (!%p1205_p3)
}
 0x505   : > { %s1209_s28 = scalar_lea.hbm %s1498_s21, 64  ;;  %s1213_s14 = scalar_lea.hbm %s1544_s9, 128 }
 0x506   : > { %p1210_p4 = scmp.ne.s32.totalorder %s1498_s21, %s1209_s28  ;;  %p1214_p9 = scmp.lt.s32.totalorder %s1498_s21, %s1544_s9 }
 0x507   : > { %p1215_p10 = scmp.lt.s32.totalorder %s1213_s14, %s1209_s28 }
 0x508   : > { %p1211_p7 = pnand %p1210_p4, %p1350_p5 }
 0x509   : > { %p1216_p11 = por %p1215_p10, %p1214_p9 }
 0x50a   : > { %p1212_p8 = pneg %p1211_p7 }
 0x50c   : > { %p1217_p12 = pnand %p1216_p11, %p1212_p8 }
 0x50e   : > { %1220 = shalt.err (!%p1217_p12)
}
 0x50f   : > { %1120 = dma.vmem_to_hbm [thread:$0]  (%p1350_p5), %s948_s16, 64, %s1498_s21, %s934_s22  }
 0x510 PF: > { %p1126_p13 = scmp.ge.s32.totalorder %s1255_s12, 2  ;;  %s959_s23 = sand.u32 1, %s1243_s30  }
 0x511   : > { %s960_s13 = scalar_lea.sflag [#allocation3], %s959_s23 }
 0x512   : > { %p1123_p0 = pnand %p1126_p13, %p1354_p6 }
 0x514   : > { %p1124_p1 = pneg %p1123_p0 }
 0x516   : > { %1238 = dma.done.wait (%p1124_p1), %s960_s13, 64  }
 0x517   : > { %1240 = vsyncadd (%p1124_p1), %s960_s13, 4294967232  ;;  %p19_p2 = scmp.ge.s32.totalorder %s1337_s15, 4   ;;  %s1547_s30 = smov %s1247_s10 }
 0x518   : > { %s1548_s10 = smov %s1251_s11  ;;  %s1549_s11 = smov %s1348_s18 }
 0x519   : > { %s1550_s12 = smov %s1337_s15  ;;  %21 = sbr.rel (!%p19_p2) target bundleno = 3 (0x3), region = 97 }
 0x51e   :  { %965 = vsyncpa [#allocation3], 1 }
 0x51f   :  { %967 = vsyncpa [#allocation3 + $0x1], 1 }

// kernel: ptr_extract_summ_forward.5
= control target key start
LH: loop header
LB: loop body
LE: loop exit
PB: predicated region body
PF: predicated region fallthrough
CT: control target
= control target key end

     0   :  { %v2738_v1 = vmov 0   ;;  %vm152_vm0 = vcmask 257024   ;;  %vm82_vm1 = vcmask 392192   ;;  %vm182_vm2 = vcmask 261120   ;;  %s2741_s28 = smov 96   ;;  %s3291_s1 = inlined_call_operand.vmem [shape: bf16[48,256], index: 1, kind: input, shape index: {}]   ;;  %s3292_s2 = inlined_call_operand.vmem [shape: bf16[32,256], index: 2, kind: input, shape index: {}]   ;;  %s3293_s4 = inlined_call_operand.vmem [shape: f32[4,32], index: 4, kind: input, shape index: {}]   ;;  %s3294_s0 = inlined_call_operand.vmem [shape: bf16[2,8,48], index: 0, kind: input, shape index: {}]   ;;  %s3295_s5 = inlined_call_operand.vmem [shape: f32[4,32], index: 5, kind: input, shape index: {}]   ;;  %s3296_s3 = inlined_call_operand.vmem [shape: f32[1,256], index: 3, kind: input, shape index: {}]   ;;  %s3297_s6 = inlined_call_operand.vmem [shape: f32[4,8], index: 6, kind: input, shape index: {}]   ;;  %s3298_s7 = inlined_call_operand.vmem [shape: f32[2,8,64], index: 7, kind: output, shape index: {}]  }
   0x1   :  { %v2460_v0 = vld [vmem:[%s3291_s1 + $0x24] ss:$8 sps:$4 sm:$0xff]   ;;  %118 = vmatprep.mubr.bf16.mxu0 %v2738_v1  ;;  %218 = vmatprep.mubr.bf16.mxu1 %v2738_v1  ;;  %v2462_v2 = vld [vmem:[%s3291_s1 + $0x20] ss:$8 sps:$4 sm:$0xff]   ;;  %v2463_v3 = vld [vmem:[%s3291_s1 + $0x14] ss:$8 sps:$4 sm:$0xff]   ;;  %v37_v16 = vlaneseq }
   0x2   :  { %2452 = vset.pattern.permute.xlu0 %v2738_v1  ;;  %96 = vmatprep.subr.bf16.mxu0 %v2460_v0  ;;  %v2465_v4 = vld [vmem:[%s3291_s1 + $0x10] ss:$8 sps:$4 sm:$0xff]   ;;  %v2466_v5 = vld [vmem:[%s3292_s2 + $0x14] ss:$8 sps:$4 sm:$0xff]   ;;  %v2468_v6 = vld [vmem:[%s3291_s1 + $0x4] ss:$8 sps:$4 sm:$0xff]  }
   0x3   :  { %97 = vmatpush1.bf16.msra.mxu0 %v2462_v2  ;;  %v2814_v7 = vld [vmem:[%s3292_s2 + $0x10] ss:$8 sps:$4 sm:$0xff]   ;;  %198 = vmatprep.subr.bf16.mxu1 %v2466_v5  ;;  %v2820_v8 = vld [vmem:[%s3292_s2 + $0x4] ss:$8 sps:$4 sm:$0xff]   ;;  %v2471_v9 = vld [vmem:[%s3291_s1] ss:$8 sps:$4 sm:$0xff]  }
   0x4   :  { %98 = vmatprep.subr.bf16.mxu0 %v2463_v3  ;;  %199 = vmatpush1.bf16.msra.mxu1 %v2814_v7  ;;  %v2828_v10 = vld [vmem:[%s3292_s2] ss:$8 sps:$4 sm:$0xff]   ;;  %v2852_v17 = vshrl.u32 %v37_v16, 7  ;;  %vm371_vm4 = vcmask 1041409   ;;  %vm374_vm5 = vcmask 1042434   ;;  %vm377_vm6 = vcmask 1043459  }
   0x5   :  { %v151_v11 = vld [vmem:[%s3293_s4] sm:$0xf]  ;;  %200 = vmatprep.subr.bf16.mxu1 %v2820_v8  ;;  %vm426_vm9 = vcmask 253952  }
   0x6   :  { %153 = vst.msk [vmem:[#allocation3] sm:$0xf] %vm152_vm0, %v151_v11  ;;  %v2474_v12 = vld [vmem:[%s3294_s0] sm:$0xff]   ;;  %v39_v18 = vsub.s32 0, %v2852_v17  ;;  %v43_v20 = vsub.s32 1, %v2852_v17  ;;  %vm150_vm3 = vcmp.lt.s32.totalorder %v2852_v17, 2 }
   0x7   :  { %99 = vmatpush1.bf16.msra.mxu0 %v2465_v4  ;;  %v154_v15 = vld [vmem:[%s3295_s5] sm:$0xf]  ;;  %s2740_s5 = smov 32  }
   0x8   :  { %100 = vmatprep.subr.bf16.mxu0 %v2468_v6  ;;  %201 = vmatpush1.bf16.msra.mxu1 %v2828_v10  ;;  %155 = vst.msk [vmem:[#allocation4] sm:$0xf] %vm152_vm0, %v154_v15  ;;  %v35_v19 = vld [vmem:[%s3296_s3] sm:$0x3]  ;;  %s2739_s3 = smov 64  }
   0x9   :  { %476 = vmatprep.subr.bf16.mxu1 %v2466_v5  ;;  %v40_v21 = vrot.slane %v35_v19, %v39_v18  ;;  %v44_v22 = vrot.slane %v35_v19, %v43_v20 }
   0xb   :  { %101 = vmatpush1.bf16.msra.mxu0 %v2471_v9 }
   0xc   :  { %748 = vmatprep.subr.bf16.mxu0 %v2466_v5 }
   0xd   :  { %v156_v13 = vld [vmem:[#allocation3] sm:$0xf] }
   0xe   :  { %2367 = vmatmul.mubr.msk.bf16.vlgmr.msra.gmra.mxu0 %vm82_vm1, %v2474_v12  ;;  %v157_v14 = vpack.c.bf16 %v156_v13, %v156_v13 }
   0xf   :  { %749 = vmatpush1.bf16.msra.mxu0 %v2814_v7  ;;  %768 = vmatprep.mubr.bf16.mxu0 %v2738_v1  ;;  %v2863_v49 = vld [vmem:[#allocation4] sm:$0xf] }
  0x10   :  { %750 = vmatprep.subr.bf16.mxu0 %v2820_v8  ;;  %2372 = vmatmul.mubr.msk.bf16.vlgmr.msra.gmra.mxu1 %vm182_vm2, %v157_v14  ;;  %v277_v51 = vrot.slane %v2863_v49, 2  ;;  %v276_v53 = vrot.slane %v2863_v49, 1  ;;  %v278_v54 = vrot.slane %v2863_v49, 3 }
  0x11   :  { %477 = vmatpush1.bf16.msra.mxu1 %v2814_v7  ;;  %496 = vmatprep.mubr.bf16.mxu1 %v2738_v1 }
  0x12   :  { %478 = vmatprep.subr.bf16.mxu1 %v2820_v8 }
  0x13   :  { %751 = vmatpush1.bf16.msra.mxu0 %v2828_v10 }
  0x15   :  { %479 = vmatpush1.bf16.msra.mxu1 %v2828_v10 }
  0x16   :  { %1020 = vmatprep.subr.bf16.mxu1 %v2466_v5 }
  0xce   :  { %v120_v23 = vpop.f32.mrf.mxu0 }
  0xcf   :  { %v121_v24 = vadd.f32 %v120_v23, %v40_v21 }
  0xd0   :  { %v122_v25 = vpop.f32.mrf.mxu0  ;;  %v220_v27 = vpop.f32.mrf.mxu1 }
  0xd1   :  { %129 = vst [vmem:[#allocation2] sm:$0xff] %v121_v24  ;;  %v123_v26 = vadd.f32 %v122_v25, %v44_v22 }
  0xd2   :  { %v124_v28 = vpop.f32.mrf.mxu0  ;;  %v222_v30 = vpop.f32.mrf.mxu1 }
  0xd3   :  { %132 = vst [vmem:[#allocation2 + $0x11] ss:$-4 sps:$4 sm:$0x88] %v123_v26   ;;  %134 = vst [vmem:[#allocation2 + $0x13] ss:$-4 sps:$4 sm:$0x44] %v123_v26   ;;  %v125_v29 = vadd.f32 %v124_v28, %v40_v21  ;;  %v233_v33 = vsel %vm150_vm3, %v220_v27, %v222_v30 }
  0xd4   :  { %136 = vst [vmem:[#allocation2 + $0x15] ss:$-4 sps:$4 sm:$0x22] %v123_v26   ;;  %138 = vst [vmem:[#allocation2 + $0x17] ss:$-4 sps:$4 sm:$0x11] %v123_v26   ;;  %v126_v31 = vpop.f32.mrf.mxu0  ;;  %v224_v34 = vpop.f32.mrf.mxu1 }
  0xd5   :  { %130 = vst [vmem:[#allocation2 + $0x8] sm:$0xff] %v125_v29  ;;  %v127_v32 = vadd.f32 %v126_v31, %v44_v22  ;;  %v235_v38 = vrot.slane %v233_v33, 1  ;;  %v236_v40 = vrot.slane %v233_v33, 2  ;;  %v237_v42 = vrot.slane %v233_v33, 3 }
  0xd6   :  { %v225_v36 = vpop.f32.mrf.mxu1 }
  0xd7   :  { %133 = vst [vmem:[#allocation2 + $0x19] ss:$-4 sps:$4 sm:$0x88] %v127_v32   ;;  %135 = vst [vmem:[#allocation2 + $0x1b] ss:$-4 sps:$4 sm:$0x44] %v127_v32  }
  0xd8   :  { %137 = vst [vmem:[#allocation2 + $0x1d] ss:$-4 sps:$4 sm:$0x22] %v127_v32   ;;  %139 = vst [vmem:[#allocation2 + $0x1f] ss:$-4 sps:$4 sm:$0x11] %v127_v32  }
  0xd9   :  { %v227_v35 = vld [vmem:[#allocation2] sm:$0x1] }
  0xda   :  { %v242_v37 = vadd.f32 %v233_v33, %v227_v35  ;;  %v229_v41 = vld [vmem:[#allocation2 + $0x10] sm:$0x1] }
  0xdb   :  { %v244_v46 = vadd.f32 %v236_v40, %v229_v41 }
  0xdc   :  { %2482 = vtanh.f32 %v242_v37  ;;  %v228_v39 = vld [vmem:[#allocation2 + $0x8] sm:$0x1]  ;;  %v2373_v56 = vmul.f32 -1.442695, %v242_v37 }
  0xdd   :  { %v243_v43 = vadd.f32 %v235_v38, %v228_v39  ;;  %v2375_v57 = vmul.f32 -1.442695, %v244_v46 }
  0xde   :  { %v230_v44 = vld [vmem:[#allocation2 + $0x18] sm:$0x1] }
  0xdf   :  { %v245_v45 = vadd.f32 %v237_v42, %v230_v44  ;;  %2484 = vtanh.f32 %v243_v43  ;;  %v2374_v55 = vmul.f32 -1.442695, %v243_v43  ;;  %v359_v43 = vld [vmem:[%s3297_s6] sm:$0xf] }
  0xe0   :  { %vm360_vm7 = vcmp.gt.f32.partialorder %v359_v43, 0.5 }
  0xe1   :  { %2486 = vtanh.f32 %v245_v45  ;;  %v2376_v58 = vmul.f32 -1.442695, %v245_v45 }
  0xe2   :  { %2488 = vtanh.f32 %v244_v46  ;;  %v361_v46 = vsel %vm360_vm7, 1, %v2738_v1 }
  0xe3   :  { %2490 = vpow2.f32 %v2374_v55 }
  0xe4   :  { %2492 = vpow2.f32 %v2373_v56 }
  0xe5   :  { %2494 = vpow2.f32 %v2375_v57 }
  0xe6   :  { %2496 = vpow2.f32 %v2376_v58 }
  0xe9   :  { %v2483_v47 = vpop.eup %2482 }
  0xea   :  { %299 = vrot.lane.b32.xlu1 %v2483_v47, %s2739_s3 }
  0xec   :  { %v2485_v48 = vpop.eup %2484 }
  0xed   :  { %301 = vrot.lane.b32.xlu0 %v2485_v48, %s2739_s3 }
  0xee   :  { %v2487_v50 = vpop.eup %2486 }
  0xef   :  { %305 = vrot.lane.b32.xlu1 %v2487_v50, %s2739_s3  ;;  %v2489_v52 = vpop.eup %2488 }
  0xf0   :  { %v2491_v59 = vpop.eup %2490 }
  0xf1   :  { %303 = vrot.lane.b32.xlu0 %v2489_v52, %s2739_s3  ;;  %v2493_v60 = vpop.eup %2492  ;;  %v259_v61 = vadd.f32 1.0, %v2491_v59 }
  0xf2   :  { %v2495_v62 = vpop.eup %2494  ;;  %v258_v63 = vadd.f32 1.0, %v2493_v60 }
  0xf3   :  { %283 = vrot.lane.b32.xlu1 %v277_v51, %s2740_s5  ;;  %v260_v0 = vadd.f32 1.0, %v2495_v62  ;;  %2498 = vrcp.f32 %v259_v61  ;;  %v2497_v2 = vpop.eup %2496 }
  0xf4   :  { %2500 = vrcp.f32 %v258_v63  ;;  %v261_v3 = vadd.f32 1.0, %v2497_v2  ;;  %v2742_v63 = vmov 1966171168  }
  0xf5   :  { %281 = vrot.lane.b32.xlu0 %v276_v53, %s2740_s5  ;;  %2502 = vrcp.f32 %v260_v0  ;;  %v403_v0 = vunpack.c.l.s4 %v2742_v63 }
  0xf6   :  { %2504 = vrcp.f32 %v261_v3 }
  0xf7   :  { %285 = vrot.lane.b32.xlu1 %v278_v54, %s2740_s5  ;;  %v404_v2 = vunpack.c.0.s8 %v403_v0 }
  0xf9   :  { %279 = vrot.lane.b32.xlu0 %v2863_v49, %s2740_s5 }
 0x100   :  { %v2499_v4 = vpop.eup %2498 }
 0x101   :  { %v2501_v11 = vpop.eup %2500 }
 0x102   :  { %v2503_v12 = vpop.eup %2502 }
 0x103   :  { %v2505_v18 = vpop.eup %2504 }
 0x15c   :  { %v300_v9 = vpop.permute.xlu1 %299 }
 0x15d   :  { %v311_v14 = vmul.f32 %v2501_v11, %v300_v9 }
 0x15f   :  { %v302_v5 = vpop.permute.xlu0 %301 }
 0x160   :  { %v312_v6 = vmul.f32 %v2499_v4, %v302_v5  ;;  %v384_v5 = vld [vmem:[#allocation3] sm:$0xf] }
 0x161   :  { %v306_v16 = vpop.permute.xlu1 %305 }
 0x162   :  { %321 = vrot.lane.b32.xlu0 %v312_v6, %s2740_s5  ;;  %v314_v19 = vmul.f32 %v2505_v18, %v306_v16 }
 0x163   :  { %v304_v13 = vpop.permute.xlu0 %303 }
 0x164   :  { %v313_v15 = vmul.f32 %v2503_v12, %v304_v13 }
 0x165   :  { %v284_v21 = vpop.permute.xlu1 %283 }
 0x166   :  { %323 = vrot.lane.b32.xlu1 %v313_v15, %s2740_s5  ;;  %319 = vrot.lane.b32.xlu0 %v311_v14, %s2740_s5  ;;  %v293_v27 = vmul.f32 %v2503_v12, %v284_v21 }
 0x167   :  { %v282_v20 = vpop.permute.xlu0 %281 }
 0x168   :  { %v292_v23 = vmul.f32 %v2499_v4, %v282_v20 }
 0x169   :  { %v286_v24 = vpop.permute.xlu1 %285 }
 0x16a   :  { %325 = vrot.lane.b32.xlu1 %v314_v19, %s2740_s5  ;;  %v294_v34 = vmul.f32 %v2505_v18, %v286_v24 }
 0x16b   :  { %v280_v22 = vpop.permute.xlu0 %279 }
 0x16c   :  { %v291_v28 = vmul.f32 %v2501_v11, %v280_v22 }
 0x1d4   :  { %v322_v25 = vpop.permute.xlu0 %321 }
 0x1d5   :  { %v332_v26 = vadd.f32 %v322_v25, %v292_v23 }
 0x1d7   :  { %2506 = vtanh.f32 %v332_v26  ;;  %v370_v31 = vrot.slane %v332_v26, 7 }
 0x1d8   :  { %v324_v29 = vpop.permute.xlu1 %323  ;;  %v320_v30 = vpop.permute.xlu0 %319 }
 0x1d9   :  { %v333_v32 = vadd.f32 %v324_v29, %v293_v27  ;;  %v331_v33 = vadd.f32 %v320_v30, %v291_v28  ;;  %v506_v27 = vld [vmem:[#allocation2 + $0x9] sm:$0x1] }
 0x1db   :  { %2508 = vtanh.f32 %v333_v32  ;;  %v373_v35 = vrot.slane %v333_v32, 6  ;;  %v372_v36 = vsel %vm371_vm4, %v370_v31, %v331_v33  ;;  %v505_v31 = vld [vmem:[#allocation2 + $0x1] sm:$0x1]  ;;  %v507_v32 = vld [vmem:[#allocation2 + $0x11] sm:$0x1] }
 0x1dc   :  { %2510 = vtanh.f32 %v331_v33  ;;  %v326_v37 = vpop.permute.xlu1 %325 }
 0x1dd   :  { %v334_v38 = vadd.f32 %v326_v37, %v294_v34  ;;  %v375_v39 = vsel %vm374_vm5, %v373_v35, %v372_v36 }
 0x1df   :  { %2512 = vtanh.f32 %v334_v38  ;;  %v376_v40 = vrot.slane %v334_v38, 5 }
 0x1e1   :  { %v378_v41 = vsel %vm377_vm6, %v376_v40, %v375_v39 }
 0x1e4   :  { %v2507_v42 = vpop.eup %2506 }
 0x1e5   :  { %345 = vrot.lane.b32.xlu0 %v2507_v42, %s2739_s3 }
 0x1e8   :  { %v2509_v44 = vpop.eup %2508 }
 0x1e9   :  { %v2511_v45 = vpop.eup %2510  ;;  %347 = vrot.lane.b32.xlu1 %v2509_v44, %s2739_s3 }
 0x1ea   :  { %343 = vrot.lane.b32.xlu0 %v2511_v45, %s2739_s3 }
 0x1ec   :  { %v2513_v47 = vpop.eup %2512 }
 0x1ed   :  { %349 = vrot.lane.b32.xlu1 %v2513_v47, %s2739_s3 }
 0x1ee   :  { %363 = vperm.xlu0 %2452, %v361_v46  }
 0x257   :  { %v346_v48 = vpop.permute.xlu0 %345 }
 0x258   :  { %v356_v50 = vmul.f32 %v2499_v4, %v346_v48  ;;  %v2897_v4 = vsub.s32 %v404_v2, %v2852_v17 }
 0x25a   :  { %v389_v55 = vrot.slane %v356_v50, 7 }
 0x25b   :  { %v348_v51 = vpop.permute.xlu1 %347 }
 0x25c   :  { %v357_v52 = vmul.f32 %v2503_v12, %v348_v51  ;;  %v344_v53 = vpop.permute.xlu0 %343 }
 0x25d   :  { %v355_v54 = vmul.f32 %v2501_v11, %v344_v53 }
 0x25e   :  { %v391_v56 = vrot.slane %v357_v52, 6 }
 0x25f   :  { %v350_v57 = vpop.permute.xlu1 %349  ;;  %v390_v59 = vsel %vm371_vm4, %v389_v55, %v355_v54 }
 0x260   :  { %v358_v58 = vmul.f32 %v2505_v18, %v350_v57  ;;  %v392_v61 = vsel %vm374_vm5, %v391_v56, %v390_v59 }
 0x262   :  { %v393_v60 = vrot.slane %v358_v58, 5 }
 0x264   :  { %v394_v62 = vsel %vm377_vm6, %v393_v60, %v392_v61 }
 0x265   :  { %395 = vrot.lane.b32.xlu1 %v394_v62, %s2740_s5 }
 0x269   :  { %379 = vrot.lane.b32.xlu1 %v378_v41, %s2741_s28  ;;  %v364_v3 = vpop.permute.xlu0 %363 }
 0x26a   :  { %vm365_vm8 = vcmp.eq.s32.totalorder %v364_v3, 1 }
 0x2d7   :  { %v396_v6 = vpop.permute.xlu1 %395 }
 0x2d8   :  { %v398_v9 = vsel %vm365_vm8, %v396_v6, %v384_v5  ;;  %v400_v11 = vsel %vm365_vm8, %v396_v6, 0.0  ;;  %v2743_v6 = vmov 1  }
 0x2d9   :  { %399 = vst.msk [vmem:[#allocation3] sm:$0xf] %vm152_vm0, %v398_v9  ;;  %v408_v12 = vrot.slane %v400_v11, %v2897_v4  ;;  %2453 = vset.pattern.permute.xlu0 %v2743_v6 }
 0x2db   :  { %v409_v13 = vcombine.high %v408_v12, %v408_v12  ;;  %v416_v14 = vrot.slane %v408_v12, %v2897_v4  ;;  %v380_v15 = vpop.permute.xlu1 %379 }
 0x2dc   :  { %v382_v16 = vsel %vm365_vm8, %v380_v15, %v2863_v49 }
 0x2dd   :  { %v423_v18 = vrot.slane %v409_v13, %v2897_v4  ;;  %427 = vst.msk [vmem:[#allocation5] sm:$0x1] %vm426_vm9, %v416_v14  ;;  %v429_v19 = vcombine.high %v416_v14, %v416_v14 }
 0x2de   :  { %383 = vst.msk [vmem:[#allocation4] sm:$0xf] %vm152_vm0, %v382_v16 }
 0x2df   :  { %428 = vst.msk [vmem:[#allocation5 + $0x8] sm:$0x1] %vm426_vm9, %v423_v18  ;;  %v430_v20 = vcombine.high %v423_v18, %v423_v18  ;;  %433 = vst.msk [vmem:[#allocation6 + $0x7] sm:$0x1] %vm426_vm9, %v429_v19 }
 0x2e0   :  { %v435_v21 = vld [vmem:[#allocation3] sm:$0xf] }
 0x2e1   :  { %434 = vst.msk [vmem:[#allocation6 + $0xf] sm:$0x1] %vm426_vm9, %v430_v20  ;;  %v436_v22 = vpack.c.bf16 %v435_v21, %v435_v21 }
 0x2e3   :  { %2381 = vmatmul.mubr.msk.bf16.vlgmr.msra.gmra.mxu1 %vm182_vm2, %v436_v22 }
 0x2e4   :  { %1021 = vmatpush1.bf16.msra.mxu1 %v2814_v7  ;;  %1040 = vmatprep.mubr.bf16.mxu1 %v2738_v1 }
 0x2e5   :  { %1022 = vmatprep.subr.bf16.mxu1 %v2820_v8  ;;  %v508_v8 = vld [vmem:[#allocation2 + $0x19] sm:$0x1]  ;;  %v2917_v38 = vld [vmem:[#allocation4] sm:$0xf] }
 0x2e6   :  { %v552_v39 = vrot.slane %v2917_v38, 1  ;;  %v553_v41 = vrot.slane %v2917_v38, 2  ;;  %v554_v42 = vrot.slane %v2917_v38, 3 }
 0x2e8   :  { %1023 = vmatpush1.bf16.msra.mxu1 %v2828_v10 }
 0x3a3   :  { %v498_v49 = vpop.f32.mrf.mxu1 }
 0x3a5   :  { %v500_v23 = vpop.f32.mrf.mxu1 }
 0x3a6   :  { %v509_v24 = vsel %vm150_vm3, %v498_v49, %v500_v23 }
 0x3a7   :  { %v511_v25 = vrot.slane %v509_v24, 1  ;;  %v502_v26 = vpop.f32.mrf.mxu1  ;;  %v512_v28 = vrot.slane %v509_v24, 2  ;;  %v518_v7 = vadd.f32 %v509_v24, %v505_v31  ;;  %v513_v33 = vrot.slane %v509_v24, 3 }
 0x3a9   :  { %v519_v29 = vadd.f32 %v511_v25, %v506_v27  ;;  %v503_v30 = vpop.f32.mrf.mxu1  ;;  %v520_v34 = vadd.f32 %v512_v28, %v507_v32  ;;  %v521_v10 = vadd.f32 %v513_v33, %v508_v8  ;;  %v2382_v44 = vmul.f32 -1.442695, %v518_v7 }
 0x3ab   :  { %2514 = vtanh.f32 %v519_v29  ;;  %v2383_v43 = vmul.f32 -1.442695, %v519_v29  ;;  %v2384_v45 = vmul.f32 -1.442695, %v520_v34  ;;  %v2385_v46 = vmul.f32 -1.442695, %v521_v10 }
 0x3ac   :  { %2516 = vtanh.f32 %v518_v7  ;;  %v635_v7 = vld [vmem:[%s3297_s6] sm:$0xf] }
 0x3ad   :  { %2518 = vtanh.f32 %v520_v34  ;;  %vm636_vm10 = vcmp.gt.f32.partialorder %v635_v7, 0.5 }
 0x3ae   :  { %2520 = vtanh.f32 %v521_v10  ;;  %v637_v8 = vsel %vm636_vm10, 1, %v2738_v1 }
 0x3af   :  { %2522 = vpow2.f32 %v2383_v43 }
 0x3b0   :  { %2524 = vpow2.f32 %v2382_v44 }
 0x3b1   :  { %2526 = vpow2.f32 %v2384_v45 }
 0x3b2   :  { %2528 = vpow2.f32 %v2385_v46 }
 0x3b8   :  { %v2515_v35 = vpop.eup %2514 }
 0x3b9   :  { %577 = vrot.lane.b32.xlu0 %v2515_v35, %s2739_s3  ;;  %v2517_v36 = vpop.eup %2516 }
 0x3ba   :  { %v2519_v37 = vpop.eup %2518 }
 0x3bb   :  { %579 = vrot.lane.b32.xlu1 %v2519_v37, %s2739_s3  ;;  %v2521_v40 = vpop.eup %2520 }
 0x3bc   :  { %v2523_v47 = vpop.eup %2522 }
 0x3bd   :  { %575 = vrot.lane.b32.xlu0 %v2517_v36, %s2739_s3  ;;  %v2525_v48 = vpop.eup %2524  ;;  %v535_v50 = vadd.f32 1.0, %v2523_v47 }
 0x3be   :  { %v2527_v51 = vpop.eup %2526  ;;  %v534_v52 = vadd.f32 1.0, %v2525_v48 }
 0x3bf   :  { %581 = vrot.lane.b32.xlu1 %v2521_v40, %s2739_s3  ;;  %v536_v53 = vadd.f32 1.0, %v2527_v51  ;;  %2530 = vrcp.f32 %v535_v50  ;;  %v2529_v54 = vpop.eup %2528 }
 0x3c0   :  { %2532 = vrcp.f32 %v534_v52  ;;  %v537_v55 = vadd.f32 1.0, %v2529_v54  ;;  %v657_v52 = vld [vmem:[#allocation3] sm:$0xf] }
 0x3c1   :  { %557 = vrot.lane.b32.xlu0 %v552_v39, %s2740_s5  ;;  %2534 = vrcp.f32 %v536_v53 }
 0x3c2   :  { %2536 = vrcp.f32 %v537_v55 }
 0x3c3   :  { %559 = vrot.lane.b32.xlu1 %v553_v41, %s2740_s5 }
 0x3c5   :  { %555 = vrot.lane.b32.xlu0 %v2917_v38, %s2740_s5 }
 0x3c7   :  { %561 = vrot.lane.b32.xlu1 %v554_v42, %s2740_s5 }
 0x3cc   :  { %v2531_v56 = vpop.eup %2530 }
 0x3cd   :  { %v2533_v59 = vpop.eup %2532 }
 0x3ce   :  { %v2535_v60 = vpop.eup %2534 }
 0x3cf   :  { %v2537_v2 = vpop.eup %2536 }
 0x42b   :  { %v578_v57 = vpop.permute.xlu0 %577 }
 0x42c   :  { %v588_v58 = vmul.f32 %v2531_v56, %v578_v57 }
 0x42d   :  { %v580_v61 = vpop.permute.xlu1 %579 }
 0x42e   :  { %597 = vrot.lane.b32.xlu0 %v588_v58, %s2740_s5  ;;  %v589_v63 = vmul.f32 %v2535_v60, %v580_v61 }
 0x42f   :  { %v576_v62 = vpop.permute.xlu0 %575 }
 0x430   :  { %v587_v0 = vmul.f32 %v2533_v59, %v576_v62  ;;  %599 = vrot.lane.b32.xlu1 %v589_v63, %s2740_s5 }
 0x431   :  { %v582_v3 = vpop.permute.xlu1 %581 }
 0x432   :  { %595 = vrot.lane.b32.xlu0 %v587_v0, %s2740_s5  ;;  %v590_v5 = vmul.f32 %v2537_v2, %v582_v3 }
 0x433   :  { %v558_v9 = vpop.permute.xlu0 %557 }
 0x434   :  { %601 = vrot.lane.b32.xlu1 %v590_v5, %s2740_s5  ;;  %v568_v13 = vmul.f32 %v2531_v56, %v558_v9 }
 0x435   :  { %v560_v11 = vpop.permute.xlu1 %559 }
 0x436   :  { %v569_v18 = vmul.f32 %v2535_v60, %v560_v11  ;;  %v778_v11 = vld [vmem:[#allocation2 + $0xa] sm:$0x1] }
 0x437   :  { %v556_v12 = vpop.permute.xlu0 %555 }
 0x438   :  { %v567_v19 = vmul.f32 %v2533_v59, %v556_v12 }
 0x439   :  { %v562_v14 = vpop.permute.xlu1 %561 }
 0x43a   :  { %v570_v24 = vmul.f32 %v2537_v2, %v562_v14 }
 0x4a0   :  { %v598_v15 = vpop.permute.xlu0 %597 }
 0x4a1   :  { %v608_v16 = vadd.f32 %v598_v15, %v568_v13  ;;  %v777_v15 = vld [vmem:[#allocation2 + $0x2] sm:$0x1] }
 0x4a2   :  { %v600_v20 = vpop.permute.xlu1 %599 }
 0x4a3   :  { %2538 = vtanh.f32 %v608_v16  ;;  %v609_v22 = vadd.f32 %v600_v20, %v569_v18  ;;  %v646_v49 = vrot.slane %v608_v16, 7  ;;  %v779_v16 = vld [vmem:[#allocation2 + $0x12] sm:$0x1] }
 0x4a4   :  { %v596_v21 = vpop.permute.xlu0 %595 }
 0x4a5   :  { %v607_v23 = vadd.f32 %v596_v21, %v567_v19  ;;  %2540 = vtanh.f32 %v609_v22  ;;  %v648_v25 = vrot.slane %v609_v22, 6  ;;  %v780_v21 = vld [vmem:[#allocation2 + $0x1a] sm:$0x1] }
 0x4a6   :  { %v602_v27 = vpop.permute.xlu1 %601 }
 0x4a7   :  { %v647_v26 = vsel %vm371_vm4, %v646_v49, %v607_v23  ;;  %2542 = vtanh.f32 %v607_v23  ;;  %v610_v28 = vadd.f32 %v602_v27, %v570_v24 }
 0x4a8   :  { %v649_v29 = vsel %vm374_vm5, %v648_v25, %v647_v26 }
 0x4a9   :  { %2544 = vtanh.f32 %v610_v28  ;;  %v650_v30 = vrot.slane %v610_v28, 5 }
 0x4ab   :  { %v651_v31 = vsel %vm377_vm6, %v650_v30, %v649_v29 }
 0x4b0   :  { %v2539_v32 = vpop.eup %2538 }
 0x4b1   :  { %621 = vrot.lane.b32.xlu0 %v2539_v32, %s2739_s3 }
 0x4b2   :  { %v2541_v33 = vpop.eup %2540 }
 0x4b3   :  { %623 = vrot.lane.b32.xlu1 %v2541_v33, %s2739_s3 }
 0x4b4   :  { %v2543_v34 = vpop.eup %2542 }
 0x4b5   :  { %619 = vrot.lane.b32.xlu0 %v2543_v34, %s2739_s3 }
 0x4b6   :  { %v2545_v10 = vpop.eup %2544 }
 0x4b7   :  { %625 = vrot.lane.b32.xlu1 %v2545_v10, %s2739_s3 }
 0x4b9   :  { %639 = vperm.xlu0 %2453, %v637_v8  }
 0x523   :  { %v622_v35 = vpop.permute.xlu0 %621 }
 0x524   :  { %v632_v36 = vmul.f32 %v2531_v56, %v622_v35 }
 0x525   :  { %v624_v37 = vpop.permute.xlu1 %623 }
 0x526   :  { %v633_v39 = vmul.f32 %v2535_v60, %v624_v37  ;;  %v662_v41 = vrot.slane %v632_v36, 7 }
 0x527   :  { %v620_v40 = vpop.permute.xlu0 %619 }
 0x528   :  { %v631_v42 = vmul.f32 %v2533_v59, %v620_v40  ;;  %v664_v43 = vrot.slane %v633_v39, 6 }
 0x529   :  { %v626_v44 = vpop.permute.xlu1 %625 }
 0x52a   :  { %v663_v45 = vsel %vm371_vm4, %v662_v41, %v631_v42  ;;  %v634_v46 = vmul.f32 %v2537_v2, %v626_v44 }
 0x52b   :  { %v665_v47 = vsel %vm374_vm5, %v664_v43, %v663_v45 }
 0x52c   :  { %v666_v48 = vrot.slane %v634_v46, 5 }
 0x52e   :  { %v667_v50 = vsel %vm377_vm6, %v666_v48, %v665_v47 }
 0x52f   :  { %668 = vrot.lane.b32.xlu1 %v667_v50, %s2740_s5 }
 0x533   :  { %652 = vrot.lane.b32.xlu1 %v651_v31, %s2741_s28 }
 0x534   :  { %v640_v51 = vpop.permute.xlu0 %639 }
 0x535   :  { %vm641_vm11 = vcmp.eq.s32.totalorder %v640_v51, 1 }
 0x5a1   :  { %v669_v53 = vpop.permute.xlu1 %668 }
 0x5a2   :  { %v671_v54 = vsel %vm641_vm11, %v669_v53, %v657_v52  ;;  %v673_v55 = vsel %vm641_vm11, %v669_v53, 0.0  ;;  %v2744_v53 = vmov 2  }
 0x5a3   :  { %672 = vst.msk [vmem:[#allocation3] sm:$0xf] %vm152_vm0, %v671_v54  ;;  %v681_v56 = vrot.slane %v673_v55, %v2897_v4  ;;  %2454 = vset.pattern.permute.xlu0 %v2744_v53 }
 0x5a5   :  { %v682_v57 = vcombine.high %v681_v56, %v681_v56  ;;  %v689_v58 = vrot.slane %v681_v56, %v2897_v4  ;;  %v653_v59 = vpop.permute.xlu1 %652 }
 0x5a6   :  { %v655_v60 = vsel %vm641_vm11, %v653_v59, %v2917_v38 }
 0x5a7   :  { %v696_v61 = vrot.slane %v682_v57, %v2897_v4  ;;  %699 = vst.msk [vmem:[#allocation5 + $0x1] sm:$0x1] %vm426_vm9, %v689_v58  ;;  %v701_v62 = vcombine.high %v689_v58, %v689_v58 }
 0x5a8   :  { %656 = vst.msk [vmem:[#allocation4] sm:$0xf] %vm152_vm0, %v655_v60 }
 0x5a9   :  { %700 = vst.msk [vmem:[#allocation5 + $0x9] sm:$0x1] %vm426_vm9, %v696_v61  ;;  %v702_v63 = vcombine.high %v696_v61, %v696_v61  ;;  %705 = vst.msk [vmem:[#allocation6 + $0x6] sm:$0x1] %vm426_vm9, %v701_v62 }
 0x5aa   :  { %v707_v0 = vld [vmem:[#allocation3] sm:$0xf] }
 0x5ab   :  { %706 = vst.msk [vmem:[#allocation6 + $0xe] sm:$0x1] %vm426_vm9, %v702_v63  ;;  %v708_v2 = vpack.c.bf16 %v707_v0, %v707_v0 }
 0x5ad   :  { %2390 = vmatmul.mubr.msk.bf16.vlgmr.msra.gmra.mxu0 %vm182_vm2, %v708_v2 }
 0x5ae   :  { %1312 = vmatprep.mubr.bf16.mxu0 %v2738_v1 }
 0x5af   :  { %v2965_v25 = vld [vmem:[#allocation4] sm:$0xf] }
 0x5b0   :  { %v824_v26 = vrot.slane %v2965_v25, 1  ;;  %v825_v28 = vrot.slane %v2965_v25, 2  ;;  %v826_v29 = vrot.slane %v2965_v25, 3 }
 0x66d   :  { %v770_v38 = vpop.f32.mrf.mxu0 }
 0x66f   :  { %v772_v3 = vpop.f32.mrf.mxu0 }
 0x670   :  { %v781_v5 = vsel %vm150_vm3, %v770_v38, %v772_v3 }
 0x671   :  { %v783_v6 = vrot.slane %v781_v5, 1  ;;  %v774_v9 = vpop.f32.mrf.mxu0  ;;  %v784_v12 = vrot.slane %v781_v5, 2  ;;  %v790_v18 = vadd.f32 %v781_v5, %v777_v15  ;;  %v785_v19 = vrot.slane %v781_v5, 3 }
 0x673   :  { %v791_v13 = vadd.f32 %v783_v6, %v778_v11  ;;  %v775_v14 = vpop.f32.mrf.mxu0  ;;  %v792_v20 = vadd.f32 %v784_v12, %v779_v16  ;;  %v793_v22 = vadd.f32 %v785_v19, %v780_v21  ;;  %v2391_v31 = vmul.f32 -1.442695, %v790_v18 }
 0x675   :  { %2546 = vtanh.f32 %v791_v13  ;;  %v2392_v30 = vmul.f32 -1.442695, %v791_v13  ;;  %v2393_v32 = vmul.f32 -1.442695, %v792_v20  ;;  %v2394_v7 = vmul.f32 -1.442695, %v793_v22 }
 0x676   :  { %2548 = vtanh.f32 %v790_v18  ;;  %v907_v18 = vld [vmem:[%s3297_s6] sm:$0xf] }
 0x677   :  { %2550 = vtanh.f32 %v792_v20  ;;  %vm908_vm12 = vcmp.gt.f32.partialorder %v907_v18, 0.5 }
 0x678   :  { %2552 = vtanh.f32 %v793_v22  ;;  %v909_v21 = vsel %vm908_vm12, 1, %v2738_v1 }
 0x679   :  { %2554 = vpow2.f32 %v2392_v30 }
 0x67a   :  { %2556 = vpow2.f32 %v2391_v31 }
 0x67b   :  { %2558 = vpow2.f32 %v2393_v32 }
 0x67c   :  { %2560 = vpow2.f32 %v2394_v7 }
 0x682   :  { %v2547_v49 = vpop.eup %2546 }
 0x683   :  { %849 = vrot.lane.b32.xlu0 %v2547_v49, %s2739_s3  ;;  %v2549_v23 = vpop.eup %2548 }
 0x684   :  { %v2551_v24 = vpop.eup %2550 }
 0x685   :  { %851 = vrot.lane.b32.xlu1 %v2551_v24, %s2739_s3  ;;  %v2553_v27 = vpop.eup %2552 }
 0x686   :  { %v2555_v33 = vpop.eup %2554 }
 0x687   :  { %847 = vrot.lane.b32.xlu0 %v2549_v23, %s2739_s3  ;;  %v2557_v34 = vpop.eup %2556  ;;  %v807_v8 = vadd.f32 1.0, %v2555_v33 }
 0x688   :  { %v2559_v10 = vpop.eup %2558  ;;  %v806_v35 = vadd.f32 1.0, %v2557_v34 }
 0x689   :  { %853 = vrot.lane.b32.xlu1 %v2553_v27, %s2739_s3  ;;  %v808_v36 = vadd.f32 1.0, %v2559_v10  ;;  %2562 = vrcp.f32 %v807_v8  ;;  %v2561_v37 = vpop.eup %2560 }
 0x68a   :  { %2564 = vrcp.f32 %v806_v35  ;;  %v809_v39 = vadd.f32 1.0, %v2561_v37  ;;  %v929_v35 = vld [vmem:[#allocation3] sm:$0xf] }
 0x68b   :  { %829 = vrot.lane.b32.xlu0 %v824_v26, %s2740_s5  ;;  %2566 = vrcp.f32 %v808_v36 }
 0x68c   :  { %2568 = vrcp.f32 %v809_v39 }
 0x68d   :  { %831 = vrot.lane.b32.xlu1 %v825_v28, %s2740_s5 }
 0x68f   :  { %827 = vrot.lane.b32.xlu0 %v2965_v25, %s2740_s5 }
 0x691   :  { %833 = vrot.lane.b32.xlu1 %v826_v29, %s2740_s5 }
 0x696   :  { %v2563_v40 = vpop.eup %2562 }
 0x697   :  { %v2565_v43 = vpop.eup %2564 }
 0x698   :  { %v2567_v44 = vpop.eup %2566 }
 0x699   :  { %v2569_v50 = vpop.eup %2568 }
 0x6f5   :  { %v850_v41 = vpop.permute.xlu0 %849 }
 0x6f6   :  { %v860_v42 = vmul.f32 %v2563_v40, %v850_v41 }
 0x6f7   :  { %v852_v45 = vpop.permute.xlu1 %851 }
 0x6f8   :  { %869 = vrot.lane.b32.xlu0 %v860_v42, %s2740_s5  ;;  %v861_v47 = vmul.f32 %v2567_v44, %v852_v45 }
 0x6f9   :  { %v848_v46 = vpop.permute.xlu0 %847 }
 0x6fa   :  { %v859_v48 = vmul.f32 %v2565_v43, %v848_v46  ;;  %871 = vrot.lane.b32.xlu1 %v861_v47, %s2740_s5 }
 0x6fb   :  { %v854_v51 = vpop.permute.xlu1 %853 }
 0x6fc   :  { %867 = vrot.lane.b32.xlu0 %v859_v48, %s2740_s5  ;;  %v862_v52 = vmul.f32 %v2569_v50, %v854_v51 }
 0x6fd   :  { %v830_v54 = vpop.permute.xlu0 %829 }
 0x6fe   :  { %873 = vrot.lane.b32.xlu1 %v862_v52, %s2740_s5  ;;  %v840_v57 = vmul.f32 %v2563_v40, %v830_v54 }
 0x6ff   :  { %v832_v55 = vpop.permute.xlu1 %831 }
 0x700   :  { %v841_v61 = vmul.f32 %v2567_v44, %v832_v55  ;;  %v1050_v55 = vld [vmem:[#allocation2 + $0xb] sm:$0x1] }
 0x701   :  { %v828_v56 = vpop.permute.xlu0 %827 }
 0x702   :  { %v839_v62 = vmul.f32 %v2565_v43, %v828_v56 }
 0x703   :  { %v834_v58 = vpop.permute.xlu1 %833 }
 0x704   :  { %v842_v5 = vmul.f32 %v2569_v50, %v834_v58 }
 0x76a   :  { %v870_v59 = vpop.permute.xlu0 %869 }
 0x76b   :  { %v880_v60 = vadd.f32 %v870_v59, %v840_v57  ;;  %v1049_v59 = vld [vmem:[#allocation2 + $0x3] sm:$0x1] }
 0x76c   :  { %v872_v63 = vpop.permute.xlu1 %871 }
 0x76d   :  { %2570 = vtanh.f32 %v880_v60  ;;  %v881_v2 = vadd.f32 %v872_v63, %v841_v61  ;;  %v918_v38 = vrot.slane %v880_v60, 7  ;;  %v1051_v60 = vld [vmem:[#allocation2 + $0x13] sm:$0x1] }
 0x76e   :  { %v868_v0 = vpop.permute.xlu0 %867 }
 0x76f   :  { %v879_v3 = vadd.f32 %v868_v0, %v839_v62  ;;  %2572 = vtanh.f32 %v881_v2  ;;  %v920_v6 = vrot.slane %v881_v2, 6  ;;  %v1052_v0 = vld [vmem:[#allocation2 + $0x1b] sm:$0x1] }
 0x770   :  { %v874_v11 = vpop.permute.xlu1 %873 }
 0x771   :  { %v919_v9 = vsel %vm371_vm4, %v918_v38, %v879_v3  ;;  %2574 = vtanh.f32 %v879_v3  ;;  %v882_v12 = vadd.f32 %v874_v11, %v842_v5 }
 0x772   :  { %v921_v13 = vsel %vm374_vm5, %v920_v6, %v919_v9 }
 0x773   :  { %2576 = vtanh.f32 %v882_v12  ;;  %v922_v14 = vrot.slane %v882_v12, 5 }
 0x775   :  { %v923_v15 = vsel %vm377_vm6, %v922_v14, %v921_v13 }
 0x77a   :  { %v2571_v16 = vpop.eup %2570 }
 0x77b   :  { %893 = vrot.lane.b32.xlu0 %v2571_v16, %s2739_s3 }
 0x77c   :  { %v2573_v19 = vpop.eup %2572 }
 0x77d   :  { %895 = vrot.lane.b32.xlu1 %v2573_v19, %s2739_s3 }
 0x77e   :  { %v2575_v20 = vpop.eup %2574 }
 0x77f   :  { %891 = vrot.lane.b32.xlu0 %v2575_v20, %s2739_s3 }
 0x780   :  { %v2577_v22 = vpop.eup %2576 }
 0x781   :  { %897 = vrot.lane.b32.xlu1 %v2577_v22, %s2739_s3 }
 0x783   :  { %911 = vperm.xlu0 %2454, %v909_v21  }
 0x7ed   :  { %v894_v49 = vpop.permute.xlu0 %893 }
 0x7ee   :  { %v904_v23 = vmul.f32 %v2563_v40, %v894_v49 }
 0x7ef   :  { %v896_v24 = vpop.permute.xlu1 %895 }
 0x7f0   :  { %v905_v26 = vmul.f32 %v2567_v44, %v896_v24  ;;  %v934_v28 = vrot.slane %v904_v23, 7 }
 0x7f1   :  { %v892_v27 = vpop.permute.xlu0 %891 }
 0x7f2   :  { %v903_v29 = vmul.f32 %v2565_v43, %v892_v27  ;;  %v936_v30 = vrot.slane %v905_v26, 6 }
 0x7f3   :  { %v898_v31 = vpop.permute.xlu1 %897 }
 0x7f4   :  { %v935_v32 = vsel %vm371_vm4, %v934_v28, %v903_v29  ;;  %v906_v7 = vmul.f32 %v2569_v50, %v898_v31 }
 0x7f5   :  { %v937_v33 = vsel %vm374_vm5, %v936_v30, %v935_v32 }
 0x7f6   :  { %v938_v34 = vrot.slane %v906_v7, 5 }
 0x7f8   :  { %v939_v8 = vsel %vm377_vm6, %v938_v34, %v937_v33 }
 0x7f9   :  { %940 = vrot.lane.b32.xlu1 %v939_v8, %s2740_s5 }
 0x7fd   :  { %924 = vrot.lane.b32.xlu1 %v923_v15, %s2741_s28 }
 0x7fe   :  { %v912_v10 = vpop.permute.xlu0 %911 }
 0x7ff   :  { %vm913_vm13 = vcmp.eq.s32.totalorder %v912_v10, 1 }
 0x86b   :  { %v941_v36 = vpop.permute.xlu1 %940 }
 0x86c   :  { %v943_v37 = vsel %vm913_vm13, %v941_v36, %v929_v35  ;;  %v945_v39 = vsel %vm913_vm13, %v941_v36, 0.0  ;;  %v2745_v36 = vmov 3  }
 0x86d   :  { %944 = vst.msk [vmem:[#allocation3] sm:$0xf] %vm152_vm0, %v943_v37  ;;  %v953_v40 = vrot.slane %v945_v39, %v2897_v4  ;;  %2455 = vset.pattern.permute.xlu0 %v2745_v36 }
 0x86f   :  { %v954_v41 = vcombine.high %v953_v40, %v953_v40  ;;  %v961_v42 = vrot.slane %v953_v40, %v2897_v4  ;;  %v925_v43 = vpop.permute.xlu1 %924 }
 0x870   :  { %v927_v44 = vsel %vm913_vm13, %v925_v43, %v2965_v25 }
 0x871   :  { %v968_v45 = vrot.slane %v954_v41, %v2897_v4  ;;  %971 = vst.msk [vmem:[#allocation5 + $0x2] sm:$0x1] %vm426_vm9, %v961_v42  ;;  %v973_v46 = vcombine.high %v961_v42, %v961_v42 }
 0x872   :  { %928 = vst.msk [vmem:[#allocation4] sm:$0xf] %vm152_vm0, %v927_v44 }
 0x873   :  { %972 = vst.msk [vmem:[#allocation5 + $0xa] sm:$0x1] %vm426_vm9, %v968_v45  ;;  %v974_v47 = vcombine.high %v968_v45, %v968_v45  ;;  %977 = vst.msk [vmem:[#allocation6 + $0x5] sm:$0x1] %vm426_vm9, %v973_v46 }
 0x874   :  { %v979_v48 = vld [vmem:[#allocation3] sm:$0xf] }
 0x875   :  { %978 = vst.msk [vmem:[#allocation6 + $0xd] sm:$0x1] %vm426_vm9, %v974_v47  ;;  %v980_v50 = vpack.c.bf16 %v979_v48, %v979_v48 }
 0x877   :  { %2399 = vmatmul.mubr.msk.bf16.vlgmr.msra.gmra.mxu1 %vm182_vm2, %v980_v50 }
 0x878   :  { %1584 = vmatprep.mubr.bf16.mxu1 %v2738_v1 }
 0x879   :  { %v3013_v6 = vld [vmem:[#allocation4] sm:$0xf] }
 0x87a   :  { %v1096_v9 = vrot.slane %v3013_v6, 1  ;;  %v1097_v12 = vrot.slane %v3013_v6, 2  ;;  %v1098_v13 = vrot.slane %v3013_v6, 3 }
 0x937   :  { %v1042_v25 = vpop.f32.mrf.mxu1 }
 0x939   :  { %v1044_v51 = vpop.f32.mrf.mxu1 }
 0x93a   :  { %v1053_v52 = vsel %vm150_vm3, %v1042_v25, %v1044_v51 }
 0x93b   :  { %v1055_v53 = vrot.slane %v1053_v52, 1  ;;  %v1046_v54 = vpop.f32.mrf.mxu1  ;;  %v1056_v56 = vrot.slane %v1053_v52, 2  ;;  %v1062_v61 = vadd.f32 %v1053_v52, %v1049_v59  ;;  %v1057_v62 = vrot.slane %v1053_v52, 3 }
 0x93d   :  { %v1063_v57 = vadd.f32 %v1055_v53, %v1050_v55  ;;  %v1047_v58 = vpop.f32.mrf.mxu1  ;;  %v1064_v63 = vadd.f32 %v1056_v56, %v1051_v60  ;;  %v1065_v2 = vadd.f32 %v1057_v62, %v1052_v0  ;;  %v2400_v15 = vmul.f32 -1.442695, %v1062_v61 }
 0x93f   :  { %2578 = vtanh.f32 %v1063_v57  ;;  %v2401_v14 = vmul.f32 -1.442695, %v1063_v57  ;;  %v2402_v16 = vmul.f32 -1.442695, %v1064_v63  ;;  %v2403_v18 = vmul.f32 -1.442695, %v1065_v2 }
 0x940   :  { %2580 = vtanh.f32 %v1062_v61  ;;  %v1179_v61 = vld [vmem:[%s3297_s6] sm:$0xf] }
 0x941   :  { %2582 = vtanh.f32 %v1064_v63  ;;  %vm1180_vm14 = vcmp.gt.f32.partialorder %v1179_v61, 0.5 }
 0x942   :  { %2584 = vtanh.f32 %v1065_v2  ;;  %v1181_v0 = vsel %vm1180_vm14, 1, %v2738_v1 }
 0x943   :  { %2586 = vpow2.f32 %v2401_v14 }
 0x944   :  { %2588 = vpow2.f32 %v2400_v15 }
 0x945   :  { %2590 = vpow2.f32 %v2402_v16  ;;  %v3059_v16 = vld [vmem:[%s3292_s2 + $0x4] ss:$8 sps:$4 sm:$0xff]  }
 0x946   :  { %2592 = vpow2.f32 %v2403_v18 }
 0x94c   :  { %v2579_v38 = vpop.eup %2578 }
 0x94d   :  { %1121 = vrot.lane.b32.xlu0 %v2579_v38, %s2739_s3  ;;  %v2581_v3 = vpop.eup %2580 }
 0x94e   :  { %v2583_v5 = vpop.eup %2582 }
 0x94f   :  { %1123 = vrot.lane.b32.xlu1 %v2583_v5, %s2739_s3  ;;  %v2585_v11 = vpop.eup %2584  ;;  %v2478_v5 = vld [vmem:[%s3292_s2 + $0x14] ss:$8 sps:$4 sm:$0xff]  }
 0x950   :  { %v2587_v19 = vpop.eup %2586  ;;  %1292 = vmatprep.subr.bf16.mxu0 %v2478_v5  ;;  %1564 = vmatprep.subr.bf16.mxu1 %v2478_v5 }
 0x951   :  { %1119 = vrot.lane.b32.xlu0 %v2581_v3, %s2739_s3  ;;  %v2589_v20 = vpop.eup %2588  ;;  %v1079_v21 = vadd.f32 1.0, %v2587_v19 }
 0x952   :  { %v2591_v22 = vpop.eup %2590  ;;  %v1078_v49 = vadd.f32 1.0, %v2589_v20 }
 0x953   :  { %1125 = vrot.lane.b32.xlu1 %v2585_v11, %s2739_s3  ;;  %v1080_v23 = vadd.f32 1.0, %v2591_v22  ;;  %2594 = vrcp.f32 %v1079_v21  ;;  %v2593_v24 = vpop.eup %2592  ;;  %v3051_v11 = vld [vmem:[%s3292_s2 + $0x10] ss:$8 sps:$4 sm:$0xff]   ;;  %v3065_v21 = vld [vmem:[%s3292_s2] ss:$8 sps:$4 sm:$0xff]  }
 0x954   :  { %2596 = vrcp.f32 %v1078_v49  ;;  %v1081_v26 = vadd.f32 1.0, %v2593_v24  ;;  %1293 = vmatpush1.bf16.msra.mxu0 %v3051_v11  ;;  %1565 = vmatpush1.bf16.msra.mxu1 %v3051_v11 }
 0x955   :  { %1101 = vrot.lane.b32.xlu0 %v1096_v9, %s2740_s5  ;;  %2598 = vrcp.f32 %v1080_v23  ;;  %1294 = vmatprep.subr.bf16.mxu0 %v3059_v16 }
 0x956   :  { %2600 = vrcp.f32 %v1081_v26  ;;  %1566 = vmatprep.subr.bf16.mxu1 %v3059_v16 }
 0x957   :  { %1103 = vrot.lane.b32.xlu1 %v1097_v12, %s2740_s5 }
 0x958   :  { %1295 = vmatpush1.bf16.msra.mxu0 %v3065_v21  ;;  %1567 = vmatpush1.bf16.msra.mxu1 %v3065_v21 }
 0x959   :  { %1099 = vrot.lane.b32.xlu0 %v3013_v6, %s2740_s5  ;;  %1836 = vmatprep.subr.bf16.mxu0 %v2478_v5 }
 0x95a   :  { %2108 = vmatprep.subr.bf16.mxu1 %v2478_v5 }
 0x95b   :  { %1105 = vrot.lane.b32.xlu1 %v1098_v13, %s2740_s5 }
 0x960   :  { %v2595_v27 = vpop.eup %2594 }
 0x961   :  { %v3026_v30 = vpop.eup %2596 }
 0x962   :  { %v2599_v31 = vpop.eup %2598 }
 0x963   :  { %v2601_v8 = vpop.eup %2600 }
 0x9bf   :  { %v1122_v28 = vpop.permute.xlu0 %1121 }
 0x9c0   :  { %v1132_v29 = vmul.f32 %v2595_v27, %v1122_v28 }
 0x9c1   :  { %v1124_v32 = vpop.permute.xlu1 %1123 }
 0x9c2   :  { %1141 = vrot.lane.b32.xlu0 %v1132_v29, %s2740_s5  ;;  %v1133_v33 = vmul.f32 %v2599_v31, %v1124_v32 }
 0x9c3   :  { %v1120_v7 = vpop.permute.xlu0 %1119 }
 0x9c4   :  { %v1131_v34 = vmul.f32 %v3026_v30, %v1120_v7  ;;  %1143 = vrot.lane.b32.xlu1 %v1133_v33, %s2740_s5 }
 0x9c5   :  { %v1126_v10 = vpop.permute.xlu1 %1125 }
 0x9c6   :  { %1139 = vrot.lane.b32.xlu0 %v1131_v34, %s2740_s5  ;;  %v1134_v35 = vmul.f32 %v2601_v8, %v1126_v10 }
 0x9c7   :  { %v1102_v37 = vpop.permute.xlu0 %1101 }
 0x9c8   :  { %1145 = vrot.lane.b32.xlu1 %v1134_v35, %s2740_s5  ;;  %v1112_v41 = vmul.f32 %v2595_v27, %v1102_v37 }
 0x9c9   :  { %v1104_v39 = vpop.permute.xlu1 %1103 }
 0x9ca   :  { %v1113_v45 = vmul.f32 %v2599_v31, %v1104_v39 }
 0x9cb   :  { %v1100_v40 = vpop.permute.xlu0 %1099 }
 0x9cc   :  { %v1111_v46 = vmul.f32 %v3026_v30, %v1100_v40 }
 0x9cd   :  { %v1106_v42 = vpop.permute.xlu1 %1105 }
 0x9ce   :  { %v1114_v52 = vmul.f32 %v2601_v8, %v1106_v42 }
 0xa34   :  { %v1142_v43 = vpop.permute.xlu0 %1141 }
 0xa35   :  { %v1152_v44 = vadd.f32 %v1142_v43, %v1112_v41  ;;  %v1322_v43 = vld [vmem:[#allocation2 + $0xc] sm:$0x1] }
 0xa36   :  { %v1144_v47 = vpop.permute.xlu1 %1143 }
 0xa37   :  { %2602 = vtanh.f32 %v1152_v44  ;;  %v1153_v50 = vadd.f32 %v1144_v47, %v1113_v45  ;;  %v1190_v25 = vrot.slane %v1152_v44, 7  ;;  %v1321_v47 = vld [vmem:[#allocation2 + $0x4] sm:$0x1] }
 0xa38   :  { %v1140_v48 = vpop.permute.xlu0 %1139 }
 0xa39   :  { %v1151_v51 = vadd.f32 %v1140_v48, %v1111_v46  ;;  %2604 = vtanh.f32 %v1153_v50  ;;  %v1192_v53 = vrot.slane %v1153_v50, 6  ;;  %v1323_v48 = vld [vmem:[#allocation2 + $0x14] sm:$0x1] }
 0xa3a   :  { %v1146_v55 = vpop.permute.xlu1 %1145 }
 0xa3b   :  { %v1191_v54 = vsel %vm371_vm4, %v1190_v25, %v1151_v51  ;;  %2606 = vtanh.f32 %v1151_v51  ;;  %v1154_v56 = vadd.f32 %v1146_v55, %v1114_v52  ;;  %v1324_v52 = vld [vmem:[#allocation2 + $0x1c] sm:$0x1] }
 0xa3c   :  { %v1193_v57 = vsel %vm374_vm5, %v1192_v53, %v1191_v54 }
 0xa3d   :  { %2608 = vtanh.f32 %v1154_v56  ;;  %v1194_v58 = vrot.slane %v1154_v56, 5 }
 0xa3f   :  { %v1195_v59 = vsel %vm377_vm6, %v1194_v58, %v1193_v57 }
 0xa44   :  { %v2603_v60 = vpop.eup %2602 }
 0xa45   :  { %1165 = vrot.lane.b32.xlu0 %v2603_v60, %s2739_s3 }
 0xa46   :  { %v2605_v62 = vpop.eup %2604 }
 0xa47   :  { %1167 = vrot.lane.b32.xlu1 %v2605_v62, %s2739_s3 }
 0xa48   :  { %v2607_v63 = vpop.eup %2606 }
 0xa49   :  { %1163 = vrot.lane.b32.xlu0 %v2607_v63, %s2739_s3 }
 0xa4a   :  { %v2609_v2 = vpop.eup %2608 }
 0xa4b   :  { %1169 = vrot.lane.b32.xlu1 %v2609_v2, %s2739_s3 }
 0xa4d   :  { %1183 = vperm.xlu0 %2455, %v1181_v0  }
 0xab7   :  { %v1166_v38 = vpop.permute.xlu0 %1165 }
 0xab8   :  { %v1176_v3 = vmul.f32 %v2595_v27, %v1166_v38  ;;  %v1201_v27 = vld [vmem:[#allocation3] sm:$0xf] }
 0xab9   :  { %v1168_v9 = vpop.permute.xlu1 %1167 }
 0xaba   :  { %v1177_v12 = vmul.f32 %v2599_v31, %v1168_v9  ;;  %v1206_v14 = vrot.slane %v1176_v3, 7 }
 0xabb   :  { %v1164_v13 = vpop.permute.xlu0 %1163 }
 0xabc   :  { %v1175_v15 = vmul.f32 %v3026_v30, %v1164_v13  ;;  %v1208_v18 = vrot.slane %v1177_v12, 6 }
 0xabd   :  { %v1170_v19 = vpop.permute.xlu1 %1169 }
 0xabe   :  { %v1207_v20 = vsel %vm371_vm4, %v1206_v14, %v1175_v15  ;;  %v1178_v22 = vmul.f32 %v2601_v8, %v1170_v19 }
 0xabf   :  { %v1209_v49 = vsel %vm374_vm5, %v1208_v18, %v1207_v20 }
 0xac0   :  { %v1210_v23 = vrot.slane %v1178_v22, 5 }
 0xac2   :  { %v1211_v24 = vsel %vm377_vm6, %v1210_v23, %v1209_v49 }
 0xac3   :  { %1212 = vrot.lane.b32.xlu1 %v1211_v24, %s2740_s5 }
 0xac7   :  { %1196 = vrot.lane.b32.xlu1 %v1195_v59, %s2741_s28 }
 0xac8   :  { %v1184_v26 = vpop.permute.xlu0 %1183 }
 0xac9   :  { %vm1185_vm15 = vcmp.eq.s32.totalorder %v1184_v26, 1 }
 0xb35   :  { %v1213_v28 = vpop.permute.xlu1 %1212 }
 0xb36   :  { %v1215_v29 = vsel %vm1185_vm15, %v1213_v28, %v1201_v27  ;;  %v1217_v30 = vsel %vm1185_vm15, %v1213_v28, 0.0 }
 0xb37   :  { %1216 = vst.msk [vmem:[#allocation3] sm:$0xf] %vm152_vm0, %v1215_v29  ;;  %v1225_v31 = vrot.slane %v1217_v30, %v2897_v4 }
 0xb39   :  { %v1226_v32 = vcombine.high %v1225_v31, %v1225_v31  ;;  %v1233_v7 = vrot.slane %v1225_v31, %v2897_v4  ;;  %v1197_v33 = vpop.permute.xlu1 %1196  ;;  %v2746_v31 = vmov 4  }
 0xb3a   :  { %v1199_v34 = vsel %vm1185_vm15, %v1197_v33, %v3013_v6  ;;  %2456 = vset.pattern.permute.xlu0 %v2746_v31 }
 0xb3b   :  { %v1240_v8 = vrot.slane %v1226_v32, %v2897_v4  ;;  %1243 = vst.msk [vmem:[#allocation5 + $0x3] sm:$0x1] %vm426_vm9, %v1233_v7  ;;  %v1245_v10 = vcombine.high %v1233_v7, %v1233_v7 }
 0xb3c   :  { %1200 = vst.msk [vmem:[#allocation4] sm:$0xf] %vm152_vm0, %v1199_v34 }
 0xb3d   :  { %1244 = vst.msk [vmem:[#allocation5 + $0xb] sm:$0x1] %vm426_vm9, %v1240_v8  ;;  %v1246_v35 = vcombine.high %v1240_v8, %v1240_v8  ;;  %1249 = vst.msk [vmem:[#allocation6 + $0x4] sm:$0x1] %vm426_vm9, %v1245_v10 }
 0xb3e   :  { %v1251_v36 = vld [vmem:[#allocation3] sm:$0xf] }
 0xb3f   :  { %1250 = vst.msk [vmem:[#allocation6 + $0xc] sm:$0x1] %vm426_vm9, %v1246_v35  ;;  %v1252_v37 = vpack.c.bf16 %v1251_v36, %v1251_v36 }
 0xb41   :  { %2408 = vmatmul.mubr.msk.bf16.vlgmr.msra.gmra.mxu0 %vm182_vm2, %v1252_v37 }
 0xb42   :  { %1837 = vmatpush1.bf16.msra.mxu0 %v3051_v11  ;;  %1856 = vmatprep.mubr.bf16.mxu0 %v2738_v1 }
 0xb43   :  { %1838 = vmatprep.subr.bf16.mxu0 %v3059_v16  ;;  %v3093_v57 = vld [vmem:[#allocation4] sm:$0xf] }
 0xb44   :  { %v1368_v58 = vrot.slane %v3093_v57, 1  ;;  %v1369_v60 = vrot.slane %v3093_v57, 2  ;;  %v1370_v61 = vrot.slane %v3093_v57, 3 }
 0xb46   :  { %1839 = vmatpush1.bf16.msra.mxu0 %v3065_v21 }
 0xc01   :  { %v1314_v6 = vpop.f32.mrf.mxu0 }
 0xc03   :  { %v1316_v39 = vpop.f32.mrf.mxu0 }
 0xc04   :  { %v1325_v40 = vsel %vm150_vm3, %v1314_v6, %v1316_v39 }
 0xc05   :  { %v1327_v41 = vrot.slane %v1325_v40, 1  ;;  %v1318_v42 = vpop.f32.mrf.mxu0  ;;  %v1328_v44 = vrot.slane %v1325_v40, 2  ;;  %v1334_v50 = vadd.f32 %v1325_v40, %v1321_v47  ;;  %v1329_v25 = vrot.slane %v1325_v40, 3 }
 0xc07   :  { %v1335_v45 = vadd.f32 %v1327_v41, %v1322_v43  ;;  %v1319_v46 = vpop.f32.mrf.mxu0  ;;  %v1336_v51 = vadd.f32 %v1328_v44, %v1323_v48  ;;  %v1337_v53 = vadd.f32 %v1329_v25, %v1324_v52  ;;  %v2409_v63 = vmul.f32 -1.442695, %v1334_v50  ;;  %v1451_v52 = vld [vmem:[%s3297_s6] sm:$0xf] }
 0xc08   :  { %vm1452_vm1 = vcmp.gt.f32.partialorder %v1451_v52, 0.5 }
 0xc09   :  { %2610 = vtanh.f32 %v1335_v45  ;;  %v2410_v62 = vmul.f32 -1.442695, %v1335_v45  ;;  %v2411_v0 = vmul.f32 -1.442695, %v1336_v51  ;;  %v2412_v2 = vmul.f32 -1.442695, %v1337_v53 }
 0xc0a   :  { %2612 = vtanh.f32 %v1334_v50 }
 0xc0b   :  { %2614 = vtanh.f32 %v1336_v51 }
 0xc0c   :  { %2616 = vtanh.f32 %v1337_v53 }
 0xc0d   :  { %2618 = vpow2.f32 %v2410_v62 }
 0xc0e   :  { %2620 = vpow2.f32 %v2409_v63 }
 0xc0f   :  { %2622 = vpow2.f32 %v2411_v0 }
 0xc10   :  { %2624 = vpow2.f32 %v2412_v2 }
 0xc16   :  { %v2611_v54 = vpop.eup %2610 }
 0xc17   :  { %1393 = vrot.lane.b32.xlu0 %v2611_v54, %s2739_s3  ;;  %v2613_v55 = vpop.eup %2612 }
 0xc18   :  { %v2615_v56 = vpop.eup %2614 }
 0xc19   :  { %1395 = vrot.lane.b32.xlu1 %v2615_v56, %s2739_s3  ;;  %v2617_v59 = vpop.eup %2616 }
 0xc1a   :  { %v2619_v38 = vpop.eup %2618 }
 0xc1b   :  { %1391 = vrot.lane.b32.xlu0 %v2613_v55, %s2739_s3  ;;  %v2621_v3 = vpop.eup %2620  ;;  %v1351_v5 = vadd.f32 1.0, %v2619_v38  ;;  %v1453_v55 = vsel %vm1452_vm1, 1, %v2738_v1 }
 0xc1c   :  { %v2623_v9 = vpop.eup %2622  ;;  %v1350_v12 = vadd.f32 1.0, %v2621_v3 }
 0xc1d   :  { %1397 = vrot.lane.b32.xlu1 %v2617_v59, %s2739_s3  ;;  %v1352_v13 = vadd.f32 1.0, %v2623_v9  ;;  %2626 = vrcp.f32 %v1351_v5  ;;  %v2625_v14 = vpop.eup %2624 }
 0xc1e   :  { %2628 = vrcp.f32 %v1350_v12  ;;  %v1353_v15 = vadd.f32 1.0, %v2625_v14 }
 0xc1f   :  { %1373 = vrot.lane.b32.xlu0 %v1368_v58, %s2740_s5  ;;  %2630 = vrcp.f32 %v1352_v13 }
 0xc20   :  { %2632 = vrcp.f32 %v1353_v15  ;;  %v1473_v15 = vld [vmem:[#allocation3] sm:$0xf] }
 0xc21   :  { %1375 = vrot.lane.b32.xlu1 %v1369_v60, %s2740_s5 }
 0xc23   :  { %1371 = vrot.lane.b32.xlu0 %v3093_v57, %s2740_s5 }
 0xc25   :  { %1377 = vrot.lane.b32.xlu1 %v1370_v61, %s2740_s5 }
 0xc2a   :  { %v2627_v18 = vpop.eup %2626 }
 0xc2b   :  { %v2629_v22 = vpop.eup %2628 }
 0xc2c   :  { %v2631_v49 = vpop.eup %2630 }
 0xc2d   :  { %v2633_v28 = vpop.eup %2632 }
 0xc89   :  { %v1394_v19 = vpop.permute.xlu0 %1393 }
 0xc8a   :  { %v1404_v20 = vmul.f32 %v2627_v18, %v1394_v19 }
 0xc8b   :  { %v1396_v23 = vpop.permute.xlu1 %1395 }
 0xc8c   :  { %1413 = vrot.lane.b32.xlu0 %v1404_v20, %s2740_s5  ;;  %v1405_v26 = vmul.f32 %v2631_v49, %v1396_v23 }
 0xc8d   :  { %v1392_v24 = vpop.permute.xlu0 %1391 }
 0xc8e   :  { %v1403_v27 = vmul.f32 %v2629_v22, %v1392_v24  ;;  %1415 = vrot.lane.b32.xlu1 %v1405_v26, %s2740_s5 }
 0xc8f   :  { %v1398_v29 = vpop.permute.xlu1 %1397 }
 0xc90   :  { %1411 = vrot.lane.b32.xlu0 %v1403_v27, %s2740_s5  ;;  %v1406_v30 = vmul.f32 %v2633_v28, %v1398_v29 }
 0xc91   :  { %v1374_v32 = vpop.permute.xlu0 %1373 }
 0xc92   :  { %1417 = vrot.lane.b32.xlu1 %v1406_v30, %s2740_s5  ;;  %v1384_v34 = vmul.f32 %v2627_v18, %v1374_v32 }
 0xc93   :  { %v1376_v7 = vpop.permute.xlu1 %1375 }
 0xc94   :  { %v1385_v36 = vmul.f32 %v2631_v49, %v1376_v7 }
 0xc95   :  { %v1372_v33 = vpop.permute.xlu0 %1371 }
 0xc96   :  { %v1383_v37 = vmul.f32 %v2629_v22, %v1372_v33 }
 0xc97   :  { %v1378_v8 = vpop.permute.xlu1 %1377 }
 0xc98   :  { %v1386_v43 = vmul.f32 %v2633_v28, %v1378_v8  ;;  %v1594_v8 = vld [vmem:[#allocation2 + $0xd] sm:$0x1] }
 0xcfe   :  { %v1414_v10 = vpop.permute.xlu0 %1413 }
 0xcff   :  { %v1424_v35 = vadd.f32 %v1414_v10, %v1384_v34 }
 0xd00   :  { %v1416_v6 = vpop.permute.xlu1 %1415 }
 0xd01   :  { %2634 = vtanh.f32 %v1424_v35  ;;  %v1425_v40 = vadd.f32 %v1416_v6, %v1385_v36  ;;  %v1462_v41 = vrot.slane %v1424_v35, 7  ;;  %v1595_v6 = vld [vmem:[#allocation2 + $0x15] sm:$0x1] }
 0xd02   :  { %v1412_v39 = vpop.permute.xlu0 %1411 }
 0xd03   :  { %v1423_v42 = vadd.f32 %v1412_v39, %v1383_v37  ;;  %2636 = vtanh.f32 %v1425_v40  ;;  %v1464_v44 = vrot.slane %v1425_v40, 6  ;;  %v1593_v37 = vld [vmem:[#allocation2 + $0x5] sm:$0x1] }
 0xd04   :  { %v1418_v46 = vpop.permute.xlu1 %1417 }
 0xd05   :  { %v1463_v45 = vsel %vm371_vm4, %v1462_v41, %v1423_v42  ;;  %2638 = vtanh.f32 %v1423_v42  ;;  %v1426_v47 = vadd.f32 %v1418_v46, %v1386_v43 }
 0xd06   :  { %v1465_v48 = vsel %vm374_vm5, %v1464_v44, %v1463_v45 }
 0xd07   :  { %2640 = vtanh.f32 %v1426_v47  ;;  %v1466_v50 = vrot.slane %v1426_v47, 5 }
 0xd09   :  { %v1467_v25 = vsel %vm377_vm6, %v1466_v50, %v1465_v48 }
 0xd0e   :  { %v2635_v51 = vpop.eup %2634 }
 0xd0f   :  { %1437 = vrot.lane.b32.xlu0 %v2635_v51, %s2739_s3 }
 0xd10   :  { %v2637_v53 = vpop.eup %2636 }
 0xd11   :  { %1439 = vrot.lane.b32.xlu1 %v2637_v53, %s2739_s3 }
 0xd12   :  { %v2639_v54 = vpop.eup %2638 }
 0xd13   :  { %1435 = vrot.lane.b32.xlu0 %v2639_v54, %s2739_s3 }
 0xd14   :  { %v2641_v56 = vpop.eup %2640 }
 0xd15   :  { %1441 = vrot.lane.b32.xlu1 %v2641_v56, %s2739_s3 }
 0xd17   :  { %1455 = vperm.xlu0 %2456, %v1453_v55  }
 0xd81   :  { %v1438_v58 = vpop.permute.xlu0 %1437 }
 0xd82   :  { %v1448_v59 = vmul.f32 %v2627_v18, %v1438_v58 }
 0xd83   :  { %v1440_v60 = vpop.permute.xlu1 %1439 }
 0xd84   :  { %v1449_v61 = vmul.f32 %v2631_v49, %v1440_v60  ;;  %v1478_v63 = vrot.slane %v1448_v59, 7 }
 0xd85   :  { %v1436_v62 = vpop.permute.xlu0 %1435 }
 0xd86   :  { %v1447_v0 = vmul.f32 %v2629_v22, %v1436_v62  ;;  %v1480_v2 = vrot.slane %v1449_v61, 6 }
 0xd87   :  { %v1442_v38 = vpop.permute.xlu1 %1441 }
 0xd88   :  { %v1479_v3 = vsel %vm371_vm4, %v1478_v63, %v1447_v0  ;;  %v1450_v5 = vmul.f32 %v2633_v28, %v1442_v38 }
 0xd89   :  { %v1481_v9 = vsel %vm374_vm5, %v1480_v2, %v1479_v3 }
 0xd8a   :  { %v1482_v12 = vrot.slane %v1450_v5, 5 }
 0xd8c   :  { %v1483_v13 = vsel %vm377_vm6, %v1482_v12, %v1481_v9 }
 0xd8d   :  { %1484 = vrot.lane.b32.xlu1 %v1483_v13, %s2740_s5 }
 0xd91   :  { %1468 = vrot.lane.b32.xlu1 %v1467_v25, %s2741_s28 }
 0xd92   :  { %v1456_v14 = vpop.permute.xlu0 %1455 }
 0xd93   :  { %vm1457_vm7 = vcmp.eq.s32.totalorder %v1456_v14, 1 }
 0xdff   :  { %v1485_v18 = vpop.permute.xlu1 %1484 }
 0xe00   :  { %v1487_v19 = vsel %vm1457_vm7, %v1485_v18, %v1473_v15  ;;  %v1489_v20 = vsel %vm1457_vm7, %v1485_v18, 0.0  ;;  %v2747_v18 = vmov 5  }
 0xe01   :  { %1488 = vst.msk [vmem:[#allocation3] sm:$0xf] %vm152_vm0, %v1487_v19  ;;  %v1497_v22 = vrot.slane %v1489_v20, %v2897_v4  ;;  %2457 = vset.pattern.permute.xlu0 %v2747_v18 }
 0xe03   :  { %v1498_v49 = vcombine.high %v1497_v22, %v1497_v22  ;;  %v1505_v23 = vrot.slane %v1497_v22, %v2897_v4  ;;  %v1469_v24 = vpop.permute.xlu1 %1468 }
 0xe04   :  { %v1471_v26 = vsel %vm1457_vm7, %v1469_v24, %v3093_v57 }
 0xe05   :  { %v1512_v27 = vrot.slane %v1498_v49, %v2897_v4  ;;  %1515 = vst.msk [vmem:[#allocation5 + $0x4] sm:$0x1] %vm426_vm9, %v1505_v23  ;;  %v1517_v28 = vcombine.high %v1505_v23, %v1505_v23 }
 0xe06   :  { %1472 = vst.msk [vmem:[#allocation4] sm:$0xf] %vm152_vm0, %v1471_v26 }
 0xe07   :  { %1516 = vst.msk [vmem:[#allocation5 + $0xc] sm:$0x1] %vm426_vm9, %v1512_v27  ;;  %v1518_v29 = vcombine.high %v1512_v27, %v1512_v27  ;;  %1521 = vst.msk [vmem:[#allocation6 + $0x3] sm:$0x1] %vm426_vm9, %v1517_v28 }
 0xe08   :  { %v1523_v30 = vld [vmem:[#allocation3] sm:$0xf] }
 0xe09   :  { %1522 = vst.msk [vmem:[#allocation6 + $0xb] sm:$0x1] %vm426_vm9, %v1518_v29  ;;  %v1524_v31 = vpack.c.bf16 %v1523_v30, %v1523_v30 }
 0xe0b   :  { %2417 = vmatmul.mubr.msk.bf16.vlgmr.msra.gmra.mxu1 %vm182_vm2, %v1524_v31 }
 0xe0c   :  { %2109 = vmatpush1.bf16.msra.mxu1 %v3051_v11  ;;  %2128 = vmatprep.mubr.bf16.mxu1 %v2738_v1 }
 0xe0d   :  { %2110 = vmatprep.subr.bf16.mxu1 %v3059_v16  ;;  %v1596_v16 = vld [vmem:[#allocation2 + $0x1d] sm:$0x1]  ;;  %v3144_v44 = vld [vmem:[#allocation4] sm:$0xf] }
 0xe0e   :  { %v1640_v45 = vrot.slane %v3144_v44, 1  ;;  %v1641_v47 = vrot.slane %v3144_v44, 2  ;;  %v1642_v48 = vrot.slane %v3144_v44, 3 }
 0xe10   :  { %2111 = vmatpush1.bf16.msra.mxu1 %v3065_v21 }
 0xecb   :  { %v1586_v57 = vpop.f32.mrf.mxu1 }
 0xecd   :  { %v1588_v32 = vpop.f32.mrf.mxu1 }
 0xece   :  { %v1597_v7 = vsel %vm150_vm3, %v1586_v57, %v1588_v32 }
 0xecf   :  { %v1599_v33 = vrot.slane %v1597_v7, 1  ;;  %v1590_v34 = vpop.f32.mrf.mxu1  ;;  %v1600_v10 = vrot.slane %v1597_v7, 2  ;;  %v1606_v11 = vadd.f32 %v1597_v7, %v1593_v37  ;;  %v1601_v39 = vrot.slane %v1597_v7, 3 }
 0xed1   :  { %v1607_v35 = vadd.f32 %v1599_v33, %v1594_v8  ;;  %v1591_v36 = vpop.f32.mrf.mxu1  ;;  %v1608_v40 = vadd.f32 %v1600_v10, %v1595_v6  ;;  %v1609_v21 = vadd.f32 %v1601_v39, %v1596_v16  ;;  %v2418_v25 = vmul.f32 -1.442695, %v1606_v11 }
 0xed3   :  { %2642 = vtanh.f32 %v1607_v35  ;;  %v2419_v50 = vmul.f32 -1.442695, %v1607_v35  ;;  %v2420_v51 = vmul.f32 -1.442695, %v1608_v40  ;;  %v2421_v52 = vmul.f32 -1.442695, %v1609_v21 }
 0xed4   :  { %2644 = vtanh.f32 %v1606_v11  ;;  %v1723_v11 = vld [vmem:[%s3297_s6] sm:$0xf] }
 0xed5   :  { %2646 = vtanh.f32 %v1608_v40  ;;  %vm1724_vm8 = vcmp.gt.f32.partialorder %v1723_v11, 0.5 }
 0xed6   :  { %2648 = vtanh.f32 %v1609_v21  ;;  %v1725_v16 = vsel %vm1724_vm8, 1, %v2738_v1 }
 0xed7   :  { %2650 = vpow2.f32 %v2419_v50 }
 0xed8   :  { %2652 = vpow2.f32 %v2418_v25 }
 0xed9   :  { %2654 = vpow2.f32 %v2420_v51 }
 0xeda   :  { %2656 = vpow2.f32 %v2421_v52 }
 0xee0   :  { %v2643_v41 = vpop.eup %2642 }
 0xee1   :  { %1665 = vrot.lane.b32.xlu0 %v2643_v41, %s2739_s3  ;;  %v2645_v42 = vpop.eup %2644 }
 0xee2   :  { %v2647_v43 = vpop.eup %2646 }
 0xee3   :  { %1667 = vrot.lane.b32.xlu1 %v2647_v43, %s2739_s3  ;;  %v2649_v46 = vpop.eup %2648 }
 0xee4   :  { %v2651_v53 = vpop.eup %2650 }
 0xee5   :  { %1663 = vrot.lane.b32.xlu0 %v2645_v42, %s2739_s3  ;;  %v2653_v54 = vpop.eup %2652  ;;  %v1623_v55 = vadd.f32 1.0, %v2651_v53 }
 0xee6   :  { %v2655_v56 = vpop.eup %2654  ;;  %v1622_v58 = vadd.f32 1.0, %v2653_v54 }
 0xee7   :  { %1669 = vrot.lane.b32.xlu1 %v2649_v46, %s2739_s3  ;;  %v1624_v59 = vadd.f32 1.0, %v2655_v56  ;;  %2658 = vrcp.f32 %v1623_v55  ;;  %v2657_v60 = vpop.eup %2656 }
 0xee8   :  { %2660 = vrcp.f32 %v1622_v58  ;;  %v1625_v61 = vadd.f32 1.0, %v2657_v60  ;;  %v1745_v58 = vld [vmem:[#allocation3] sm:$0xf] }
 0xee9   :  { %1645 = vrot.lane.b32.xlu0 %v1640_v45, %s2740_s5  ;;  %2662 = vrcp.f32 %v1624_v59 }
 0xeea   :  { %2664 = vrcp.f32 %v1625_v61 }
 0xeeb   :  { %1647 = vrot.lane.b32.xlu1 %v1641_v47, %s2740_s5 }
 0xeed   :  { %1643 = vrot.lane.b32.xlu0 %v3144_v44, %s2740_s5 }
 0xeef   :  { %1649 = vrot.lane.b32.xlu1 %v1642_v48, %s2740_s5 }
 0xef4   :  { %v2659_v62 = vpop.eup %2658 }
 0xef5   :  { %v2661_v2 = vpop.eup %2660 }
 0xef6   :  { %v2663_v38 = vpop.eup %2662 }
 0xef7   :  { %v2665_v13 = vpop.eup %2664 }
 0xf53   :  { %v1666_v63 = vpop.permute.xlu0 %1665 }
 0xf54   :  { %v1676_v0 = vmul.f32 %v2659_v62, %v1666_v63 }
 0xf55   :  { %v1668_v3 = vpop.permute.xlu1 %1667 }
 0xf56   :  { %1685 = vrot.lane.b32.xlu0 %v1676_v0, %s2740_s5  ;;  %v1677_v9 = vmul.f32 %v2663_v38, %v1668_v3 }
 0xf57   :  { %v1664_v5 = vpop.permute.xlu0 %1663 }
 0xf58   :  { %v1675_v12 = vmul.f32 %v2661_v2, %v1664_v5  ;;  %1687 = vrot.lane.b32.xlu1 %v1677_v9, %s2740_s5 }
 0xf59   :  { %v1670_v14 = vpop.permute.xlu1 %1669 }
 0xf5a   :  { %1683 = vrot.lane.b32.xlu0 %v1675_v12, %s2740_s5  ;;  %v1678_v15 = vmul.f32 %v2665_v13, %v1670_v14 }
 0xf5b   :  { %v1646_v19 = vpop.permute.xlu0 %1645 }
 0xf5c   :  { %1689 = vrot.lane.b32.xlu1 %v1678_v15, %s2740_s5  ;;  %v1656_v49 = vmul.f32 %v2659_v62, %v1646_v19 }
 0xf5d   :  { %v1648_v20 = vpop.permute.xlu1 %1647 }
 0xf5e   :  { %v1657_v27 = vmul.f32 %v2663_v38, %v1648_v20  ;;  %v1866_v20 = vld [vmem:[#allocation2 + $0xe] sm:$0x1] }
 0xf5f   :  { %v1644_v22 = vpop.permute.xlu0 %1643 }
 0xf60   :  { %v1655_v28 = vmul.f32 %v2661_v2, %v1644_v22 }
 0xf61   :  { %v1650_v23 = vpop.permute.xlu1 %1649 }
 0xf62   :  { %v1658_v7 = vmul.f32 %v2665_v13, %v1650_v23 }
 0xfc8   :  { %v1686_v24 = vpop.permute.xlu0 %1685 }
 0xfc9   :  { %v1696_v26 = vadd.f32 %v1686_v24, %v1656_v49  ;;  %v1865_v24 = vld [vmem:[#allocation2 + $0x6] sm:$0x1] }
 0xfca   :  { %v1688_v29 = vpop.permute.xlu1 %1687 }
 0xfcb   :  { %2666 = vtanh.f32 %v1696_v26  ;;  %v1697_v31 = vadd.f32 %v1688_v29, %v1657_v27  ;;  %v1734_v57 = vrot.slane %v1696_v26, 7  ;;  %v1867_v26 = vld [vmem:[#allocation2 + $0x16] sm:$0x1] }
 0xfcc   :  { %v1684_v30 = vpop.permute.xlu0 %1683 }
 0xfcd   :  { %v1695_v32 = vadd.f32 %v1684_v30, %v1655_v28  ;;  %2668 = vtanh.f32 %v1697_v31  ;;  %v1736_v33 = vrot.slane %v1697_v31, 6  ;;  %v1868_v30 = vld [vmem:[#allocation2 + $0x1e] sm:$0x1] }
 0xfce   :  { %v1690_v8 = vpop.permute.xlu1 %1689 }
 0xfcf   :  { %v1735_v34 = vsel %vm371_vm4, %v1734_v57, %v1695_v32  ;;  %2670 = vtanh.f32 %v1695_v32  ;;  %v1698_v10 = vadd.f32 %v1690_v8, %v1658_v7 }
 0xfd0   :  { %v1737_v35 = vsel %vm374_vm5, %v1736_v33, %v1735_v34 }
 0xfd1   :  { %2672 = vtanh.f32 %v1698_v10  ;;  %v1738_v36 = vrot.slane %v1698_v10, 5 }
 0xfd3   :  { %v1739_v37 = vsel %vm377_vm6, %v1738_v36, %v1737_v35 }
 0xfd8   :  { %v2667_v6 = vpop.eup %2666 }
 0xfd9   :  { %1709 = vrot.lane.b32.xlu0 %v2667_v6, %s2739_s3 }
 0xfda   :  { %v2669_v39 = vpop.eup %2668 }
 0xfdb   :  { %1711 = vrot.lane.b32.xlu1 %v2669_v39, %s2739_s3 }
 0xfdc   :  { %v2671_v40 = vpop.eup %2670 }
 0xfdd   :  { %1707 = vrot.lane.b32.xlu0 %v2671_v40, %s2739_s3 }
 0xfde   :  { %v2673_v21 = vpop.eup %2672 }
 0xfdf   :  { %1713 = vrot.lane.b32.xlu1 %v2673_v21, %s2739_s3 }
 0xfe1   :  { %1727 = vperm.xlu0 %2457, %v1725_v16  }
0x104b   :  { %v1710_v41 = vpop.permute.xlu0 %1709 }
0x104c   :  { %v1720_v42 = vmul.f32 %v2659_v62, %v1710_v41 }
0x104d   :  { %v1712_v43 = vpop.permute.xlu1 %1711 }
0x104e   :  { %v1721_v45 = vmul.f32 %v2663_v38, %v1712_v43  ;;  %v1750_v47 = vrot.slane %v1720_v42, 7 }
0x104f   :  { %v1708_v46 = vpop.permute.xlu0 %1707 }
0x1050   :  { %v1719_v48 = vmul.f32 %v2661_v2, %v1708_v46  ;;  %v1752_v50 = vrot.slane %v1721_v45, 6 }
0x1051   :  { %v1714_v25 = vpop.permute.xlu1 %1713 }
0x1052   :  { %v1751_v51 = vsel %vm371_vm4, %v1750_v47, %v1719_v48  ;;  %v1722_v52 = vmul.f32 %v2665_v13, %v1714_v25 }
0x1053   :  { %v1753_v53 = vsel %vm374_vm5, %v1752_v50, %v1751_v51 }
0x1054   :  { %v1754_v54 = vrot.slane %v1722_v52, 5 }
0x1056   :  { %v1755_v55 = vsel %vm377_vm6, %v1754_v54, %v1753_v53 }
0x1057   :  { %1756 = vrot.lane.b32.xlu1 %v1755_v55, %s2740_s5 }
0x105b   :  { %1740 = vrot.lane.b32.xlu1 %v1739_v37, %s2741_s28 }
0x105c   :  { %v1728_v56 = vpop.permute.xlu0 %1727 }
0x105d   :  { %vm1729_vm10 = vcmp.eq.s32.totalorder %v1728_v56, 1 }
0x10c9   :  { %v1757_v59 = vpop.permute.xlu1 %1756 }
0x10ca   :  { %v1759_v60 = vsel %vm1729_vm10, %v1757_v59, %v1745_v58  ;;  %v1761_v61 = vsel %vm1729_vm10, %v1757_v59, 0.0  ;;  %v2748_v59 = vmov 6  }
0x10cb   :  { %v1769_v62 = vrot.slane %v1761_v61, %v2897_v4  ;;  %1760 = vst.msk [vmem:[#allocation3] sm:$0xf] %vm152_vm0, %v1759_v60  ;;  %2458 = vset.pattern.permute.xlu0 %v2748_v59 }
0x10cd   :  { %v1770_v63 = vcombine.high %v1769_v62, %v1769_v62  ;;  %v1777_v0 = vrot.slane %v1769_v62, %v2897_v4  ;;  %v1741_v2 = vpop.permute.xlu1 %1740 }
0x10ce   :  { %v1743_v38 = vsel %vm1729_vm10, %v1741_v2, %v3144_v44 }
0x10cf   :  { %v1784_v3 = vrot.slane %v1770_v63, %v2897_v4  ;;  %1787 = vst.msk [vmem:[#allocation5 + $0x5] sm:$0x1] %vm426_vm9, %v1777_v0  ;;  %v1789_v5 = vcombine.high %v1777_v0, %v1777_v0 }
0x10d0   :  { %1744 = vst.msk [vmem:[#allocation4] sm:$0xf] %vm152_vm0, %v1743_v38 }
0x10d1   :  { %1788 = vst.msk [vmem:[#allocation5 + $0xd] sm:$0x1] %vm426_vm9, %v1784_v3  ;;  %v1790_v9 = vcombine.high %v1784_v3, %v1784_v3  ;;  %1793 = vst.msk [vmem:[#allocation6 + $0x2] sm:$0x1] %vm426_vm9, %v1789_v5 }
0x10d2   :  { %v1795_v12 = vld [vmem:[#allocation3] sm:$0xf] }
0x10d3   :  { %1794 = vst.msk [vmem:[#allocation6 + $0xa] sm:$0x1] %vm426_vm9, %v1790_v9  ;;  %v1796_v13 = vpack.c.bf16 %v1795_v12, %v1795_v12 }
0x10d5   :  { %2426 = vmatmul.mubr.msk.bf16.vlgmr.msra.gmra.mxu0 %vm182_vm2, %v1796_v13 }
0x10d7   :  { %v3191_v33 = vld [vmem:[#allocation4] sm:$0xf] }
0x10d8   :  { %v1912_v34 = vrot.slane %v3191_v33, 1  ;;  %v1913_v10 = vrot.slane %v3191_v33, 2  ;;  %v1914_v35 = vrot.slane %v3191_v33, 3 }
0x1195   :  { %v1858_v14 = vpop.f32.mrf.mxu0 }
0x1197   :  { %v1860_v44 = vpop.f32.mrf.mxu0 }
0x1198   :  { %v1869_v15 = vsel %vm150_vm3, %v1858_v14, %v1860_v44 }
0x1199   :  { %v1871_v18 = vrot.slane %v1869_v15, 1  ;;  %v1862_v19 = vpop.f32.mrf.mxu0  ;;  %v1872_v22 = vrot.slane %v1869_v15, 2  ;;  %v1878_v27 = vadd.f32 %v1869_v15, %v1865_v24  ;;  %v1873_v28 = vrot.slane %v1869_v15, 3 }
0x119b   :  { %v1879_v49 = vadd.f32 %v1871_v18, %v1866_v20  ;;  %v1863_v23 = vpop.f32.mrf.mxu0  ;;  %v1880_v29 = vadd.f32 %v1872_v22, %v1867_v26  ;;  %v1881_v31 = vadd.f32 %v1873_v28, %v1868_v30  ;;  %v2427_v37 = vmul.f32 -1.442695, %v1878_v27 }
0x119d   :  { %2674 = vtanh.f32 %v1879_v49  ;;  %v2428_v36 = vmul.f32 -1.442695, %v1879_v49  ;;  %v2429_v6 = vmul.f32 -1.442695, %v1880_v29  ;;  %v2430_v11 = vmul.f32 -1.442695, %v1881_v31 }
0x119e   :  { %2676 = vtanh.f32 %v1878_v27  ;;  %v1995_v27 = vld [vmem:[%s3297_s6] sm:$0xf] }
0x119f   :  { %2678 = vtanh.f32 %v1880_v29  ;;  %vm1996_vm11 = vcmp.gt.f32.partialorder %v1995_v27, 0.5 }
0x11a0   :  { %2680 = vtanh.f32 %v1881_v31  ;;  %v1997_v30 = vsel %vm1996_vm11, 1, %v2738_v1 }
0x11a1   :  { %2682 = vpow2.f32 %v2428_v36 }
0x11a2   :  { %2684 = vpow2.f32 %v2427_v37 }
0x11a3   :  { %2686 = vpow2.f32 %v2429_v6 }
0x11a4   :  { %2688 = vpow2.f32 %v2430_v11 }
0x11aa   :  { %v2675_v57 = vpop.eup %2674 }
0x11ab   :  { %1937 = vrot.lane.b32.xlu0 %v2675_v57, %s2739_s3  ;;  %v2677_v32 = vpop.eup %2676 }
0x11ac   :  { %v2679_v7 = vpop.eup %2678 }
0x11ad   :  { %1939 = vrot.lane.b32.xlu1 %v2679_v7, %s2739_s3  ;;  %v2681_v8 = vpop.eup %2680 }
0x11ae   :  { %v2683_v39 = vpop.eup %2682 }
0x11af   :  { %1935 = vrot.lane.b32.xlu0 %v2677_v32, %s2739_s3  ;;  %v2685_v40 = vpop.eup %2684  ;;  %v1895_v16 = vadd.f32 1.0, %v2683_v39 }
0x11b0   :  { %v2687_v21 = vpop.eup %2686  ;;  %v1894_v41 = vadd.f32 1.0, %v2685_v40 }
0x11b1   :  { %1941 = vrot.lane.b32.xlu1 %v2681_v8, %s2739_s3  ;;  %v1896_v42 = vadd.f32 1.0, %v2687_v21  ;;  %2690 = vrcp.f32 %v1895_v16  ;;  %v2689_v43 = vpop.eup %2688 }
0x11b2   :  { %2692 = vrcp.f32 %v1894_v41  ;;  %v1897_v45 = vadd.f32 1.0, %v2689_v43  ;;  %v2017_v41 = vld [vmem:[#allocation3] sm:$0xf] }
0x11b3   :  { %1917 = vrot.lane.b32.xlu0 %v1912_v34, %s2740_s5  ;;  %2694 = vrcp.f32 %v1896_v42 }
0x11b4   :  { %2696 = vrcp.f32 %v1897_v45 }
0x11b5   :  { %1919 = vrot.lane.b32.xlu1 %v1913_v10, %s2740_s5 }
0x11b7   :  { %1915 = vrot.lane.b32.xlu0 %v3191_v33, %s2740_s5 }
0x11b9   :  { %1921 = vrot.lane.b32.xlu1 %v1914_v35, %s2740_s5 }
0x11be   :  { %v2691_v46 = vpop.eup %2690 }
0x11bf   :  { %v2693_v50 = vpop.eup %2692 }
0x11c0   :  { %v2695_v25 = vpop.eup %2694 }
0x11c1   :  { %v2697_v55 = vpop.eup %2696 }
0x121d   :  { %v1938_v47 = vpop.permute.xlu0 %1937 }
0x121e   :  { %v1948_v48 = vmul.f32 %v2691_v46, %v1938_v47 }
0x121f   :  { %v1940_v51 = vpop.permute.xlu1 %1939 }
0x1220   :  { %1957 = vrot.lane.b32.xlu0 %v1948_v48, %s2740_s5  ;;  %v1949_v53 = vmul.f32 %v2695_v25, %v1940_v51 }
0x1221   :  { %v1936_v52 = vpop.permute.xlu0 %1935 }
0x1222   :  { %v1947_v54 = vmul.f32 %v2693_v50, %v1936_v52  ;;  %1959 = vrot.lane.b32.xlu1 %v1949_v53, %s2740_s5 }
0x1223   :  { %v1942_v56 = vpop.permute.xlu1 %1941 }
0x1224   :  { %1955 = vrot.lane.b32.xlu0 %v1947_v54, %s2740_s5  ;;  %v1950_v58 = vmul.f32 %v2697_v55, %v1942_v56 }
0x1225   :  { %v1918_v60 = vpop.permute.xlu0 %1917 }
0x1226   :  { %1961 = vrot.lane.b32.xlu1 %v1950_v58, %s2740_s5  ;;  %v1928_v63 = vmul.f32 %v2691_v46, %v1918_v60 }
0x1227   :  { %v1920_v61 = vpop.permute.xlu1 %1919 }
0x1228   :  { %v1929_v3 = vmul.f32 %v2695_v25, %v1920_v61  ;;  %v2138_v61 = vld [vmem:[#allocation2 + $0xf] sm:$0x1] }
0x1229   :  { %v1916_v62 = vpop.permute.xlu0 %1915 }
0x122a   :  { %v1927_v5 = vmul.f32 %v2693_v50, %v1916_v62 }
0x122b   :  { %v1922_v0 = vpop.permute.xlu1 %1921 }
0x122c   :  { %v1930_v15 = vmul.f32 %v2697_v55, %v1922_v0 }
0x1292   :  { %v1958_v2 = vpop.permute.xlu0 %1957 }
0x1293   :  { %v1968_v38 = vadd.f32 %v1958_v2, %v1928_v63  ;;  %v2137_v2 = vld [vmem:[#allocation2 + $0x7] sm:$0x1] }
0x1294   :  { %v1960_v9 = vpop.permute.xlu1 %1959 }
0x1295   :  { %2698 = vtanh.f32 %v1968_v38  ;;  %v1969_v13 = vadd.f32 %v1960_v9, %v1929_v3  ;;  %v2006_v14 = vrot.slane %v1968_v38, 7  ;;  %v2139_v38 = vld [vmem:[#allocation2 + $0x17] sm:$0x1] }
0x1296   :  { %v1956_v12 = vpop.permute.xlu0 %1955 }
0x1297   :  { %v1967_v44 = vadd.f32 %v1956_v12, %v1927_v5  ;;  %2700 = vtanh.f32 %v1969_v13  ;;  %v2008_v18 = vrot.slane %v1969_v13, 6  ;;  %v2140_v12 = vld [vmem:[#allocation2 + $0x1f] sm:$0x1] }
0x1298   :  { %v1962_v20 = vpop.permute.xlu1 %1961 }
0x1299   :  { %v2007_v19 = vsel %vm371_vm4, %v2006_v14, %v1967_v44  ;;  %2702 = vtanh.f32 %v1967_v44  ;;  %v1970_v22 = vadd.f32 %v1962_v20, %v1930_v15 }
0x129a   :  { %v2009_v49 = vsel %vm374_vm5, %v2008_v18, %v2007_v19 }
0x129b   :  { %2704 = vtanh.f32 %v1970_v22  ;;  %v2010_v23 = vrot.slane %v1970_v22, 5 }
0x129d   :  { %v2011_v24 = vsel %vm377_vm6, %v2010_v23, %v2009_v49 }
0x12a2   :  { %v2699_v26 = vpop.eup %2698 }
0x12a3   :  { %1981 = vrot.lane.b32.xlu0 %v2699_v26, %s2739_s3 }
0x12a4   :  { %v2701_v28 = vpop.eup %2700 }
0x12a5   :  { %1983 = vrot.lane.b32.xlu1 %v2701_v28, %s2739_s3 }
0x12a6   :  { %v2703_v29 = vpop.eup %2702 }
0x12a7   :  { %1979 = vrot.lane.b32.xlu0 %v2703_v29, %s2739_s3 }
0x12a8   :  { %v2705_v31 = vpop.eup %2704 }
0x12a9   :  { %1985 = vrot.lane.b32.xlu1 %v2705_v31, %s2739_s3 }
0x12ab   :  { %1999 = vperm.xlu0 %2458, %v1997_v30  }
0x1315   :  { %v1982_v57 = vpop.permute.xlu0 %1981 }
0x1316   :  { %v1992_v32 = vmul.f32 %v2691_v46, %v1982_v57 }
0x1317   :  { %v1984_v7 = vpop.permute.xlu1 %1983 }
0x1318   :  { %v1993_v34 = vmul.f32 %v2695_v25, %v1984_v7  ;;  %v2022_v10 = vrot.slane %v1992_v32, 7 }
0x1319   :  { %v1980_v8 = vpop.permute.xlu0 %1979 }
0x131a   :  { %v1991_v35 = vmul.f32 %v2693_v50, %v1980_v8  ;;  %v2024_v36 = vrot.slane %v1993_v34, 6 }
0x131b   :  { %v1986_v37 = vpop.permute.xlu1 %1985 }
0x131c   :  { %v2023_v6 = vsel %vm371_vm4, %v2022_v10, %v1991_v35  ;;  %v1994_v11 = vmul.f32 %v2697_v55, %v1986_v37 }
0x131d   :  { %v2025_v39 = vsel %vm374_vm5, %v2024_v36, %v2023_v6 }
0x131e   :  { %v2026_v40 = vrot.slane %v1994_v11, 5 }
0x1320   :  { %v2027_v16 = vsel %vm377_vm6, %v2026_v40, %v2025_v39 }
0x1321   :  { %2028 = vrot.lane.b32.xlu1 %v2027_v16, %s2740_s5 }
0x1325   :  { %2012 = vrot.lane.b32.xlu1 %v2011_v24, %s2741_s28 }
0x1326   :  { %v2000_v21 = vpop.permute.xlu0 %1999 }
0x1327   :  { %vm2001_vm12 = vcmp.eq.s32.totalorder %v2000_v21, 1 }
0x1393   :  { %v2029_v42 = vpop.permute.xlu1 %2028 }
0x1394   :  { %v2031_v43 = vsel %vm2001_vm12, %v2029_v42, %v2017_v41  ;;  %v2033_v45 = vsel %vm2001_vm12, %v2029_v42, 0.0  ;;  %v2749_v41 = vmov 7  }
0x1395   :  { %v2041_v46 = vrot.slane %v2033_v45, %v2897_v4  ;;  %2032 = vst.msk [vmem:[#allocation3] sm:$0xf] %vm152_vm0, %v2031_v43  ;;  %2459 = vset.pattern.permute.xlu0 %v2749_v41 }
0x1397   :  { %v2042_v47 = vcombine.high %v2041_v46, %v2041_v46  ;;  %v2049_v48 = vrot.slane %v2041_v46, %v2897_v4  ;;  %v2013_v50 = vpop.permute.xlu1 %2012 }
0x1398   :  { %v2015_v25 = vsel %vm2001_vm12, %v2013_v50, %v3191_v33 }
0x1399   :  { %v2056_v51 = vrot.slane %v2042_v47, %v2897_v4  ;;  %2059 = vst.msk [vmem:[#allocation5 + $0x6] sm:$0x1] %vm426_vm9, %v2049_v48  ;;  %v2061_v52 = vcombine.high %v2049_v48, %v2049_v48 }
0x139a   :  { %2016 = vst.msk [vmem:[#allocation4] sm:$0xf] %vm152_vm0, %v2015_v25 }
0x139b   :  { %2060 = vst.msk [vmem:[#allocation5 + $0xe] sm:$0x1] %vm426_vm9, %v2056_v51  ;;  %v2062_v53 = vcombine.high %v2056_v51, %v2056_v51  ;;  %2065 = vst.msk [vmem:[#allocation6 + $0x1] sm:$0x1] %vm426_vm9, %v2061_v52 }
0x139c   :  { %v2067_v54 = vld [vmem:[#allocation3] sm:$0xf] }
0x139d   :  { %2066 = vst.msk [vmem:[#allocation6 + $0x9] sm:$0x1] %vm426_vm9, %v2062_v53  ;;  %v2068_v55 = vpack.c.bf16 %v2067_v54, %v2067_v54 }
0x139f   :  { %2435 = vmatmul.mubr.msk.bf16.vlgmr.msra.gmra.mxu1 %vm182_vm2, %v2068_v55 }
0x13a1   :  { %v3238_v15 = vld [vmem:[#allocation4] sm:$0xf] }
0x13a2   :  { %v2184_v18 = vrot.slane %v3238_v15, 1  ;;  %v2185_v20 = vrot.slane %v3238_v15, 2  ;;  %v2186_v22 = vrot.slane %v3238_v15, 3 }
0x145f   :  { %v2130_v56 = vpop.f32.mrf.mxu1 }
0x1461   :  { %v2132_v33 = vpop.f32.mrf.mxu1 }
0x1462   :  { %v2141_v58 = vsel %vm150_vm3, %v2130_v56, %v2132_v33 }
0x1463   :  { %v2143_v59 = vrot.slane %v2141_v58, 1  ;;  %v2134_v60 = vpop.f32.mrf.mxu1  ;;  %v2144_v62 = vrot.slane %v2141_v58, 2  ;;  %v2150_v3 = vadd.f32 %v2141_v58, %v2137_v2  ;;  %v2145_v5 = vrot.slane %v2141_v58, 3 }
0x1465   :  { %v2151_v63 = vadd.f32 %v2143_v59, %v2138_v61  ;;  %v2135_v0 = vpop.f32.mrf.mxu1  ;;  %v2152_v9 = vadd.f32 %v2144_v62, %v2139_v38  ;;  %v2153_v13 = vadd.f32 %v2145_v5, %v2140_v12  ;;  %v2436_v23 = vmul.f32 -1.442695, %v2150_v3  ;;  %v2267_v38 = vld [vmem:[%s3297_s6] sm:$0xf] }
0x1466   :  { %vm2268_vm3 = vcmp.gt.f32.partialorder %v2267_v38, 0.5 }
0x1467   :  { %2706 = vtanh.f32 %v2151_v63  ;;  %v2437_v49 = vmul.f32 -1.442695, %v2151_v63  ;;  %v2438_v24 = vmul.f32 -1.442695, %v2152_v9  ;;  %v2439_v26 = vmul.f32 -1.442695, %v2153_v13 }
0x1468   :  { %2708 = vtanh.f32 %v2150_v3 }
0x1469   :  { %2710 = vtanh.f32 %v2152_v9  ;;  %v2269_v9 = vsel %vm2268_vm3, 1, %v2738_v1 }
0x146a   :  { %2712 = vtanh.f32 %v2153_v13 }
0x146b   :  { %2714 = vpow2.f32 %v2437_v49 }
0x146c   :  { %2716 = vpow2.f32 %v2436_v23 }
0x146d   :  { %2718 = vpow2.f32 %v2438_v24 }
0x146e   :  { %2720 = vpow2.f32 %v2439_v26 }
0x1474   :  { %v2707_v14 = vpop.eup %2706 }
0x1475   :  { %2209 = vrot.lane.b32.xlu0 %v2707_v14, %s2739_s3  ;;  %v2709_v17 = vpop.eup %2708 }
0x1476   :  { %v2711_v44 = vpop.eup %2710 }
0x1477   :  { %2211 = vrot.lane.b32.xlu1 %v2711_v44, %s2739_s3  ;;  %v2713_v19 = vpop.eup %2712 }
0x1478   :  { %v2715_v27 = vpop.eup %2714 }
0x1479   :  { %2207 = vrot.lane.b32.xlu0 %v2709_v17, %s2739_s3  ;;  %v2717_v28 = vpop.eup %2716  ;;  %v2167_v29 = vadd.f32 1.0, %v2715_v27 }
0x147a   :  { %v2719_v30 = vpop.eup %2718  ;;  %v2166_v31 = vadd.f32 1.0, %v2717_v28 }
0x147b   :  { %2213 = vrot.lane.b32.xlu1 %v2713_v19, %s2739_s3  ;;  %v2168_v57 = vadd.f32 1.0, %v2719_v30  ;;  %2722 = vrcp.f32 %v2167_v29  ;;  %v2721_v32 = vpop.eup %2720  ;;  %v2289_v29 = vld [vmem:[#allocation3] sm:$0xf] }
0x147c   :  { %2724 = vrcp.f32 %v2166_v31  ;;  %v2169_v7 = vadd.f32 1.0, %v2721_v32 }
0x147d   :  { %2189 = vrot.lane.b32.xlu0 %v2184_v18, %s2740_s5  ;;  %2726 = vrcp.f32 %v2168_v57 }
0x147e   :  { %2728 = vrcp.f32 %v2169_v7 }
0x147f   :  { %2191 = vrot.lane.b32.xlu1 %v2185_v20, %s2740_s5 }
0x1481   :  { %2187 = vrot.lane.b32.xlu0 %v3238_v15, %s2740_s5 }
0x1483   :  { %2193 = vrot.lane.b32.xlu1 %v2186_v22, %s2740_s5 }
0x1488   :  { %v2723_v34 = vpop.eup %2722 }
0x1489   :  { %v2725_v35 = vpop.eup %2724 }
0x148a   :  { %v2727_v36 = vpop.eup %2726 }
0x148b   :  { %v2729_v40 = vpop.eup %2728 }
0x14e7   :  { %v2210_v8 = vpop.permute.xlu0 %2209 }
0x14e8   :  { %v2220_v10 = vmul.f32 %v2723_v34, %v2210_v8 }
0x14e9   :  { %v2212_v37 = vpop.permute.xlu1 %2211 }
0x14ea   :  { %2229 = vrot.lane.b32.xlu0 %v2220_v10, %s2740_s5  ;;  %v2221_v11 = vmul.f32 %v2727_v36, %v2212_v37 }
0x14eb   :  { %v2208_v6 = vpop.permute.xlu0 %2207 }
0x14ec   :  { %v2219_v39 = vmul.f32 %v2725_v35, %v2208_v6  ;;  %2231 = vrot.lane.b32.xlu1 %v2221_v11, %s2740_s5 }
0x14ed   :  { %v2214_v16 = vpop.permute.xlu1 %2213 }
0x14ee   :  { %2227 = vrot.lane.b32.xlu0 %v2219_v39, %s2740_s5  ;;  %v2222_v21 = vmul.f32 %v2729_v40, %v2214_v16 }
0x14ef   :  { %v2190_v42 = vpop.permute.xlu0 %2189 }
0x14f0   :  { %2233 = vrot.lane.b32.xlu1 %v2222_v21, %s2740_s5  ;;  %v2200_v46 = vmul.f32 %v2723_v34, %v2190_v42 }
0x14f1   :  { %v2192_v43 = vpop.permute.xlu1 %2191 }
0x14f2   :  { %v2201_v25 = vmul.f32 %v2727_v36, %v2192_v43 }
0x14f3   :  { %v2188_v45 = vpop.permute.xlu0 %2187 }
0x14f4   :  { %v2199_v51 = vmul.f32 %v2725_v35, %v2188_v45 }
0x14f5   :  { %v2194_v47 = vpop.permute.xlu1 %2193 }
0x14f6   :  { %v2202_v33 = vmul.f32 %v2729_v40, %v2194_v47 }
0x155c   :  { %v2230_v48 = vpop.permute.xlu0 %2229 }
0x155d   :  { %v2240_v50 = vadd.f32 %v2230_v48, %v2200_v46 }
0x155e   :  { %v2232_v52 = vpop.permute.xlu1 %2231 }
0x155f   :  { %2730 = vtanh.f32 %v2240_v50  ;;  %v2241_v54 = vadd.f32 %v2232_v52, %v2201_v25  ;;  %v2278_v55 = vrot.slane %v2240_v50, 7 }
0x1560   :  { %v2228_v53 = vpop.permute.xlu0 %2227 }
0x1561   :  { %v2239_v56 = vadd.f32 %v2228_v53, %v2199_v51  ;;  %2732 = vtanh.f32 %v2241_v54  ;;  %v2280_v58 = vrot.slane %v2241_v54, 6 }
0x1562   :  { %v2234_v60 = vpop.permute.xlu1 %2233 }
0x1563   :  { %v2279_v59 = vsel %vm371_vm4, %v2278_v55, %v2239_v56  ;;  %2734 = vtanh.f32 %v2239_v56  ;;  %v2242_v61 = vadd.f32 %v2234_v60, %v2202_v33 }
0x1564   :  { %v2281_v62 = vsel %vm374_vm5, %v2280_v58, %v2279_v59 }
0x1565   :  { %2736 = vtanh.f32 %v2242_v61  ;;  %v2282_v63 = vrot.slane %v2242_v61, 5 }
0x1567   :  { %v2283_v0 = vsel %vm377_vm6, %v2282_v63, %v2281_v62 }
0x156c   :  { %v2731_v2 = vpop.eup %2730 }
0x156d   :  { %2253 = vrot.lane.b32.xlu0 %v2731_v2, %s2739_s3 }
0x156e   :  { %v2733_v3 = vpop.eup %2732 }
0x156f   :  { %2255 = vrot.lane.b32.xlu1 %v2733_v3, %s2739_s3 }
0x1570   :  { %v2735_v5 = vpop.eup %2734 }
0x1571   :  { %2251 = vrot.lane.b32.xlu0 %v2735_v5, %s2739_s3 }
0x1572   :  { %v2737_v12 = vpop.eup %2736 }
0x1573   :  { %2257 = vrot.lane.b32.xlu1 %v2737_v12, %s2739_s3 }
0x1575   :  { %2271 = vperm.xlu0 %2459, %v2269_v9  }
0x15df   :  { %v2254_v13 = vpop.permute.xlu0 %2253 }
0x15e0   :  { %v2264_v14 = vmul.f32 %v2723_v34, %v2254_v13 }
0x15e1   :  { %v2256_v17 = vpop.permute.xlu1 %2255 }
0x15e2   :  { %v2265_v44 = vmul.f32 %v2727_v36, %v2256_v17  ;;  %v2294_v19 = vrot.slane %v2264_v14, 7 }
0x15e3   :  { %v2252_v18 = vpop.permute.xlu0 %2251 }
0x15e4   :  { %v2263_v20 = vmul.f32 %v2725_v35, %v2252_v18  ;;  %v2296_v22 = vrot.slane %v2265_v44, 6 }
0x15e5   :  { %v2258_v49 = vpop.permute.xlu1 %2257 }
0x15e6   :  { %v2295_v23 = vsel %vm371_vm4, %v2294_v19, %v2263_v20  ;;  %v2266_v24 = vmul.f32 %v2729_v40, %v2258_v49  ;;  %vm2353_vm4 = vcmask 523264  }
0x15e7   :  { %v2297_v26 = vsel %vm374_vm5, %v2296_v22, %v2295_v23 }
0x15e8   :  { %v2298_v27 = vrot.slane %v2266_v24, 5 }
0x15ea   :  { %v2299_v1 = vsel %vm377_vm6, %v2298_v27, %v2297_v26 }
0x15eb   :  { %2300 = vrot.lane.b32.xlu1 %v2299_v1, %s2740_s5 }
0x15ef   :  { %2284 = vrot.lane.b32.xlu1 %v2283_v0, %s2741_s28 }
0x15f0   :  { %v2272_v28 = vpop.permute.xlu0 %2271 }
0x15f1   :  { %vm2273_vm13 = vcmp.eq.s32.totalorder %v2272_v28, 1 }
0x165d   :  { %v2301_v30 = vpop.permute.xlu1 %2300 }
0x165e   :  { %v2303_v31 = vsel %vm2273_vm13, %v2301_v30, %v2289_v29  ;;  %v2305_v57 = vsel %vm2273_vm13, %v2301_v30, 0.0 }
0x165f   :  { %2304 = vst.msk [vmem:[#allocation3] sm:$0xf] %vm152_vm0, %v2303_v31  ;;  %v2313_v32 = vrot.slane %v2305_v57, %v2897_v4 }
0x1661   :  { %v2314_v7 = vcombine.high %v2313_v32, %v2313_v32  ;;  %v2321_v34 = vrot.slane %v2313_v32, %v2897_v4  ;;  %v2285_v8 = vpop.permute.xlu1 %2284 }
0x1662   :  { %v2287_v10 = vsel %vm2273_vm13, %v2285_v8, %v3238_v15 }
0x1663   :  { %v2328_v35 = vrot.slane %v2314_v7, %v2897_v4  ;;  %2331 = vst.msk [vmem:[#allocation5 + $0x7] sm:$0x1] %vm426_vm9, %v2321_v34  ;;  %v2333_v36 = vcombine.high %v2321_v34, %v2321_v34 }
0x1664   :  { %2288 = vst.msk [vmem:[#allocation4] sm:$0xf] %vm152_vm0, %v2287_v10 }
0x1665   :  { %2332 = vst.msk [vmem:[#allocation5 + $0xf] sm:$0x1] %vm426_vm9, %v2328_v35  ;;  %v2334_v37 = vcombine.high %v2328_v35, %v2328_v35  ;;  %2337 = vst.msk [vmem:[#allocation6] sm:$0x1] %vm426_vm9, %v2333_v36 }
0x1667   :  { %2338 = vst.msk [vmem:[#allocation6 + $0x8] sm:$0x1] %vm426_vm9, %v2334_v37 }
0x166a   :  { %v2339_v15 = vld [vmem:[#allocation5] sm:$0xff] }
0x166c   :  { %v2341_v6 = vld [vmem:[#allocation6] sm:$0xff]  ;;  %v2340_v16 = vld [vmem:[#allocation5 + $0x8] sm:$0xff] }
0x166d   :  { %2345 = vrot.lane.b32.xlu0 %v2341_v6, %s2740_s5 }
0x166e   :  { %v2342_v11 = vld [vmem:[#allocation6 + $0x8] sm:$0xff] }
0x166f   :  { %2347 = vrot.lane.b32.xlu1 %v2342_v11, %s2740_s5 }
0x16df   :  { %v2346_v4 = vpop.permute.xlu0 %2345 }
0x16e0   :  { %v2351_v39 = vsel %vm182_vm2, %v2339_v15, %v2346_v4 }
0x16e1   :  { %2354 = vst.msk [vmem:[%s3298_s7] sm:$0xff] %vm2353_vm4, %v2351_v39  ;;  %v2348_v40 = vpop.permute.xlu1 %2347 }
0x16e2   :  { %v2352_v21 = vsel %vm182_vm2, %v2340_v16, %v2348_v40 }
0x16e3   :  { %2355 = vst.msk [vmem:[%s3298_s7 + $0x8] sm:$0xff] %vm2353_vm4, %v2352_v21 }

</bundles_post_ra>
